<compile_context>
chip_gen: v6e
topology: v6e:2x2x1
jax: 0.10.0
libtpu: 0.0.40
codegen_flags: <defaults>
</compile_context>

<pallas_src>
import jax
import jax.numpy as jnp
from jax.experimental import pallas as pl
from jax.experimental.pallas import tpu as pltpu


C1_PAD = 128          # conv1 out channels 20  -> 128 (lane dense)
C2_PAD = 128          # conv2 out channels 50  -> 128
FC1_PAD = 512         # fc1   out features 500 -> 512
CLS_PAD = 128         # logits             10  -> 128
NEG_INF = -1e30       # bias for padded logit columns (vanishes in softmax)

_COMPILER_PARAMS = pltpu.CompilerParams(
    dimension_semantics=("parallel",),            # M tiles are independent
    vmem_limit_bytes=32 * 1024 * 1024,            # safe on v5e/v6e/v7x
)


def _round_up(x, m):
    return (x + m - 1) // m * m


# ----------------------------- Pallas kernels ------------------------------

def _conv_relu_pool_kernel(a0_ref, a1_ref, a2_ref, a3_ref, w_ref, b_ref, o_ref):
    """Fused conv (as im2col matmul) + bias + ReLU + 2x2/stride-2 max-pool.

    a0..a3 hold the im2col patches of the four conv-output pixels belonging to
    each pooling window.  Since +bias and ReLU are monotone,
        maxpool(relu(conv + b)) == relu(max_p(A_p @ W) + b).
    """
    w = w_ref[...]
    acc = jnp.dot(a0_ref[...], w, preferred_element_type=jnp.float32)
    acc = jnp.maximum(acc, jnp.dot(a1_ref[...], w, preferred_element_type=jnp.float32))
    acc = jnp.maximum(acc, jnp.dot(a2_ref[...], w, preferred_element_type=jnp.float32))
    acc = jnp.maximum(acc, jnp.dot(a3_ref[...], w, preferred_element_type=jnp.float32))
    acc = jnp.maximum(acc + b_ref[...], 0.0)
    o_ref[...] = acc.astype(o_ref.dtype)


def _mlp_head_kernel(x_ref, w1_ref, b1_ref, w2_ref, b2_ref, o_ref):
    """Fused fc1 + ReLU + fc2 + log_softmax (f32 epilogue, bf16 MXU operands).

    Padded logit columns carry a -1e30 bias, so exp() kills them and the
    normalizer only sums the real classes.
    """
    h = jnp.dot(x_ref[...], w1_ref[...], preferred_element_type=jnp.float32)
    h = jnp.maximum(h + b1_ref[...], 0.0)
    z = jnp.dot(h.astype(jnp.bfloat16), w2_ref[...],
                preferred_element_type=jnp.float32)
    z = z + b2_ref[...]
    z = z - jnp.max(z, axis=-1, keepdims=True)
    o_ref[...] = z - jnp.log(jnp.sum(jnp.exp(z), axis=-1, keepdims=True))


# ------------------------------ tiled launcher ------------------------------

def _tiled_rowwise_call(kernel, row_inputs, resident_inputs, M, N, out_dtype,
                        max_tile=512, stream_budget=8 * 1024 * 1024):
    """Run `kernel` on a 1-D grid tiling the shared row (M) dimension.

    row_inputs:      list of (M, K_i) arrays streamed one M-tile per grid step.
    resident_inputs: 2-D arrays whose block is the full array every step
                     (weights / biases; they stay VMEM-resident).
    The M tile is 16-aligned (bf16 sublane packing) and sized so the
    double-buffered row streams fit `stream_budget` bytes of VMEM.
    """
    row_bytes = sum(a.shape[1] * a.dtype.itemsize for a in row_inputs)
    row_bytes += N * jnp.dtype(out_dtype).itemsize
    budget_rows = (stream_budget // (2 * row_bytes)) // 16 * 16
    tm = max(16, min(max_tile, _round_up(M, 16), budget_rows))
    m_pad = _round_up(M, tm)
    grid = (m_pad // tm,)

    padded_rows = []
    for a in row_inputs:
        if a.shape[0] != m_pad:
            a = jnp.pad(a, ((0, m_pad - a.shape[0]), (0, 0)))
        padded_rows.append(a)

    in_specs = [pl.BlockSpec((tm, a.shape[1]), lambda i: (i, 0))
                for a in padded_rows]
    in_specs += [pl.BlockSpec(r.shape, lambda i: (0, 0))
                 for r in resident_inputs]
    out_spec = pl.BlockSpec((tm, N), lambda i: (i, 0))

    out = pl.pallas_call(
        kernel,
        grid=grid,
        in_specs=in_specs,
        out_specs=out_spec,
        out_shape=jax.ShapeDtypeStruct((m_pad, N), out_dtype),
        compiler_params=_COMPILER_PARAMS,
    )(*padded_rows, *resident_inputs)
    return out[:M]


# ----------------------------- conv + pool layer -----------------------------

def conv_relu_pool(x_nhwc, w_oihw, bias, cout_pad):
    """VALID conv (stride 1) + bias + ReLU + 2x2/2 max-pool on NHWC activations.

    The input channel dim may already be zero-padded (extra channels are zero),
    the weight matrix is zero-padded to match.  Output: (B, OH//2, OW//2,
    cout_pad) in bfloat16 with zero padded channels.
    """
    B, H, W, C = x_nhwc.shape
    Cout, Cin, KH, KW = w_oihw.shape
    OH, OW = H - KH + 1, W - KW + 1
    POH, POW = OH // 2, OW // 2

    # Four im2col matrices, one per position of the 2x2 pooling window.
    # Column order is (c, kh, kw), matching torch's weight.reshape(Cout, -1).
    x_bf16 = x_nhwc.astype(jnp.bfloat16)
    mats = []
    for p in range(2):
        for q in range(2):
            patches = jnp.stack(
                [x_bf16[:, p + i:p + i + 2 * POH:2, q + j:q + j + 2 * POW:2, :]
                 for i in range(KH) for j in range(KW)],
                axis=-1)                                  # (B, POH, POW, C, KH*KW)
            mats.append(patches.reshape(B * POH * POW, C * KH * KW))

    # Weight -> (C*KH*KW, cout_pad); rows for padded input channels and columns
    # for padded output channels are zero (their inputs are zero too).
    w2d = w_oihw.reshape(Cout, Cin * KH * KW).T           # (Cin*KH*KW, Cout)
    w2d = jnp.pad(w2d, ((0, (C - Cin) * KH * KW), (0, cout_pad - Cout)))
    w2d = w2d.astype(jnp.bfloat16)
    b2d = jnp.pad(bias.astype(jnp.float32),
                  (0, cout_pad - Cout)).reshape(1, cout_pad)

    out = _tiled_rowwise_call(
        _conv_relu_pool_kernel, mats, [w2d, b2d],
        M=B * POH * POW, N=cout_pad, out_dtype=jnp.bfloat16)
    return out.reshape(B, POH, POW, cout_pad)


# ------------------------------ parameters ----------------------------------

def init_params(key):
    """Torch-layout parameters (same as nn.Module state_dict shapes)."""
    ks = jax.random.split(key, 8)
    s = 0.05
    return {
        "conv1_w": s * jax.random.normal(ks[0], (20, 1, 5, 5), jnp.float32),
        "conv1_b": s * jax.random.normal(ks[1], (20,), jnp.float32),
        "conv2_w": s * jax.random.normal(ks[2], (50, 20, 5, 5), jnp.float32),
        "conv2_b": s * jax.random.normal(ks[3], (50,), jnp.float32),
        "fc1_w": s * jax.random.normal(ks[4], (500, 800), jnp.float32),  # (out, in)
        "fc1_b": s * jax.random.normal(ks[5], (500,), jnp.float32),
        "fc2_w": s * jax.random.normal(ks[6], (10, 500), jnp.float32),   # (out, in)
        "fc2_b": s * jax.random.normal(ks[7], (10,), jnp.float32),
    }


def prepare_params(p):
    """One-time repack of torch-layout params into the padded kernel layout
    (lane-dense N, fc1 columns permuted so the NHWC flatten needs no transpose)."""
    kp = {
        "conv1_w": p["conv1_w"], "conv1_b": p["conv1_b"],
        "conv2_w": p["conv2_w"], "conv2_b": p["conv2_b"],
    }
    # fc1: torch input index is (c, h, w); kernel consumes (h, w, c_pad).
    w1 = p["fc1_w"].T.reshape(50, 4, 4, 500)               # (c, h, w, out)
    w1 = jnp.transpose(w1, (1, 2, 0, 3))                   # (h, w, c, out)
    w1 = jnp.pad(w1, ((0, 0), (0, 0), (0, C2_PAD - 50), (0, FC1_PAD - 500)))
    kp["fc1_w"] = w1.reshape(4 * 4 * C2_PAD, FC1_PAD).astype(jnp.bfloat16)
    kp["fc1_b"] = jnp.pad(p["fc1_b"].astype(jnp.float32),
                          (0, FC1_PAD - 500)).reshape(1, FC1_PAD)
    # fc2: pad to (FC1_PAD, CLS_PAD); padded logit columns get -1e30 bias.
    kp["fc2_w"] = jnp.pad(p["fc2_w"].T,
                          ((0, FC1_PAD - 500), (0, CLS_PAD - 10))).astype(jnp.bfloat16)
    kp["fc2_b"] = jnp.concatenate(
        [p["fc2_b"].astype(jnp.float32),
         jnp.full((CLS_PAD - 10,), NEG_INF, jnp.float32)]).reshape(1, CLS_PAD)
    return kp


# ------------------------------ the network ---------------------------------

def net_forward(x_nchw, kp):
    # NCHW (torch) -> NHWC (kernel layout).
    x = jnp.transpose(x_nchw, (0, 2, 3, 1)).astype(jnp.float32)    # (B, 28, 28, 1)
    x = conv_relu_pool(x, kp["conv1_w"], kp["conv1_b"], C1_PAD)    # (B, 12, 12, 128)
    x = conv_relu_pool(x, kp["conv2_w"], kp["conv2_b"], C2_PAD)    # (B, 4, 4, 128)
    B = x.shape[0]
    x = x.reshape(B, 4 * 4 * C2_PAD)        # NHWC flatten; fc1_w is pre-permuted
    logits = _tiled_rowwise_call(
        _mlp_head_kernel, [x],
        [kp["fc1_w"], kp["fc1_b"], kp["fc2_w"], kp["fc2_b"]],
        M=B, N=CLS_PAD, out_dtype=jnp.float32)
    return logits[:, :10]                   # drop padded classes


if __name__ == "__main__":
    key = jax.random.PRNGKey(0)
    pkey, xkey = jax.random.split(key)
    params = init_params(pkey)
    kparams = prepare_params(params)
    x = jax.random.normal(xkey, (4, 1, 28, 28), jnp.float32)       # MNIST-like input

    out = jax.jit(net_forward)(x, kparams)
    out = jax.block_until_ready(out)

    assert out.shape == (4, 10), out.shape
    assert bool(jnp.all(jnp.isfinite(out)))
    # log_softmax rows must exponentiate-sum to 1 (f32 epilogue)
    assert bool(jnp.allclose(jnp.sum(jnp.exp(out), axis=1), 1.0, atol=1e-3))
    print("KERNEL_OK")
</pallas_src>

<mosaic_0001>
module attributes {stable_mosaic.version = 11 : i64} {
  func.func @_conv_relu_pool_kernel(%arg0: i32, %arg1: memref<512x25xbf16, #tpu.memory_space<vmem>>, %arg2: memref<512x25xbf16, #tpu.memory_space<vmem>>, %arg3: memref<512x25xbf16, #tpu.memory_space<vmem>>, %arg4: memref<512x25xbf16, #tpu.memory_space<vmem>>, %arg5: memref<25x128xbf16, #tpu.memory_space<vmem>>, %arg6: memref<1x128xf32, #tpu.memory_space<vmem>>, %arg7: memref<512x128xbf16, #tpu.memory_space<vmem>>) attributes {dimension_semantics = [#tpu.dimension_semantics<parallel>], iteration_bounds = array<i64: 2>, scalar_prefetch = 0 : i64, scratch_operands = 0 : i64, tpu.core_type = #tpu.core_type<tc>, window_params = [{transform_indices = @transform_0, window_bounds = array<i64: 512, 25>}, {transform_indices = @transform_1, window_bounds = array<i64: 512, 25>}, {transform_indices = @transform_2, window_bounds = array<i64: 512, 25>}, {transform_indices = @transform_3, window_bounds = array<i64: 512, 25>}, {pipeline_mode = #tpu.pipeline_mode<synchronous>, transform_indices = @transform_4, window_bounds = array<i64: 25, 128>}, {pipeline_mode = #tpu.pipeline_mode<synchronous>, transform_indices = @transform_5, window_bounds = array<i64: 1, 128>}, {transform_indices = @transform_6, window_bounds = array<i64: 512, 128>}]} {
    %c0 = arith.constant 0 : index
    %c0_0 = arith.constant 0 : index
    %0 = vector.load %arg5[%c0, %c0_0] : memref<25x128xbf16, #tpu.memory_space<vmem>>, vector<25x128xbf16>
    %c0_1 = arith.constant 0 : index
    %c0_2 = arith.constant 0 : index
    %1 = vector.load %arg1[%c0_1, %c0_2] : memref<512x25xbf16, #tpu.memory_space<vmem>>, vector<512x25xbf16>
    %cst = arith.constant dense<0.000000e+00> : vector<512x128xf32>
    %2 = tpu.matmul %1, %0, %cst {dimension_numbers = #tpu.dot_dimension_numbers<[1], [0], [0], [1], [0, 0, 1, 1], [], []>} : vector<512x25xbf16>, vector<25x128xbf16>, vector<512x128xf32> -> vector<512x128xf32>
    %c0_3 = arith.constant 0 : index
    %c0_4 = arith.constant 0 : index
    %3 = vector.load %arg2[%c0_3, %c0_4] : memref<512x25xbf16, #tpu.memory_space<vmem>>, vector<512x25xbf16>
    %cst_5 = arith.constant dense<0.000000e+00> : vector<512x128xf32>
    %4 = tpu.matmul %3, %0, %cst_5 {dimension_numbers = #tpu.dot_dimension_numbers<[1], [0], [0], [1], [0, 0, 1, 1], [], []>} : vector<512x25xbf16>, vector<25x128xbf16>, vector<512x128xf32> -> vector<512x128xf32>
    %5 = arith.maximumf %2, %4 : vector<512x128xf32>
    %c0_6 = arith.constant 0 : index
    %c0_7 = arith.constant 0 : index
    %6 = vector.load %arg3[%c0_6, %c0_7] : memref<512x25xbf16, #tpu.memory_space<vmem>>, vector<512x25xbf16>
    %cst_8 = arith.constant dense<0.000000e+00> : vector<512x128xf32>
    %7 = tpu.matmul %6, %0, %cst_8 {dimension_numbers = #tpu.dot_dimension_numbers<[1], [0], [0], [1], [0, 0, 1, 1], [], []>} : vector<512x25xbf16>, vector<25x128xbf16>, vector<512x128xf32> -> vector<512x128xf32>
    %8 = arith.maximumf %5, %7 : vector<512x128xf32>
    %c0_9 = arith.constant 0 : index
    %c0_10 = arith.constant 0 : index
    %9 = vector.load %arg4[%c0_9, %c0_10] : memref<512x25xbf16, #tpu.memory_space<vmem>>, vector<512x25xbf16>
    %cst_11 = arith.constant dense<0.000000e+00> : vector<512x128xf32>
    %10 = tpu.matmul %9, %0, %cst_11 {dimension_numbers = #tpu.dot_dimension_numbers<[1], [0], [0], [1], [0, 0, 1, 1], [], []>} : vector<512x25xbf16>, vector<25x128xbf16>, vector<512x128xf32> -> vector<512x128xf32>
    %11 = arith.maximumf %8, %10 : vector<512x128xf32>
    %c0_12 = arith.constant 0 : index
    %c0_13 = arith.constant 0 : index
    %12 = vector.load %arg6[%c0_12, %c0_13] : memref<1x128xf32, #tpu.memory_space<vmem>>, vector<1x128xf32>
    %13 = vector.broadcast %12 : vector<1x128xf32> to vector<512x128xf32>
    %14 = arith.addf %11, %13 : vector<512x128xf32>
    %cst_14 = arith.constant 0.000000e+00 : f32
    %15 = vector.broadcast %cst_14 : f32 to vector<512x128xf32>
    %16 = arith.maximumf %14, %15 : vector<512x128xf32>
    %17 = arith.truncf %16 : vector<512x128xf32> to vector<512x128xbf16>
    %c0_15 = arith.constant 0 : index
    %c0_16 = arith.constant 0 : index
    %18 = vector.load %arg7[%c0_15, %c0_16] : memref<512x128xbf16, #tpu.memory_space<vmem>>, vector<512x128xbf16>
    tpu.vector_store %arg7[%c0_15, %c0_16], %17 {strides = array<i32>} : memref<512x128xbf16, #tpu.memory_space<vmem>>, vector<512x128xbf16>,
    return
  }
  func.func @transform_0(%arg0: i32) -> (i32, i32) {
    %c0_i32 = arith.constant 0 : i32
    %c0_i32_0 = arith.constant 0 : i32
    return %arg0, %c0_i32 : i32, i32
  }
  func.func @transform_1(%arg0: i32) -> (i32, i32) {
    %c0_i32 = arith.constant 0 : i32
    %c0_i32_0 = arith.constant 0 : i32
    return %arg0, %c0_i32 : i32, i32
  }
  func.func @transform_2(%arg0: i32) -> (i32, i32) {
    %c0_i32 = arith.constant 0 : i32
    %c0_i32_0 = arith.constant 0 : i32
    return %arg0, %c0_i32 : i32, i32
  }
  func.func @transform_3(%arg0: i32) -> (i32, i32) {
    %c0_i32 = arith.constant 0 : i32
    %c0_i32_0 = arith.constant 0 : i32
    return %arg0, %c0_i32 : i32, i32
  }
  func.func @transform_4(%arg0: i32) -> (i32, i32) {
    %c0_i32 = arith.constant 0 : i32
    %c0_i32_0 = arith.constant 0 : i32
    %c0_i32_1 = arith.constant 0 : i32
    return %c0_i32, %c0_i32_0 : i32, i32
  }
  func.func @transform_5(%arg0: i32) -> (i32, i32) {
    %c0_i32 = arith.constant 0 : i32
    %c0_i32_0 = arith.constant 0 : i32
    %c0_i32_1 = arith.constant 0 : i32
    return %c0_i32, %c0_i32_0 : i32, i32
  }
  func.func @transform_6(%arg0: i32) -> (i32, i32) {
    %c0_i32 = arith.constant 0 : i32
    %c0_i32_0 = arith.constant 0 : i32
    return %arg0, %c0_i32 : i32, i32
  }
}

module attributes {stable_mosaic.version = 11 : i64} {
  func.func @_conv_relu_pool_kernel(%arg0: i32, %arg1: memref<64x3200xbf16, #tpu.memory_space<vmem>>, %arg2: memref<64x3200xbf16, #tpu.memory_space<vmem>>, %arg3: memref<64x3200xbf16, #tpu.memory_space<vmem>>, %arg4: memref<64x3200xbf16, #tpu.memory_space<vmem>>, %arg5: memref<3200x128xbf16, #tpu.memory_space<vmem>>, %arg6: memref<1x128xf32, #tpu.memory_space<vmem>>, %arg7: memref<64x128xbf16, #tpu.memory_space<vmem>>) attributes {dimension_semantics = [#tpu.dimension_semantics<parallel>], iteration_bounds = array<i64: 1>, scalar_prefetch = 0 : i64, scratch_operands = 0 : i64, tpu.core_type = #tpu.core_type<tc>, window_params = [{transform_indices = @transform_0, window_bounds = array<i64: 64, 3200>}, {transform_indices = @transform_1, window_bounds = array<i64: 64, 3200>}, {transform_indices = @transform_2, window_bounds = array<i64: 64, 3200>}, {transform_indices = @transform_3, window_bounds = array<i64: 64, 3200>}, {pipeline_mode = #tpu.pipeline_mode<synchronous>, transform_indices = @transform_4, window_bounds = array<i64: 3200, 128>}, {pipeline_mode = #tpu.pipeline_mode<synchronous>, transform_indices = @transform_5, window_bounds = array<i64: 1, 128>}, {transform_indices = @transform_6, window_bounds = array<i64: 64, 128>}]} {
    %c0 = arith.constant 0 : index
    %c0_0 = arith.constant 0 : index
    %0 = vector.load %arg5[%c0, %c0_0] : memref<3200x128xbf16, #tpu.memory_space<vmem>>, vector<3200x128xbf16>
    %c0_1 = arith.constant 0 : index
    %c0_2 = arith.constant 0 : index
    %1 = vector.load %arg1[%c0_1, %c0_2] : memref<64x3200xbf16, #tpu.memory_space<vmem>>, vector<64x3200xbf16>
    %cst = arith.constant dense<0.000000e+00> : vector<64x128xf32>
    %2 = tpu.matmul %1, %0, %cst {dimension_numbers = #tpu.dot_dimension_numbers<[1], [0], [0], [1], [0, 0, 1, 1], [], []>} : vector<64x3200xbf16>, vector<3200x128xbf16>, vector<64x128xf32> -> vector<64x128xf32>
    %c0_3 = arith.constant 0 : index
    %c0_4 = arith.constant 0 : index
    %3 = vector.load %arg2[%c0_3, %c0_4] : memref<64x3200xbf16, #tpu.memory_space<vmem>>, vector<64x3200xbf16>
    %cst_5 = arith.constant dense<0.000000e+00> : vector<64x128xf32>
    %4 = tpu.matmul %3, %0, %cst_5 {dimension_numbers = #tpu.dot_dimension_numbers<[1], [0], [0], [1], [0, 0, 1, 1], [], []>} : vector<64x3200xbf16>, vector<3200x128xbf16>, vector<64x128xf32> -> vector<64x128xf32>
    %5 = arith.maximumf %2, %4 : vector<64x128xf32>
    %c0_6 = arith.constant 0 : index
    %c0_7 = arith.constant 0 : index
    %6 = vector.load %arg3[%c0_6, %c0_7] : memref<64x3200xbf16, #tpu.memory_space<vmem>>, vector<64x3200xbf16>
    %cst_8 = arith.constant dense<0.000000e+00> : vector<64x128xf32>
    %7 = tpu.matmul %6, %0, %cst_8 {dimension_numbers = #tpu.dot_dimension_numbers<[1], [0], [0], [1], [0, 0, 1, 1], [], []>} : vector<64x3200xbf16>, vector<3200x128xbf16>, vector<64x128xf32> -> vector<64x128xf32>
    %8 = arith.maximumf %5, %7 : vector<64x128xf32>
    %c0_9 = arith.constant 0 : index
    %c0_10 = arith.constant 0 : index
    %9 = vector.load %arg4[%c0_9, %c0_10] : memref<64x3200xbf16, #tpu.memory_space<vmem>>, vector<64x3200xbf16>
    %cst_11 = arith.constant dense<0.000000e+00> : vector<64x128xf32>
    %10 = tpu.matmul %9, %0, %cst_11 {dimension_numbers = #tpu.dot_dimension_numbers<[1], [0], [0], [1], [0, 0, 1, 1], [], []>} : vector<64x3200xbf16>, vector<3200x128xbf16>, vector<64x128xf32> -> vector<64x128xf32>
    %11 = arith.maximumf %8, %10 : vector<64x128xf32>
    %c0_12 = arith.constant 0 : index
    %c0_13 = arith.constant 0 : index
    %12 = vector.load %arg6[%c0_12, %c0_13] : memref<1x128xf32, #tpu.memory_space<vmem>>, vector<1x128xf32>
    %13 = vector.broadcast %12 : vector<1x128xf32> to vector<64x128xf32>
    %14 = arith.addf %11, %13 : vector<64x128xf32>
    %cst_14 = arith.constant 0.000000e+00 : f32
    %15 = vector.broadcast %cst_14 : f32 to vector<64x128xf32>
    %16 = arith.maximumf %14, %15 : vector<64x128xf32>
    %17 = arith.truncf %16 : vector<64x128xf32> to vector<64x128xbf16>
    %c0_15 = arith.constant 0 : index
    %c0_16 = arith.constant 0 : index
    %18 = vector.load %arg7[%c0_15, %c0_16] : memref<64x128xbf16, #tpu.memory_space<vmem>>, vector<64x128xbf16>
    tpu.vector_store %arg7[%c0_15, %c0_16], %17 {strides = array<i32>} : memref<64x128xbf16, #tpu.memory_space<vmem>>, vector<64x128xbf16>,
    return
  }
  func.func @transform_0(%arg0: i32) -> (i32, i32) {
    %c0_i32 = arith.constant 0 : i32
    %c0_i32_0 = arith.constant 0 : i32
    return %arg0, %c0_i32 : i32, i32
  }
  func.func @transform_1(%arg0: i32) -> (i32, i32) {
    %c0_i32 = arith.constant 0 : i32
    %c0_i32_0 = arith.constant 0 : i32
    return %arg0, %c0_i32 : i32, i32
  }
  func.func @transform_2(%arg0: i32) -> (i32, i32) {
    %c0_i32 = arith.constant 0 : i32
    %c0_i32_0 = arith.constant 0 : i32
    return %arg0, %c0_i32 : i32, i32
  }
  func.func @transform_3(%arg0: i32) -> (i32, i32) {
    %c0_i32 = arith.constant 0 : i32
    %c0_i32_0 = arith.constant 0 : i32
    return %arg0, %c0_i32 : i32, i32
  }
  func.func @transform_4(%arg0: i32) -> (i32, i32) {
    %c0_i32 = arith.constant 0 : i32
    %c0_i32_0 = arith.constant 0 : i32
    %c0_i32_1 = arith.constant 0 : i32
    return %c0_i32, %c0_i32_0 : i32, i32
  }
  func.func @transform_5(%arg0: i32) -> (i32, i32) {
    %c0_i32 = arith.constant 0 : i32
    %c0_i32_0 = arith.constant 0 : i32
    %c0_i32_1 = arith.constant 0 : i32
    return %c0_i32, %c0_i32_0 : i32, i32
  }
  func.func @transform_6(%arg0: i32) -> (i32, i32) {
    %c0_i32 = arith.constant 0 : i32
    %c0_i32_0 = arith.constant 0 : i32
    return %arg0, %c0_i32 : i32, i32
  }
}

module attributes {stable_mosaic.version = 11 : i64} {
  func.func @_mlp_head_kernel(%arg0: i32, %arg1: memref<16x2048xbf16, #tpu.memory_space<vmem>>, %arg2: memref<2048x512xbf16, #tpu.memory_space<vmem>>, %arg3: memref<1x512xf32, #tpu.memory_space<vmem>>, %arg4: memref<512x128xbf16, #tpu.memory_space<vmem>>, %arg5: memref<1x128xf32, #tpu.memory_space<vmem>>, %arg6: memref<16x128xf32, #tpu.memory_space<vmem>>) attributes {dimension_semantics = [#tpu.dimension_semantics<parallel>], iteration_bounds = array<i64: 1>, scalar_prefetch = 0 : i64, scratch_operands = 0 : i64, tpu.core_type = #tpu.core_type<tc>, window_params = [{transform_indices = @transform_0, window_bounds = array<i64: 16, 2048>}, {pipeline_mode = #tpu.pipeline_mode<synchronous>, transform_indices = @transform_1, window_bounds = array<i64: 2048, 512>}, {pipeline_mode = #tpu.pipeline_mode<synchronous>, transform_indices = @transform_2, window_bounds = array<i64: 1, 512>}, {pipeline_mode = #tpu.pipeline_mode<synchronous>, transform_indices = @transform_3, window_bounds = array<i64: 512, 128>}, {pipeline_mode = #tpu.pipeline_mode<synchronous>, transform_indices = @transform_4, window_bounds = array<i64: 1, 128>}, {transform_indices = @transform_5, window_bounds = array<i64: 16, 128>}]} {
    %c0 = arith.constant 0 : index
    %c0_0 = arith.constant 0 : index
    %0 = vector.load %arg1[%c0, %c0_0] : memref<16x2048xbf16, #tpu.memory_space<vmem>>, vector<16x2048xbf16>
    %c0_1 = arith.constant 0 : index
    %c0_2 = arith.constant 0 : index
    %1 = vector.load %arg2[%c0_1, %c0_2] : memref<2048x512xbf16, #tpu.memory_space<vmem>>, vector<2048x512xbf16>
    %cst = arith.constant dense<0.000000e+00> : vector<16x512xf32>
    %2 = tpu.matmul %0, %1, %cst {dimension_numbers = #tpu.dot_dimension_numbers<[1], [0], [0], [1], [0, 0, 1, 1], [], []>} : vector<16x2048xbf16>, vector<2048x512xbf16>, vector<16x512xf32> -> vector<16x512xf32>
    %c0_3 = arith.constant 0 : index
    %c0_4 = arith.constant 0 : index
    %3 = vector.load %arg3[%c0_3, %c0_4] : memref<1x512xf32, #tpu.memory_space<vmem>>, vector<1x512xf32>
    %4 = vector.broadcast %3 : vector<1x512xf32> to vector<16x512xf32>
    %5 = arith.addf %2, %4 : vector<16x512xf32>
    %cst_5 = arith.constant 0.000000e+00 : f32
    %6 = vector.broadcast %cst_5 : f32 to vector<16x512xf32>
    %7 = arith.maximumf %5, %6 : vector<16x512xf32>
    %8 = arith.truncf %7 : vector<16x512xf32> to vector<16x512xbf16>
    %c0_6 = arith.constant 0 : index
    %c0_7 = arith.constant 0 : index
    %9 = vector.load %arg4[%c0_6, %c0_7] : memref<512x128xbf16, #tpu.memory_space<vmem>>, vector<512x128xbf16>
    %cst_8 = arith.constant dense<0.000000e+00> : vector<16x128xf32>
    %10 = tpu.matmul %8, %9, %cst_8 {dimension_numbers = #tpu.dot_dimension_numbers<[1], [0], [0], [1], [0, 0, 1, 1], [], []>} : vector<16x512xbf16>, vector<512x128xbf16>, vector<16x128xf32> -> vector<16x128xf32>
    %c0_9 = arith.constant 0 : index
    %c0_10 = arith.constant 0 : index
    %11 = vector.load %arg5[%c0_9, %c0_10] : memref<1x128xf32, #tpu.memory_space<vmem>>, vector<1x128xf32>
    %12 = vector.broadcast %11 : vector<1x128xf32> to vector<16x128xf32>
    %13 = arith.addf %10, %12 : vector<16x128xf32>
    %cst_11 = arith.constant dense<0xFF800000> : vector<16xf32>
    %14 = vector.multi_reduction <maximumf>, %13, %cst_11 [1] : vector<16x128xf32> to vector<16xf32>
    %15 = vector.shape_cast %14 : vector<16xf32> to vector<16x1xf32>
    %16 = vector.broadcast %15 : vector<16x1xf32> to vector<16x128xf32>
    %17 = arith.subf %13, %16 : vector<16x128xf32>
    %18 = math.exp %17 : vector<16x128xf32>
    %cst_12 = arith.constant dense<0.000000e+00> : vector<16xf32>
    %19 = vector.multi_reduction <add>, %18, %cst_12 [1] : vector<16x128xf32> to vector<16xf32>
    %20 = vector.shape_cast %19 : vector<16xf32> to vector<16x1xf32>
    %21 = math.log %20 : vector<16x1xf32>
    %22 = vector.broadcast %21 : vector<16x1xf32> to vector<16x128xf32>
    %23 = arith.subf %17, %22 : vector<16x128xf32>
    %c0_13 = arith.constant 0 : index
    %c0_14 = arith.constant 0 : index
    %24 = vector.load %arg6[%c0_13, %c0_14] : memref<16x128xf32, #tpu.memory_space<vmem>>, vector<16x128xf32>
    tpu.vector_store %arg6[%c0_13, %c0_14], %23 {strides = array<i32>} : memref<16x128xf32, #tpu.memory_space<vmem>>, vector<16x128xf32>,
    return
  }
  func.func @transform_0(%arg0: i32) -> (i32, i32) {
    %c0_i32 = arith.constant 0 : i32
    %c0_i32_0 = arith.constant 0 : i32
    return %arg0, %c0_i32 : i32, i32
  }
  func.func @transform_1(%arg0: i32) -> (i32, i32) {
    %c0_i32 = arith.constant 0 : i32
    %c0_i32_0 = arith.constant 0 : i32
    %c0_i32_1 = arith.constant 0 : i32
    return %c0_i32, %c0_i32_0 : i32, i32
  }
  func.func @transform_2(%arg0: i32) -> (i32, i32) {
    %c0_i32 = arith.constant 0 : i32
    %c0_i32_0 = arith.constant 0 : i32
    %c0_i32_1 = arith.constant 0 : i32
    return %c0_i32, %c0_i32_0 : i32, i32
  }
  func.func @transform_3(%arg0: i32) -> (i32, i32) {
    %c0_i32 = arith.constant 0 : i32
    %c0_i32_0 = arith.constant 0 : i32
    %c0_i32_1 = arith.constant 0 : i32
    return %c0_i32, %c0_i32_0 : i32, i32
  }
  func.func @transform_4(%arg0: i32) -> (i32, i32) {
    %c0_i32 = arith.constant 0 : i32
    %c0_i32_0 = arith.constant 0 : i32
    %c0_i32_1 = arith.constant 0 : i32
    return %c0_i32, %c0_i32_0 : i32, i32
  }
  func.func @transform_5(%arg0: i32) -> (i32, i32) {
    %c0_i32 = arith.constant 0 : i32
    %c0_i32_0 = arith.constant 0 : i32
    return %arg0, %c0_i32 : i32, i32
  }
}

</mosaic_0001>

<bundles_post_ra>
// kernel: net_forward.3
= control target key start
LH: loop header
LB: loop body
LE: loop exit
PB: predicated region body
PF: predicated region fallthrough
CT: control target
= control target key end

     0   :  { %s4706_s21 = smov 0   ;;  %s5688_s0 = inlined_call_operand.vmem [shape: bf16[1024,25], index: 0, kind: input, shape index: {}]   ;;  %s5689_s1 = inlined_call_operand.vmem [shape: bf16[1024,25], index: 1, kind: input, shape index: {}]   ;;  %s5690_s2 = inlined_call_operand.vmem [shape: bf16[1024,25], index: 2, kind: input, shape index: {}]   ;;  %s5691_s3 = inlined_call_operand.vmem [shape: bf16[1024,25], index: 3, kind: input, shape index: {}]   ;;  %s5692_s4 = inlined_call_operand.vmem [shape: bf16[25,128], index: 4, kind: input, shape index: {}]   ;;  %s5693_s5 = inlined_call_operand.vmem [shape: f32[1,128], index: 5, kind: input, shape index: {}]   ;;  %s5694_s6 = inlined_call_operand.vmem [shape: bf16[1024,128], index: 6, kind: output, shape index: {}]  }
   0x1 LB: > { %s3520_s22 = sadd.s32 4294967295, %s4668_s21   ;;  %p3524_p0 = scmp.ge.s32.totalorder %s4668_s21, 1  ;;  %s4668_s21 = sphi %s4706_s21, %s16_s21  }
   0x2   : > { %p246_p1 = scmp.lt.s32.totalorder %s4668_s21, 3 }
   0x4   : > { %p247_p2 = pnand %p3524_p0, %p246_p1 }
   0x6   : > { %250 = sbr.rel (%p247_p2) target bundleno = 482 (0x1e2), region = 44 }
   0xb   : > { %v4532_v0 = vld [vmem:[%s5692_s4 + $0x8] sm:$0x1f]   ;;  %vm658_vm0 = vcmask 1043456   ;;  %vm659_vm1 = vcmask 1044480   ;;  %v4670_v1 = vmov 65535   ;;  %s3525_s25 = sshll.u32 %s3520_s22, 6 }
   0xc   : > { %v660_v2 = vsel %vm658_vm0, 4294967295, %v4670_v1  ;;  %p292_p3 = scmp.lt.s32.totalorder %s3525_s25, 127  ;;  %v4533_v5 = vld [vmem:[%s5692_s4] sm:$0xff]   ;;  %vm561_vm2 = vcmask 203776  }
   0xd   : > { %v661_v3 = vsel %vm659_vm1, %v660_v2, 0 }
   0xe   : > { %v663_v4 = vand.u32 %v4532_v0, %v661_v3  ;;  %s5997_s25 = smov (!%p292_p3, %s3525_s25), 127 }
   0xf   : > { %s4720_s28 = sshll.u32 %s5997_s25, 2 }
  0x10   : > { %4251 = vmatprep.subr.bf16.mxu0 %v663_v4  ;;  %4319 = vmatprep.subr.bf16.mxu1 %v663_v4  ;;  %s4726_s7 = scalar_lea.vmem %s5688_s0, %s4720_s28  ;;  %s4732_s10 = scalar_lea.vmem %s5689_s1, %s4720_s28 }
  0x11   : > { %4252 = vmatpush3.bf16.msra.mxu0 %v663_v4  ;;  %4320 = vmatpush3.bf16.msra.mxu1 %v663_v4  ;;  %v4534_v6 = vld [vmem:[%s4726_s7] sm:$0xff]   ;;  %v4536_v8 = vld [vmem:[%s4726_s7 + $0x8] sm:$0xff]   ;;  %v4538_v10 = vld [vmem:[%s4726_s7 + $0x10] sm:$0xff]   ;;  %s4807_s13 = scalar_lea.vmem %s5690_s2, %s4720_s28  ;;  %s4814_s16 = scalar_lea.vmem %s5691_s3, %s4720_s28 }
  0x12   : > { %4253 = vmatprep.subr.bf16.mxu0 %v4533_v5  ;;  %4321 = vmatprep.subr.bf16.mxu1 %v4533_v5  ;;  %v4535_v7 = vld [vmem:[%s4732_s10] sm:$0xff]   ;;  %v4537_v9 = vld [vmem:[%s4732_s10 + $0x8] sm:$0xff]   ;;  %v4539_v11 = vld [vmem:[%s4732_s10 + $0x10] sm:$0xff]   ;;  %s5417_s22 = scalar_lea.vmem %s5694_s6, %s4720_s28 }
  0x13   : > { %4255 = vmatprep.mubr.msk.bf16.mxu0 %vm561_vm2, %v4534_v6  ;;  %4323 = vmatprep.mubr.msk.bf16.mxu1 %vm561_vm2, %v4535_v7  ;;  %v4540_v12 = vld [vmem:[%s4726_s7 + $0x18] sm:$0xff]   ;;  %v4542_v14 = vld [vmem:[%s4726_s7 + $0x20] sm:$0xff]   ;;  %v4544_v16 = vld [vmem:[%s4726_s7 + $0x28] sm:$0xff]  }
  0x14   : > { %v4541_v13 = vld [vmem:[%s4732_s10 + $0x18] sm:$0xff]   ;;  %v4543_v15 = vld [vmem:[%s4732_s10 + $0x20] sm:$0xff]   ;;  %v4545_v17 = vld [vmem:[%s4732_s10 + $0x28] sm:$0xff]  }
  0x15   : > { %4254 = vmatpush3.bf16.msra.mxu0 %v4533_v5  ;;  %4322 = vmatpush3.bf16.msra.mxu1 %v4533_v5  ;;  %v4546_v18 = vld [vmem:[%s4726_s7 + $0x30] sm:$0xff]   ;;  %v4548_v20 = vld [vmem:[%s4726_s7 + $0x38] sm:$0xff]   ;;  %v4550_v22 = vld [vmem:[%s4726_s7 + $0x40] sm:$0xff]  }
  0x16   : > { %4387 = vmatprep.subr.bf16.mxu0 %v663_v4  ;;  %4455 = vmatprep.subr.bf16.mxu1 %v663_v4  ;;  %v4547_v19 = vld [vmem:[%s4732_s10 + $0x30] sm:$0xff]   ;;  %v4549_v21 = vld [vmem:[%s4732_s10 + $0x38] sm:$0xff]   ;;  %v4551_v23 = vld [vmem:[%s4732_s10 + $0x40] sm:$0xff]  }
  0x17   : > { %v4552_v24 = vld [vmem:[%s4726_s7 + $0x48] sm:$0xff]   ;;  %v4554_v26 = vld [vmem:[%s4726_s7 + $0x50] sm:$0xff]   ;;  %v4556_v28 = vld [vmem:[%s4726_s7 + $0x58] sm:$0xff]  }
  0x18   : > { %4256 = vmatmul.mubr.msk.bf16.vlgmr.msra.gmra.mxu0 %vm561_vm2, %v4536_v8  ;;  %4324 = vmatmul.mubr.msk.bf16.vlgmr.msra.gmra.mxu1 %vm561_vm2, %v4537_v9  ;;  %v4553_v25 = vld [vmem:[%s4732_s10 + $0x48] sm:$0xff]   ;;  %v4555_v27 = vld [vmem:[%s4732_s10 + $0x50] sm:$0xff]   ;;  %v4557_v29 = vld [vmem:[%s4732_s10 + $0x58] sm:$0xff]  }
  0x19   : > { %4388 = vmatpush3.bf16.msra.mxu0 %v663_v4  ;;  %4456 = vmatpush3.bf16.msra.mxu1 %v663_v4  ;;  %v4558_v30 = vld [vmem:[%s4726_s7 + $0x60] sm:$0xff]   ;;  %v4560_v32 = vld [vmem:[%s4726_s7 + $0x68] sm:$0xff]   ;;  %v4562_v34 = vld [vmem:[%s4726_s7 + $0x70] sm:$0xff]  }
  0x1a   : > { %4259 = vmatprep.mubr.msk.bf16.mxu0 %vm561_vm2, %v4538_v10  ;;  %4327 = vmatprep.mubr.msk.bf16.mxu1 %vm561_vm2, %v4539_v11  ;;  %v4559_v31 = vld [vmem:[%s4732_s10 + $0x60] sm:$0xff]   ;;  %v4561_v33 = vld [vmem:[%s4732_s10 + $0x68] sm:$0xff]   ;;  %v4563_v35 = vld [vmem:[%s4732_s10 + $0x70] sm:$0xff]  }
  0x1b   : > { %4389 = vmatprep.subr.bf16.mxu0 %v4533_v5  ;;  %4457 = vmatprep.subr.bf16.mxu1 %v4533_v5  ;;  %v4564_v36 = vld [vmem:[%s4726_s7 + $0x78] sm:$0xff]   ;;  %v4566_v38 = vld [vmem:[%s4726_s7 + $0x80] sm:$0xff]   ;;  %v4568_v40 = vld [vmem:[%s4726_s7 + $0x88] sm:$0xff]  }
  0x1c   : > { %v4565_v37 = vld [vmem:[%s4732_s10 + $0x78] sm:$0xff]   ;;  %v4567_v39 = vld [vmem:[%s4732_s10 + $0x80] sm:$0xff]   ;;  %v4569_v41 = vld [vmem:[%s4732_s10 + $0x88] sm:$0xff]  }
  0x1d   : > { %4390 = vmatpush3.bf16.msra.mxu0 %v4533_v5  ;;  %4458 = vmatpush3.bf16.msra.mxu1 %v4533_v5  ;;  %v4570_v42 = vld [vmem:[%s4726_s7 + $0x90] sm:$0xff]   ;;  %v4572_v44 = vld [vmem:[%s4726_s7 + $0x98] sm:$0xff]   ;;  %v4574_v46 = vld [vmem:[%s4726_s7 + $0xa0] sm:$0xff]  }
  0x1e   : > { %v4571_v43 = vld [vmem:[%s4732_s10 + $0x90] sm:$0xff]   ;;  %v4573_v45 = vld [vmem:[%s4732_s10 + $0x98] sm:$0xff]   ;;  %v4575_v47 = vld [vmem:[%s4732_s10 + $0xa0] sm:$0xff]  }
  0x1f   : > { %v4576_v48 = vld [vmem:[%s4726_s7 + $0xa8] sm:$0xff]   ;;  %v4578_v50 = vld [vmem:[%s4726_s7 + $0xb0] sm:$0xff]   ;;  %v4580_v52 = vld [vmem:[%s4726_s7 + $0xb8] sm:$0xff]  }
  0x20   : > { %4260 = vmatmul.mubr.msk.bf16.gmra.mxu0 %vm561_vm2, %v4540_v12  ;;  %4328 = vmatmul.mubr.msk.bf16.gmra.mxu1 %vm561_vm2, %v4541_v13  ;;  %v4577_v49 = vld [vmem:[%s4732_s10 + $0xa8] sm:$0xff]   ;;  %v4579_v51 = vld [vmem:[%s4732_s10 + $0xb0] sm:$0xff]   ;;  %v4581_v53 = vld [vmem:[%s4732_s10 + $0xb8] sm:$0xff]  }
  0x21   : > { %4263 = vmatprep.mubr.msk.bf16.mxu0 %vm561_vm2, %v4542_v14  ;;  %4331 = vmatprep.mubr.msk.bf16.mxu1 %vm561_vm2, %v4543_v15  ;;  %v4582_v54 = vld [vmem:[%s4726_s7 + $0xc0] sm:$0xff]   ;;  %v4584_v56 = vld [vmem:[%s4726_s7 + $0xc8] sm:$0xff]   ;;  %v4586_v58 = vld [vmem:[%s4726_s7 + $0xd0] sm:$0xff]  }
  0x22   : > { %v4583_v55 = vld [vmem:[%s4732_s10 + $0xc0] sm:$0xff]   ;;  %v4585_v57 = vld [vmem:[%s4732_s10 + $0xc8] sm:$0xff]   ;;  %v4587_v59 = vld [vmem:[%s4732_s10 + $0xd0] sm:$0xff]  }
  0x23   : > { %v4588_v60 = vld [vmem:[%s4726_s7 + $0xd8] sm:$0xff]   ;;  %v4590_v62 = vld [vmem:[%s4726_s7 + $0xe0] sm:$0xff]   ;;  %v4592_v0 = vld [vmem:[%s4726_s7 + $0xe8] sm:$0xff]  }
  0x24   : > { %v4589_v61 = vld [vmem:[%s4732_s10 + $0xd8] sm:$0xff]   ;;  %v4591_v63 = vld [vmem:[%s4732_s10 + $0xe0] sm:$0xff]   ;;  %v4593_v1 = vld [vmem:[%s4732_s10 + $0xe8] sm:$0xff]  }
  0x25   : > { %v4594_v2 = vld [vmem:[%s4726_s7 + $0xf0] sm:$0xff]   ;;  %v4596_v4 = vld [vmem:[%s4726_s7 + $0xf8] sm:$0xff]   ;;  %v4598_v6 = vld [vmem:[%s4807_s13] sm:$0xff]  }
  0x26   : > { %v4595_v3 = vld [vmem:[%s4732_s10 + $0xf0] sm:$0xff]   ;;  %v4597_v5 = vld [vmem:[%s4732_s10 + $0xf8] sm:$0xff]   ;;  %v4599_v7 = vld [vmem:[%s4814_s16] sm:$0xff]  }
  0x27   : > { %v4600_v8 = vld [vmem:[%s4807_s13 + $0x8] sm:$0xff]   ;;  %v4602_v10 = vld [vmem:[%s4807_s13 + $0x10] sm:$0xff]   ;;  %v4604_v12 = vld [vmem:[%s4807_s13 + $0x18] sm:$0xff]  }
  0x28   : > { %4264 = vmatmul.mubr.msk.bf16.gmra.mxu0 %vm561_vm2, %v4544_v16  ;;  %4332 = vmatmul.mubr.msk.bf16.gmra.mxu1 %vm561_vm2, %v4545_v17  ;;  %v4601_v9 = vld [vmem:[%s4814_s16 + $0x8] sm:$0xff]   ;;  %v4603_v11 = vld [vmem:[%s4814_s16 + $0x10] sm:$0xff]   ;;  %v4605_v13 = vld [vmem:[%s4814_s16 + $0x18] sm:$0xff]  }
  0x29   : > { %4267 = vmatprep.mubr.msk.bf16.mxu0 %vm561_vm2, %v4546_v18  ;;  %4335 = vmatprep.mubr.msk.bf16.mxu1 %vm561_vm2, %v4547_v19  ;;  %v4606_v14 = vld [vmem:[%s4807_s13 + $0x20] sm:$0xff]   ;;  %v4608_v16 = vld [vmem:[%s4807_s13 + $0x28] sm:$0xff]   ;;  %v4610_v18 = vld [vmem:[%s4807_s13 + $0x30] sm:$0xff]  }
  0x2a   : > { %v4607_v15 = vld [vmem:[%s4814_s16 + $0x20] sm:$0xff]   ;;  %v4609_v17 = vld [vmem:[%s4814_s16 + $0x28] sm:$0xff]   ;;  %v4611_v19 = vld [vmem:[%s4814_s16 + $0x30] sm:$0xff]  }
  0x30   : > { %4268 = vmatmul.mubr.msk.bf16.gmra.mxu0 %vm561_vm2, %v4548_v20  ;;  %4336 = vmatmul.mubr.msk.bf16.gmra.mxu1 %vm561_vm2, %v4549_v21  ;;  %v4612_v20 = vld [vmem:[%s4807_s13 + $0x38] sm:$0xff]  }
  0x31   : > { %4271 = vmatprep.mubr.msk.bf16.mxu0 %vm561_vm2, %v4550_v22  ;;  %4339 = vmatprep.mubr.msk.bf16.mxu1 %vm561_vm2, %v4551_v23  ;;  %v4613_v21 = vld [vmem:[%s4814_s16 + $0x38] sm:$0xff]   ;;  %v4614_v22 = vld [vmem:[%s4807_s13 + $0x40] sm:$0xff]  }
  0x32   : > { %v4615_v23 = vld [vmem:[%s4814_s16 + $0x40] sm:$0xff]  }
  0x38   : > { %4272 = vmatmul.mubr.msk.bf16.gmra.mxu0 %vm561_vm2, %v4552_v24  ;;  %4340 = vmatmul.mubr.msk.bf16.gmra.mxu1 %vm561_vm2, %v4553_v25  ;;  %v4616_v24 = vld [vmem:[%s4807_s13 + $0x48] sm:$0xff]  }
  0x39   : > { %4275 = vmatprep.mubr.msk.bf16.mxu0 %vm561_vm2, %v4554_v26  ;;  %4343 = vmatprep.mubr.msk.bf16.mxu1 %vm561_vm2, %v4555_v27  ;;  %v4617_v25 = vld [vmem:[%s4814_s16 + $0x48] sm:$0xff]   ;;  %v4618_v26 = vld [vmem:[%s4807_s13 + $0x50] sm:$0xff]  }
  0x3a   : > { %v4619_v27 = vld [vmem:[%s4814_s16 + $0x50] sm:$0xff]  }
  0x40   : > { %4276 = vmatmul.mubr.msk.bf16.gmra.mxu0 %vm561_vm2, %v4556_v28  ;;  %4344 = vmatmul.mubr.msk.bf16.gmra.mxu1 %vm561_vm2, %v4557_v29  ;;  %v4620_v28 = vld [vmem:[%s4807_s13 + $0x58] sm:$0xff]  }
  0x41   : > { %4279 = vmatprep.mubr.msk.bf16.mxu0 %vm561_vm2, %v4558_v30  ;;  %4347 = vmatprep.mubr.msk.bf16.mxu1 %vm561_vm2, %v4559_v31  ;;  %v4621_v29 = vld [vmem:[%s4814_s16 + $0x58] sm:$0xff]   ;;  %v4622_v30 = vld [vmem:[%s4807_s13 + $0x60] sm:$0xff]  }
  0x42   : > { %v4623_v31 = vld [vmem:[%s4814_s16 + $0x60] sm:$0xff]  }
  0x48   : > { %4280 = vmatmul.mubr.msk.bf16.gmra.mxu0 %vm561_vm2, %v4560_v32  ;;  %4348 = vmatmul.mubr.msk.bf16.gmra.mxu1 %vm561_vm2, %v4561_v33  ;;  %v4624_v32 = vld [vmem:[%s4807_s13 + $0x68] sm:$0xff]  }
  0x49   : > { %4283 = vmatprep.mubr.msk.bf16.mxu0 %vm561_vm2, %v4562_v34  ;;  %4351 = vmatprep.mubr.msk.bf16.mxu1 %vm561_vm2, %v4563_v35  ;;  %v4625_v33 = vld [vmem:[%s4814_s16 + $0x68] sm:$0xff]   ;;  %v4626_v34 = vld [vmem:[%s4807_s13 + $0x70] sm:$0xff]  }
  0x4a   : > { %v4627_v35 = vld [vmem:[%s4814_s16 + $0x70] sm:$0xff]  }
  0x50   : > { %4284 = vmatmul.mubr.msk.bf16.gmra.mxu0 %vm561_vm2, %v4564_v36  ;;  %4352 = vmatmul.mubr.msk.bf16.gmra.mxu1 %vm561_vm2, %v4565_v37  ;;  %v4628_v36 = vld [vmem:[%s4807_s13 + $0x78] sm:$0xff]  }
  0x51   : > { %4287 = vmatprep.mubr.msk.bf16.mxu0 %vm561_vm2, %v4566_v38  ;;  %4355 = vmatprep.mubr.msk.bf16.mxu1 %vm561_vm2, %v4567_v39  ;;  %v4629_v37 = vld [vmem:[%s4814_s16 + $0x78] sm:$0xff]   ;;  %v4630_v38 = vld [vmem:[%s4807_s13 + $0x80] sm:$0xff]  }
  0x52   : > { %v4631_v39 = vld [vmem:[%s4814_s16 + $0x80] sm:$0xff]  }
  0x58   : > { %4288 = vmatmul.mubr.msk.bf16.gmra.mxu0 %vm561_vm2, %v4568_v40  ;;  %4356 = vmatmul.mubr.msk.bf16.gmra.mxu1 %vm561_vm2, %v4569_v41  ;;  %v4632_v40 = vld [vmem:[%s4807_s13 + $0x88] sm:$0xff]  }
  0x59   : > { %4291 = vmatprep.mubr.msk.bf16.mxu0 %vm561_vm2, %v4570_v42  ;;  %4359 = vmatprep.mubr.msk.bf16.mxu1 %vm561_vm2, %v4571_v43  ;;  %v4633_v41 = vld [vmem:[%s4814_s16 + $0x88] sm:$0xff]   ;;  %v4634_v42 = vld [vmem:[%s4807_s13 + $0x90] sm:$0xff]  }
  0x5a   : > { %v4635_v43 = vld [vmem:[%s4814_s16 + $0x90] sm:$0xff]  }
  0x60   : > { %4292 = vmatmul.mubr.msk.bf16.gmra.mxu0 %vm561_vm2, %v4572_v44  ;;  %4360 = vmatmul.mubr.msk.bf16.gmra.mxu1 %vm561_vm2, %v4573_v45 }
  0x61   : > { %4295 = vmatprep.mubr.msk.bf16.mxu0 %vm561_vm2, %v4574_v46  ;;  %4363 = vmatprep.mubr.msk.bf16.mxu1 %vm561_vm2, %v4575_v47 }
  0x68   : > { %4296 = vmatmul.mubr.msk.bf16.gmra.mxu0 %vm561_vm2, %v4576_v48  ;;  %4364 = vmatmul.mubr.msk.bf16.gmra.mxu1 %vm561_vm2, %v4577_v49 }
  0x69   : > { %4299 = vmatprep.mubr.msk.bf16.mxu0 %vm561_vm2, %v4578_v50  ;;  %4367 = vmatprep.mubr.msk.bf16.mxu1 %vm561_vm2, %v4579_v51 }
  0x70   : > { %4300 = vmatmul.mubr.msk.bf16.gmra.mxu0 %vm561_vm2, %v4580_v52  ;;  %4368 = vmatmul.mubr.msk.bf16.gmra.mxu1 %vm561_vm2, %v4581_v53  ;;  %v4636_v52 = vld [vmem:[%s4807_s13 + $0x98] sm:$0xff]  }
  0x71   : > { %4303 = vmatprep.mubr.msk.bf16.mxu0 %vm561_vm2, %v4582_v54  ;;  %4371 = vmatprep.mubr.msk.bf16.mxu1 %vm561_vm2, %v4583_v55  ;;  %v4637_v53 = vld [vmem:[%s4814_s16 + $0x98] sm:$0xff]   ;;  %v4638_v55 = vld [vmem:[%s4807_s13 + $0xa0] sm:$0xff]  }
  0x78   : > { %4304 = vmatmul.mubr.msk.bf16.gmra.mxu0 %vm561_vm2, %v4584_v56  ;;  %4372 = vmatmul.mubr.msk.bf16.gmra.mxu1 %vm561_vm2, %v4585_v57  ;;  %v4639_v56 = vld [vmem:[%s4814_s16 + $0xa0] sm:$0xff]  }
  0x79   : > { %4307 = vmatprep.mubr.msk.bf16.mxu0 %vm561_vm2, %v4586_v58  ;;  %4375 = vmatprep.mubr.msk.bf16.mxu1 %vm561_vm2, %v4587_v59 }
  0x80   : > { %4308 = vmatmul.mubr.msk.bf16.gmra.mxu0 %vm561_vm2, %v4588_v60  ;;  %4376 = vmatmul.mubr.msk.bf16.gmra.mxu1 %vm561_vm2, %v4589_v61 }
  0x81   : > { %4311 = vmatprep.mubr.msk.bf16.mxu0 %vm561_vm2, %v4590_v62  ;;  %4379 = vmatprep.mubr.msk.bf16.mxu1 %vm561_vm2, %v4591_v63 }
  0x88   : > { %4312 = vmatmul.mubr.msk.bf16.gmra.mxu0 %vm561_vm2, %v4592_v0  ;;  %4380 = vmatmul.mubr.msk.bf16.gmra.mxu1 %vm561_vm2, %v4593_v1 }
  0x89   : > { %4315 = vmatprep.mubr.msk.bf16.mxu0 %vm561_vm2, %v4594_v2  ;;  %4383 = vmatprep.mubr.msk.bf16.mxu1 %vm561_vm2, %v4595_v3 }
  0x90   : > { %4316 = vmatmul.mubr.msk.bf16.gmra.mxu0 %vm561_vm2, %v4596_v4  ;;  %4384 = vmatmul.mubr.msk.bf16.gmra.mxu1 %vm561_vm2, %v4597_v5  ;;  %v4640_v4 = vld [vmem:[%s4807_s13 + $0xa8] sm:$0xff]  }
  0x91   : > { %4391 = vmatprep.mubr.msk.bf16.mxu0 %vm561_vm2, %v4598_v6  ;;  %4459 = vmatprep.mubr.msk.bf16.mxu1 %vm561_vm2, %v4599_v7  ;;  %v4641_v5 = vld [vmem:[%s4814_s16 + $0xa8] sm:$0xff]   ;;  %v4642_v7 = vld [vmem:[%s4807_s13 + $0xb0] sm:$0xff]  }
  0x98   : > { %4392 = vmatmul.mubr.msk.bf16.vlgmr.msra.gmra.mxu0 %vm561_vm2, %v4600_v8  ;;  %4460 = vmatmul.mubr.msk.bf16.vlgmr.msra.gmra.mxu1 %vm561_vm2, %v4601_v9  ;;  %v4643_v8 = vld [vmem:[%s4814_s16 + $0xb0] sm:$0xff]  }
  0x99   : > { %4395 = vmatprep.mubr.msk.bf16.mxu0 %vm561_vm2, %v4602_v10  ;;  %4463 = vmatprep.mubr.msk.bf16.mxu1 %vm561_vm2, %v4603_v11 }
  0xa0   : > { %4396 = vmatmul.mubr.msk.bf16.gmra.mxu0 %vm561_vm2, %v4604_v12  ;;  %4464 = vmatmul.mubr.msk.bf16.gmra.mxu1 %vm561_vm2, %v4605_v13 }
  0xa1   : > { %4399 = vmatprep.mubr.msk.bf16.mxu0 %vm561_vm2, %v4606_v14  ;;  %4467 = vmatprep.mubr.msk.bf16.mxu1 %vm561_vm2, %v4607_v15 }
  0xa8   : > { %4400 = vmatmul.mubr.msk.bf16.gmra.mxu0 %vm561_vm2, %v4608_v16  ;;  %4468 = vmatmul.mubr.msk.bf16.gmra.mxu1 %vm561_vm2, %v4609_v17 }
  0xa9   : > { %4403 = vmatprep.mubr.msk.bf16.mxu0 %vm561_vm2, %v4610_v18  ;;  %4471 = vmatprep.mubr.msk.bf16.mxu1 %vm561_vm2, %v4611_v19 }
  0xb0   : > { %4404 = vmatmul.mubr.msk.bf16.gmra.mxu0 %vm561_vm2, %v4612_v20  ;;  %4472 = vmatmul.mubr.msk.bf16.gmra.mxu1 %vm561_vm2, %v4613_v21  ;;  %v4644_v20 = vld [vmem:[%s4807_s13 + $0xb8] sm:$0xff]  }
  0xb1   : > { %4407 = vmatprep.mubr.msk.bf16.mxu0 %vm561_vm2, %v4614_v22  ;;  %4475 = vmatprep.mubr.msk.bf16.mxu1 %vm561_vm2, %v4615_v23  ;;  %v4645_v21 = vld [vmem:[%s4814_s16 + $0xb8] sm:$0xff]   ;;  %v4646_v23 = vld [vmem:[%s4807_s13 + $0xc0] sm:$0xff]  }
  0xb8   : > { %4408 = vmatmul.mubr.msk.bf16.gmra.mxu0 %vm561_vm2, %v4616_v24  ;;  %4476 = vmatmul.mubr.msk.bf16.gmra.mxu1 %vm561_vm2, %v4617_v25  ;;  %v4647_v24 = vld [vmem:[%s4814_s16 + $0xc0] sm:$0xff]  }
  0xb9   : > { %4411 = vmatprep.mubr.msk.bf16.mxu0 %vm561_vm2, %v4618_v26  ;;  %4479 = vmatprep.mubr.msk.bf16.mxu1 %vm561_vm2, %v4619_v27  ;;  %v4658_v27 = vld [vmem:[%s4807_s13 + $0xf0] sm:$0xff]  }
  0xc0   : > { %4412 = vmatmul.mubr.msk.bf16.gmra.mxu0 %vm561_vm2, %v4620_v28  ;;  %4480 = vmatmul.mubr.msk.bf16.gmra.mxu1 %vm561_vm2, %v4621_v29 }
  0xc1   : > { %4415 = vmatprep.mubr.msk.bf16.mxu0 %vm561_vm2, %v4622_v30  ;;  %4483 = vmatprep.mubr.msk.bf16.mxu1 %vm561_vm2, %v4623_v31 }
  0xc8   : > { %4416 = vmatmul.mubr.msk.bf16.gmra.mxu0 %vm561_vm2, %v4624_v32  ;;  %4484 = vmatmul.mubr.msk.bf16.gmra.mxu1 %vm561_vm2, %v4625_v33 }
  0xc9   : > { %4419 = vmatprep.mubr.msk.bf16.mxu0 %vm561_vm2, %v4626_v34  ;;  %4487 = vmatprep.mubr.msk.bf16.mxu1 %vm561_vm2, %v4627_v35 }
  0xd0   : > { %4420 = vmatmul.mubr.msk.bf16.gmra.mxu0 %vm561_vm2, %v4628_v36  ;;  %4488 = vmatmul.mubr.msk.bf16.gmra.mxu1 %vm561_vm2, %v4629_v37  ;;  %v4648_v36 = vld [vmem:[%s4807_s13 + $0xc8] sm:$0xff]  }
  0xd1   : > { %4423 = vmatprep.mubr.msk.bf16.mxu0 %vm561_vm2, %v4630_v38  ;;  %4491 = vmatprep.mubr.msk.bf16.mxu1 %vm561_vm2, %v4631_v39  ;;  %v4649_v37 = vld [vmem:[%s4814_s16 + $0xc8] sm:$0xff]   ;;  %v4650_v39 = vld [vmem:[%s4807_s13 + $0xd0] sm:$0xff]  }
  0xd8   : > { %v4946_v44 = vpop.f32.mrf.mxu0  ;;  %v4948_v45 = vpop.f32.mrf.mxu1  ;;  %4424 = vmatmul.mubr.msk.bf16.gmra.mxu0 %vm561_vm2, %v4632_v40  ;;  %4492 = vmatmul.mubr.msk.bf16.gmra.mxu1 %vm561_vm2, %v4633_v41  ;;  %v4651_v40 = vld [vmem:[%s4814_s16 + $0xd0] sm:$0xff]  }
  0xd9   : > { %4427 = vmatprep.mubr.msk.bf16.mxu0 %vm561_vm2, %v4634_v42  ;;  %4495 = vmatprep.mubr.msk.bf16.mxu1 %vm561_vm2, %v4635_v43 }
  0xda   : > { %v4956_v47 = vpop.f32.mrf.mxu0  ;;  %v4958_v48 = vpop.f32.mrf.mxu1 }
  0xdc   : > { %v4962_v50 = vpop.f32.mrf.mxu0  ;;  %v4964_v51 = vpop.f32.mrf.mxu1 }
  0xde   : > { %v4972_v57 = vpop.f32.mrf.mxu0  ;;  %v4974_v58 = vpop.f32.mrf.mxu1 }
  0xe0   : > { %v4978_v60 = vpop.f32.mrf.mxu0  ;;  %v4980_v61 = vpop.f32.mrf.mxu1  ;;  %4428 = vmatmul.mubr.msk.bf16.gmra.mxu0 %vm561_vm2, %v4636_v52  ;;  %4496 = vmatmul.mubr.msk.bf16.gmra.mxu1 %vm561_vm2, %v4637_v53 }
  0xe1   : > { %4431 = vmatprep.mubr.msk.bf16.mxu0 %vm561_vm2, %v4638_v55  ;;  %4499 = vmatprep.mubr.msk.bf16.mxu1 %vm561_vm2, %v4639_v56 }
  0xe2   : > { %v4988_v63 = vpop.f32.mrf.mxu0  ;;  %v4990_v0 = vpop.f32.mrf.mxu1 }
  0xe4   : > { %v4994_v2 = vpop.f32.mrf.mxu0  ;;  %v4996_v3 = vpop.f32.mrf.mxu1 }
  0xe6   : > { %v5004_v9 = vpop.f32.mrf.mxu0  ;;  %v5006_v10 = vpop.f32.mrf.mxu1 }
  0xe8   : > { %v5010_v12 = vpop.f32.mrf.mxu0  ;;  %v5012_v13 = vpop.f32.mrf.mxu1  ;;  %4432 = vmatmul.mubr.msk.bf16.gmra.mxu0 %vm561_vm2, %v4640_v4  ;;  %4500 = vmatmul.mubr.msk.bf16.gmra.mxu1 %vm561_vm2, %v4641_v5 }
  0xe9   : > { %4435 = vmatprep.mubr.msk.bf16.mxu0 %vm561_vm2, %v4642_v7  ;;  %4503 = vmatprep.mubr.msk.bf16.mxu1 %vm561_vm2, %v4643_v8 }
  0xea   : > { %v5020_v15 = vpop.f32.mrf.mxu0  ;;  %v5022_v16 = vpop.f32.mrf.mxu1 }
  0xec   : > { %v5026_v18 = vpop.f32.mrf.mxu0  ;;  %v5028_v19 = vpop.f32.mrf.mxu1 }
  0xee   : > { %v5036_v25 = vpop.f32.mrf.mxu0  ;;  %v5038_v26 = vpop.f32.mrf.mxu1 }
  0xf0   : > { %v5042_v28 = vpop.f32.mrf.mxu0  ;;  %v5044_v29 = vpop.f32.mrf.mxu1  ;;  %4436 = vmatmul.mubr.msk.bf16.gmra.mxu0 %vm561_vm2, %v4644_v20  ;;  %4504 = vmatmul.mubr.msk.bf16.gmra.mxu1 %vm561_vm2, %v4645_v21  ;;  %v4652_v20 = vld [vmem:[%s4807_s13 + $0xd8] sm:$0xff]  }
  0xf1   : > { %4439 = vmatprep.mubr.msk.bf16.mxu0 %vm561_vm2, %v4646_v23  ;;  %4507 = vmatprep.mubr.msk.bf16.mxu1 %vm561_vm2, %v4647_v24  ;;  %v4653_v21 = vld [vmem:[%s4814_s16 + $0xd8] sm:$0xff]   ;;  %v4654_v24 = vld [vmem:[%s4807_s13 + $0xe0] sm:$0xff]  }
  0xf2   : > { %v5052_v31 = vpop.f32.mrf.mxu0  ;;  %v5054_v32 = vpop.f32.mrf.mxu1 }
  0xf4   : > { %v5058_v34 = vpop.f32.mrf.mxu0  ;;  %v5060_v35 = vpop.f32.mrf.mxu1 }
  0xf6   : > { %v5068_v41 = vpop.f32.mrf.mxu0  ;;  %v5070_v42 = vpop.f32.mrf.mxu1 }
  0xf8   : > { %v5074_v52 = vpop.f32.mrf.mxu0  ;;  %v5076_v53 = vpop.f32.mrf.mxu1  ;;  %4440 = vmatmul.mubr.msk.bf16.gmra.mxu0 %vm561_vm2, %v4648_v36  ;;  %4508 = vmatmul.mubr.msk.bf16.gmra.mxu1 %vm561_vm2, %v4649_v37  ;;  %v4655_v36 = vld [vmem:[%s4814_s16 + $0xe0] sm:$0xff]  }
  0xf9   : > { %4443 = vmatprep.mubr.msk.bf16.mxu0 %vm561_vm2, %v4650_v39  ;;  %4511 = vmatprep.mubr.msk.bf16.mxu1 %vm561_vm2, %v4651_v40 }
  0xfa   : > { %v5084_v56 = vpop.f32.mrf.mxu0  ;;  %v5086_v4 = vpop.f32.mrf.mxu1 }
  0xfc   : > { %v5090_v7 = vpop.f32.mrf.mxu0  ;;  %v5092_v8 = vpop.f32.mrf.mxu1 }
  0xfe   : > { %v5100_v37 = vpop.f32.mrf.mxu0  ;;  %v5102_v39 = vpop.f32.mrf.mxu1 }
 0x100   : > { %v5106_v5 = vpop.f32.mrf.mxu0  ;;  %v5108_v55 = vpop.f32.mrf.mxu1  ;;  %4444 = vmatmul.mubr.msk.bf16.gmra.mxu0 %vm561_vm2, %v4652_v20  ;;  %4512 = vmatmul.mubr.msk.bf16.gmra.mxu1 %vm561_vm2, %v4653_v21  ;;  %v4656_v20 = vld [vmem:[%s4807_s13 + $0xe8] sm:$0xff]  }
 0x101   : > { %4447 = vmatprep.mubr.msk.bf16.mxu0 %vm561_vm2, %v4654_v24  ;;  %4515 = vmatprep.mubr.msk.bf16.mxu1 %vm561_vm2, %v4655_v36  ;;  %v4657_v21 = vld [vmem:[%s4814_s16 + $0xe8] sm:$0xff]   ;;  %v4659_v24 = vld [vmem:[%s4814_s16 + $0xf0] sm:$0xff]  }
 0x102   : > { %v5116_v43 = vpop.f32.mrf.mxu0  ;;  %v5118_v40 = vpop.f32.mrf.mxu1 }
 0x104   : > { %v5122_v33 = vpop.f32.mrf.mxu0  ;;  %v5124_v30 = vpop.f32.mrf.mxu1 }
 0x106   : > { %v5132_v36 = vpop.f32.mrf.mxu0  ;;  %v5134_v22 = vpop.f32.mrf.mxu1 }
 0x108   : > { %v5138_v17 = vpop.f32.mrf.mxu0  ;;  %v5140_v14 = vpop.f32.mrf.mxu1  ;;  %4448 = vmatmul.mubr.msk.bf16.gmra.mxu0 %vm561_vm2, %v4656_v20  ;;  %4516 = vmatmul.mubr.msk.bf16.gmra.mxu1 %vm561_vm2, %v4657_v21  ;;  %v4660_v20 = vld [vmem:[%s4807_s13 + $0xf8] sm:$0xff]  }
 0x109   : > { %5774 = vst [vmem:[#allocation2_spill] sm:$0xff] %v5140_v14  ;;  %4451 = vmatprep.mubr.msk.bf16.mxu0 %vm561_vm2, %v4658_v27  ;;  %4519 = vmatprep.mubr.msk.bf16.mxu1 %vm561_vm2, %v4659_v24  ;;  %v4661_v21 = vld [vmem:[%s4814_s16 + $0xf8] sm:$0xff]  }
 0x10a   : > { %v5148_v11 = vpop.f32.mrf.mxu0  ;;  %v5150_v6 = vpop.f32.mrf.mxu1 }
 0x10b   : > { %5775 = vst [vmem:[#allocation3_spill] sm:$0xff] %v5148_v11  ;;  %5776 = vst [vmem:[#allocation4_spill] sm:$0xff] %v5150_v6  ;;  %v5854_v11 = vmax.f32 %v4956_v47, %v4958_v48  ;;  %v5856_v47 = vmax.f32 %v4972_v57, %v4974_v58  ;;  %v5858_v57 = vmax.f32 %v4988_v63, %v4990_v0 }
 0x10c   : > { %v5154_v1 = vpop.f32.mrf.mxu0  ;;  %v5156_v62 = vpop.f32.mrf.mxu1 }
 0x10d   : > { %5777 = vst [vmem:[#allocation5_spill] sm:$0xff] %v5154_v1  ;;  %5778 = vst [vmem:[#allocation6_spill] sm:$0xff] %v5156_v62 }
 0x10e   : > { %v5162_v59 = vpop.f32.mrf.mxu0  ;;  %v5164_v27 = vpop.f32.mrf.mxu1 }
 0x10f   : > { %5779 = vst [vmem:[#allocation7_spill] sm:$0xff] %v5162_v59  ;;  %5780 = vst [vmem:[#allocation8_spill] sm:$0xff] %v5164_v27  ;;  %v5853_v59 = vmax.f32 %v4946_v44, %v4948_v45 }
 0x110   : > { %v5168_v54 = vpop.f32.mrf.mxu0  ;;  %v5170_v49 = vpop.f32.mrf.mxu1  ;;  %4452 = vmatmul.mubr.msk.bf16.gmra.mxu0 %vm561_vm2, %v4660_v20  ;;  %4520 = vmatmul.mubr.msk.bf16.gmra.mxu1 %vm561_vm2, %v4661_v21 }
 0x111   : > { %5781 = vst [vmem:[#allocation9_spill] sm:$0xff] %v5168_v54  ;;  %5782 = vst [vmem:[#allocation10_spill] sm:$0xff] %v5170_v49 }
 0x112   : > { %v5176_v46 = vpop.f32.mrf.mxu0  ;;  %v5178_v23 = vpop.f32.mrf.mxu1 }
 0x113   : > { %5783 = vst [vmem:[#allocation11_spill] sm:$0xff] %v5176_v46  ;;  %5784 = vst [vmem:[#allocation12_spill] sm:$0xff] %v5178_v23 }
 0x114   : > { %v5182_v1 = vpop.f32.mrf.mxu0  ;;  %v5184_v24 = vpop.f32.mrf.mxu1 }
 0x115   : > { %5785 = vst [vmem:[#allocation13_spill] sm:$0xff] %v5182_v1  ;;  %5786 = vst [vmem:[#allocation14_spill] sm:$0xff] %v5184_v24 }
 0x116   : > { %v5188_v20 = vpop.f32.mrf.mxu0  ;;  %v5190_v21 = vpop.f32.mrf.mxu1 }
 0x117   : > { %5787 = vst [vmem:[#allocation15_spill] sm:$0xff] %v5188_v20  ;;  %5788 = vst [vmem:[#allocation16_spill] sm:$0xff] %v5190_v21 }
 0x118   : > { %v5194_v49 = vpop.f32.mrf.mxu0  ;;  %v5196_v54 = vpop.f32.mrf.mxu1 }
 0x119   : > { %5789 = vst [vmem:[#allocation17_spill] sm:$0xff] %v5194_v49  ;;  %5790 = vst [vmem:[#allocation18_spill] sm:$0xff] %v5196_v54 }
 0x11a   : > { %v5200_v23 = vpop.f32.mrf.mxu0  ;;  %v5202_v46 = vpop.f32.mrf.mxu1 }
 0x11b   : > { %5791 = vst [vmem:[#allocation19_spill] sm:$0xff] %v5200_v23  ;;  %5792 = vst [vmem:[#allocation20_spill] sm:$0xff] %v5202_v46 }
 0x11c   : > { %v5206_v24 = vpop.f32.mrf.mxu0  ;;  %v5208_v1 = vpop.f32.mrf.mxu1 }
 0x11d   : > { %5793 = vst [vmem:[#allocation21_spill] sm:$0xff] %v5206_v24  ;;  %5794 = vst [vmem:[#allocation22_spill] sm:$0xff] %v5208_v1 }
 0x11e   : > { %v5212_v21 = vpop.f32.mrf.mxu0  ;;  %v5214_v20 = vpop.f32.mrf.mxu1 }
 0x11f   : > { %5795 = vst [vmem:[#allocation23_spill] sm:$0xff] %v5212_v21  ;;  %5796 = vst [vmem:[#allocation24_spill] sm:$0xff] %v5214_v20 }
 0x120   : > { %v5218_v54 = vpop.f32.mrf.mxu0  ;;  %v5220_v49 = vpop.f32.mrf.mxu1 }
 0x121   : > { %5797 = vst [vmem:[#allocation25_spill] sm:$0xff] %v5218_v54  ;;  %5798 = vst [vmem:[#allocation26_spill] sm:$0xff] %v5220_v49 }
 0x122   : > { %v5224_v46 = vpop.f32.mrf.mxu0  ;;  %v5226_v23 = vpop.f32.mrf.mxu1 }
 0x123   : > { %5799 = vst [vmem:[#allocation27_spill] sm:$0xff] %v5224_v46  ;;  %5800 = vst [vmem:[#allocation28_spill] sm:$0xff] %v5226_v23 }
 0x124   : > { %v5230_v1 = vpop.f32.mrf.mxu0  ;;  %v5232_v24 = vpop.f32.mrf.mxu1 }
 0x125   : > { %5801 = vst [vmem:[#allocation29_spill] sm:$0xff] %v5230_v1  ;;  %5802 = vst [vmem:[#allocation30_spill] sm:$0xff] %v5232_v24 }
 0x126   : > { %v5236_v20 = vpop.f32.mrf.mxu0  ;;  %v5238_v21 = vpop.f32.mrf.mxu1 }
 0x127   : > { %5803 = vst [vmem:[#allocation31_spill] sm:$0xff] %v5236_v20  ;;  %5804 = vst [vmem:[#allocation32_spill] sm:$0xff] %v5238_v21 }
 0x128   : > { %v5242_v49 = vpop.f32.mrf.mxu0  ;;  %v5244_v54 = vpop.f32.mrf.mxu1 }
 0x129   : > { %5805 = vst [vmem:[#allocation33_spill] sm:$0xff] %v5242_v49  ;;  %5806 = vst [vmem:[#allocation34_spill] sm:$0xff] %v5244_v54 }
 0x12a   : > { %v5248_v23 = vpop.f32.mrf.mxu0  ;;  %v5250_v46 = vpop.f32.mrf.mxu1 }
 0x12b   : > { %5807 = vst [vmem:[#allocation35_spill] sm:$0xff] %v5248_v23  ;;  %5808 = vst [vmem:[#allocation36_spill] sm:$0xff] %v5250_v46 }
 0x12c   : > { %v5254_v24 = vpop.f32.mrf.mxu0  ;;  %v5256_v1 = vpop.f32.mrf.mxu1 }
 0x12d   : > { %5809 = vst [vmem:[#allocation37_spill] sm:$0xff] %v5254_v24  ;;  %5810 = vst [vmem:[#allocation38_spill] sm:$0xff] %v5256_v1 }
 0x12e   : > { %v5260_v21 = vpop.f32.mrf.mxu0  ;;  %v5262_v20 = vpop.f32.mrf.mxu1 }
 0x12f   : > { %5811 = vst [vmem:[#allocation39_spill] sm:$0xff] %v5260_v21  ;;  %5812 = vst [vmem:[#allocation40_spill] sm:$0xff] %v5262_v20 }
 0x130   : > { %v5266_v54 = vpop.f32.mrf.mxu0  ;;  %v5268_v49 = vpop.f32.mrf.mxu1 }
 0x131   : > { %5813 = vst [vmem:[#allocation41_spill] sm:$0xff] %v5266_v54  ;;  %5814 = vst [vmem:[#allocation42_spill] sm:$0xff] %v5268_v49 }
 0x132   : > { %v5272_v46 = vpop.f32.mrf.mxu0  ;;  %v5274_v23 = vpop.f32.mrf.mxu1 }
 0x133   : > { %5815 = vst [vmem:[#allocation43_spill] sm:$0xff] %v5272_v46  ;;  %5816 = vst [vmem:[#allocation44_spill] sm:$0xff] %v5274_v23 }
 0x134   : > { %v5278_v1 = vpop.f32.mrf.mxu0  ;;  %v5280_v24 = vpop.f32.mrf.mxu1 }
 0x135   : > { %5817 = vst [vmem:[#allocation45_spill] sm:$0xff] %v5278_v1  ;;  %5818 = vst [vmem:[#allocation46_spill] sm:$0xff] %v5280_v24 }
 0x136   : > { %v5284_v20 = vpop.f32.mrf.mxu0  ;;  %v5286_v21 = vpop.f32.mrf.mxu1 }
 0x137   : > { %5819 = vst [vmem:[#allocation47_spill] sm:$0xff] %v5284_v20  ;;  %5820 = vst [vmem:[#allocation48_spill] sm:$0xff] %v5286_v21 }
 0x138   : > { %v5290_v49 = vpop.f32.mrf.mxu0  ;;  %v5292_v54 = vpop.f32.mrf.mxu1 }
 0x139   : > { %5821 = vst [vmem:[#allocation49_spill] sm:$0xff] %v5290_v49  ;;  %5822 = vst [vmem:[#allocation50_spill] sm:$0xff] %v5292_v54 }
 0x13a   : > { %v5296_v23 = vpop.f32.mrf.mxu0  ;;  %v5298_v46 = vpop.f32.mrf.mxu1 }
 0x13b   : > { %5823 = vst [vmem:[#allocation51_spill] sm:$0xff] %v5296_v23  ;;  %5824 = vst [vmem:[#allocation52_spill] sm:$0xff] %v5298_v46 }
 0x13c   : > { %v5302_v24 = vpop.f32.mrf.mxu0  ;;  %v5304_v1 = vpop.f32.mrf.mxu1 }
 0x13d   : > { %5825 = vst [vmem:[#allocation53_spill] sm:$0xff] %v5302_v24  ;;  %5826 = vst [vmem:[#allocation54_spill] sm:$0xff] %v5304_v1 }
 0x13e   : > { %v5308_v21 = vpop.f32.mrf.mxu0  ;;  %v5310_v20 = vpop.f32.mrf.mxu1 }
 0x13f   : > { %5827 = vst [vmem:[#allocation55_spill] sm:$0xff] %v5308_v21  ;;  %5828 = vst [vmem:[#allocation56_spill] sm:$0xff] %v5310_v20 }
 0x140   : > { %v5314_v54 = vpop.f32.mrf.mxu0  ;;  %v5316_v49 = vpop.f32.mrf.mxu1 }
 0x141   : > { %5829 = vst [vmem:[#allocation57_spill] sm:$0xff] %v5314_v54  ;;  %5830 = vst [vmem:[#allocation58_spill] sm:$0xff] %v5316_v49 }
 0x142   : > { %v5320_v46 = vpop.f32.mrf.mxu0  ;;  %v5322_v23 = vpop.f32.mrf.mxu1 }
 0x143   : > { %5831 = vst [vmem:[#allocation59_spill] sm:$0xff] %v5320_v46  ;;  %5832 = vst [vmem:[#allocation60_spill] sm:$0xff] %v5322_v23 }
 0x144   : > { %v5326_v1 = vpop.f32.mrf.mxu0  ;;  %v5328_v24 = vpop.f32.mrf.mxu1 }
 0x145   : > { %5833 = vst [vmem:[#allocation61_spill] sm:$0xff] %v5326_v1  ;;  %5834 = vst [vmem:[#allocation62_spill] sm:$0xff] %v5328_v24 }
 0x146   : > { %v5332_v20 = vpop.f32.mrf.mxu0  ;;  %v5334_v21 = vpop.f32.mrf.mxu1 }
 0x147   : > { %5835 = vst [vmem:[#allocation63_spill] sm:$0xff] %v5332_v20  ;;  %5836 = vst [vmem:[#allocation64_spill] sm:$0xff] %v5334_v21 }
 0x148   : > { %v5338_v49 = vpop.f32.mrf.mxu0  ;;  %v5340_v54 = vpop.f32.mrf.mxu1 }
 0x149   : > { %5837 = vst [vmem:[#allocation65_spill] sm:$0xff] %v5338_v49  ;;  %5838 = vst [vmem:[#allocation66_spill] sm:$0xff] %v5340_v54 }
 0x14a   : > { %v5344_v23 = vpop.f32.mrf.mxu0  ;;  %v5346_v46 = vpop.f32.mrf.mxu1 }
 0x14b   : > { %5839 = vst [vmem:[#allocation67_spill] sm:$0xff] %v5344_v23  ;;  %5840 = vst [vmem:[#allocation68_spill] sm:$0xff] %v5346_v46 }
 0x14c   : > { %v5350_v24 = vpop.f32.mrf.mxu0  ;;  %v5352_v1 = vpop.f32.mrf.mxu1 }
 0x14d   : > { %5841 = vst [vmem:[#allocation69_spill] sm:$0xff] %v5350_v24  ;;  %5842 = vst [vmem:[#allocation70_spill] sm:$0xff] %v5352_v1 }
 0x14e   : > { %v5356_v21 = vpop.f32.mrf.mxu0  ;;  %v5358_v20 = vpop.f32.mrf.mxu1 }
 0x14f   : > { %5843 = vst [vmem:[#allocation71_spill] sm:$0xff] %v5356_v21  ;;  %5844 = vst [vmem:[#allocation72_spill] sm:$0xff] %v5358_v20 }
 0x150   : > { %v5362_v54 = vpop.f32.mrf.mxu0  ;;  %v5364_v49 = vpop.f32.mrf.mxu1 }
 0x151   : > { %5845 = vst [vmem:[#allocation73_spill] sm:$0xff] %v5362_v54  ;;  %5846 = vst [vmem:[#allocation74_spill] sm:$0xff] %v5364_v49 }
 0x152   : > { %v5368_v46 = vpop.f32.mrf.mxu0  ;;  %v5370_v23 = vpop.f32.mrf.mxu1 }
 0x153   : > { %5847 = vst [vmem:[#allocation75_spill] sm:$0xff] %v5368_v46  ;;  %5848 = vst [vmem:[#allocation76_spill] sm:$0xff] %v5370_v23 }
 0x154   : > { %v5374_v1 = vpop.f32.mrf.mxu0  ;;  %v5376_v24 = vpop.f32.mrf.mxu1 }
 0x155   : > { %5849 = vst [vmem:[#allocation77_spill] sm:$0xff] %v5374_v1  ;;  %5850 = vst [vmem:[#allocation78_spill] sm:$0xff] %v5376_v24  ;;  %v5395_v24 = vld [vmem:[%s5693_s5] ss:$0 sm:$0xff] }
 0x156   : > { %v5380_v20 = vpop.f32.mrf.mxu0  ;;  %v5382_v21 = vpop.f32.mrf.mxu1 }
 0x157   : > { %5851 = vst [vmem:[#allocation79_spill] sm:$0xff] %v5380_v20  ;;  %5852 = vst [vmem:[#allocation80_spill] sm:$0xff] %v5382_v21  ;;  %v5855_v20 = vmax.f32 %v4962_v50, %v4964_v51  ;;  %v5857_v50 = vmax.f32 %v4978_v60, %v4980_v61 }
 0x158   : > { %v4393_v49 = vpop.f32.mrf.mxu0  ;;  %v4461_v54 = vpop.f32.mrf.mxu1 }
 0x159   : > { %v2238_v38 = vmax.f32 %v5853_v59, %v4393_v49 }
 0x15a   : > { %v1981_v23 = vpop.f32.mrf.mxu0  ;;  %v2654_v46 = vpop.f32.mrf.mxu1 }
 0x15b   : > { %v2911_v6 = vmax.f32 %v2238_v38, %v4461_v54  ;;  %v2236_v62 = vmax.f32 %v5854_v11, %v1981_v23 }
 0x15c   : > { %v4394_v1 = vpop.f32.mrf.mxu0  ;;  %v4462_v27 = vpop.f32.mrf.mxu1 }
 0x15d   : > { %v2909_v21 = vmax.f32 %v2236_v62, %v2654_v46  ;;  %v2239_v44 = vmax.f32 %v5855_v20, %v4394_v1  ;;  %v2982_v54 = vadd.f32 %v5395_v24, %v2911_v6 }
 0x15e   : > { %v1984_v45 = vpop.f32.mrf.mxu0  ;;  %v2657_v49 = vpop.f32.mrf.mxu1 }
 0x15f   : > { %v2912_v59 = vmax.f32 %v2239_v44, %v4462_v27  ;;  %v2237_v48 = vmax.f32 %v5856_v47, %v1984_v45  ;;  %v2980_v23 = vadd.f32 %v5395_v24, %v2909_v21  ;;  %v3046_v14 = vmax.f32 %v2982_v54, 0.0 }
 0x160   : > { %v4397_v11 = vpop.f32.mrf.mxu0  ;;  %v4465_v38 = vpop.f32.mrf.mxu1 }
 0x161   : > { %v2983_v46 = vadd.f32 %v5395_v24, %v2912_v59  ;;  %v2910_v62 = vmax.f32 %v2237_v48, %v2657_v49  ;;  %v2242_v51 = vmax.f32 %v5857_v50, %v4397_v11  ;;  %v3044_v61 = vmax.f32 %v2980_v23, 0.0 }
 0x162   : > { %v1997_v1 = vpop.f32.mrf.mxu0  ;;  %v2670_v20 = vpop.f32.mrf.mxu1  ;;  %v5859_v59 = vmax.f32 %v4994_v2, %v4996_v3  ;;  %v5860_v11 = vmax.f32 %v5004_v9, %v5006_v10  ;;  %v5861_v2 = vmax.f32 %v5010_v12, %v5012_v13  ;;  %v5863_v13 = vmax.f32 %v5026_v18, %v5028_v19 }
 0x163   : > { %v3047_v6 = vmax.f32 %v2983_v46, 0.0  ;;  %v2981_v27 = vadd.f32 %v5395_v24, %v2910_v62  ;;  %v2240_v58 = vmax.f32 %v5858_v57, %v1997_v1  ;;  %v2915_v21 = vmax.f32 %v2242_v51, %v4465_v38 }
 0x164   : > { %v4398_v44 = vpop.f32.mrf.mxu0  ;;  %v4466_v60 = vpop.f32.mrf.mxu1  ;;  %v5865_v18 = vmax.f32 %v5042_v28, %v5044_v29  ;;  %v5867_v29 = vmax.f32 %v5058_v34, %v5060_v35 }
 0x165   : > { %v3932_v45 = vpack.c.bf16 %v3047_v6, %v3046_v14  ;;  %v3045_v49 = vmax.f32 %v2981_v27, 0.0  ;;  %v2913_v54 = vmax.f32 %v2240_v58, %v2670_v20  ;;  %v2243_v47 = vmax.f32 %v5859_v59, %v4398_v44 }
 0x166   : > { %v2000_v63 = vpop.f32.mrf.mxu0  ;;  %v2673_v0 = vpop.f32.mrf.mxu1  ;;  %v2986_v38 = vadd.f32 %v5395_v24, %v2915_v21  ;;  %v5862_v27 = vmax.f32 %v5020_v15, %v5022_v16 }
 0x167   : > { %4084 = vst [vmem:[%s5417_s22 + $0x8] sm:$0xff] %v3932_v45   ;;  %v3927_v48 = vpack.c.bf16 %v3045_v49, %v3044_v61  ;;  %v2241_v46 = vmax.f32 %v5860_v11, %v2000_v63  ;;  %v2916_v62 = vmax.f32 %v2243_v47, %v4466_v60  ;;  %v2984_v14 = vadd.f32 %v5395_v24, %v2913_v54 }
 0x168   : > { %v4401_v50 = vpop.f32.mrf.mxu0  ;;  %v4469_v23 = vpop.f32.mrf.mxu1  ;;  %v3050_v58 = vmax.f32 %v2986_v38, 0.0 }
 0x169   : > { %3928 = vst [vmem:[%s5417_s22] sm:$0xff] %v3927_v48   ;;  %v2914_v51 = vmax.f32 %v2241_v46, %v2673_v0  ;;  %v2246_v3 = vmax.f32 %v5861_v2, %v4401_v50  ;;  %v2987_v1 = vadd.f32 %v5395_v24, %v2916_v62  ;;  %v3048_v61 = vmax.f32 %v2984_v14, 0.0 }
 0x16a   : > { %v2013_v20 = vpop.f32.mrf.mxu0  ;;  %v2686_v6 = vpop.f32.mrf.mxu1  ;;  %v5864_v0 = vmax.f32 %v5036_v25, %v5038_v26  ;;  %v5866_v25 = vmax.f32 %v5052_v31, %v5054_v32  ;;  %v5868_v32 = vmax.f32 %v5068_v41, %v5070_v42  ;;  %v5870_v42 = vmax.f32 %v5084_v56, %v5086_v4 }
 0x16b   : > { %v2985_v9 = vadd.f32 %v5395_v24, %v2914_v51  ;;  %v2919_v10 = vmax.f32 %v2246_v3, %v4469_v23  ;;  %v2244_v57 = vmax.f32 %v5862_v27, %v2013_v20  ;;  %v3051_v21 = vmax.f32 %v2987_v1, 0.0 }
 0x16c   : > { %v4402_v44 = vpop.f32.mrf.mxu0  ;;  %v4470_v60 = vpop.f32.mrf.mxu1  ;;  %v5872_v56 = vmax.f32 %v5100_v37, %v5102_v39 }
 0x16d   : > { %v3049_v12 = vmax.f32 %v2985_v9, 0.0  ;;  %v2247_v45 = vmax.f32 %v5863_v13, %v4402_v44  ;;  %v3942_v49 = vpack.c.bf16 %v3051_v21, %v3050_v58  ;;  %v2917_v54 = vmax.f32 %v2244_v57, %v2686_v6 }
 0x16e   : > { %v2016_v59 = vpop.f32.mrf.mxu0  ;;  %v2689_v47 = vpop.f32.mrf.mxu1  ;;  %v2990_v15 = vadd.f32 %v5395_v24, %v2919_v10 }
 0x16f   : > { %v3937_v63 = vpack.c.bf16 %v3049_v12, %v3048_v61  ;;  %v2920_v16 = vmax.f32 %v2247_v45, %v4470_v60  ;;  %4086 = vst [vmem:[%s5417_s22 + $0x18] sm:$0xff] %v3942_v49   ;;  %v2245_v48 = vmax.f32 %v5864_v0, %v2016_v59  ;;  %v2988_v62 = vadd.f32 %v5395_v24, %v2917_v54 }
 0x170   : > { %v4405_v11 = vpop.f32.mrf.mxu0  ;;  %v4473_v46 = vpop.f32.mrf.mxu1  ;;  %v3054_v51 = vmax.f32 %v2990_v15, 0.0  ;;  %v5869_v49 = vmax.f32 %v5074_v52, %v5076_v53 }
 0x171   : > { %4085 = vst [vmem:[%s5417_s22 + $0x10] sm:$0xff] %v3937_v63   ;;  %v2991_v38 = vadd.f32 %v5395_v24, %v2920_v16  ;;  %v2250_v19 = vmax.f32 %v5865_v18, %v4405_v11  ;;  %v2918_v50 = vmax.f32 %v2245_v48, %v2689_v47  ;;  %v3052_v27 = vmax.f32 %v2988_v62, 0.0 }
 0x172   : > { %v2029_v23 = vpop.f32.mrf.mxu0  ;;  %v2702_v14 = vpop.f32.mrf.mxu1  ;;  %v5871_v18 = vmax.f32 %v5090_v7, %v5092_v8  ;;  %v5873_v7 = vmax.f32 %v5106_v5, %v5108_v55  ;;  %v5875_v5 = vmax.f32 %v5122_v33, %v5124_v30  ;;  %v5877_v30 = vld [vmem:[#allocation2_spill] sm:$0xff] }
 0x173   : > { %v3055_v2 = vmax.f32 %v2991_v38, 0.0  ;;  %v2923_v3 = vmax.f32 %v2250_v19, %v4473_v46  ;;  %v2248_v26 = vmax.f32 %v5866_v25, %v2029_v23  ;;  %v2989_v1 = vadd.f32 %v5395_v24, %v2918_v50 }
 0x174   : > { %v4406_v20 = vpop.f32.mrf.mxu0  ;;  %v4474_v6 = vpop.f32.mrf.mxu1  ;;  %v5878_v33 = vmax.f32 %v5138_v17, %v5877_v30 }
 0x175   : > { %v3952_v9 = vpack.c.bf16 %v3055_v2, %v3054_v51  ;;  %v2921_v28 = vmax.f32 %v2248_v26, %v2702_v14  ;;  %v2251_v10 = vmax.f32 %v5867_v29, %v4406_v20  ;;  %v3053_v57 = vmax.f32 %v2989_v1, 0.0 }
 0x176   : > { %v2032_v58 = vpop.f32.mrf.mxu0  ;;  %v2705_v21 = vpop.f32.mrf.mxu1  ;;  %v2994_v44 = vadd.f32 %v5395_v24, %v2923_v3 }
 0x177   : > { %4088 = vst [vmem:[%s5417_s22 + $0x28] sm:$0xff] %v3952_v9   ;;  %v2924_v31 = vmax.f32 %v2251_v10, %v4474_v6  ;;  %v2249_v60 = vmax.f32 %v5868_v32, %v2032_v58  ;;  %v3947_v61 = vpack.c.bf16 %v3053_v57, %v3052_v27  ;;  %v2992_v45 = vadd.f32 %v5395_v24, %v2921_v28 }
 0x178   : > { %v4409_v12 = vpop.f32.mrf.mxu0  ;;  %v4477_v13 = vpop.f32.mrf.mxu1  ;;  %v3058_v63 = vmax.f32 %v2994_v44, 0.0  ;;  %v5874_v9 = vmax.f32 %v5116_v43, %v5118_v40 }
 0x179   : > { %v2995_v34 = vadd.f32 %v5395_v24, %v2924_v31  ;;  %v2922_v35 = vmax.f32 %v2249_v60, %v2705_v21  ;;  %v2254_v54 = vmax.f32 %v5869_v49, %v4409_v12  ;;  %4087 = vst [vmem:[%s5417_s22 + $0x20] sm:$0xff] %v3947_v61   ;;  %v3056_v46 = vmax.f32 %v2992_v45, 0.0 }
 0x17a   : > { %v2045_v59 = vpop.f32.mrf.mxu0  ;;  %v2718_v47 = vpop.f32.mrf.mxu1  ;;  %v5876_v12 = vmax.f32 %v5132_v36, %v5134_v22  ;;  %v5879_v22 = vld [vmem:[#allocation3_spill] sm:$0xff]  ;;  %v5880_v36 = vld [vmem:[#allocation4_spill] sm:$0xff] }
 0x17b   : > { %v3059_v15 = vmax.f32 %v2995_v34, 0.0  ;;  %v2993_v41 = vadd.f32 %v5395_v24, %v2922_v35  ;;  %v2252_v16 = vmax.f32 %v5870_v42, %v2045_v59  ;;  %v2927_v0 = vmax.f32 %v2254_v54, %v4477_v13 }
 0x17c   : > { %v4410_v48 = vpop.f32.mrf.mxu0  ;;  %v4478_v11 = vpop.f32.mrf.mxu1 }
 0x17d   : > { %v3962_v38 = vpack.c.bf16 %v3059_v15, %v3058_v63  ;;  %v3057_v52 = vmax.f32 %v2993_v41, 0.0  ;;  %v2925_v53 = vmax.f32 %v2252_v16, %v2718_v47  ;;  %v2255_v19 = vmax.f32 %v5871_v18, %v4410_v48 }
 0x17e   : > { %v2048_v62 = vpop.f32.mrf.mxu0  ;;  %v2721_v50 = vpop.f32.mrf.mxu1  ;;  %v2998_v14 = vadd.f32 %v5395_v24, %v2927_v0  ;;  %v5881_v16 = vmax.f32 %v5879_v22, %v5880_v36 }
 0x17f   : > { %4090 = vst [vmem:[%s5417_s22 + $0x38] sm:$0xff] %v3962_v38   ;;  %v3957_v23 = vpack.c.bf16 %v3057_v52, %v3056_v46  ;;  %v2253_v4 = vmax.f32 %v5872_v56, %v2048_v62  ;;  %v2928_v51 = vmax.f32 %v2255_v19, %v4478_v11  ;;  %v2996_v25 = vadd.f32 %v5395_v24, %v2925_v53  ;;  %v5882_v52 = vld [vmem:[#allocation5_spill] sm:$0xff]  ;;  %v5883_v53 = vld [vmem:[#allocation6_spill] sm:$0xff] }
 0x180   : > { %v4413_v2 = vpop.f32.mrf.mxu0  ;;  %v4481_v3 = vpop.f32.mrf.mxu1  ;;  %v3062_v29 = vmax.f32 %v2998_v14, 0.0  ;;  %v5884_v18 = vmax.f32 %v5882_v52, %v5883_v53 }
 0x181   : > { %4089 = vst [vmem:[%s5417_s22 + $0x30] sm:$0xff] %v3957_v23   ;;  %v2926_v26 = vmax.f32 %v2253_v4, %v2721_v50  ;;  %v2258_v8 = vmax.f32 %v5873_v7, %v4413_v2  ;;  %v2999_v1 = vadd.f32 %v5395_v24, %v2928_v51  ;;  %v3060_v58 = vmax.f32 %v2996_v25, 0.0  ;;  %v5885_v51 = vld [vmem:[#allocation7_spill] sm:$0xff]  ;;  %v5886_v2 = vld [vmem:[#allocation8_spill] sm:$0xff] }
 0x182   : > { %v2061_v20 = vpop.f32.mrf.mxu0  ;;  %v2734_v6 = vpop.f32.mrf.mxu1 }
 0x183   : > { %v2997_v37 = vadd.f32 %v5395_v24, %v2926_v26  ;;  %v2931_v39 = vmax.f32 %v2258_v8, %v4481_v3  ;;  %v2256_v28 = vmax.f32 %v5874_v9, %v2061_v20  ;;  %v3063_v10 = vmax.f32 %v2999_v1, 0.0 }
 0x184   : > { %v4414_v27 = vpop.f32.mrf.mxu0  ;;  %v4482_v57 = vpop.f32.mrf.mxu1  ;;  %v5887_v3 = vmax.f32 %v5885_v51, %v5886_v2 }
 0x185   : > { %v3061_v55 = vmax.f32 %v2997_v37, 0.0  ;;  %v2259_v21 = vmax.f32 %v5875_v5, %v4414_v27  ;;  %v3972_v44 = vpack.c.bf16 %v3063_v10, %v3062_v29  ;;  %v2929_v31 = vmax.f32 %v2256_v28, %v2734_v6  ;;  %v5888_v37 = vld [vmem:[#allocation9_spill] sm:$0xff]  ;;  %v5892_v5 = vld [vmem:[#allocation12_spill] sm:$0xff] }
 0x186   : > { %v2064_v32 = vpop.f32.mrf.mxu0  ;;  %v2737_v60 = vpop.f32.mrf.mxu1  ;;  %v3002_v43 = vadd.f32 %v5395_v24, %v2931_v39  ;;  %v5889_v39 = vld [vmem:[#allocation10_spill] sm:$0xff] }
 0x187   : > { %v3967_v61 = vpack.c.bf16 %v3061_v55, %v3060_v58  ;;  %v2932_v40 = vmax.f32 %v2259_v21, %v4482_v57  ;;  %4092 = vst [vmem:[%s5417_s22 + $0x48] sm:$0xff] %v3972_v44   ;;  %v2257_v13 = vmax.f32 %v5876_v12, %v2064_v32  ;;  %v3000_v54 = vadd.f32 %v5395_v24, %v2929_v31  ;;  %v5891_v55 = vld [vmem:[#allocation11_spill] sm:$0xff] }
 0x188   : > { %v4417_v45 = vpop.f32.mrf.mxu0  ;;  %v4485_v34 = vpop.f32.mrf.mxu1  ;;  %v3066_v15 = vmax.f32 %v3002_v43, 0.0  ;;  %v5890_v9 = vmax.f32 %v5888_v37, %v5889_v39  ;;  %v5893_v21 = vmax.f32 %v5891_v55, %v5892_v5 }
 0x189   : > { %4091 = vst [vmem:[%s5417_s22 + $0x40] sm:$0xff] %v3967_v61   ;;  %v3003_v35 = vadd.f32 %v5395_v24, %v2932_v40  ;;  %v2262_v49 = vmax.f32 %v5878_v33, %v4417_v45  ;;  %v2930_v59 = vmax.f32 %v2257_v13, %v2737_v60  ;;  %v3064_v62 = vmax.f32 %v3000_v54, 0.0  ;;  %v5894_v13 = vld [vmem:[#allocation13_spill] sm:$0xff]  ;;  %v5895_v45 = vld [vmem:[#allocation14_spill] sm:$0xff]  ;;  %v5897_v54 = vld [vmem:[#allocation15_spill] sm:$0xff] }
 0x18a   : > { %v2077_v47 = vpop.f32.mrf.mxu0  ;;  %v2750_v63 = vpop.f32.mrf.mxu1 }
 0x18b   : > { %v3067_v41 = vmax.f32 %v3003_v35, 0.0  ;;  %v2935_v42 = vmax.f32 %v2262_v49, %v4485_v34  ;;  %v2260_v0 = vmax.f32 %v5881_v16, %v2077_v47  ;;  %v3001_v48 = vadd.f32 %v5395_v24, %v2930_v59  ;;  %v5898_v59 = vld [vmem:[#allocation16_spill] sm:$0xff] }
 0x18c   : > { %v4418_v11 = vpop.f32.mrf.mxu0  ;;  %v4486_v46 = vpop.f32.mrf.mxu1  ;;  %v5896_v34 = vmax.f32 %v5894_v13, %v5895_v45  ;;  %v5899_v47 = vmax.f32 %v5897_v54, %v5898_v59 }
 0x18d   : > { %v3982_v38 = vpack.c.bf16 %v3067_v41, %v3066_v15  ;;  %v2933_v17 = vmax.f32 %v2260_v0, %v2750_v63  ;;  %v2263_v19 = vmax.f32 %v5884_v18, %v4418_v11  ;;  %v3065_v50 = vmax.f32 %v3001_v48, 0.0  ;;  %v5900_v0 = vld [vmem:[#allocation17_spill] sm:$0xff]  ;;  %v5901_v48 = vld [vmem:[#allocation18_spill] sm:$0xff] }
 0x18e   : > { %v2080_v23 = vpop.f32.mrf.mxu0  ;;  %v2753_v56 = vpop.f32.mrf.mxu1  ;;  %v3006_v4 = vadd.f32 %v5395_v24, %v2935_v42  ;;  %v5902_v11 = vmax.f32 %v5900_v0, %v5901_v48 }
 0x18f   : > { %4094 = vst [vmem:[%s5417_s22 + $0x58] sm:$0xff] %v3982_v38   ;;  %v2936_v14 = vmax.f32 %v2263_v19, %v4486_v46  ;;  %v2261_v25 = vmax.f32 %v5887_v3, %v2080_v23  ;;  %v3977_v26 = vpack.c.bf16 %v3065_v50, %v3064_v62  ;;  %v3004_v1 = vadd.f32 %v5395_v24, %v2933_v17  ;;  %v5903_v19 = vld [vmem:[#allocation19_spill] sm:$0xff]  ;;  %v5904_v62 = vld [vmem:[#allocation20_spill] sm:$0xff] }
 0x190   : > { %v4421_v7 = vpop.f32.mrf.mxu0  ;;  %v4489_v8 = vpop.f32.mrf.mxu1  ;;  %v3070_v27 = vmax.f32 %v3006_v4, 0.0  ;;  %v5905_v50 = vmax.f32 %v5903_v19, %v5904_v62 }
 0x191   : > { %v3007_v20 = vadd.f32 %v5395_v24, %v2936_v14  ;;  %v2934_v6 = vmax.f32 %v2261_v25, %v2753_v56  ;;  %v2266_v28 = vmax.f32 %v5890_v9, %v4421_v7  ;;  %4093 = vst [vmem:[%s5417_s22 + $0x50] sm:$0xff] %v3977_v26   ;;  %v3068_v61 = vmax.f32 %v3004_v1, 0.0  ;;  %v5906_v25 = vld [vmem:[#allocation21_spill] sm:$0xff]  ;;  %v5907_v26 = vld [vmem:[#allocation22_spill] sm:$0xff] }
 0x192   : > { %v2093_v29 = vpop.f32.mrf.mxu0  ;;  %v2766_v10 = vpop.f32.mrf.mxu1  ;;  %v5908_v7 = vmax.f32 %v5906_v25, %v5907_v26 }
 0x193   : > { %v3071_v57 = vmax.f32 %v3007_v20, 0.0  ;;  %v3005_v58 = vadd.f32 %v5395_v24, %v2934_v6  ;;  %v2264_v44 = vmax.f32 %v5893_v21, %v2093_v29  ;;  %v2939_v31 = vmax.f32 %v2266_v28, %v4489_v8  ;;  %v5909_v29 = vld [vmem:[#allocation23_spill] sm:$0xff]  ;;  %v5912_v21 = vld [vmem:[#allocation25_spill] sm:$0xff] }
 0x194   : > { %v4422_v32 = vpop.f32.mrf.mxu0  ;;  %v4490_v60 = vpop.f32.mrf.mxu1 }
 0x195   : > { %v3992_v43 = vpack.c.bf16 %v3071_v57, %v3070_v27  ;;  %v3069_v40 = vmax.f32 %v3005_v58, 0.0  ;;  %v2937_v12 = vmax.f32 %v2264_v44, %v2766_v10  ;;  %v2267_v35 = vmax.f32 %v5896_v34, %v4422_v32  ;;  %v5910_v10 = vld [vmem:[#allocation24_spill] sm:$0xff]  ;;  %v5913_v44 = vld [vmem:[#allocation26_spill] sm:$0xff]  ;;  %v5915_v34 = vld [vmem:[#allocation27_spill] sm:$0xff] }
 0x196   : > { %v2096_v30 = vpop.f32.mrf.mxu0  ;;  %v2769_v33 = vpop.f32.mrf.mxu1  ;;  %v3010_v15 = vadd.f32 %v5395_v24, %v2939_v31  ;;  %v5911_v27 = vmax.f32 %v5909_v29, %v5910_v10  ;;  %v5914_v31 = vmax.f32 %v5912_v21, %v5913_v44 }
 0x197   : > { %4096 = vst [vmem:[%s5417_s22 + $0x68] sm:$0xff] %v3992_v43   ;;  %v3987_v49 = vpack.c.bf16 %v3069_v40, %v3068_v61  ;;  %v2265_v63 = vmax.f32 %v5899_v47, %v2096_v30  ;;  %v2940_v41 = vmax.f32 %v2267_v35, %v4490_v60  ;;  %v3008_v36 = vadd.f32 %v5395_v24, %v2937_v12  ;;  %v5916_v35 = vld [vmem:[#allocation28_spill] sm:$0xff] }
 0x198   : > { %v4425_v42 = vpop.f32.mrf.mxu0  ;;  %v4493_v22 = vpop.f32.mrf.mxu1  ;;  %v3074_v56 = vmax.f32 %v3010_v15, 0.0  ;;  %v5917_v30 = vmax.f32 %v5915_v34, %v5916_v35  ;;  %v5918_v15 = vld [vmem:[#allocation29_spill] sm:$0xff] }
 0x199   : > { %4095 = vst [vmem:[%s5417_s22 + $0x60] sm:$0xff] %v3987_v49   ;;  %v2938_v16 = vmax.f32 %v2265_v63, %v2769_v33  ;;  %v2270_v46 = vmax.f32 %v5902_v11, %v4425_v42  ;;  %v3011_v38 = vadd.f32 %v5395_v24, %v2940_v41  ;;  %v3072_v2 = vmax.f32 %v3008_v36, 0.0  ;;  %v5919_v41 = vld [vmem:[#allocation30_spill] sm:$0xff] }
 0x19a   : > { %v2109_v17 = vpop.f32.mrf.mxu0  ;;  %v2782_v52 = vpop.f32.mrf.mxu1  ;;  %v5920_v42 = vmax.f32 %v5918_v15, %v5919_v41 }
 0x19b   : > { %v3009_v53 = vadd.f32 %v5395_v24, %v2938_v16  ;;  %v2943_v18 = vmax.f32 %v2270_v46, %v4493_v22  ;;  %v2268_v23 = vmax.f32 %v5905_v50, %v2109_v17  ;;  %v3075_v4 = vmax.f32 %v3011_v38, 0.0  ;;  %v5921_v38 = vld [vmem:[#allocation31_spill] sm:$0xff]  ;;  %v5922_v17 = vld [vmem:[#allocation32_spill] sm:$0xff] }
 0x19c   : > { %v4426_v14 = vpop.f32.mrf.mxu0  ;;  %v4494_v51 = vpop.f32.mrf.mxu1 }
 0x19d   : > { %v3073_v3 = vmax.f32 %v3009_v53, 0.0  ;;  %v2271_v8 = vmax.f32 %v5908_v7, %v4426_v14  ;;  %v4002_v1 = vpack.c.bf16 %v3075_v4, %v3074_v56  ;;  %v2941_v20 = vmax.f32 %v2268_v23, %v2782_v52  ;;  %v5924_v4 = vld [vmem:[#allocation33_spill] sm:$0xff]  ;;  %v5925_v14 = vld [vmem:[#allocation34_spill] sm:$0xff] }
 0x19e   : > { %v2112_v6 = vpop.f32.mrf.mxu0  ;;  %v2785_v37 = vpop.f32.mrf.mxu1  ;;  %v3014_v9 = vadd.f32 %v5395_v24, %v2943_v18  ;;  %v5923_v52 = vmax.f32 %v5921_v38, %v5922_v17 }
 0x19f   : > { %v3997_v39 = vpack.c.bf16 %v3073_v3, %v3072_v2  ;;  %v2944_v28 = vmax.f32 %v2271_v8, %v4494_v51  ;;  %4098 = vst [vmem:[%s5417_s22 + $0x78] sm:$0xff] %v4002_v1   ;;  %v2269_v57 = vmax.f32 %v5911_v27, %v2112_v6  ;;  %v3012_v60 = vadd.f32 %v5395_v24, %v2941_v20  ;;  %v5927_v1 = vld [vmem:[#allocation35_spill] sm:$0xff]  ;;  %v5928_v20 = vld [vmem:[#allocation36_spill] sm:$0xff] }
 0x1a0   : > { %v4429_v58 = vpop.f32.mrf.mxu0  ;;  %v4497_v55 = vpop.f32.mrf.mxu1  ;;  %v3078_v12 = vmax.f32 %v3014_v9, 0.0  ;;  %v5926_v51 = vmax.f32 %v5924_v4, %v5925_v14  ;;  %v5929_v6 = vmax.f32 %v5927_v1, %v5928_v20 }
 0x1a1   : > { %4097 = vst [vmem:[%s5417_s22 + $0x70] sm:$0xff] %v3997_v39   ;;  %v3015_v5 = vadd.f32 %v5395_v24, %v2944_v28  ;;  %v2274_v32 = vmax.f32 %v5914_v31, %v4429_v58  ;;  %v2942_v61 = vmax.f32 %v2269_v57, %v2785_v37  ;;  %v3076_v36 = vmax.f32 %v3012_v60, 0.0  ;;  %v5930_v58 = vld [vmem:[#allocation37_spill] sm:$0xff]  ;;  %v5933_v60 = vld [vmem:[#allocation39_spill] sm:$0xff] }
 0x1a2   : > { %v2125_v43 = vpop.f32.mrf.mxu0  ;;  %v2798_v40 = vpop.f32.mrf.mxu1 }
 0x1a3   : > { %v3079_v13 = vmax.f32 %v3015_v5, 0.0  ;;  %v2947_v45 = vmax.f32 %v2274_v32, %v4497_v55  ;;  %v2272_v33 = vmax.f32 %v5917_v30, %v2125_v43  ;;  %v3013_v49 = vadd.f32 %v5395_v24, %v2942_v61  ;;  %v5931_v55 = vld [vmem:[#allocation38_spill] sm:$0xff]  ;;  %v5934_v61 = vld [vmem:[#allocation40_spill] sm:$0xff] }
 0x1a4   : > { %v4430_v54 = vpop.f32.mrf.mxu0  ;;  %v4498_v59 = vpop.f32.mrf.mxu1  ;;  %v5932_v5 = vmax.f32 %v5930_v58, %v5931_v55  ;;  %v5935_v43 = vmax.f32 %v5933_v60, %v5934_v61 }
 0x1a5   : > { %v4012_v47 = vpack.c.bf16 %v3079_v13, %v3078_v12  ;;  %v2945_v63 = vmax.f32 %v2272_v33, %v2798_v40  ;;  %v2275_v22 = vmax.f32 %v5920_v42, %v4430_v54  ;;  %v3077_v16 = vmax.f32 %v3013_v49, 0.0  ;;  %v5936_v33 = vld [vmem:[#allocation41_spill] sm:$0xff]  ;;  %v5937_v49 = vld [vmem:[#allocation42_spill] sm:$0xff] }
 0x1a6   : > { %v2128_v0 = vpop.f32.mrf.mxu0  ;;  %v2801_v48 = vpop.f32.mrf.mxu1  ;;  %v3018_v11 = vadd.f32 %v5395_v24, %v2947_v45  ;;  %v5938_v54 = vmax.f32 %v5936_v33, %v5937_v49 }
 0x1a7   : > { %4100 = vst [vmem:[%s5417_s22 + $0x88] sm:$0xff] %v4012_v47   ;;  %v2948_v46 = vmax.f32 %v2275_v22, %v4498_v59  ;;  %v2273_v53 = vmax.f32 %v5923_v52, %v2128_v0  ;;  %v4007_v18 = vpack.c.bf16 %v3077_v16, %v3076_v36  ;;  %v3016_v50 = vadd.f32 %v5395_v24, %v2945_v63  ;;  %v5939_v22 = vld [vmem:[#allocation43_spill] sm:$0xff]  ;;  %v5940_v36 = vld [vmem:[#allocation44_spill] sm:$0xff] }
 0x1a8   : > { %v4433_v19 = vpop.f32.mrf.mxu0  ;;  %v4501_v62 = vpop.f32.mrf.mxu1  ;;  %v3082_v26 = vmax.f32 %v3018_v11, 0.0  ;;  %v5941_v16 = vmax.f32 %v5939_v22, %v5940_v36 }
 0x1a9   : > { %v3019_v23 = vadd.f32 %v5395_v24, %v2948_v46  ;;  %v2946_v56 = vmax.f32 %v2273_v53, %v2801_v48  ;;  %v2278_v2 = vmax.f32 %v5926_v51, %v4433_v19  ;;  %4099 = vst [vmem:[%s5417_s22 + $0x80] sm:$0xff] %v4007_v18   ;;  %v3080_v29 = vmax.f32 %v3016_v50, 0.0  ;;  %v5942_v53 = vld [vmem:[#allocation45_spill] sm:$0xff]  ;;  %v5943_v18 = vld [vmem:[#allocation46_spill] sm:$0xff] }
 0x1aa   : > { %v2141_v3 = vpop.f32.mrf.mxu0  ;;  %v2814_v25 = vpop.f32.mrf.mxu1  ;;  %v5944_v19 = vmax.f32 %v5942_v53, %v5943_v18 }
 0x1ab   : > { %v3083_v7 = vmax.f32 %v3019_v23, 0.0  ;;  %v3017_v8 = vadd.f32 %v5395_v24, %v2946_v56  ;;  %v2276_v37 = vmax.f32 %v5929_v6, %v2141_v3  ;;  %v2951_v39 = vmax.f32 %v2278_v2, %v4501_v62  ;;  %v5945_v3 = vld [vmem:[#allocation47_spill] sm:$0xff]  ;;  %v5948_v6 = vld [vmem:[#allocation49_spill] sm:$0xff] }
 0x1ac   : > { %v4434_v9 = vpop.f32.mrf.mxu0  ;;  %v4502_v28 = vpop.f32.mrf.mxu1 }
 0x1ad   : > { %v4022_v10 = vpack.c.bf16 %v3083_v7, %v3082_v26  ;;  %v3081_v27 = vmax.f32 %v3017_v8, 0.0  ;;  %v2949_v57 = vmax.f32 %v2276_v37, %v2814_v25  ;;  %v2279_v21 = vmax.f32 %v5932_v5, %v4434_v9  ;;  %v5946_v25 = vld [vmem:[#allocation48_spill] sm:$0xff]  ;;  %v5949_v37 = vld [vmem:[#allocation50_spill] sm:$0xff]  ;;  %v5951_v5 = vld [vmem:[#allocation51_spill] sm:$0xff] }
 0x1ae   : > { %v2144_v44 = vpop.f32.mrf.mxu0  ;;  %v2817_v31 = vpop.f32.mrf.mxu1  ;;  %v3022_v12 = vadd.f32 %v5395_v24, %v2951_v39  ;;  %v5947_v26 = vmax.f32 %v5945_v3, %v5946_v25  ;;  %v5950_v39 = vmax.f32 %v5948_v6, %v5949_v37 }
 0x1af   : > { %4102 = vst [vmem:[%s5417_s22 + $0x98] sm:$0xff] %v4022_v10   ;;  %v4017_v32 = vpack.c.bf16 %v3081_v27, %v3080_v29  ;;  %v2277_v40 = vmax.f32 %v5935_v43, %v2144_v44  ;;  %v2952_v13 = vmax.f32 %v2279_v21, %v4502_v28  ;;  %v3020_v35 = vadd.f32 %v5395_v24, %v2949_v57  ;;  %v5952_v21 = vld [vmem:[#allocation52_spill] sm:$0xff] }
 0x1b0   : > { %v4437_v45 = vpop.f32.mrf.mxu0  ;;  %v4505_v34 = vpop.f32.mrf.mxu1  ;;  %v3086_v48 = vmax.f32 %v3022_v12, 0.0  ;;  %v5953_v44 = vmax.f32 %v5951_v5, %v5952_v21  ;;  %v5954_v12 = vld [vmem:[#allocation53_spill] sm:$0xff] }
 0x1b1   : > { %4101 = vst [vmem:[%s5417_s22 + $0x90] sm:$0xff] %v4017_v32   ;;  %v2950_v30 = vmax.f32 %v2277_v40, %v2817_v31  ;;  %v2282_v59 = vmax.f32 %v5938_v54, %v4437_v45  ;;  %v3023_v47 = vadd.f32 %v5395_v24, %v2952_v13  ;;  %v3084_v17 = vmax.f32 %v3020_v35, 0.0  ;;  %v5955_v13 = vld [vmem:[#allocation54_spill] sm:$0xff] }
 0x1b2   : > { %v2157_v63 = vpop.f32.mrf.mxu0  ;;  %v2830_v15 = vpop.f32.mrf.mxu1  ;;  %v5956_v45 = vmax.f32 %v5954_v12, %v5955_v13 }
 0x1b3   : > { %v3021_v41 = vadd.f32 %v5395_v24, %v2950_v30  ;;  %v2955_v42 = vmax.f32 %v2282_v59, %v4505_v34  ;;  %v2280_v0 = vmax.f32 %v5941_v16, %v2157_v63  ;;  %v3087_v11 = vmax.f32 %v3023_v47, 0.0  ;;  %v5957_v47 = vld [vmem:[#allocation55_spill] sm:$0xff]  ;;  %v5958_v63 = vld [vmem:[#allocation56_spill] sm:$0xff] }
 0x1b4   : > { %v4438_v46 = vpop.f32.mrf.mxu0  ;;  %v4506_v38 = vpop.f32.mrf.mxu1 }
 0x1b5   : > { %v3085_v52 = vmax.f32 %v3021_v41, 0.0  ;;  %v2283_v62 = vmax.f32 %v5944_v19, %v4438_v46  ;;  %v4032_v50 = vpack.c.bf16 %v3087_v11, %v3086_v48  ;;  %v2953_v23 = vmax.f32 %v2280_v0, %v2830_v15  ;;  %v5960_v11 = vld [vmem:[#allocation57_spill] sm:$0xff]  ;;  %v5961_v46 = vld [vmem:[#allocation58_spill] sm:$0xff] }
 0x1b6   : > { %v2160_v56 = vpop.f32.mrf.mxu0  ;;  %v2833_v4 = vpop.f32.mrf.mxu1  ;;  %v3026_v51 = vadd.f32 %v5395_v24, %v2955_v42  ;;  %v5959_v15 = vmax.f32 %v5957_v47, %v5958_v63 }
 0x1b7   : > { %v4027_v14 = vpack.c.bf16 %v3085_v52, %v3084_v17  ;;  %v2956_v2 = vmax.f32 %v2283_v62, %v4506_v38  ;;  %4104 = vst [vmem:[%s5417_s22 + $0xa8] sm:$0xff] %v4032_v50   ;;  %v2281_v7 = vmax.f32 %v5947_v26, %v2160_v56  ;;  %v3024_v28 = vadd.f32 %v5395_v24, %v2953_v23  ;;  %v5963_v50 = vld [vmem:[#allocation59_spill] sm:$0xff]  ;;  %v5964_v23 = vld [vmem:[#allocation60_spill] sm:$0xff] }
 0x1b8   : > { %v4441_v8 = vpop.f32.mrf.mxu0  ;;  %v4509_v1 = vpop.f32.mrf.mxu1  ;;  %v3090_v57 = vmax.f32 %v3026_v51, 0.0  ;;  %v5962_v38 = vmax.f32 %v5960_v11, %v5961_v46  ;;  %v5965_v56 = vmax.f32 %v5963_v50, %v5964_v23 }
 0x1b9   : > { %4103 = vst [vmem:[%s5417_s22 + $0xa0] sm:$0xff] %v4027_v14   ;;  %v3027_v20 = vadd.f32 %v5395_v24, %v2956_v2  ;;  %v2286_v9 = vmax.f32 %v5950_v39, %v4441_v8  ;;  %v2954_v29 = vmax.f32 %v2281_v7, %v2833_v4  ;;  %v3088_v35 = vmax.f32 %v3024_v28, 0.0  ;;  %v5966_v8 = vld [vmem:[#allocation61_spill] sm:$0xff]  ;;  %v5969_v28 = vld [vmem:[#allocation63_spill] sm:$0xff] }
 0x1ba   : > { %v2173_v10 = vpop.f32.mrf.mxu0  ;;  %v2846_v27 = vpop.f32.mrf.mxu1 }
 0x1bb   : > { %v3091_v58 = vmax.f32 %v3027_v20, 0.0  ;;  %v2959_v55 = vmax.f32 %v2286_v9, %v4509_v1  ;;  %v2284_v31 = vmax.f32 %v5953_v44, %v2173_v10  ;;  %v3025_v32 = vadd.f32 %v5395_v24, %v2954_v29  ;;  %v5967_v1 = vld [vmem:[#allocation62_spill] sm:$0xff]  ;;  %v5970_v29 = vld [vmem:[#allocation64_spill] sm:$0xff] }
 0x1bc   : > { %v4442_v60 = vpop.f32.mrf.mxu0  ;;  %v4510_v61 = vpop.f32.mrf.mxu1  ;;  %v5968_v20 = vmax.f32 %v5966_v8, %v5967_v1  ;;  %v5971_v10 = vmax.f32 %v5969_v28, %v5970_v29 }
 0x1bd   : > { %v4042_v43 = vpack.c.bf16 %v3091_v58, %v3090_v57  ;;  %v2957_v40 = vmax.f32 %v2284_v31, %v2846_v27  ;;  %v2287_v34 = vmax.f32 %v5956_v45, %v4442_v60  ;;  %v3089_v30 = vmax.f32 %v3025_v32, 0.0  ;;  %v5972_v31 = vld [vmem:[#allocation65_spill] sm:$0xff]  ;;  %v5973_v32 = vld [vmem:[#allocation66_spill] sm:$0xff] }
 0x1be   : > { %v2176_v33 = vpop.f32.mrf.mxu0  ;;  %v2849_v49 = vpop.f32.mrf.mxu1  ;;  %v3030_v54 = vadd.f32 %v5395_v24, %v2959_v55  ;;  %v5974_v60 = vmax.f32 %v5972_v31, %v5973_v32 }
 0x1bf   : > { %4106 = vst [vmem:[%s5417_s22 + $0xb8] sm:$0xff] %v4042_v43   ;;  %v2960_v59 = vmax.f32 %v2287_v34, %v4510_v61  ;;  %v2285_v41 = vmax.f32 %v5959_v15, %v2176_v33  ;;  %v4037_v42 = vpack.c.bf16 %v3089_v30, %v3088_v35  ;;  %v3028_v16 = vadd.f32 %v5395_v24, %v2957_v40  ;;  %v5975_v34 = vld [vmem:[#allocation67_spill] sm:$0xff]  ;;  %v5976_v35 = vld [vmem:[#allocation68_spill] sm:$0xff] }
 0x1c0   : > { %v4445_v22 = vpop.f32.mrf.mxu0  ;;  %v4513_v36 = vpop.f32.mrf.mxu1  ;;  %v3094_v18 = vmax.f32 %v3030_v54, 0.0  ;;  %v5977_v30 = vmax.f32 %v5975_v34, %v5976_v35 }
 0x1c1   : > { %v3031_v0 = vadd.f32 %v5395_v24, %v2960_v59  ;;  %v2958_v48 = vmax.f32 %v2285_v41, %v2849_v49  ;;  %v2290_v17 = vmax.f32 %v5962_v38, %v4445_v22  ;;  %4105 = vst [vmem:[%s5417_s22 + $0xb0] sm:$0xff] %v4037_v42   ;;  %v3092_v3 = vmax.f32 %v3028_v16, 0.0  ;;  %v5978_v41 = vld [vmem:[#allocation69_spill] sm:$0xff]  ;;  %v5979_v42 = vld [vmem:[#allocation70_spill] sm:$0xff] }
 0x1c2   : > { %v2189_v52 = vpop.f32.mrf.mxu0  ;;  %v2862_v53 = vpop.f32.mrf.mxu1  ;;  %v5980_v22 = vmax.f32 %v5978_v41, %v5979_v42 }
 0x1c3   : > { %v3095_v19 = vmax.f32 %v3031_v0, 0.0  ;;  %v3029_v62 = vadd.f32 %v5395_v24, %v2958_v48  ;;  %v2288_v4 = vmax.f32 %v5965_v56, %v2189_v52  ;;  %v2963_v14 = vmax.f32 %v2290_v17, %v4513_v36  ;;  %v5981_v52 = vld [vmem:[#allocation71_spill] sm:$0xff]  ;;  %v5984_v56 = vld [vmem:[#allocation73_spill] sm:$0xff] }
 0x1c4   : > { %v4446_v51 = vpop.f32.mrf.mxu0  ;;  %v4514_v2 = vpop.f32.mrf.mxu1 }
 0x1c5   : > { %v4052_v25 = vpack.c.bf16 %v3095_v19, %v3094_v18  ;;  %v3093_v26 = vmax.f32 %v3029_v62, 0.0  ;;  %v2961_v7 = vmax.f32 %v2288_v4, %v2862_v53  ;;  %v2291_v6 = vmax.f32 %v5968_v20, %v4446_v51  ;;  %v5982_v53 = vld [vmem:[#allocation72_spill] sm:$0xff]  ;;  %v5985_v4 = vld [vmem:[#allocation74_spill] sm:$0xff]  ;;  %v5987_v20 = vld [vmem:[#allocation75_spill] sm:$0xff] }
 0x1c6   : > { %v2192_v37 = vpop.f32.mrf.mxu0  ;;  %v2865_v39 = vpop.f32.mrf.mxu1  ;;  %v3034_v57 = vadd.f32 %v5395_v24, %v2963_v14  ;;  %v5983_v18 = vmax.f32 %v5981_v52, %v5982_v53  ;;  %v5986_v14 = vmax.f32 %v5984_v56, %v5985_v4 }
 0x1c7   : > { %4108 = vst [vmem:[%s5417_s22 + $0xc8] sm:$0xff] %v4052_v25   ;;  %v4047_v9 = vpack.c.bf16 %v3093_v26, %v3092_v3  ;;  %v2289_v27 = vmax.f32 %v5971_v10, %v2192_v37  ;;  %v2964_v58 = vmax.f32 %v2291_v6, %v4514_v2  ;;  %v3032_v21 = vadd.f32 %v5395_v24, %v2961_v7  ;;  %v5988_v6 = vld [vmem:[#allocation76_spill] sm:$0xff] }
 0x1c8   : > { %v4449_v55 = vpop.f32.mrf.mxu0  ;;  %v4517_v5 = vpop.f32.mrf.mxu1  ;;  %v3098_v49 = vmax.f32 %v3034_v57, 0.0  ;;  %v5989_v37 = vmax.f32 %v5987_v20, %v5988_v6  ;;  %v5990_v57 = vld [vmem:[#allocation77_spill] sm:$0xff] }
 0x1c9   : > { %4107 = vst [vmem:[%s5417_s22 + $0xc0] sm:$0xff] %v4047_v9   ;;  %v2962_v44 = vmax.f32 %v2289_v27, %v2865_v39  ;;  %v2294_v61 = vmax.f32 %v5974_v60, %v4449_v55  ;;  %v3035_v43 = vadd.f32 %v5395_v24, %v2964_v58  ;;  %v3096_v63 = vmax.f32 %v3032_v21, 0.0  ;;  %v5991_v58 = vld [vmem:[#allocation78_spill] sm:$0xff] }
 0x1ca   : > { %v2205_v40 = vpop.f32.mrf.mxu0  ;;  %v2878_v12 = vpop.f32.mrf.mxu1  ;;  %v5992_v55 = vmax.f32 %v5990_v57, %v5991_v58 }
 0x1cb   : > { %v3033_v13 = vadd.f32 %v5395_v24, %v2962_v44  ;;  %v2967_v45 = vmax.f32 %v2294_v61, %v4517_v5  ;;  %v2292_v33 = vmax.f32 %v5977_v30, %v2205_v40  ;;  %v3099_v54 = vmax.f32 %v3035_v43, 0.0  ;;  %v5993_v61 = vld [vmem:[#allocation79_spill] sm:$0xff]  ;;  %v5994_v43 = vld [vmem:[#allocation80_spill] sm:$0xff] }
 0x1cc   : > { %v4450_v59 = vpop.f32.mrf.mxu0  ;;  %v4518_v47 = vpop.f32.mrf.mxu1  ;;  %v5995_v40 = vmax.f32 %v5993_v61, %v5994_v43 }
 0x1cd   : > { %v3097_v15 = vmax.f32 %v3033_v13, 0.0  ;;  %v2295_v36 = vmax.f32 %v5980_v22, %v4450_v59  ;;  %v4062_v16 = vpack.c.bf16 %v3099_v54, %v3098_v49  ;;  %v2965_v0 = vmax.f32 %v2292_v33, %v2878_v12 }
 0x1ce   : > { %v2208_v48 = vpop.f32.mrf.mxu0  ;;  %v2881_v11 = vpop.f32.mrf.mxu1  ;;  %v3038_v38 = vadd.f32 %v5395_v24, %v2967_v45 }
 0x1cf   : > { %v4057_v46 = vpack.c.bf16 %v3097_v15, %v3096_v63  ;;  %v2968_v17 = vmax.f32 %v2295_v36, %v4518_v47  ;;  %4110 = vst [vmem:[%s5417_s22 + $0xd8] sm:$0xff] %v4062_v16   ;;  %v2293_v19 = vmax.f32 %v5983_v18, %v2208_v48  ;;  %v3036_v2 = vadd.f32 %v5395_v24, %v2965_v0 }
 0x1d0   : > { %v4453_v62 = vpop.f32.mrf.mxu0  ;;  %v4521_v50 = vpop.f32.mrf.mxu1  ;;  %v3102_v7 = vmax.f32 %v3038_v38, 0.0 }
 0x1d1   : > { %4109 = vst [vmem:[%s5417_s22 + $0xd0] sm:$0xff] %v4057_v46   ;;  %v3039_v23 = vadd.f32 %v5395_v24, %v2968_v17  ;;  %v2298_v51 = vmax.f32 %v5986_v14, %v4453_v62  ;;  %v2966_v3 = vmax.f32 %v2293_v19, %v2881_v11  ;;  %v3100_v21 = vmax.f32 %v3036_v2, 0.0 }
 0x1d2   : > { %v2221_v25 = vpop.f32.mrf.mxu0  ;;  %v2894_v26 = vpop.f32.mrf.mxu1 }
 0x1d3   : > { %v3103_v8 = vmax.f32 %v3039_v23, 0.0  ;;  %v2971_v1 = vmax.f32 %v2298_v51, %v4521_v50  ;;  %v2296_v39 = vmax.f32 %v5989_v37, %v2221_v25  ;;  %v3037_v9 = vadd.f32 %v5395_v24, %v2966_v3 }
 0x1d4   : > { %v4454_v28 = vpop.f32.mrf.mxu0  ;;  %v4522_v29 = vpop.f32.mrf.mxu1 }
 0x1d5   : > { %v4072_v10 = vpack.c.bf16 %v3103_v8, %v3102_v7  ;;  %v2969_v27 = vmax.f32 %v2296_v39, %v2894_v26  ;;  %v2299_v5 = vmax.f32 %v5992_v55, %v4454_v28  ;;  %v3101_v44 = vmax.f32 %v3037_v9, 0.0 }
 0x1d6   : > { %v2224_v31 = vpop.f32.mrf.mxu0  ;;  %v3042_v32 = vadd.f32 %v5395_v24, %v2971_v1  ;;  %v2897_v45 = vpop.f32.mrf.mxu1 }
 0x1d7   : > { %4112 = vst [vmem:[%s5417_s22 + $0xe8] sm:$0xff] %v4072_v10   ;;  %v2972_v60 = vmax.f32 %v2299_v5, %v4522_v29  ;;  %v2297_v12 = vmax.f32 %v5995_v40, %v2224_v31  ;;  %v4067_v13 = vpack.c.bf16 %v3101_v44, %v3100_v21  ;;  %v3040_v34 = vadd.f32 %v5395_v24, %v2969_v27 }
 0x1d8   : > { %v3106_v33 = vmax.f32 %v3042_v32, 0.0 }
 0x1d9   : > { %v3043_v35 = vadd.f32 %v5395_v24, %v2972_v60  ;;  %v2970_v30 = vmax.f32 %v2297_v12, %v2897_v45  ;;  %4111 = vst [vmem:[%s5417_s22 + $0xe0] sm:$0xff] %v4067_v13   ;;  %v3104_v59 = vmax.f32 %v3040_v34, 0.0 }
 0x1db   : > { %v3107_v49 = vmax.f32 %v3043_v35, 0.0  ;;  %v3041_v54 = vadd.f32 %v5395_v24, %v2970_v30 }
 0x1dd   : > { %v4082_v47 = vpack.c.bf16 %v3107_v49, %v3106_v33  ;;  %v3105_v63 = vmax.f32 %v3041_v54, 0.0 }
 0x1df   : > { %4114 = vst [vmem:[%s5417_s22 + $0xf8] sm:$0xff] %v4082_v47   ;;  %v4077_v15 = vpack.c.bf16 %v3105_v63, %v3104_v59 }
 0x1e1   : > { %4113 = vst [vmem:[%s5417_s22 + $0xf0] sm:$0xff] %v4077_v15  }
 0x1e2 PF: > { %s16_s21 = sadd.s32 1, %s4668_s21  }
 0x1e3   : > { %p13_p4 = scmp.ge.s32.totalorder %s16_s21, 4  }
 0x1e5   :  { %15 = sbr.rel (!%p13_p4) target bundleno = 1 (0x1), region = 83 }

// kernel: net_forward.5
= control target key start
LH: loop header
LB: loop body
LE: loop exit
PB: predicated region body
PF: predicated region fallthrough
CT: control target
= control target key end

     0   :  { %s7610_s1 = inlined_call_operand.vmem [shape: bf16[2048,512], index: 1, kind: input, shape index: {}]   ;;  %s7611_s0 = inlined_call_operand.vmem [shape: bf16[16,2048], index: 0, kind: input, shape index: {}]   ;;  %s7612_s3 = inlined_call_operand.vmem [shape: bf16[512,128], index: 3, kind: input, shape index: {}]   ;;  %s7613_s2 = inlined_call_operand.vmem [shape: f32[1,512], index: 2, kind: input, shape index: {}]   ;;  %s7614_s4 = inlined_call_operand.vmem [shape: f32[1,128], index: 4, kind: input, shape index: {}]   ;;  %s7615_s5 = inlined_call_operand.vmem [shape: f32[16,128], index: 5, kind: output, shape index: {}]  }
   0x1   :  { %v4887_v0 = vld [vmem:[%s7610_s1 + $0xe4] ss:$16 sps:$4 sm:$0xff]   ;;  %v4891_v2 = vld [vmem:[%s7610_s1 + $0xe0] ss:$16 sps:$4 sm:$0xff]   ;;  %v22_v50 = vld [vmem:[%s7611_s0 + $0x8] sm:$0xff] }
   0x2   :  { %v4889_v1 = vld [vmem:[%s7610_s1 + $0x2e4] ss:$16 sps:$4 sm:$0xff]   ;;  %3211 = vmatprep.subr.bf16.mxu0 %v4887_v0  ;;  %v4892_v3 = vld [vmem:[%s7610_s1 + $0x2e0] ss:$16 sps:$4 sm:$0xff]   ;;  %v30_v51 = vld [vmem:[%s7611_s0 + $0x48] sm:$0xff] }
   0x3   :  { %3254 = vmatprep.subr.bf16.mxu1 %v4889_v1  ;;  %v4893_v4 = vld [vmem:[%s7610_s1 + $0xc4] ss:$16 sps:$4 sm:$0xff]   ;;  %3212 = vmatpush1.bf16.msra.mxu0 %v4891_v2  ;;  %v4897_v6 = vld [vmem:[%s7610_s1 + $0xc0] ss:$16 sps:$4 sm:$0xff]   ;;  %v5889_v55 = vcombine.high %v22_v50, %v30_v51 }
   0x4   :  { %3255 = vmatpush1.bf16.msra.mxu1 %v4892_v3  ;;  %v4895_v5 = vld [vmem:[%s7610_s1 + $0x2c4] ss:$16 sps:$4 sm:$0xff]   ;;  %3213 = vmatprep.subr.bf16.mxu0 %v4893_v4  ;;  %v4898_v7 = vld [vmem:[%s7610_s1 + $0x2c0] ss:$16 sps:$4 sm:$0xff]  }
   0x5   :  { %3256 = vmatprep.subr.bf16.mxu1 %v4895_v5  ;;  %v4899_v8 = vld [vmem:[%s7610_s1 + $0xa4] ss:$16 sps:$4 sm:$0xff]   ;;  %v4903_v10 = vld [vmem:[%s7610_s1 + $0xa0] ss:$16 sps:$4 sm:$0xff]   ;;  %3286 = vmatprep.mubr.bf16.mxu1 %v5889_v55 }
   0x6   :  { %v4901_v9 = vld [vmem:[%s7610_s1 + $0x2a4] ss:$16 sps:$4 sm:$0xff]   ;;  %v4904_v11 = vld [vmem:[%s7610_s1 + $0x2a0] ss:$16 sps:$4 sm:$0xff]  }
   0x7   :  { %3214 = vmatpush1.bf16.msra.mxu0 %v4897_v6  ;;  %v4905_v12 = vld [vmem:[%s7610_s1 + $0x84] ss:$16 sps:$4 sm:$0xff]   ;;  %v4909_v14 = vld [vmem:[%s7610_s1 + $0x80] ss:$16 sps:$4 sm:$0xff]  }
   0x8   :  { %3257 = vmatpush1.bf16.msra.mxu1 %v4898_v7  ;;  %3215 = vmatprep.subr.bf16.mxu0 %v4899_v8  ;;  %v4907_v13 = vld [vmem:[%s7610_s1 + $0x284] ss:$16 sps:$4 sm:$0xff]   ;;  %v4910_v15 = vld [vmem:[%s7610_s1 + $0x280] ss:$16 sps:$4 sm:$0xff]  }
   0x9   :  { %3258 = vmatprep.subr.bf16.mxu1 %v4901_v9  ;;  %v4911_v16 = vld [vmem:[%s7610_s1 + $0x64] ss:$16 sps:$4 sm:$0xff]   ;;  %v4915_v18 = vld [vmem:[%s7610_s1 + $0x60] ss:$16 sps:$4 sm:$0xff]   ;;  %v5943_v9 = vcombine.low %v22_v50, %v30_v51 }
   0xa   :  { %v4913_v17 = vld [vmem:[%s7610_s1 + $0x264] ss:$16 sps:$4 sm:$0xff]   ;;  %v4916_v19 = vld [vmem:[%s7610_s1 + $0x260] ss:$16 sps:$4 sm:$0xff]  }
   0xb   :  { %3216 = vmatpush1.bf16.msra.mxu0 %v4903_v10  ;;  %v4917_v20 = vld [vmem:[%s7610_s1 + $0x44] ss:$16 sps:$4 sm:$0xff]   ;;  %v4921_v22 = vld [vmem:[%s7610_s1 + $0x40] ss:$16 sps:$4 sm:$0xff]  }
   0xc   :  { %3259 = vmatpush1.bf16.msra.mxu1 %v4904_v11  ;;  %3217 = vmatprep.subr.bf16.mxu0 %v4905_v12  ;;  %v4919_v21 = vld [vmem:[%s7610_s1 + $0x244] ss:$16 sps:$4 sm:$0xff]   ;;  %v4922_v23 = vld [vmem:[%s7610_s1 + $0x240] ss:$16 sps:$4 sm:$0xff]  }
   0xd   :  { %3260 = vmatprep.subr.bf16.mxu1 %v4907_v13  ;;  %v4923_v24 = vld [vmem:[%s7610_s1 + $0x24] ss:$16 sps:$4 sm:$0xff]   ;;  %v4927_v26 = vld [vmem:[%s7610_s1 + $0x20] ss:$16 sps:$4 sm:$0xff]  }
   0xe   :  { %v4925_v25 = vld [vmem:[%s7610_s1 + $0x224] ss:$16 sps:$4 sm:$0xff]   ;;  %v4928_v27 = vld [vmem:[%s7610_s1 + $0x220] ss:$16 sps:$4 sm:$0xff]  }
   0xf   :  { %3218 = vmatpush1.bf16.msra.mxu0 %v4909_v14  ;;  %v4929_v28 = vld [vmem:[%s7610_s1 + $0x4] ss:$16 sps:$4 sm:$0xff]   ;;  %v4933_v30 = vld [vmem:[%s7610_s1] ss:$16 sps:$4 sm:$0xff]  }
  0x10   :  { %3261 = vmatpush1.bf16.msra.mxu1 %v4910_v15  ;;  %3219 = vmatprep.subr.bf16.mxu0 %v4911_v16  ;;  %v4931_v29 = vld [vmem:[%s7610_s1 + $0x204] ss:$16 sps:$4 sm:$0xff]   ;;  %v4934_v31 = vld [vmem:[%s7610_s1 + $0x200] ss:$16 sps:$4 sm:$0xff]  }
  0x11   :  { %3262 = vmatprep.subr.bf16.mxu1 %v4913_v17  ;;  %v4935_v32 = vld [vmem:[%s7610_s1 + $0x1e4] ss:$16 sps:$4 sm:$0xff]   ;;  %v4939_v34 = vld [vmem:[%s7610_s1 + $0x1e0] ss:$16 sps:$4 sm:$0xff]  }
  0x12   :  { %v4937_v33 = vld [vmem:[%s7610_s1 + $0x3e4] ss:$16 sps:$4 sm:$0xff]   ;;  %v4940_v35 = vld [vmem:[%s7610_s1 + $0x3e0] ss:$16 sps:$4 sm:$0xff]  }
  0x13   :  { %3220 = vmatpush1.bf16.msra.mxu0 %v4915_v18  ;;  %v4941_v36 = vld [vmem:[%s7610_s1 + $0x1c4] ss:$16 sps:$4 sm:$0xff]   ;;  %v4945_v38 = vld [vmem:[%s7610_s1 + $0x1c0] ss:$16 sps:$4 sm:$0xff]  }
  0x14   :  { %3263 = vmatpush1.bf16.msra.mxu1 %v4916_v19  ;;  %3221 = vmatprep.subr.bf16.mxu0 %v4917_v20  ;;  %v4943_v37 = vld [vmem:[%s7610_s1 + $0x3c4] ss:$16 sps:$4 sm:$0xff]   ;;  %v4946_v39 = vld [vmem:[%s7610_s1 + $0x3c0] ss:$16 sps:$4 sm:$0xff]  }
  0x15   :  { %3264 = vmatprep.subr.bf16.mxu1 %v4919_v21  ;;  %v4947_v40 = vld [vmem:[%s7610_s1 + $0x1a4] ss:$16 sps:$4 sm:$0xff]   ;;  %v4951_v42 = vld [vmem:[%s7610_s1 + $0x1a0] ss:$16 sps:$4 sm:$0xff]  }
  0x16   :  { %v4949_v41 = vld [vmem:[%s7610_s1 + $0x3a4] ss:$16 sps:$4 sm:$0xff]   ;;  %v4952_v43 = vld [vmem:[%s7610_s1 + $0x3a0] ss:$16 sps:$4 sm:$0xff]  }
  0x17   :  { %3222 = vmatpush1.bf16.msra.mxu0 %v4921_v22  ;;  %v4953_v44 = vld [vmem:[%s7610_s1 + $0x184] ss:$16 sps:$4 sm:$0xff]   ;;  %v4957_v46 = vld [vmem:[%s7610_s1 + $0x180] ss:$16 sps:$4 sm:$0xff]  }
  0x18   :  { %3265 = vmatpush1.bf16.msra.mxu1 %v4922_v23  ;;  %3223 = vmatprep.subr.bf16.mxu0 %v4923_v24  ;;  %v4955_v45 = vld [vmem:[%s7610_s1 + $0x384] ss:$16 sps:$4 sm:$0xff]   ;;  %v4958_v47 = vld [vmem:[%s7610_s1 + $0x380] ss:$16 sps:$4 sm:$0xff]  }
  0x19   :  { %3266 = vmatprep.subr.bf16.mxu1 %v4925_v25  ;;  %v21_v48 = vld [vmem:[%s7611_s0] sm:$0xff] }
  0x1a   :  { %v29_v49 = vld [vmem:[%s7611_s0 + $0x40] sm:$0xff] }
  0x1b   :  { %3224 = vmatpush1.bf16.msra.mxu0 %v4927_v26  ;;  %v4959_v52 = vld [vmem:[%s7610_s1 + $0x164] ss:$16 sps:$4 sm:$0xff]   ;;  %v5884_v53 = vcombine.high %v21_v48, %v29_v49  ;;  %v4963_v56 = vld [vmem:[%s7610_s1 + $0x160] ss:$16 sps:$4 sm:$0xff]   ;;  %v5941_v8 = vcombine.low %v21_v48, %v29_v49 }
  0x1c   :  { %3267 = vmatpush1.bf16.msra.mxu1 %v4928_v27  ;;  %3225 = vmatprep.subr.bf16.mxu0 %v4929_v28  ;;  %v4961_v54 = vld [vmem:[%s7610_s1 + $0x364] ss:$16 sps:$4 sm:$0xff]   ;;  %v4964_v57 = vld [vmem:[%s7610_s1 + $0x360] ss:$16 sps:$4 sm:$0xff]  }
  0x1d   :  { %3268 = vmatprep.subr.bf16.mxu1 %v4931_v29  ;;  %3243 = vmatprep.mubr.bf16.mxu0 %v5884_v53  ;;  %v4965_v58 = vld [vmem:[%s7610_s1 + $0x144] ss:$16 sps:$4 sm:$0xff]   ;;  %v4969_v60 = vld [vmem:[%s7610_s1 + $0x140] ss:$16 sps:$4 sm:$0xff]  }
  0x1e   :  { %v4967_v59 = vld [vmem:[%s7610_s1 + $0x344] ss:$16 sps:$4 sm:$0xff]   ;;  %v4970_v61 = vld [vmem:[%s7610_s1 + $0x340] ss:$16 sps:$4 sm:$0xff]  }
  0x1f   :  { %3226 = vmatpush1.bf16.msra.mxu0 %v4933_v30  ;;  %v4971_v62 = vld [vmem:[%s7610_s1 + $0x124] ss:$16 sps:$4 sm:$0xff]   ;;  %v4975_v0 = vld [vmem:[%s7610_s1 + $0x120] ss:$16 sps:$4 sm:$0xff]  }
  0x20   :  { %3269 = vmatpush1.bf16.msra.mxu1 %v4934_v31  ;;  %3227 = vmatprep.subr.bf16.mxu0 %v4935_v32  ;;  %v4973_v63 = vld [vmem:[%s7610_s1 + $0x324] ss:$16 sps:$4 sm:$0xff]   ;;  %v4976_v1 = vld [vmem:[%s7610_s1 + $0x320] ss:$16 sps:$4 sm:$0xff]  }
  0x21   :  { %3270 = vmatprep.subr.bf16.mxu1 %v4937_v33  ;;  %v4977_v2 = vld [vmem:[%s7610_s1 + $0x104] ss:$16 sps:$4 sm:$0xff]   ;;  %v4981_v4 = vld [vmem:[%s7610_s1 + $0x100] ss:$16 sps:$4 sm:$0xff]  }
  0x22   :  { %v4979_v3 = vld [vmem:[%s7610_s1 + $0x304] ss:$16 sps:$4 sm:$0xff]   ;;  %v4982_v5 = vld [vmem:[%s7610_s1 + $0x300] ss:$16 sps:$4 sm:$0xff]  }
  0x23   :  { %3228 = vmatpush2.bf16.msra.mxu0 %v4939_v34  ;;  %v4985_v6 = vld [vmem:[%s7610_s1 + $0x4e4] ss:$16 sps:$4 sm:$0xff]   ;;  %v4983_v10 = vld [vmem:[%s7610_s1 + $0x4e0] ss:$16 sps:$4 sm:$0xff]  }
  0x24   :  { %3271 = vmatpush2.bf16.msra.mxu1 %v4940_v35  ;;  %3229 = vmatprep.subr.bf16.mxu0 %v4941_v36  ;;  %v4988_v7 = vld [vmem:[%s7610_s1 + $0x6e4] ss:$16 sps:$4 sm:$0xff]   ;;  %v4986_v11 = vld [vmem:[%s7610_s1 + $0x6e0] ss:$16 sps:$4 sm:$0xff]  }
  0x25   :  { %3272 = vmatprep.subr.bf16.mxu1 %v4943_v37  ;;  %v4991_v12 = vld [vmem:[%s7610_s1 + $0x4c4] ss:$16 sps:$4 sm:$0xff]   ;;  %v4989_v14 = vld [vmem:[%s7610_s1 + $0x4c0] ss:$16 sps:$4 sm:$0xff]  }
  0x26   :  { %v4994_v13 = vld [vmem:[%s7610_s1 + $0x6c4] ss:$16 sps:$4 sm:$0xff]   ;;  %v4992_v15 = vld [vmem:[%s7610_s1 + $0x6c0] ss:$16 sps:$4 sm:$0xff]  }
  0x27   :  { %3230 = vmatpush2.bf16.msra.mxu0 %v4945_v38  ;;  %v4997_v16 = vld [vmem:[%s7610_s1 + $0x4a4] ss:$16 sps:$4 sm:$0xff]   ;;  %v4995_v18 = vld [vmem:[%s7610_s1 + $0x4a0] ss:$16 sps:$4 sm:$0xff]   ;;  %v6038_v38 = vld [vmem:[%s7611_s0 + $0x18] sm:$0xff] }
  0x28   :  { %3273 = vmatpush2.bf16.msra.mxu1 %v4946_v39  ;;  %3231 = vmatprep.subr.bf16.mxu0 %v4947_v40  ;;  %v5000_v17 = vld [vmem:[%s7610_s1 + $0x6a4] ss:$16 sps:$4 sm:$0xff]   ;;  %v4998_v19 = vld [vmem:[%s7610_s1 + $0x6a0] ss:$16 sps:$4 sm:$0xff]   ;;  %v6043_v39 = vld [vmem:[%s7611_s0 + $0x58] sm:$0xff] }
  0x29   :  { %3274 = vmatprep.subr.bf16.mxu1 %v4949_v41  ;;  %v5003_v20 = vld [vmem:[%s7610_s1 + $0x484] ss:$16 sps:$4 sm:$0xff]   ;;  %v5001_v22 = vld [vmem:[%s7610_s1 + $0x480] ss:$16 sps:$4 sm:$0xff]  }
  0x2a   :  { %v5006_v21 = vld [vmem:[%s7610_s1 + $0x684] ss:$16 sps:$4 sm:$0xff]   ;;  %v5004_v23 = vld [vmem:[%s7610_s1 + $0x680] ss:$16 sps:$4 sm:$0xff]  }
  0x2b   :  { %3232 = vmatpush2.bf16.msra.mxu0 %v4951_v42  ;;  %v5009_v24 = vld [vmem:[%s7610_s1 + $0x464] ss:$16 sps:$4 sm:$0xff]   ;;  %v5007_v26 = vld [vmem:[%s7610_s1 + $0x460] ss:$16 sps:$4 sm:$0xff]  }
  0x2c   :  { %3275 = vmatpush2.bf16.msra.mxu1 %v4952_v43  ;;  %3233 = vmatprep.subr.bf16.mxu0 %v4953_v44  ;;  %v5012_v25 = vld [vmem:[%s7610_s1 + $0x664] ss:$16 sps:$4 sm:$0xff]   ;;  %v5010_v27 = vld [vmem:[%s7610_s1 + $0x660] ss:$16 sps:$4 sm:$0xff]   ;;  %v6057_v43 = vcombine.high %v6038_v38, %v6043_v39 }
  0x2d   :  { %3276 = vmatprep.subr.bf16.mxu1 %v4955_v45  ;;  %v5015_v28 = vld [vmem:[%s7610_s1 + $0x444] ss:$16 sps:$4 sm:$0xff]   ;;  %v5013_v30 = vld [vmem:[%s7610_s1 + $0x440] ss:$16 sps:$4 sm:$0xff]  }
  0x2e   :  { %v5018_v29 = vld [vmem:[%s7610_s1 + $0x644] ss:$16 sps:$4 sm:$0xff]   ;;  %v5016_v31 = vld [vmem:[%s7610_s1 + $0x640] ss:$16 sps:$4 sm:$0xff]  }
  0x2f   :  { %3234 = vmatpush2.bf16.msra.mxu0 %v4957_v46  ;;  %v5021_v32 = vld [vmem:[%s7610_s1 + $0x424] ss:$16 sps:$4 sm:$0xff]   ;;  %v5019_v34 = vld [vmem:[%s7610_s1 + $0x420] ss:$16 sps:$4 sm:$0xff]  }
  0x30   :  { %3277 = vmatpush2.bf16.msra.mxu1 %v4958_v47  ;;  %3235 = vmatprep.subr.bf16.mxu0 %v4959_v52  ;;  %v5024_v33 = vld [vmem:[%s7610_s1 + $0x624] ss:$16 sps:$4 sm:$0xff]   ;;  %v5022_v35 = vld [vmem:[%s7610_s1 + $0x620] ss:$16 sps:$4 sm:$0xff]  }
  0x31   :  { %3278 = vmatprep.subr.bf16.mxu1 %v4961_v54  ;;  %v6028_v36 = vld [vmem:[%s7611_s0 + $0x10] sm:$0xff] }
  0x32   :  { %v6033_v37 = vld [vmem:[%s7611_s0 + $0x50] sm:$0xff] }
  0x33   :  { %3236 = vmatpush2.bf16.msra.mxu0 %v4963_v56  ;;  %v5027_v40 = vld [vmem:[%s7610_s1 + $0x404] ss:$16 sps:$4 sm:$0xff]   ;;  %v6050_v41 = vcombine.high %v6028_v36, %v6033_v37  ;;  %v5025_v44 = vld [vmem:[%s7610_s1 + $0x400] ss:$16 sps:$4 sm:$0xff]  }
  0x34   :  { %3279 = vmatpush2.bf16.msra.mxu1 %v4964_v57  ;;  %3237 = vmatprep.subr.bf16.mxu0 %v4965_v58  ;;  %v5030_v42 = vld [vmem:[%s7610_s1 + $0x604] ss:$16 sps:$4 sm:$0xff]   ;;  %v5028_v45 = vld [vmem:[%s7610_s1 + $0x600] ss:$16 sps:$4 sm:$0xff]  }
  0x35   :  { %3280 = vmatprep.subr.bf16.mxu1 %v4967_v59  ;;  %v5033_v46 = vld [vmem:[%s7610_s1 + $0x5e4] ss:$16 sps:$4 sm:$0xff]   ;;  %v5031_v48 = vld [vmem:[%s7610_s1 + $0x5e0] ss:$16 sps:$4 sm:$0xff]  }
  0x36   :  { %v5036_v47 = vld [vmem:[%s7610_s1 + $0x7e4] ss:$16 sps:$4 sm:$0xff]   ;;  %v5034_v49 = vld [vmem:[%s7610_s1 + $0x7e0] ss:$16 sps:$4 sm:$0xff]  }
  0x37   :  { %3238 = vmatpush2.bf16.msra.mxu0 %v4969_v60  ;;  %v5039_v50 = vld [vmem:[%s7610_s1 + $0x5c4] ss:$16 sps:$4 sm:$0xff]   ;;  %v5037_v52 = vld [vmem:[%s7610_s1 + $0x5c0] ss:$16 sps:$4 sm:$0xff]  }
  0x38   :  { %3281 = vmatpush2.bf16.msra.mxu1 %v4970_v61  ;;  %3239 = vmatprep.subr.bf16.mxu0 %v4971_v62  ;;  %v5042_v51 = vld [vmem:[%s7610_s1 + $0x7c4] ss:$16 sps:$4 sm:$0xff]   ;;  %v5040_v54 = vld [vmem:[%s7610_s1 + $0x7c0] ss:$16 sps:$4 sm:$0xff]  }
  0x39   :  { %3282 = vmatprep.subr.bf16.mxu1 %v4973_v63  ;;  %v5045_v56 = vld [vmem:[%s7610_s1 + $0x5a4] ss:$16 sps:$4 sm:$0xff]   ;;  %v5043_v58 = vld [vmem:[%s7610_s1 + $0x5a0] ss:$16 sps:$4 sm:$0xff]  }
  0x3a   :  { %v5048_v57 = vld [vmem:[%s7610_s1 + $0x7a4] ss:$16 sps:$4 sm:$0xff]   ;;  %v5046_v59 = vld [vmem:[%s7610_s1 + $0x7a0] ss:$16 sps:$4 sm:$0xff]  }
  0x3b   :  { %3240 = vmatpush2.bf16.msra.mxu0 %v4975_v0  ;;  %v5051_v60 = vld [vmem:[%s7610_s1 + $0x584] ss:$16 sps:$4 sm:$0xff]   ;;  %v5049_v62 = vld [vmem:[%s7610_s1 + $0x580] ss:$16 sps:$4 sm:$0xff]  }
  0x3c   :  { %3283 = vmatpush2.bf16.msra.mxu1 %v4976_v1  ;;  %3241 = vmatprep.subr.bf16.mxu0 %v4977_v2  ;;  %v5054_v61 = vld [vmem:[%s7610_s1 + $0x784] ss:$16 sps:$4 sm:$0xff]   ;;  %v5052_v63 = vld [vmem:[%s7610_s1 + $0x780] ss:$16 sps:$4 sm:$0xff]  }
  0x3d   :  { %3284 = vmatprep.subr.bf16.mxu1 %v4979_v3  ;;  %v5057_v0 = vld [vmem:[%s7610_s1 + $0x564] ss:$16 sps:$4 sm:$0xff]   ;;  %v5055_v2 = vld [vmem:[%s7610_s1 + $0x560] ss:$16 sps:$4 sm:$0xff]  }
  0x3e   :  { %v5060_v1 = vld [vmem:[%s7610_s1 + $0x764] ss:$16 sps:$4 sm:$0xff]   ;;  %v5058_v3 = vld [vmem:[%s7610_s1 + $0x760] ss:$16 sps:$4 sm:$0xff]  }
  0x3f   :  { %3242 = vmatpush2.bf16.msra.mxu0 %v4981_v4  ;;  %v5063_v4 = vld [vmem:[%s7610_s1 + $0x544] ss:$16 sps:$4 sm:$0xff]  }
  0x40   :  { %3285 = vmatpush2.bf16.msra.mxu1 %v4982_v5  ;;  %3297 = vmatprep.subr.bf16.mxu0 %v4985_v6  ;;  %v5066_v5 = vld [vmem:[%s7610_s1 + $0x744] ss:$16 sps:$4 sm:$0xff]   ;;  %v5061_v6 = vld [vmem:[%s7610_s1 + $0x540] ss:$16 sps:$4 sm:$0xff]  }
  0x41   :  { %3340 = vmatprep.subr.bf16.mxu1 %v4988_v7  ;;  %v5064_v7 = vld [vmem:[%s7610_s1 + $0x740] ss:$16 sps:$4 sm:$0xff]  }
  0x42   :  { %3244 = vmatmul.mubr.bf16.vlgmr.msra.gmra.mxu0 %v5941_v8 }
  0x43   :  { %3287 = vmatmul.mubr.bf16.vlgmr.msra.gmra.mxu1 %v5943_v9  ;;  %3298 = vmatpush1.bf16.msra.mxu0 %v4983_v10  ;;  %v5069_v10 = vld [vmem:[%s7610_s1 + $0x524] ss:$16 sps:$4 sm:$0xff]  }
  0x44   :  { %3341 = vmatpush1.bf16.msra.mxu1 %v4986_v11  ;;  %3299 = vmatprep.subr.bf16.mxu0 %v4991_v12  ;;  %v5072_v11 = vld [vmem:[%s7610_s1 + $0x724] ss:$16 sps:$4 sm:$0xff]   ;;  %v5067_v12 = vld [vmem:[%s7610_s1 + $0x520] ss:$16 sps:$4 sm:$0xff]  }
  0x45   :  { %3342 = vmatprep.subr.bf16.mxu1 %v4994_v13  ;;  %3329 = vmatprep.mubr.bf16.mxu0 %v6050_v41  ;;  %v5070_v13 = vld [vmem:[%s7610_s1 + $0x720] ss:$16 sps:$4 sm:$0xff]  }
  0x46   :  { %3372 = vmatprep.mubr.bf16.mxu1 %v6057_v43 }
  0x47   :  { %3300 = vmatpush1.bf16.msra.mxu0 %v4989_v14  ;;  %v5075_v14 = vld [vmem:[%s7610_s1 + $0x504] ss:$16 sps:$4 sm:$0xff]  }
  0x48   :  { %3343 = vmatpush1.bf16.msra.mxu1 %v4992_v15  ;;  %3301 = vmatprep.subr.bf16.mxu0 %v4997_v16  ;;  %v5078_v15 = vld [vmem:[%s7610_s1 + $0x704] ss:$16 sps:$4 sm:$0xff]   ;;  %v5073_v16 = vld [vmem:[%s7610_s1 + $0x500] ss:$16 sps:$4 sm:$0xff]  }
  0x49   :  { %3344 = vmatprep.subr.bf16.mxu1 %v5000_v17  ;;  %v5076_v17 = vld [vmem:[%s7610_s1 + $0x700] ss:$16 sps:$4 sm:$0xff]  }
  0x4b   :  { %3302 = vmatpush1.bf16.msra.mxu0 %v4995_v18  ;;  %v5081_v18 = vld [vmem:[%s7610_s1 + $0x8e4] ss:$16 sps:$4 sm:$0xff]  }
  0x4c   :  { %3345 = vmatpush1.bf16.msra.mxu1 %v4998_v19  ;;  %3303 = vmatprep.subr.bf16.mxu0 %v5003_v20  ;;  %v5084_v19 = vld [vmem:[%s7610_s1 + $0xae4] ss:$16 sps:$4 sm:$0xff]   ;;  %v6171_v20 = vcombine.low %v6028_v36, %v6033_v37  ;;  %v5091_v36 = vld [vmem:[%s7610_s1 + $0x8a0] ss:$16 sps:$4 sm:$0xff]  }
  0x4d   :  { %3346 = vmatprep.subr.bf16.mxu1 %v5006_v21  ;;  %v6175_v21 = vcombine.low %v6038_v38, %v6043_v39  ;;  %v5094_v37 = vld [vmem:[%s7610_s1 + $0xaa0] ss:$16 sps:$4 sm:$0xff]   ;;  %v5099_v38 = vld [vmem:[%s7610_s1 + $0x884] ss:$16 sps:$4 sm:$0xff]  }
  0x4e   :  { %v5102_v39 = vld [vmem:[%s7610_s1 + $0xa84] ss:$16 sps:$4 sm:$0xff]  }
  0x4f   :  { %3304 = vmatpush1.bf16.msra.mxu0 %v5001_v22  ;;  %v5079_v22 = vld [vmem:[%s7610_s1 + $0x8e0] ss:$16 sps:$4 sm:$0xff]  }
  0x50   :  { %3347 = vmatpush1.bf16.msra.mxu1 %v5004_v23  ;;  %3305 = vmatprep.subr.bf16.mxu0 %v5009_v24  ;;  %v5082_v23 = vld [vmem:[%s7610_s1 + $0xae0] ss:$16 sps:$4 sm:$0xff]   ;;  %v5087_v24 = vld [vmem:[%s7610_s1 + $0x8c4] ss:$16 sps:$4 sm:$0xff]  }
  0x51   :  { %3348 = vmatprep.subr.bf16.mxu1 %v5012_v25  ;;  %v5090_v25 = vld [vmem:[%s7610_s1 + $0xac4] ss:$16 sps:$4 sm:$0xff]  }
  0x53   :  { %3306 = vmatpush1.bf16.msra.mxu0 %v5007_v26  ;;  %v5085_v26 = vld [vmem:[%s7610_s1 + $0x8c0] ss:$16 sps:$4 sm:$0xff]  }
  0x54   :  { %3349 = vmatpush1.bf16.msra.mxu1 %v5010_v27  ;;  %3307 = vmatprep.subr.bf16.mxu0 %v5015_v28  ;;  %v5088_v27 = vld [vmem:[%s7610_s1 + $0xac0] ss:$16 sps:$4 sm:$0xff]  }
  0x55   :  { %3350 = vmatprep.subr.bf16.mxu1 %v5018_v29  ;;  %v6198_v28 = vld [vmem:[%s7611_s0 + $0x20] sm:$0xff] }
  0x56   :  { %v6205_v29 = vld [vmem:[%s7611_s0 + $0x60] sm:$0xff] }
  0x57   :  { %3308 = vmatpush1.bf16.msra.mxu0 %v5013_v30  ;;  %v6210_v30 = vld [vmem:[%s7611_s0 + $0x28] sm:$0xff] }
  0x58   :  { %3351 = vmatpush1.bf16.msra.mxu1 %v5016_v31  ;;  %3309 = vmatprep.subr.bf16.mxu0 %v5021_v32  ;;  %v6215_v31 = vld [vmem:[%s7611_s0 + $0x68] sm:$0xff]  ;;  %v5093_v32 = vld [vmem:[%s7610_s1 + $0x8a4] ss:$16 sps:$4 sm:$0xff]  }
  0x59   :  { %3352 = vmatprep.subr.bf16.mxu1 %v5024_v33  ;;  %v6222_v33 = vcombine.high %v6198_v28, %v6205_v29 }
  0x5b   :  { %3310 = vmatpush1.bf16.msra.mxu0 %v5019_v34  ;;  %v5096_v34 = vld [vmem:[%s7610_s1 + $0xaa4] ss:$16 sps:$4 sm:$0xff]  }
  0x5c   :  { %3353 = vmatpush1.bf16.msra.mxu1 %v5022_v35  ;;  %3311 = vmatprep.subr.bf16.mxu0 %v5027_v40  ;;  %v6229_v35 = vcombine.high %v6210_v30, %v6215_v31  ;;  %v5097_v40 = vld [vmem:[%s7610_s1 + $0x880] ss:$16 sps:$4 sm:$0xff]  }
  0x5d   :  { %3354 = vmatprep.subr.bf16.mxu1 %v5030_v42  ;;  %v5100_v42 = vld [vmem:[%s7610_s1 + $0xa80] ss:$16 sps:$4 sm:$0xff]  }
  0x5f   :  { %3312 = vmatpush1.bf16.msra.mxu0 %v5025_v44  ;;  %v5105_v44 = vld [vmem:[%s7610_s1 + $0x864] ss:$16 sps:$4 sm:$0xff]  }
  0x60   :  { %3355 = vmatpush1.bf16.msra.mxu1 %v5028_v45  ;;  %3313 = vmatprep.subr.bf16.mxu0 %v5033_v46  ;;  %v5108_v45 = vld [vmem:[%s7610_s1 + $0xa64] ss:$16 sps:$4 sm:$0xff]   ;;  %v5103_v46 = vld [vmem:[%s7610_s1 + $0x860] ss:$16 sps:$4 sm:$0xff]  }
  0x61   :  { %3356 = vmatprep.subr.bf16.mxu1 %v5036_v47  ;;  %v5106_v47 = vld [vmem:[%s7610_s1 + $0xa60] ss:$16 sps:$4 sm:$0xff]  }
  0x63   :  { %3314 = vmatpush2.bf16.msra.mxu0 %v5031_v48  ;;  %v5111_v48 = vld [vmem:[%s7610_s1 + $0x844] ss:$16 sps:$4 sm:$0xff]  }
  0x64   :  { %3357 = vmatpush2.bf16.msra.mxu1 %v5034_v49  ;;  %3315 = vmatprep.subr.bf16.mxu0 %v5039_v50  ;;  %v5114_v49 = vld [vmem:[%s7610_s1 + $0xa44] ss:$16 sps:$4 sm:$0xff]   ;;  %v5109_v50 = vld [vmem:[%s7610_s1 + $0x840] ss:$16 sps:$4 sm:$0xff]  }
  0x65   :  { %3358 = vmatprep.subr.bf16.mxu1 %v5042_v51  ;;  %v5112_v51 = vld [vmem:[%s7610_s1 + $0xa40] ss:$16 sps:$4 sm:$0xff]  }
  0x67   :  { %3316 = vmatpush2.bf16.msra.mxu0 %v5037_v52  ;;  %v5117_v52 = vld [vmem:[%s7610_s1 + $0x824] ss:$16 sps:$4 sm:$0xff]  }
  0x68   :  { %3359 = vmatpush2.bf16.msra.mxu1 %v5040_v54  ;;  %3317 = vmatprep.subr.bf16.mxu0 %v5045_v56  ;;  %v5120_v54 = vld [vmem:[%s7610_s1 + $0xa24] ss:$16 sps:$4 sm:$0xff]   ;;  %v5115_v56 = vld [vmem:[%s7610_s1 + $0x820] ss:$16 sps:$4 sm:$0xff]  }
  0x69   :  { %3360 = vmatprep.subr.bf16.mxu1 %v5048_v57  ;;  %v5118_v57 = vld [vmem:[%s7610_s1 + $0xa20] ss:$16 sps:$4 sm:$0xff]  }
  0x6b   :  { %3318 = vmatpush2.bf16.msra.mxu0 %v5043_v58  ;;  %v5123_v58 = vld [vmem:[%s7610_s1 + $0x804] ss:$16 sps:$4 sm:$0xff]  }
  0x6c   :  { %3361 = vmatpush2.bf16.msra.mxu1 %v5046_v59  ;;  %3319 = vmatprep.subr.bf16.mxu0 %v5051_v60  ;;  %v5126_v59 = vld [vmem:[%s7610_s1 + $0xa04] ss:$16 sps:$4 sm:$0xff]   ;;  %v5121_v60 = vld [vmem:[%s7610_s1 + $0x800] ss:$16 sps:$4 sm:$0xff]  }
  0x6d   :  { %3362 = vmatprep.subr.bf16.mxu1 %v5054_v61  ;;  %v5124_v61 = vld [vmem:[%s7610_s1 + $0xa00] ss:$16 sps:$4 sm:$0xff]  }
  0x6f   :  { %3320 = vmatpush2.bf16.msra.mxu0 %v5049_v62  ;;  %v5129_v62 = vld [vmem:[%s7610_s1 + $0x9e4] ss:$16 sps:$4 sm:$0xff]  }
  0x70   :  { %3363 = vmatpush2.bf16.msra.mxu1 %v5052_v63  ;;  %3321 = vmatprep.subr.bf16.mxu0 %v5057_v0  ;;  %v5132_v63 = vld [vmem:[%s7610_s1 + $0xbe4] ss:$16 sps:$4 sm:$0xff]   ;;  %v5127_v0 = vld [vmem:[%s7610_s1 + $0x9e0] ss:$16 sps:$4 sm:$0xff]  }
  0x71   :  { %3364 = vmatprep.subr.bf16.mxu1 %v5060_v1  ;;  %v5130_v1 = vld [vmem:[%s7610_s1 + $0xbe0] ss:$16 sps:$4 sm:$0xff]  }
  0x73   :  { %3322 = vmatpush2.bf16.msra.mxu0 %v5055_v2  ;;  %v5135_v2 = vld [vmem:[%s7610_s1 + $0x9c4] ss:$16 sps:$4 sm:$0xff]  }
  0x74   :  { %3365 = vmatpush2.bf16.msra.mxu1 %v5058_v3  ;;  %3323 = vmatprep.subr.bf16.mxu0 %v5063_v4  ;;  %v5138_v3 = vld [vmem:[%s7610_s1 + $0xbc4] ss:$16 sps:$4 sm:$0xff]   ;;  %v5133_v4 = vld [vmem:[%s7610_s1 + $0x9c0] ss:$16 sps:$4 sm:$0xff]  }
  0x75   :  { %3366 = vmatprep.subr.bf16.mxu1 %v5066_v5  ;;  %v5136_v5 = vld [vmem:[%s7610_s1 + $0xbc0] ss:$16 sps:$4 sm:$0xff]  }
  0x77   :  { %3324 = vmatpush2.bf16.msra.mxu0 %v5061_v6  ;;  %v5141_v6 = vld [vmem:[%s7610_s1 + $0x9a4] ss:$16 sps:$4 sm:$0xff]  }
  0x78   :  { %3367 = vmatpush2.bf16.msra.mxu1 %v5064_v7  ;;  %3325 = vmatprep.subr.bf16.mxu0 %v5069_v10  ;;  %v5144_v7 = vld [vmem:[%s7610_s1 + $0xba4] ss:$16 sps:$4 sm:$0xff]   ;;  %v5139_v10 = vld [vmem:[%s7610_s1 + $0x9a0] ss:$16 sps:$4 sm:$0xff]  }
  0x79   :  { %3368 = vmatprep.subr.bf16.mxu1 %v5072_v11  ;;  %v5142_v11 = vld [vmem:[%s7610_s1 + $0xba0] ss:$16 sps:$4 sm:$0xff]  }
  0x7b   :  { %3326 = vmatpush2.bf16.msra.mxu0 %v5067_v12  ;;  %v5147_v12 = vld [vmem:[%s7610_s1 + $0x984] ss:$16 sps:$4 sm:$0xff]  }
  0x7c   :  { %3369 = vmatpush2.bf16.msra.mxu1 %v5070_v13  ;;  %3327 = vmatprep.subr.bf16.mxu0 %v5075_v14  ;;  %v5150_v13 = vld [vmem:[%s7610_s1 + $0xb84] ss:$16 sps:$4 sm:$0xff]   ;;  %v5145_v14 = vld [vmem:[%s7610_s1 + $0x980] ss:$16 sps:$4 sm:$0xff]  }
  0x7d   :  { %3370 = vmatprep.subr.bf16.mxu1 %v5078_v15  ;;  %v5148_v15 = vld [vmem:[%s7610_s1 + $0xb80] ss:$16 sps:$4 sm:$0xff]  }
  0x7f   :  { %3328 = vmatpush2.bf16.msra.mxu0 %v5073_v16  ;;  %v5153_v16 = vld [vmem:[%s7610_s1 + $0x964] ss:$16 sps:$4 sm:$0xff]  }
  0x80   :  { %3371 = vmatpush2.bf16.msra.mxu1 %v5076_v17  ;;  %3383 = vmatprep.subr.bf16.mxu0 %v5081_v18  ;;  %v5156_v17 = vld [vmem:[%s7610_s1 + $0xb64] ss:$16 sps:$4 sm:$0xff]   ;;  %v5151_v18 = vld [vmem:[%s7610_s1 + $0x960] ss:$16 sps:$4 sm:$0xff]  }
  0x81   :  { %3426 = vmatprep.subr.bf16.mxu1 %v5084_v19  ;;  %v5154_v19 = vld [vmem:[%s7610_s1 + $0xb60] ss:$16 sps:$4 sm:$0xff]  }
  0x82   :  { %3330 = vmatmul.mubr.bf16.vlgmr.msra.gmra.mxu0 %v6171_v20 }
  0x83   :  { %3373 = vmatmul.mubr.bf16.vlgmr.msra.gmra.mxu1 %v6175_v21  ;;  %3384 = vmatpush1.bf16.msra.mxu0 %v5079_v22  ;;  %v5159_v22 = vld [vmem:[%s7610_s1 + $0x944] ss:$16 sps:$4 sm:$0xff]  }
  0x84   :  { %3427 = vmatpush1.bf16.msra.mxu1 %v5082_v23  ;;  %3385 = vmatprep.subr.bf16.mxu0 %v5087_v24  ;;  %v5162_v23 = vld [vmem:[%s7610_s1 + $0xb44] ss:$16 sps:$4 sm:$0xff]   ;;  %v5157_v24 = vld [vmem:[%s7610_s1 + $0x940] ss:$16 sps:$4 sm:$0xff]  }
  0x85   :  { %3428 = vmatprep.subr.bf16.mxu1 %v5090_v25  ;;  %3415 = vmatprep.mubr.bf16.mxu0 %v6222_v33  ;;  %v5160_v25 = vld [vmem:[%s7610_s1 + $0xb40] ss:$16 sps:$4 sm:$0xff]  }
  0x86   :  { %3458 = vmatprep.mubr.bf16.mxu1 %v6229_v35 }
  0x87   :  { %3386 = vmatpush1.bf16.msra.mxu0 %v5085_v26  ;;  %v5165_v26 = vld [vmem:[%s7610_s1 + $0x924] ss:$16 sps:$4 sm:$0xff]  }
  0x88   :  { %3429 = vmatpush1.bf16.msra.mxu1 %v5088_v27  ;;  %3387 = vmatprep.subr.bf16.mxu0 %v5093_v32  ;;  %v5168_v27 = vld [vmem:[%s7610_s1 + $0xb24] ss:$16 sps:$4 sm:$0xff]   ;;  %v5163_v32 = vld [vmem:[%s7610_s1 + $0x920] ss:$16 sps:$4 sm:$0xff]  }
  0x89   :  { %3430 = vmatprep.subr.bf16.mxu1 %v5096_v34  ;;  %v5166_v34 = vld [vmem:[%s7610_s1 + $0xb20] ss:$16 sps:$4 sm:$0xff]  }
  0x8b   :  { %3388 = vmatpush1.bf16.msra.mxu0 %v5091_v36  ;;  %v5171_v36 = vld [vmem:[%s7610_s1 + $0x904] ss:$16 sps:$4 sm:$0xff]  }
  0x8c   :  { %3431 = vmatpush1.bf16.msra.mxu1 %v5094_v37  ;;  %3389 = vmatprep.subr.bf16.mxu0 %v5099_v38  ;;  %v5174_v37 = vld [vmem:[%s7610_s1 + $0xb04] ss:$16 sps:$4 sm:$0xff]   ;;  %v5169_v38 = vld [vmem:[%s7610_s1 + $0x900] ss:$16 sps:$4 sm:$0xff]  }
  0x8d   :  { %3432 = vmatprep.subr.bf16.mxu1 %v5102_v39  ;;  %v5172_v39 = vld [vmem:[%s7610_s1 + $0xb00] ss:$16 sps:$4 sm:$0xff]  }
  0x8f   :  { %3390 = vmatpush1.bf16.msra.mxu0 %v5097_v40  ;;  %v5177_v40 = vld [vmem:[%s7610_s1 + $0xce4] ss:$16 sps:$4 sm:$0xff]  }
  0x90   :  { %3433 = vmatpush1.bf16.msra.mxu1 %v5100_v42  ;;  %3391 = vmatprep.subr.bf16.mxu0 %v5105_v44  ;;  %v5180_v42 = vld [vmem:[%s7610_s1 + $0xee4] ss:$16 sps:$4 sm:$0xff]  }
  0x91   :  { %3434 = vmatprep.subr.bf16.mxu1 %v5108_v45  ;;  %v6404_v44 = vld [vmem:[%s7611_s0 + $0x30] sm:$0xff] }
  0x92   :  { %v5175_v45 = vld [vmem:[%s7610_s1 + $0xce0] ss:$16 sps:$4 sm:$0xff]  }
  0x93   :  { %3392 = vmatpush1.bf16.msra.mxu0 %v5103_v46  ;;  %v6412_v46 = vld [vmem:[%s7611_s0 + $0x70] sm:$0xff] }
  0x94   :  { %3435 = vmatpush1.bf16.msra.mxu1 %v5106_v47  ;;  %3393 = vmatprep.subr.bf16.mxu0 %v5111_v48  ;;  %v6417_v47 = vld [vmem:[%s7611_s0 + $0x38] sm:$0xff]  ;;  %v6421_v48 = vcombine.low %v6198_v28, %v6205_v29  ;;  %v5183_v28 = vld [vmem:[%s7610_s1 + $0xcc4] ss:$16 sps:$4 sm:$0xff]  }
  0x95   :  { %3436 = vmatprep.subr.bf16.mxu1 %v5114_v49  ;;  %v6425_v49 = vcombine.low %v6210_v30, %v6215_v31  ;;  %v5186_v29 = vld [vmem:[%s7610_s1 + $0xec4] ss:$16 sps:$4 sm:$0xff]   ;;  %v6443_v30 = vcombine.high %v6404_v44, %v6412_v46 }
  0x97   :  { %3394 = vmatpush1.bf16.msra.mxu0 %v5109_v50  ;;  %v6430_v50 = vld [vmem:[%s7611_s0 + $0x78] sm:$0xff] }
  0x98   :  { %3437 = vmatpush1.bf16.msra.mxu1 %v5112_v51  ;;  %3395 = vmatprep.subr.bf16.mxu0 %v5117_v52  ;;  %v5178_v51 = vld [vmem:[%s7610_s1 + $0xee0] ss:$16 sps:$4 sm:$0xff]   ;;  %v6447_v31 = vcombine.high %v6417_v47, %v6430_v50 }
  0x99   :  { %3438 = vmatprep.subr.bf16.mxu1 %v5120_v54  ;;  %v5181_v52 = vld [vmem:[%s7610_s1 + $0xcc0] ss:$16 sps:$4 sm:$0xff]  }
  0x9a   :  { %v5184_v54 = vld [vmem:[%s7610_s1 + $0xec0] ss:$16 sps:$4 sm:$0xff]  }
  0x9b   :  { %3396 = vmatpush1.bf16.msra.mxu0 %v5115_v56  ;;  %v5189_v56 = vld [vmem:[%s7610_s1 + $0xca4] ss:$16 sps:$4 sm:$0xff]  }
  0x9c   :  { %3439 = vmatpush1.bf16.msra.mxu1 %v5118_v57  ;;  %3397 = vmatprep.subr.bf16.mxu0 %v5123_v58  ;;  %v5192_v57 = vld [vmem:[%s7610_s1 + $0xea4] ss:$16 sps:$4 sm:$0xff]   ;;  %v5187_v58 = vld [vmem:[%s7610_s1 + $0xca0] ss:$16 sps:$4 sm:$0xff]  }
  0x9d   :  { %3440 = vmatprep.subr.bf16.mxu1 %v5126_v59  ;;  %v5190_v59 = vld [vmem:[%s7610_s1 + $0xea0] ss:$16 sps:$4 sm:$0xff]  }
  0x9f   :  { %3398 = vmatpush1.bf16.msra.mxu0 %v5121_v60  ;;  %v5195_v60 = vld [vmem:[%s7610_s1 + $0xc84] ss:$16 sps:$4 sm:$0xff]  }
  0xa0   :  { %3441 = vmatpush1.bf16.msra.mxu1 %v5124_v61  ;;  %3399 = vmatprep.subr.bf16.mxu0 %v5129_v62  ;;  %v5198_v61 = vld [vmem:[%s7610_s1 + $0xe84] ss:$16 sps:$4 sm:$0xff]   ;;  %v5193_v62 = vld [vmem:[%s7610_s1 + $0xc80] ss:$16 sps:$4 sm:$0xff]  }
  0xa1   :  { %3442 = vmatprep.subr.bf16.mxu1 %v5132_v63  ;;  %v5196_v63 = vld [vmem:[%s7610_s1 + $0xe80] ss:$16 sps:$4 sm:$0xff]  }
  0xa3   :  { %3400 = vmatpush2.bf16.msra.mxu0 %v5127_v0  ;;  %v5201_v0 = vld [vmem:[%s7610_s1 + $0xc64] ss:$16 sps:$4 sm:$0xff]  }
  0xa4   :  { %3443 = vmatpush2.bf16.msra.mxu1 %v5130_v1  ;;  %3401 = vmatprep.subr.bf16.mxu0 %v5135_v2  ;;  %v5204_v1 = vld [vmem:[%s7610_s1 + $0xe64] ss:$16 sps:$4 sm:$0xff]   ;;  %v5199_v2 = vld [vmem:[%s7610_s1 + $0xc60] ss:$16 sps:$4 sm:$0xff]  }
  0xa5   :  { %3444 = vmatprep.subr.bf16.mxu1 %v5138_v3  ;;  %v5202_v3 = vld [vmem:[%s7610_s1 + $0xe60] ss:$16 sps:$4 sm:$0xff]  }
  0xa7   :  { %3402 = vmatpush2.bf16.msra.mxu0 %v5133_v4  ;;  %v5207_v4 = vld [vmem:[%s7610_s1 + $0xc44] ss:$16 sps:$4 sm:$0xff]  }
  0xa8   :  { %3445 = vmatpush2.bf16.msra.mxu1 %v5136_v5  ;;  %3403 = vmatprep.subr.bf16.mxu0 %v5141_v6  ;;  %v5210_v5 = vld [vmem:[%s7610_s1 + $0xe44] ss:$16 sps:$4 sm:$0xff]   ;;  %v5205_v6 = vld [vmem:[%s7610_s1 + $0xc40] ss:$16 sps:$4 sm:$0xff]  }
  0xa9   :  { %3446 = vmatprep.subr.bf16.mxu1 %v5144_v7  ;;  %v5208_v7 = vld [vmem:[%s7610_s1 + $0xe40] ss:$16 sps:$4 sm:$0xff]  }
  0xab   :  { %3404 = vmatpush2.bf16.msra.mxu0 %v5139_v10  ;;  %v5213_v10 = vld [vmem:[%s7610_s1 + $0xc24] ss:$16 sps:$4 sm:$0xff]  }
  0xac   :  { %3447 = vmatpush2.bf16.msra.mxu1 %v5142_v11  ;;  %3405 = vmatprep.subr.bf16.mxu0 %v5147_v12  ;;  %v5216_v11 = vld [vmem:[%s7610_s1 + $0xe24] ss:$16 sps:$4 sm:$0xff]   ;;  %v5211_v12 = vld [vmem:[%s7610_s1 + $0xc20] ss:$16 sps:$4 sm:$0xff]  }
  0xad   :  { %3448 = vmatprep.subr.bf16.mxu1 %v5150_v13  ;;  %v5214_v13 = vld [vmem:[%s7610_s1 + $0xe20] ss:$16 sps:$4 sm:$0xff]  }
  0xaf   :  { %3406 = vmatpush2.bf16.msra.mxu0 %v5145_v14  ;;  %v5219_v14 = vld [vmem:[%s7610_s1 + $0xc04] ss:$16 sps:$4 sm:$0xff]  }
  0xb0   :  { %3449 = vmatpush2.bf16.msra.mxu1 %v5148_v15  ;;  %3407 = vmatprep.subr.bf16.mxu0 %v5153_v16  ;;  %v5222_v15 = vld [vmem:[%s7610_s1 + $0xe04] ss:$16 sps:$4 sm:$0xff]   ;;  %v5217_v16 = vld [vmem:[%s7610_s1 + $0xc00] ss:$16 sps:$4 sm:$0xff]  }
  0xb1   :  { %3450 = vmatprep.subr.bf16.mxu1 %v5156_v17  ;;  %v5220_v17 = vld [vmem:[%s7610_s1 + $0xe00] ss:$16 sps:$4 sm:$0xff]  }
  0xb3   :  { %3408 = vmatpush2.bf16.msra.mxu0 %v5151_v18  ;;  %v5225_v18 = vld [vmem:[%s7610_s1 + $0xde4] ss:$16 sps:$4 sm:$0xff]  }
  0xb4   :  { %3451 = vmatpush2.bf16.msra.mxu1 %v5154_v19  ;;  %3409 = vmatprep.subr.bf16.mxu0 %v5159_v22  ;;  %v5228_v19 = vld [vmem:[%s7610_s1 + $0xfe4] ss:$16 sps:$4 sm:$0xff]   ;;  %v5223_v22 = vld [vmem:[%s7610_s1 + $0xde0] ss:$16 sps:$4 sm:$0xff]  }
  0xb5   :  { %3452 = vmatprep.subr.bf16.mxu1 %v5162_v23  ;;  %v5226_v23 = vld [vmem:[%s7610_s1 + $0xfe0] ss:$16 sps:$4 sm:$0xff]  }
  0xb7   :  { %3410 = vmatpush2.bf16.msra.mxu0 %v5157_v24  ;;  %v5231_v24 = vld [vmem:[%s7610_s1 + $0xdc4] ss:$16 sps:$4 sm:$0xff]  }
  0xb8   :  { %3453 = vmatpush2.bf16.msra.mxu1 %v5160_v25  ;;  %3411 = vmatprep.subr.bf16.mxu0 %v5165_v26  ;;  %v5234_v25 = vld [vmem:[%s7610_s1 + $0xfc4] ss:$16 sps:$4 sm:$0xff]   ;;  %v5229_v26 = vld [vmem:[%s7610_s1 + $0xdc0] ss:$16 sps:$4 sm:$0xff]  }
  0xb9   :  { %3454 = vmatprep.subr.bf16.mxu1 %v5168_v27  ;;  %v5232_v27 = vld [vmem:[%s7610_s1 + $0xfc0] ss:$16 sps:$4 sm:$0xff]  }
  0xbb   :  { %3412 = vmatpush2.bf16.msra.mxu0 %v5163_v32  ;;  %v5237_v32 = vld [vmem:[%s7610_s1 + $0xda4] ss:$16 sps:$4 sm:$0xff]  }
  0xbc   :  { %3455 = vmatpush2.bf16.msra.mxu1 %v5166_v34  ;;  %3413 = vmatprep.subr.bf16.mxu0 %v5171_v36  ;;  %v5240_v34 = vld [vmem:[%s7610_s1 + $0xfa4] ss:$16 sps:$4 sm:$0xff]   ;;  %v5235_v36 = vld [vmem:[%s7610_s1 + $0xda0] ss:$16 sps:$4 sm:$0xff]  }
  0xbd   :  { %3456 = vmatprep.subr.bf16.mxu1 %v5174_v37  ;;  %v5238_v37 = vld [vmem:[%s7610_s1 + $0xfa0] ss:$16 sps:$4 sm:$0xff]  }
  0xbf   :  { %3414 = vmatpush2.bf16.msra.mxu0 %v5169_v38  ;;  %v5243_v38 = vld [vmem:[%s7610_s1 + $0xd84] ss:$16 sps:$4 sm:$0xff]  }
  0xc0   :  { %3457 = vmatpush2.bf16.msra.mxu1 %v5172_v39  ;;  %3469 = vmatprep.subr.bf16.mxu0 %v5177_v40  ;;  %v5246_v39 = vld [vmem:[%s7610_s1 + $0xf84] ss:$16 sps:$4 sm:$0xff]   ;;  %v5241_v40 = vld [vmem:[%s7610_s1 + $0xd80] ss:$16 sps:$4 sm:$0xff]  }
  0xc1   :  { %3512 = vmatprep.subr.bf16.mxu1 %v5180_v42  ;;  %v5244_v42 = vld [vmem:[%s7610_s1 + $0xf80] ss:$16 sps:$4 sm:$0xff]  }
  0xc2   :  { %3416 = vmatmul.mubr.bf16.vlgmr.msra.gmra.mxu0 %v6421_v48 }
  0xc3   :  { %3459 = vmatmul.mubr.bf16.vlgmr.msra.gmra.mxu1 %v6425_v49  ;;  %3470 = vmatpush1.bf16.msra.mxu0 %v5175_v45  ;;  %v5249_v45 = vld [vmem:[%s7610_s1 + $0xd64] ss:$16 sps:$4 sm:$0xff]  }
  0xc4   :  { %3513 = vmatpush1.bf16.msra.mxu1 %v5178_v51  ;;  %3471 = vmatprep.subr.bf16.mxu0 %v5183_v28  ;;  %v5252_v51 = vld [vmem:[%s7610_s1 + $0xf64] ss:$16 sps:$4 sm:$0xff]   ;;  %v5247_v28 = vld [vmem:[%s7610_s1 + $0xd60] ss:$16 sps:$4 sm:$0xff]  }
  0xc5   :  { %3514 = vmatprep.subr.bf16.mxu1 %v5186_v29  ;;  %3501 = vmatprep.mubr.bf16.mxu0 %v6443_v30  ;;  %v5250_v29 = vld [vmem:[%s7610_s1 + $0xf60] ss:$16 sps:$4 sm:$0xff]  }
  0xc6   :  { %3544 = vmatprep.mubr.bf16.mxu1 %v6447_v31 }
  0xc7   :  { %3472 = vmatpush1.bf16.msra.mxu0 %v5181_v52  ;;  %v5255_v52 = vld [vmem:[%s7610_s1 + $0xd44] ss:$16 sps:$4 sm:$0xff]  }
  0xc8   :  { %3515 = vmatpush1.bf16.msra.mxu1 %v5184_v54  ;;  %3473 = vmatprep.subr.bf16.mxu0 %v5189_v56  ;;  %v5258_v54 = vld [vmem:[%s7610_s1 + $0xf44] ss:$16 sps:$4 sm:$0xff]   ;;  %v5253_v56 = vld [vmem:[%s7610_s1 + $0xd40] ss:$16 sps:$4 sm:$0xff]  }
  0xc9   :  { %3516 = vmatprep.subr.bf16.mxu1 %v5192_v57  ;;  %v5256_v57 = vld [vmem:[%s7610_s1 + $0xf40] ss:$16 sps:$4 sm:$0xff]  }
  0xcb   :  { %3474 = vmatpush1.bf16.msra.mxu0 %v5187_v58  ;;  %v5261_v58 = vld [vmem:[%s7610_s1 + $0xd24] ss:$16 sps:$4 sm:$0xff]  }
  0xcc   :  { %3517 = vmatpush1.bf16.msra.mxu1 %v5190_v59  ;;  %3475 = vmatprep.subr.bf16.mxu0 %v5195_v60  ;;  %v5264_v59 = vld [vmem:[%s7610_s1 + $0xf24] ss:$16 sps:$4 sm:$0xff]   ;;  %v5259_v60 = vld [vmem:[%s7610_s1 + $0xd20] ss:$16 sps:$4 sm:$0xff]  }
  0xcd   :  { %3518 = vmatprep.subr.bf16.mxu1 %v5198_v61  ;;  %v5262_v61 = vld [vmem:[%s7610_s1 + $0xf20] ss:$16 sps:$4 sm:$0xff]  }
  0xcf   :  { %3476 = vmatpush1.bf16.msra.mxu0 %v5193_v62  ;;  %v5267_v62 = vld [vmem:[%s7610_s1 + $0xd04] ss:$16 sps:$4 sm:$0xff]  }
  0xd0   :  { %3519 = vmatpush1.bf16.msra.mxu1 %v5196_v63  ;;  %3477 = vmatprep.subr.bf16.mxu0 %v5201_v0  ;;  %v5270_v63 = vld [vmem:[%s7610_s1 + $0xf04] ss:$16 sps:$4 sm:$0xff]   ;;  %v5265_v0 = vld [vmem:[%s7610_s1 + $0xd00] ss:$16 sps:$4 sm:$0xff]  }
  0xd1   :  { %3520 = vmatprep.subr.bf16.mxu1 %v5204_v1  ;;  %v5268_v1 = vld [vmem:[%s7610_s1 + $0xf00] ss:$16 sps:$4 sm:$0xff]  }
  0xd3   :  { %3478 = vmatpush1.bf16.msra.mxu0 %v5199_v2  ;;  %v5273_v2 = vld [vmem:[%s7610_s1 + $0xec] ss:$16 sps:$4 sm:$0xff]  }
  0xd4   :  { %3521 = vmatpush1.bf16.msra.mxu1 %v5202_v3  ;;  %3479 = vmatprep.subr.bf16.mxu0 %v5207_v4  ;;  %v5276_v3 = vld [vmem:[%s7610_s1 + $0x2ec] ss:$16 sps:$4 sm:$0xff]   ;;  %v6635_v4 = vcombine.low %v6404_v44, %v6412_v46 }
  0xd5   :  { %3522 = vmatprep.subr.bf16.mxu1 %v5210_v5  ;;  %v6639_v5 = vcombine.low %v6417_v47, %v6430_v50  ;;  %v5279_v44 = vld [vmem:[%s7610_s1 + $0xcc] ss:$16 sps:$4 sm:$0xff]   ;;  %v5277_v47 = vld [vmem:[%s7610_s1 + $0xc8] ss:$16 sps:$4 sm:$0xff]  }
  0xd6   :  { %v5282_v46 = vld [vmem:[%s7610_s1 + $0x2cc] ss:$16 sps:$4 sm:$0xff]   ;;  %v5280_v50 = vld [vmem:[%s7610_s1 + $0x2c8] ss:$16 sps:$4 sm:$0xff]  }
  0xd7   :  { %3480 = vmatpush1.bf16.msra.mxu0 %v5205_v6  ;;  %v5271_v6 = vld [vmem:[%s7610_s1 + $0xe8] ss:$16 sps:$4 sm:$0xff]  }
  0xd8   :  { %3523 = vmatpush1.bf16.msra.mxu1 %v5208_v7  ;;  %3481 = vmatprep.subr.bf16.mxu0 %v5213_v10  ;;  %v5274_v7 = vld [vmem:[%s7610_s1 + $0x2e8] ss:$16 sps:$4 sm:$0xff]   ;;  %v5285_v10 = vld [vmem:[%s7610_s1 + $0xac] ss:$16 sps:$4 sm:$0xff]  }
  0xd9   :  { %3524 = vmatprep.subr.bf16.mxu1 %v5216_v11  ;;  %v5288_v11 = vld [vmem:[%s7610_s1 + $0x2ac] ss:$16 sps:$4 sm:$0xff]  }
  0xdb   :  { %3482 = vmatpush1.bf16.msra.mxu0 %v5211_v12  ;;  %v5283_v12 = vld [vmem:[%s7610_s1 + $0xa8] ss:$16 sps:$4 sm:$0xff]  }
  0xdc   :  { %3525 = vmatpush1.bf16.msra.mxu1 %v5214_v13  ;;  %3483 = vmatprep.subr.bf16.mxu0 %v5219_v14  ;;  %v5286_v13 = vld [vmem:[%s7610_s1 + $0x2a8] ss:$16 sps:$4 sm:$0xff]   ;;  %v5291_v14 = vld [vmem:[%s7610_s1 + $0x8c] ss:$16 sps:$4 sm:$0xff]  }
  0xdd   :  { %3526 = vmatprep.subr.bf16.mxu1 %v5222_v15  ;;  %v5292_v15 = vld [vmem:[%s7610_s1 + $0x288] ss:$16 sps:$4 sm:$0xff]  }
  0xdf   :  { %3484 = vmatpush1.bf16.msra.mxu0 %v5217_v16  ;;  %v5297_v16 = vld [vmem:[%s7610_s1 + $0x6c] ss:$16 sps:$4 sm:$0xff]  }
  0xe0   :  { %3527 = vmatpush1.bf16.msra.mxu1 %v5220_v17  ;;  %3485 = vmatprep.subr.bf16.mxu0 %v5225_v18  ;;  %v5300_v17 = vld [vmem:[%s7610_s1 + $0x26c] ss:$16 sps:$4 sm:$0xff]   ;;  %v5295_v18 = vld [vmem:[%s7610_s1 + $0x68] ss:$16 sps:$4 sm:$0xff]  }
  0xe1   :  { %3528 = vmatprep.subr.bf16.mxu1 %v5228_v19  ;;  %v5298_v19 = vld [vmem:[%s7610_s1 + $0x268] ss:$16 sps:$4 sm:$0xff]  }
  0xe3   :  { %3486 = vmatpush2.bf16.msra.mxu0 %v5223_v22  ;;  %v5303_v22 = vld [vmem:[%s7610_s1 + $0x4c] ss:$16 sps:$4 sm:$0xff]  }
  0xe4   :  { %3529 = vmatpush2.bf16.msra.mxu1 %v5226_v23  ;;  %3487 = vmatprep.subr.bf16.mxu0 %v5231_v24  ;;  %v5306_v23 = vld [vmem:[%s7610_s1 + $0x24c] ss:$16 sps:$4 sm:$0xff]   ;;  %v5301_v24 = vld [vmem:[%s7610_s1 + $0x48] ss:$16 sps:$4 sm:$0xff]  }
  0xe5   :  { %3530 = vmatprep.subr.bf16.mxu1 %v5234_v25  ;;  %v5304_v25 = vld [vmem:[%s7610_s1 + $0x248] ss:$16 sps:$4 sm:$0xff]  }
  0xe7   :  { %3488 = vmatpush2.bf16.msra.mxu0 %v5229_v26  ;;  %v5309_v26 = vld [vmem:[%s7610_s1 + $0x2c] ss:$16 sps:$4 sm:$0xff]  }
  0xe8   :  { %3531 = vmatpush2.bf16.msra.mxu1 %v5232_v27  ;;  %3489 = vmatprep.subr.bf16.mxu0 %v5237_v32  ;;  %v5312_v27 = vld [vmem:[%s7610_s1 + $0x22c] ss:$16 sps:$4 sm:$0xff]   ;;  %v5307_v32 = vld [vmem:[%s7610_s1 + $0x28] ss:$16 sps:$4 sm:$0xff]  }
  0xe9   :  { %3532 = vmatprep.subr.bf16.mxu1 %v5240_v34  ;;  %v5310_v34 = vld [vmem:[%s7610_s1 + $0x228] ss:$16 sps:$4 sm:$0xff]  }
  0xeb   :  { %3490 = vmatpush2.bf16.msra.mxu0 %v5235_v36  ;;  %v5315_v36 = vld [vmem:[%s7610_s1 + $0xc] ss:$16 sps:$4 sm:$0xff]  }
  0xec   :  { %3533 = vmatpush2.bf16.msra.mxu1 %v5238_v37  ;;  %3491 = vmatprep.subr.bf16.mxu0 %v5243_v38  ;;  %v5318_v37 = vld [vmem:[%s7610_s1 + $0x20c] ss:$16 sps:$4 sm:$0xff]   ;;  %v5313_v38 = vld [vmem:[%s7610_s1 + $0x8] ss:$16 sps:$4 sm:$0xff]  }
  0xed   :  { %3534 = vmatprep.subr.bf16.mxu1 %v5246_v39  ;;  %v5316_v39 = vld [vmem:[%s7610_s1 + $0x208] ss:$16 sps:$4 sm:$0xff]  }
  0xef   :  { %3492 = vmatpush2.bf16.msra.mxu0 %v5241_v40  ;;  %v5321_v40 = vld [vmem:[%s7610_s1 + $0x1ec] ss:$16 sps:$4 sm:$0xff]  }
  0xf0   :  { %3535 = vmatpush2.bf16.msra.mxu1 %v5244_v42  ;;  %3493 = vmatprep.subr.bf16.mxu0 %v5249_v45  ;;  %v5324_v42 = vld [vmem:[%s7610_s1 + $0x3ec] ss:$16 sps:$4 sm:$0xff]   ;;  %v5319_v45 = vld [vmem:[%s7610_s1 + $0x1e8] ss:$16 sps:$4 sm:$0xff]  }
  0xf1   :  { %3536 = vmatprep.subr.bf16.mxu1 %v5252_v51  ;;  %v5322_v51 = vld [vmem:[%s7610_s1 + $0x3e8] ss:$16 sps:$4 sm:$0xff]  }
  0xf3   :  { %3494 = vmatpush2.bf16.msra.mxu0 %v5247_v28  ;;  %v5327_v28 = vld [vmem:[%s7610_s1 + $0x1cc] ss:$16 sps:$4 sm:$0xff]  }
  0xf4   :  { %3537 = vmatpush2.bf16.msra.mxu1 %v5250_v29  ;;  %3495 = vmatprep.subr.bf16.mxu0 %v5255_v52  ;;  %v5330_v29 = vld [vmem:[%s7610_s1 + $0x3cc] ss:$16 sps:$4 sm:$0xff]   ;;  %v5325_v52 = vld [vmem:[%s7610_s1 + $0x1c8] ss:$16 sps:$4 sm:$0xff]  }
  0xf5   :  { %3538 = vmatprep.subr.bf16.mxu1 %v5258_v54  ;;  %v5328_v54 = vld [vmem:[%s7610_s1 + $0x3c8] ss:$16 sps:$4 sm:$0xff]  }
  0xf7   :  { %3496 = vmatpush2.bf16.msra.mxu0 %v5253_v56  ;;  %v5333_v56 = vld [vmem:[%s7610_s1 + $0x1ac] ss:$16 sps:$4 sm:$0xff]  }
  0xf8   :  { %3539 = vmatpush2.bf16.msra.mxu1 %v5256_v57  ;;  %3497 = vmatprep.subr.bf16.mxu0 %v5261_v58  ;;  %v5336_v57 = vld [vmem:[%s7610_s1 + $0x3ac] ss:$16 sps:$4 sm:$0xff]   ;;  %v5331_v58 = vld [vmem:[%s7610_s1 + $0x1a8] ss:$16 sps:$4 sm:$0xff]  }
  0xf9   :  { %3540 = vmatprep.subr.bf16.mxu1 %v5264_v59  ;;  %v5334_v59 = vld [vmem:[%s7610_s1 + $0x3a8] ss:$16 sps:$4 sm:$0xff]  }
  0xfb   :  { %3498 = vmatpush2.bf16.msra.mxu0 %v5259_v60  ;;  %v5339_v60 = vld [vmem:[%s7610_s1 + $0x18c] ss:$16 sps:$4 sm:$0xff]  }
  0xfc   :  { %3541 = vmatpush2.bf16.msra.mxu1 %v5262_v61  ;;  %3499 = vmatprep.subr.bf16.mxu0 %v5267_v62  ;;  %v5342_v61 = vld [vmem:[%s7610_s1 + $0x38c] ss:$16 sps:$4 sm:$0xff]   ;;  %v5337_v62 = vld [vmem:[%s7610_s1 + $0x188] ss:$16 sps:$4 sm:$0xff]  }
  0xfd   :  { %3542 = vmatprep.subr.bf16.mxu1 %v5270_v63  ;;  %v5340_v63 = vld [vmem:[%s7610_s1 + $0x388] ss:$16 sps:$4 sm:$0xff]  }
  0xff   :  { %3500 = vmatpush2.bf16.msra.mxu0 %v5265_v0  ;;  %v5345_v0 = vld [vmem:[%s7610_s1 + $0x16c] ss:$16 sps:$4 sm:$0xff]  }
 0x100   :  { %3543 = vmatpush2.bf16.msra.mxu1 %v5268_v1  ;;  %3555 = vmatprep.subr.bf16.mxu0 %v5273_v2  ;;  %v5348_v1 = vld [vmem:[%s7610_s1 + $0x36c] ss:$16 sps:$4 sm:$0xff]   ;;  %v5343_v2 = vld [vmem:[%s7610_s1 + $0x168] ss:$16 sps:$4 sm:$0xff]  }
 0x101   :  { %3598 = vmatprep.subr.bf16.mxu1 %v5276_v3  ;;  %v5346_v3 = vld [vmem:[%s7610_s1 + $0x368] ss:$16 sps:$4 sm:$0xff]  }
 0x102   :  { %3502 = vmatmul.mubr.bf16.vlgmr.msra.gmra.mxu0 %v6635_v4 }
 0x103   :  { %3545 = vmatmul.mubr.bf16.vlgmr.msra.gmra.mxu1 %v6639_v5  ;;  %3556 = vmatpush1.bf16.msra.mxu0 %v5271_v6  ;;  %v5351_v6 = vld [vmem:[%s7610_s1 + $0x14c] ss:$16 sps:$4 sm:$0xff]  }
 0x104   :  { %3599 = vmatpush1.bf16.msra.mxu1 %v5274_v7  ;;  %3557 = vmatprep.subr.bf16.mxu0 %v5279_v44  ;;  %v5354_v7 = vld [vmem:[%s7610_s1 + $0x34c] ss:$16 sps:$4 sm:$0xff]   ;;  %v5349_v44 = vld [vmem:[%s7610_s1 + $0x148] ss:$16 sps:$4 sm:$0xff]  }
 0x105   :  { %3600 = vmatprep.subr.bf16.mxu1 %v5282_v46  ;;  %3587 = vmatprep.mubr.bf16.mxu0 %v5884_v53  ;;  %v5294_v53 = vld [vmem:[%s7610_s1 + $0x28c] ss:$16 sps:$4 sm:$0xff]   ;;  %v5352_v46 = vld [vmem:[%s7610_s1 + $0x348] ss:$16 sps:$4 sm:$0xff]  }
 0x106   :  { %3630 = vmatprep.mubr.bf16.mxu1 %v5889_v55  ;;  %v5289_v55 = vld [vmem:[%s7610_s1 + $0x88] ss:$16 sps:$4 sm:$0xff]  }
 0x107   :  { %3558 = vmatpush1.bf16.msra.mxu0 %v5277_v47  ;;  %v5357_v47 = vld [vmem:[%s7610_s1 + $0x12c] ss:$16 sps:$4 sm:$0xff]  }
 0x108   :  { %3601 = vmatpush1.bf16.msra.mxu1 %v5280_v50  ;;  %3559 = vmatprep.subr.bf16.mxu0 %v5285_v10  ;;  %v5360_v50 = vld [vmem:[%s7610_s1 + $0x32c] ss:$16 sps:$4 sm:$0xff]   ;;  %v5355_v10 = vld [vmem:[%s7610_s1 + $0x128] ss:$16 sps:$4 sm:$0xff]  }
 0x109   :  { %3602 = vmatprep.subr.bf16.mxu1 %v5288_v11  ;;  %v5358_v11 = vld [vmem:[%s7610_s1 + $0x328] ss:$16 sps:$4 sm:$0xff]  }
 0x10b   :  { %3560 = vmatpush1.bf16.msra.mxu0 %v5283_v12  ;;  %v5363_v12 = vld [vmem:[%s7610_s1 + $0x10c] ss:$16 sps:$4 sm:$0xff]  }
 0x10c   :  { %3603 = vmatpush1.bf16.msra.mxu1 %v5286_v13  ;;  %3561 = vmatprep.subr.bf16.mxu0 %v5291_v14  ;;  %v5366_v13 = vld [vmem:[%s7610_s1 + $0x30c] ss:$16 sps:$4 sm:$0xff]   ;;  %v5361_v14 = vld [vmem:[%s7610_s1 + $0x108] ss:$16 sps:$4 sm:$0xff]  }
 0x10d   :  { %3604 = vmatprep.subr.bf16.mxu1 %v5294_v53  ;;  %v5364_v53 = vld [vmem:[%s7610_s1 + $0x308] ss:$16 sps:$4 sm:$0xff]  }
 0x10f   :  { %3562 = vmatpush1.bf16.msra.mxu0 %v5289_v55  ;;  %v5369_v55 = vld [vmem:[%s7610_s1 + $0x4ec] ss:$16 sps:$4 sm:$0xff]  }
 0x110   :  { %3605 = vmatpush1.bf16.msra.mxu1 %v5292_v15  ;;  %3563 = vmatprep.subr.bf16.mxu0 %v5297_v16  ;;  %v5372_v15 = vld [vmem:[%s7610_s1 + $0x6ec] ss:$16 sps:$4 sm:$0xff]   ;;  %v5367_v16 = vld [vmem:[%s7610_s1 + $0x4e8] ss:$16 sps:$4 sm:$0xff]  }
 0x111   :  { %3606 = vmatprep.subr.bf16.mxu1 %v5300_v17  ;;  %v5370_v17 = vld [vmem:[%s7610_s1 + $0x6e8] ss:$16 sps:$4 sm:$0xff]  }
 0x113   :  { %3564 = vmatpush1.bf16.msra.mxu0 %v5295_v18  ;;  %v5375_v18 = vld [vmem:[%s7610_s1 + $0x4cc] ss:$16 sps:$4 sm:$0xff]  }
 0x114   :  { %3607 = vmatpush1.bf16.msra.mxu1 %v5298_v19  ;;  %3565 = vmatprep.subr.bf16.mxu0 %v5303_v22  ;;  %v5378_v19 = vld [vmem:[%s7610_s1 + $0x6cc] ss:$16 sps:$4 sm:$0xff]   ;;  %v5373_v22 = vld [vmem:[%s7610_s1 + $0x4c8] ss:$16 sps:$4 sm:$0xff]  }
 0x115   :  { %3608 = vmatprep.subr.bf16.mxu1 %v5306_v23  ;;  %v5376_v23 = vld [vmem:[%s7610_s1 + $0x6c8] ss:$16 sps:$4 sm:$0xff]  }
 0x117   :  { %3566 = vmatpush1.bf16.msra.mxu0 %v5301_v24  ;;  %v5381_v24 = vld [vmem:[%s7610_s1 + $0x4ac] ss:$16 sps:$4 sm:$0xff]  }
 0x118   :  { %3609 = vmatpush1.bf16.msra.mxu1 %v5304_v25  ;;  %3567 = vmatprep.subr.bf16.mxu0 %v5309_v26  ;;  %v5384_v25 = vld [vmem:[%s7610_s1 + $0x6ac] ss:$16 sps:$4 sm:$0xff]  }
 0x119   :  { %3610 = vmatprep.subr.bf16.mxu1 %v5312_v27  ;;  %v5387_v26 = vld [vmem:[%s7610_s1 + $0x48c] ss:$16 sps:$4 sm:$0xff]   ;;  %v5388_v27 = vld [vmem:[%s7610_s1 + $0x688] ss:$16 sps:$4 sm:$0xff]  }
 0x11b   :  { %3568 = vmatpush1.bf16.msra.mxu0 %v5307_v32  ;;  %v5393_v32 = vld [vmem:[%s7610_s1 + $0x46c] ss:$16 sps:$4 sm:$0xff]  }
 0x11c   :  { %3611 = vmatpush1.bf16.msra.mxu1 %v5310_v34  ;;  %3569 = vmatprep.subr.bf16.mxu0 %v5315_v36  ;;  %v5396_v34 = vld [vmem:[%s7610_s1 + $0x66c] ss:$16 sps:$4 sm:$0xff]   ;;  %v5391_v36 = vld [vmem:[%s7610_s1 + $0x468] ss:$16 sps:$4 sm:$0xff]  }
 0x11d   :  { %3612 = vmatprep.subr.bf16.mxu1 %v5318_v37  ;;  %v5394_v37 = vld [vmem:[%s7610_s1 + $0x668] ss:$16 sps:$4 sm:$0xff]  }
 0x11f   :  { %3570 = vmatpush1.bf16.msra.mxu0 %v5313_v38  ;;  %v5399_v38 = vld [vmem:[%s7610_s1 + $0x44c] ss:$16 sps:$4 sm:$0xff]  }
 0x120   :  { %3613 = vmatpush1.bf16.msra.mxu1 %v5316_v39  ;;  %3571 = vmatprep.subr.bf16.mxu0 %v5321_v40  ;;  %v5402_v39 = vld [vmem:[%s7610_s1 + $0x64c] ss:$16 sps:$4 sm:$0xff]   ;;  %v5397_v40 = vld [vmem:[%s7610_s1 + $0x448] ss:$16 sps:$4 sm:$0xff]  }
 0x121   :  { %3614 = vmatprep.subr.bf16.mxu1 %v5324_v42  ;;  %v5400_v42 = vld [vmem:[%s7610_s1 + $0x648] ss:$16 sps:$4 sm:$0xff]  }
 0x123   :  { %3572 = vmatpush2.bf16.msra.mxu0 %v5319_v45  ;;  %v5405_v45 = vld [vmem:[%s7610_s1 + $0x42c] ss:$16 sps:$4 sm:$0xff]  }
 0x124   :  { %3615 = vmatpush2.bf16.msra.mxu1 %v5322_v51  ;;  %3573 = vmatprep.subr.bf16.mxu0 %v5327_v28  ;;  %v5408_v51 = vld [vmem:[%s7610_s1 + $0x62c] ss:$16 sps:$4 sm:$0xff]   ;;  %v5403_v28 = vld [vmem:[%s7610_s1 + $0x428] ss:$16 sps:$4 sm:$0xff]  }
 0x125   :  { %3616 = vmatprep.subr.bf16.mxu1 %v5330_v29  ;;  %v5406_v29 = vld [vmem:[%s7610_s1 + $0x628] ss:$16 sps:$4 sm:$0xff]  }
 0x127   :  { %3574 = vmatpush2.bf16.msra.mxu0 %v5325_v52  ;;  %v5411_v52 = vld [vmem:[%s7610_s1 + $0x40c] ss:$16 sps:$4 sm:$0xff]  }
 0x128   :  { %3617 = vmatpush2.bf16.msra.mxu1 %v5328_v54  ;;  %3575 = vmatprep.subr.bf16.mxu0 %v5333_v56  ;;  %v5414_v54 = vld [vmem:[%s7610_s1 + $0x60c] ss:$16 sps:$4 sm:$0xff]   ;;  %v5409_v56 = vld [vmem:[%s7610_s1 + $0x408] ss:$16 sps:$4 sm:$0xff]  }
 0x129   :  { %3618 = vmatprep.subr.bf16.mxu1 %v5336_v57  ;;  %v5412_v57 = vld [vmem:[%s7610_s1 + $0x608] ss:$16 sps:$4 sm:$0xff]  }
 0x12b   :  { %3576 = vmatpush2.bf16.msra.mxu0 %v5331_v58  ;;  %v5417_v58 = vld [vmem:[%s7610_s1 + $0x5ec] ss:$16 sps:$4 sm:$0xff]  }
 0x12c   :  { %3619 = vmatpush2.bf16.msra.mxu1 %v5334_v59  ;;  %3577 = vmatprep.subr.bf16.mxu0 %v5339_v60  ;;  %v5420_v59 = vld [vmem:[%s7610_s1 + $0x7ec] ss:$16 sps:$4 sm:$0xff]   ;;  %v5415_v60 = vld [vmem:[%s7610_s1 + $0x5e8] ss:$16 sps:$4 sm:$0xff]  }
 0x12d   :  { %3620 = vmatprep.subr.bf16.mxu1 %v5342_v61  ;;  %v5418_v61 = vld [vmem:[%s7610_s1 + $0x7e8] ss:$16 sps:$4 sm:$0xff]  }
 0x12f   :  { %3578 = vmatpush2.bf16.msra.mxu0 %v5337_v62  ;;  %v5423_v62 = vld [vmem:[%s7610_s1 + $0x5cc] ss:$16 sps:$4 sm:$0xff]  }
 0x130   :  { %3621 = vmatpush2.bf16.msra.mxu1 %v5340_v63  ;;  %3579 = vmatprep.subr.bf16.mxu0 %v5345_v0  ;;  %v5426_v63 = vld [vmem:[%s7610_s1 + $0x7cc] ss:$16 sps:$4 sm:$0xff]   ;;  %v5421_v0 = vld [vmem:[%s7610_s1 + $0x5c8] ss:$16 sps:$4 sm:$0xff]  }
 0x131   :  { %3622 = vmatprep.subr.bf16.mxu1 %v5348_v1  ;;  %v5424_v1 = vld [vmem:[%s7610_s1 + $0x7c8] ss:$16 sps:$4 sm:$0xff]  }
 0x133   :  { %3580 = vmatpush2.bf16.msra.mxu0 %v5343_v2  ;;  %v5429_v2 = vld [vmem:[%s7610_s1 + $0x5ac] ss:$16 sps:$4 sm:$0xff]  }
 0x134   :  { %3623 = vmatpush2.bf16.msra.mxu1 %v5346_v3  ;;  %3581 = vmatprep.subr.bf16.mxu0 %v5351_v6  ;;  %v5432_v3 = vld [vmem:[%s7610_s1 + $0x7ac] ss:$16 sps:$4 sm:$0xff]   ;;  %v5427_v6 = vld [vmem:[%s7610_s1 + $0x5a8] ss:$16 sps:$4 sm:$0xff]  }
 0x135   :  { %3624 = vmatprep.subr.bf16.mxu1 %v5354_v7  ;;  %v5430_v7 = vld [vmem:[%s7610_s1 + $0x7a8] ss:$16 sps:$4 sm:$0xff]  }
 0x137   :  { %3582 = vmatpush2.bf16.msra.mxu0 %v5349_v44  ;;  %v5435_v44 = vld [vmem:[%s7610_s1 + $0x58c] ss:$16 sps:$4 sm:$0xff]  }
 0x138   :  { %3625 = vmatpush2.bf16.msra.mxu1 %v5352_v46  ;;  %3583 = vmatprep.subr.bf16.mxu0 %v5357_v47  ;;  %v5438_v46 = vld [vmem:[%s7610_s1 + $0x78c] ss:$16 sps:$4 sm:$0xff]   ;;  %v5433_v47 = vld [vmem:[%s7610_s1 + $0x588] ss:$16 sps:$4 sm:$0xff]  }
 0x139   :  { %3626 = vmatprep.subr.bf16.mxu1 %v5360_v50  ;;  %v5436_v50 = vld [vmem:[%s7610_s1 + $0x788] ss:$16 sps:$4 sm:$0xff]  }
 0x13b   :  { %3584 = vmatpush2.bf16.msra.mxu0 %v5355_v10  ;;  %v5441_v10 = vld [vmem:[%s7610_s1 + $0x56c] ss:$16 sps:$4 sm:$0xff]  }
 0x13c   :  { %3627 = vmatpush2.bf16.msra.mxu1 %v5358_v11  ;;  %3585 = vmatprep.subr.bf16.mxu0 %v5363_v12  ;;  %v5444_v11 = vld [vmem:[%s7610_s1 + $0x76c] ss:$16 sps:$4 sm:$0xff]   ;;  %v5439_v12 = vld [vmem:[%s7610_s1 + $0x568] ss:$16 sps:$4 sm:$0xff]  }
 0x13d   :  { %3628 = vmatprep.subr.bf16.mxu1 %v5366_v13  ;;  %v5442_v13 = vld [vmem:[%s7610_s1 + $0x768] ss:$16 sps:$4 sm:$0xff]  }
 0x13f   :  { %3586 = vmatpush2.bf16.msra.mxu0 %v5361_v14  ;;  %v5447_v14 = vld [vmem:[%s7610_s1 + $0x54c] ss:$16 sps:$4 sm:$0xff]  }
 0x140   :  { %3629 = vmatpush2.bf16.msra.mxu1 %v5364_v53  ;;  %3641 = vmatprep.subr.bf16.mxu0 %v5369_v55  ;;  %v5450_v53 = vld [vmem:[%s7610_s1 + $0x74c] ss:$16 sps:$4 sm:$0xff]   ;;  %v5445_v55 = vld [vmem:[%s7610_s1 + $0x548] ss:$16 sps:$4 sm:$0xff]  }
 0x141   :  { %3684 = vmatprep.subr.bf16.mxu1 %v5372_v15  ;;  %v5448_v15 = vld [vmem:[%s7610_s1 + $0x748] ss:$16 sps:$4 sm:$0xff]  }
 0x142   :  { %3588 = vmatmul.mubr.bf16.vlgmr.msra.gmra.mxu0 %v5941_v8  ;;  %v5379_v8 = vld [vmem:[%s7610_s1 + $0x4a8] ss:$16 sps:$4 sm:$0xff]  }
 0x143   :  { %3631 = vmatmul.mubr.bf16.vlgmr.msra.gmra.mxu1 %v5943_v9  ;;  %3642 = vmatpush1.bf16.msra.mxu0 %v5367_v16  ;;  %v5382_v9 = vld [vmem:[%s7610_s1 + $0x6a8] ss:$16 sps:$4 sm:$0xff]   ;;  %v5453_v16 = vld [vmem:[%s7610_s1 + $0x52c] ss:$16 sps:$4 sm:$0xff]  }
 0x144   :  { %3685 = vmatpush1.bf16.msra.mxu1 %v5370_v17  ;;  %3643 = vmatprep.subr.bf16.mxu0 %v5375_v18  ;;  %v5456_v17 = vld [vmem:[%s7610_s1 + $0x72c] ss:$16 sps:$4 sm:$0xff]   ;;  %v5451_v18 = vld [vmem:[%s7610_s1 + $0x528] ss:$16 sps:$4 sm:$0xff]  }
 0x145   :  { %3686 = vmatprep.subr.bf16.mxu1 %v5378_v19  ;;  %3673 = vmatprep.mubr.bf16.mxu0 %v6050_v41  ;;  %v5390_v41 = vld [vmem:[%s7610_s1 + $0x68c] ss:$16 sps:$4 sm:$0xff]   ;;  %v5454_v19 = vld [vmem:[%s7610_s1 + $0x728] ss:$16 sps:$4 sm:$0xff]  }
 0x146   :  { %3716 = vmatprep.mubr.bf16.mxu1 %v6057_v43  ;;  %v5385_v43 = vld [vmem:[%s7610_s1 + $0x488] ss:$16 sps:$4 sm:$0xff]  }
 0x147   :  { %3644 = vmatpush1.bf16.msra.mxu0 %v5373_v22  ;;  %v5459_v22 = vld [vmem:[%s7610_s1 + $0x50c] ss:$16 sps:$4 sm:$0xff]  }
 0x148   :  { %3687 = vmatpush1.bf16.msra.mxu1 %v5376_v23  ;;  %3645 = vmatprep.subr.bf16.mxu0 %v5381_v24  ;;  %v5462_v23 = vld [vmem:[%s7610_s1 + $0x70c] ss:$16 sps:$4 sm:$0xff]   ;;  %v5457_v24 = vld [vmem:[%s7610_s1 + $0x508] ss:$16 sps:$4 sm:$0xff]  }
 0x149   :  { %3688 = vmatprep.subr.bf16.mxu1 %v5384_v25  ;;  %v5460_v25 = vld [vmem:[%s7610_s1 + $0x708] ss:$16 sps:$4 sm:$0xff]  }
 0x14b   :  { %3646 = vmatpush1.bf16.msra.mxu0 %v5379_v8  ;;  %v5465_v8 = vld [vmem:[%s7610_s1 + $0x8ec] ss:$16 sps:$4 sm:$0xff]  }
 0x14c   :  { %3689 = vmatpush1.bf16.msra.mxu1 %v5382_v9  ;;  %3647 = vmatprep.subr.bf16.mxu0 %v5387_v26  ;;  %v5468_v9 = vld [vmem:[%s7610_s1 + $0xaec] ss:$16 sps:$4 sm:$0xff]   ;;  %v5463_v26 = vld [vmem:[%s7610_s1 + $0x8e8] ss:$16 sps:$4 sm:$0xff]  }
 0x14d   :  { %3690 = vmatprep.subr.bf16.mxu1 %v5390_v41  ;;  %v5466_v41 = vld [vmem:[%s7610_s1 + $0xae8] ss:$16 sps:$4 sm:$0xff]  }
 0x14f   :  { %3648 = vmatpush1.bf16.msra.mxu0 %v5385_v43  ;;  %v5471_v43 = vld [vmem:[%s7610_s1 + $0x8cc] ss:$16 sps:$4 sm:$0xff]  }
 0x150   :  { %3691 = vmatpush1.bf16.msra.mxu1 %v5388_v27  ;;  %3649 = vmatprep.subr.bf16.mxu0 %v5393_v32  ;;  %v5474_v27 = vld [vmem:[%s7610_s1 + $0xacc] ss:$16 sps:$4 sm:$0xff]   ;;  %v5469_v32 = vld [vmem:[%s7610_s1 + $0x8c8] ss:$16 sps:$4 sm:$0xff]  }
 0x151   :  { %3692 = vmatprep.subr.bf16.mxu1 %v5396_v34  ;;  %v5472_v34 = vld [vmem:[%s7610_s1 + $0xac8] ss:$16 sps:$4 sm:$0xff]  }
 0x153   :  { %3650 = vmatpush1.bf16.msra.mxu0 %v5391_v36  ;;  %v5477_v36 = vld [vmem:[%s7610_s1 + $0x8ac] ss:$16 sps:$4 sm:$0xff]  }
 0x154   :  { %3693 = vmatpush1.bf16.msra.mxu1 %v5394_v37  ;;  %3651 = vmatprep.subr.bf16.mxu0 %v5399_v38  ;;  %v5480_v37 = vld [vmem:[%s7610_s1 + $0xaac] ss:$16 sps:$4 sm:$0xff]   ;;  %v5475_v38 = vld [vmem:[%s7610_s1 + $0x8a8] ss:$16 sps:$4 sm:$0xff]  }
 0x155   :  { %3694 = vmatprep.subr.bf16.mxu1 %v5402_v39  ;;  %v5486_v39 = vld [vmem:[%s7610_s1 + $0xa8c] ss:$16 sps:$4 sm:$0xff]  }
 0x157   :  { %3652 = vmatpush1.bf16.msra.mxu0 %v5397_v40  ;;  %v5481_v40 = vld [vmem:[%s7610_s1 + $0x888] ss:$16 sps:$4 sm:$0xff]  }
 0x158   :  { %3695 = vmatpush1.bf16.msra.mxu1 %v5400_v42  ;;  %3653 = vmatprep.subr.bf16.mxu0 %v5405_v45  ;;  %v5492_v42 = vld [vmem:[%s7610_s1 + $0xa6c] ss:$16 sps:$4 sm:$0xff]   ;;  %v5487_v45 = vld [vmem:[%s7610_s1 + $0x868] ss:$16 sps:$4 sm:$0xff]  }
 0x159   :  { %3696 = vmatprep.subr.bf16.mxu1 %v5408_v51  ;;  %v5490_v51 = vld [vmem:[%s7610_s1 + $0xa68] ss:$16 sps:$4 sm:$0xff]  }
 0x15b   :  { %3654 = vmatpush1.bf16.msra.mxu0 %v5403_v28  ;;  %v5495_v28 = vld [vmem:[%s7610_s1 + $0x84c] ss:$16 sps:$4 sm:$0xff]  }
 0x15c   :  { %3697 = vmatpush1.bf16.msra.mxu1 %v5406_v29  ;;  %3655 = vmatprep.subr.bf16.mxu0 %v5411_v52  ;;  %v5498_v29 = vld [vmem:[%s7610_s1 + $0xa4c] ss:$16 sps:$4 sm:$0xff]   ;;  %v5493_v52 = vld [vmem:[%s7610_s1 + $0x848] ss:$16 sps:$4 sm:$0xff]  }
 0x15d   :  { %3698 = vmatprep.subr.bf16.mxu1 %v5414_v54  ;;  %v5496_v54 = vld [vmem:[%s7610_s1 + $0xa48] ss:$16 sps:$4 sm:$0xff]  }
 0x15f   :  { %3656 = vmatpush1.bf16.msra.mxu0 %v5409_v56  ;;  %v5501_v56 = vld [vmem:[%s7610_s1 + $0x82c] ss:$16 sps:$4 sm:$0xff]  }
 0x160   :  { %3699 = vmatpush1.bf16.msra.mxu1 %v5412_v57  ;;  %3657 = vmatprep.subr.bf16.mxu0 %v5417_v58  ;;  %v5504_v57 = vld [vmem:[%s7610_s1 + $0xa2c] ss:$16 sps:$4 sm:$0xff]   ;;  %v5499_v58 = vld [vmem:[%s7610_s1 + $0x828] ss:$16 sps:$4 sm:$0xff]  }
 0x161   :  { %3700 = vmatprep.subr.bf16.mxu1 %v5420_v59  ;;  %v5502_v59 = vld [vmem:[%s7610_s1 + $0xa28] ss:$16 sps:$4 sm:$0xff]  }
 0x163   :  { %3658 = vmatpush2.bf16.msra.mxu0 %v5415_v60  ;;  %v5507_v60 = vld [vmem:[%s7610_s1 + $0x80c] ss:$16 sps:$4 sm:$0xff]  }
 0x164   :  { %3701 = vmatpush2.bf16.msra.mxu1 %v5418_v61  ;;  %3659 = vmatprep.subr.bf16.mxu0 %v5423_v62  ;;  %v5510_v61 = vld [vmem:[%s7610_s1 + $0xa0c] ss:$16 sps:$4 sm:$0xff]   ;;  %v5505_v62 = vld [vmem:[%s7610_s1 + $0x808] ss:$16 sps:$4 sm:$0xff]  }
 0x165   :  { %3702 = vmatprep.subr.bf16.mxu1 %v5426_v63  ;;  %v5508_v63 = vld [vmem:[%s7610_s1 + $0xa08] ss:$16 sps:$4 sm:$0xff]  }
 0x167   :  { %3660 = vmatpush2.bf16.msra.mxu0 %v5421_v0  ;;  %v5513_v0 = vld [vmem:[%s7610_s1 + $0x9ec] ss:$16 sps:$4 sm:$0xff]  }
 0x168   :  { %3703 = vmatpush2.bf16.msra.mxu1 %v5424_v1  ;;  %3661 = vmatprep.subr.bf16.mxu0 %v5429_v2  ;;  %v5516_v1 = vld [vmem:[%s7610_s1 + $0xbec] ss:$16 sps:$4 sm:$0xff]   ;;  %v5511_v2 = vld [vmem:[%s7610_s1 + $0x9e8] ss:$16 sps:$4 sm:$0xff]  }
 0x169   :  { %3704 = vmatprep.subr.bf16.mxu1 %v5432_v3  ;;  %v5514_v3 = vld [vmem:[%s7610_s1 + $0xbe8] ss:$16 sps:$4 sm:$0xff]  }
 0x16b   :  { %3662 = vmatpush2.bf16.msra.mxu0 %v5427_v6  ;;  %v5519_v6 = vld [vmem:[%s7610_s1 + $0x9cc] ss:$16 sps:$4 sm:$0xff]  }
 0x16c   :  { %3705 = vmatpush2.bf16.msra.mxu1 %v5430_v7  ;;  %3663 = vmatprep.subr.bf16.mxu0 %v5435_v44  ;;  %v5522_v7 = vld [vmem:[%s7610_s1 + $0xbcc] ss:$16 sps:$4 sm:$0xff]   ;;  %v5517_v44 = vld [vmem:[%s7610_s1 + $0x9c8] ss:$16 sps:$4 sm:$0xff]  }
 0x16d   :  { %3706 = vmatprep.subr.bf16.mxu1 %v5438_v46  ;;  %v5520_v46 = vld [vmem:[%s7610_s1 + $0xbc8] ss:$16 sps:$4 sm:$0xff]  }
 0x16f   :  { %3664 = vmatpush2.bf16.msra.mxu0 %v5433_v47  ;;  %v5525_v47 = vld [vmem:[%s7610_s1 + $0x9ac] ss:$16 sps:$4 sm:$0xff]  }
 0x170   :  { %3707 = vmatpush2.bf16.msra.mxu1 %v5436_v50  ;;  %3665 = vmatprep.subr.bf16.mxu0 %v5441_v10  ;;  %v5528_v50 = vld [vmem:[%s7610_s1 + $0xbac] ss:$16 sps:$4 sm:$0xff]   ;;  %v5523_v10 = vld [vmem:[%s7610_s1 + $0x9a8] ss:$16 sps:$4 sm:$0xff]  }
 0x171   :  { %3708 = vmatprep.subr.bf16.mxu1 %v5444_v11  ;;  %v5526_v11 = vld [vmem:[%s7610_s1 + $0xba8] ss:$16 sps:$4 sm:$0xff]  }
 0x173   :  { %3666 = vmatpush2.bf16.msra.mxu0 %v5439_v12  ;;  %v5531_v12 = vld [vmem:[%s7610_s1 + $0x98c] ss:$16 sps:$4 sm:$0xff]  }
 0x174   :  { %3709 = vmatpush2.bf16.msra.mxu1 %v5442_v13  ;;  %3667 = vmatprep.subr.bf16.mxu0 %v5447_v14  ;;  %v5534_v13 = vld [vmem:[%s7610_s1 + $0xb8c] ss:$16 sps:$4 sm:$0xff]   ;;  %v5529_v14 = vld [vmem:[%s7610_s1 + $0x988] ss:$16 sps:$4 sm:$0xff]  }
 0x175   :  { %3710 = vmatprep.subr.bf16.mxu1 %v5450_v53  ;;  %v5532_v53 = vld [vmem:[%s7610_s1 + $0xb88] ss:$16 sps:$4 sm:$0xff]  }
 0x177   :  { %3668 = vmatpush2.bf16.msra.mxu0 %v5445_v55  ;;  %v5537_v55 = vld [vmem:[%s7610_s1 + $0x96c] ss:$16 sps:$4 sm:$0xff]  }
 0x178   :  { %3711 = vmatpush2.bf16.msra.mxu1 %v5448_v15  ;;  %3669 = vmatprep.subr.bf16.mxu0 %v5453_v16  ;;  %v5540_v15 = vld [vmem:[%s7610_s1 + $0xb6c] ss:$16 sps:$4 sm:$0xff]   ;;  %v5535_v16 = vld [vmem:[%s7610_s1 + $0x968] ss:$16 sps:$4 sm:$0xff]  }
 0x179   :  { %3712 = vmatprep.subr.bf16.mxu1 %v5456_v17  ;;  %v5538_v17 = vld [vmem:[%s7610_s1 + $0xb68] ss:$16 sps:$4 sm:$0xff]  }
 0x17b   :  { %3670 = vmatpush2.bf16.msra.mxu0 %v5451_v18  ;;  %v5543_v18 = vld [vmem:[%s7610_s1 + $0x94c] ss:$16 sps:$4 sm:$0xff]  }
 0x17c   :  { %3713 = vmatpush2.bf16.msra.mxu1 %v5454_v19  ;;  %3671 = vmatprep.subr.bf16.mxu0 %v5459_v22  ;;  %v5546_v19 = vld [vmem:[%s7610_s1 + $0xb4c] ss:$16 sps:$4 sm:$0xff]   ;;  %v5541_v22 = vld [vmem:[%s7610_s1 + $0x948] ss:$16 sps:$4 sm:$0xff]  }
 0x17d   :  { %3714 = vmatprep.subr.bf16.mxu1 %v5462_v23  ;;  %v5544_v23 = vld [vmem:[%s7610_s1 + $0xb48] ss:$16 sps:$4 sm:$0xff]  }
 0x17f   :  { %3672 = vmatpush2.bf16.msra.mxu0 %v5457_v24  ;;  %v5549_v24 = vld [vmem:[%s7610_s1 + $0x92c] ss:$16 sps:$4 sm:$0xff]  }
 0x180   :  { %3715 = vmatpush2.bf16.msra.mxu1 %v5460_v25  ;;  %3727 = vmatprep.subr.bf16.mxu0 %v5465_v8  ;;  %v5552_v25 = vld [vmem:[%s7610_s1 + $0xb2c] ss:$16 sps:$4 sm:$0xff]   ;;  %v5547_v8 = vld [vmem:[%s7610_s1 + $0x928] ss:$16 sps:$4 sm:$0xff]  }
 0x181   :  { %3770 = vmatprep.subr.bf16.mxu1 %v5468_v9  ;;  %v5550_v9 = vld [vmem:[%s7610_s1 + $0xb28] ss:$16 sps:$4 sm:$0xff]  }
 0x182   :  { %3674 = vmatmul.mubr.bf16.vlgmr.msra.gmra.mxu0 %v6171_v20  ;;  %v5478_v20 = vld [vmem:[%s7610_s1 + $0xaa8] ss:$16 sps:$4 sm:$0xff]  }
 0x183   :  { %3717 = vmatmul.mubr.bf16.vlgmr.msra.gmra.mxu1 %v6175_v21  ;;  %3728 = vmatpush1.bf16.msra.mxu0 %v5463_v26  ;;  %v5483_v21 = vld [vmem:[%s7610_s1 + $0x88c] ss:$16 sps:$4 sm:$0xff]  }
 0x184   :  { %3771 = vmatpush1.bf16.msra.mxu1 %v5466_v41  ;;  %3729 = vmatprep.subr.bf16.mxu0 %v5471_v43  ;;  %v5555_v26 = vld [vmem:[%s7610_s1 + $0x90c] ss:$16 sps:$4 sm:$0xff]   ;;  %v5553_v43 = vld [vmem:[%s7610_s1 + $0x908] ss:$16 sps:$4 sm:$0xff]  }
 0x185   :  { %3772 = vmatprep.subr.bf16.mxu1 %v5474_v27  ;;  %3759 = vmatprep.mubr.bf16.mxu0 %v6222_v33  ;;  %v5484_v33 = vld [vmem:[%s7610_s1 + $0xa88] ss:$16 sps:$4 sm:$0xff]   ;;  %v5558_v41 = vld [vmem:[%s7610_s1 + $0xb0c] ss:$16 sps:$4 sm:$0xff]  }
 0x186   :  { %3802 = vmatprep.mubr.bf16.mxu1 %v6229_v35  ;;  %v5489_v35 = vld [vmem:[%s7610_s1 + $0x86c] ss:$16 sps:$4 sm:$0xff]   ;;  %v5556_v27 = vld [vmem:[%s7610_s1 + $0xb08] ss:$16 sps:$4 sm:$0xff]  }
 0x187   :  { %3730 = vmatpush1.bf16.msra.mxu0 %v5469_v32  ;;  %v7223_v32 = vpop.f32.mrf.mxu0 }
 0x188   :  { %3773 = vmatpush1.bf16.msra.mxu1 %v5472_v34  ;;  %3731 = vmatprep.subr.bf16.mxu0 %v5477_v36  ;;  %v5561_v34 = vld [vmem:[%s7610_s1 + $0xcec] ss:$16 sps:$4 sm:$0xff]  }
 0x189   :  { %3774 = vmatprep.subr.bf16.mxu1 %v5480_v37  ;;  %v5564_v36 = vld [vmem:[%s7610_s1 + $0xeec] ss:$16 sps:$4 sm:$0xff]   ;;  %v5559_v37 = vld [vmem:[%s7610_s1 + $0xce8] ss:$16 sps:$4 sm:$0xff]  }
 0x18b   :  { %3732 = vmatpush1.bf16.msra.mxu0 %v5475_v38  ;;  %v5562_v38 = vld [vmem:[%s7610_s1 + $0xee8] ss:$16 sps:$4 sm:$0xff]  }
 0x18c   :  { %3775 = vmatpush1.bf16.msra.mxu1 %v5478_v20  ;;  %3733 = vmatprep.subr.bf16.mxu0 %v5483_v21  ;;  %v7237_v20 = vpop.f32.mrf.mxu0  ;;  %v5567_v21 = vld [vmem:[%s7610_s1 + $0xccc] ss:$16 sps:$4 sm:$0xff]  }
 0x18d   :  { %3776 = vmatprep.subr.bf16.mxu1 %v5486_v39  ;;  %v5570_v39 = vld [vmem:[%s7610_s1 + $0xecc] ss:$16 sps:$4 sm:$0xff]  }
 0x18f   :  { %3734 = vmatpush1.bf16.msra.mxu0 %v5481_v40  ;;  %v7245_v40 = vpop.f32.mrf.mxu1 }
 0x190   :  { %3777 = vmatpush1.bf16.msra.mxu1 %v5484_v33  ;;  %3735 = vmatprep.subr.bf16.mxu0 %v5489_v35  ;;  %v5565_v33 = vld [vmem:[%s7610_s1 + $0xcc8] ss:$16 sps:$4 sm:$0xff]  }
 0x191   :  { %3778 = vmatprep.subr.bf16.mxu1 %v5492_v42  ;;  %v5568_v35 = vld [vmem:[%s7610_s1 + $0xec8] ss:$16 sps:$4 sm:$0xff]   ;;  %v7255_v42 = vpop.f32.mrf.mxu0 }
 0x193   :  { %3736 = vmatpush1.bf16.msra.mxu0 %v5487_v45  ;;  %v7265_v45 = vpop.f32.mrf.mxu1 }
 0x194   :  { %3779 = vmatpush1.bf16.msra.mxu1 %v5490_v51  ;;  %3737 = vmatprep.subr.bf16.mxu0 %v5495_v28  ;;  %v5571_v51 = vld [vmem:[%s7610_s1 + $0xca8] ss:$16 sps:$4 sm:$0xff]  }
 0x195   :  { %3780 = vmatprep.subr.bf16.mxu1 %v5498_v29  ;;  %v5574_v28 = vld [vmem:[%s7610_s1 + $0xea8] ss:$16 sps:$4 sm:$0xff]   ;;  %v7273_v29 = vpop.f32.mrf.mxu0 }
 0x197   :  { %3738 = vmatpush1.bf16.msra.mxu0 %v5493_v52  ;;  %v7281_v52 = vpop.f32.mrf.mxu1 }
 0x198   :  { %3781 = vmatpush1.bf16.msra.mxu1 %v5496_v54  ;;  %3739 = vmatprep.subr.bf16.mxu0 %v5501_v56  ;;  %v7283_v54 = vpop.f32.mrf.mxu0  ;;  %v5577_v56 = vld [vmem:[%s7610_s1 + $0xc88] ss:$16 sps:$4 sm:$0xff]  }
 0x199   :  { %3782 = vmatprep.subr.bf16.mxu1 %v5504_v57  ;;  %v5580_v57 = vld [vmem:[%s7610_s1 + $0xe88] ss:$16 sps:$4 sm:$0xff]  }
 0x19b   :  { %3740 = vmatpush1.bf16.msra.mxu0 %v5499_v58  ;;  %v5585_v58 = vld [vmem:[%s7610_s1 + $0xc6c] ss:$16 sps:$4 sm:$0xff]  }
 0x19c   :  { %3783 = vmatpush1.bf16.msra.mxu1 %v5502_v59  ;;  %3741 = vmatprep.subr.bf16.mxu0 %v5507_v60  ;;  %v5588_v59 = vld [vmem:[%s7610_s1 + $0xe6c] ss:$16 sps:$4 sm:$0xff]   ;;  %v7297_v60 = vpop.f32.mrf.mxu1 }
 0x19d   :  { %3784 = vmatprep.subr.bf16.mxu1 %v5510_v61  ;;  %v7299_v61 = vpop.f32.mrf.mxu0 }
 0x19f   :  { %3742 = vmatpush1.bf16.msra.mxu0 %v5505_v62  ;;  %v5583_v62 = vld [vmem:[%s7610_s1 + $0xc68] ss:$16 sps:$4 sm:$0xff]  }
 0x1a0   :  { %3785 = vmatpush1.bf16.msra.mxu1 %v5508_v63  ;;  %3743 = vmatprep.subr.bf16.mxu0 %v5513_v0  ;;  %v5586_v63 = vld [vmem:[%s7610_s1 + $0xe68] ss:$16 sps:$4 sm:$0xff]   ;;  %v7307_v0 = vpop.f32.mrf.mxu1 }
 0x1a1   :  { %3786 = vmatprep.subr.bf16.mxu1 %v5516_v1  ;;  %v5591_v1 = vld [vmem:[%s7610_s1 + $0xc4c] ss:$16 sps:$4 sm:$0xff]  }
 0x1a3   :  { %3744 = vmatpush2.bf16.msra.mxu0 %v5511_v2  ;;  %v5594_v2 = vld [vmem:[%s7610_s1 + $0xe4c] ss:$16 sps:$4 sm:$0xff]  }
 0x1a4   :  { %3787 = vmatpush2.bf16.msra.mxu1 %v5514_v3  ;;  %3745 = vmatprep.subr.bf16.mxu0 %v5519_v6  ;;  %v7315_v3 = vpop.f32.mrf.mxu0  ;;  %v5589_v6 = vld [vmem:[%s7610_s1 + $0xc48] ss:$16 sps:$4 sm:$0xff]  }
 0x1a5   :  { %3788 = vmatprep.subr.bf16.mxu1 %v5522_v7  ;;  %v5592_v7 = vld [vmem:[%s7610_s1 + $0xe48] ss:$16 sps:$4 sm:$0xff]  }
 0x1a7   :  { %3746 = vmatpush2.bf16.msra.mxu0 %v5517_v44  ;;  %v7323_v44 = vpop.f32.mrf.mxu1 }
 0x1a8   :  { %3789 = vmatpush2.bf16.msra.mxu1 %v5520_v46  ;;  %3747 = vmatprep.subr.bf16.mxu0 %v5525_v47  ;;  %v5597_v46 = vld [vmem:[%s7610_s1 + $0xc2c] ss:$16 sps:$4 sm:$0xff]  }
 0x1a9   :  { %3790 = vmatprep.subr.bf16.mxu1 %v5528_v50  ;;  %v5600_v47 = vld [vmem:[%s7610_s1 + $0xe2c] ss:$16 sps:$4 sm:$0xff]   ;;  %v551_v50 = vlaneseq }
 0x1ab   :  { %3748 = vmatpush2.bf16.msra.mxu0 %v5523_v10  ;;  %v3337_v10 = vpop.f32.mrf.mxu0 }
 0x1ac   :  { %3791 = vmatpush2.bf16.msra.mxu1 %v5526_v11  ;;  %3749 = vmatprep.subr.bf16.mxu0 %v5531_v12  ;;  %v5595_v11 = vld [vmem:[%s7610_s1 + $0xc28] ss:$16 sps:$4 sm:$0xff]  }
 0x1ad   :  { %3792 = vmatprep.subr.bf16.mxu1 %v5534_v13  ;;  %v5598_v12 = vld [vmem:[%s7610_s1 + $0xe28] ss:$16 sps:$4 sm:$0xff]   ;;  %v7337_v13 = vpop.f32.mrf.mxu1 }
 0x1af   :  { %3750 = vmatpush2.bf16.msra.mxu0 %v5529_v14  ;;  %v7339_v14 = vpop.f32.mrf.mxu0 }
 0x1b0   :  { %3793 = vmatpush2.bf16.msra.mxu1 %v5532_v53  ;;  %3751 = vmatprep.subr.bf16.mxu0 %v5537_v55  ;;  %v5603_v53 = vld [vmem:[%s7610_s1 + $0xc0c] ss:$16 sps:$4 sm:$0xff]  }
 0x1b1   :  { %3794 = vmatprep.subr.bf16.mxu1 %v5540_v15  ;;  %v5606_v55 = vld [vmem:[%s7610_s1 + $0xe0c] ss:$16 sps:$4 sm:$0xff]   ;;  %v7347_v15 = vshrl.u32 %v551_v50, 7  ;;  %v5634_v50 = vld [vmem:[%s7610_s1 + $0xf68] ss:$16 sps:$4 sm:$0xff]  }
 0x1b3   :  { %3752 = vmatpush2.bf16.msra.mxu0 %v5535_v16  ;;  %v5601_v16 = vld [vmem:[%s7610_s1 + $0xc08] ss:$16 sps:$4 sm:$0xff]  }
 0x1b4   :  { %3795 = vmatpush2.bf16.msra.mxu1 %v5538_v17  ;;  %3753 = vmatprep.subr.bf16.mxu0 %v5543_v18  ;;  %v5604_v17 = vld [vmem:[%s7610_s1 + $0xe08] ss:$16 sps:$4 sm:$0xff]   ;;  %v3380_v18 = vpop.f32.mrf.mxu1 }
 0x1b5   :  { %3796 = vmatprep.subr.bf16.mxu1 %v5546_v19  ;;  %v7355_v19 = vpop.f32.mrf.mxu0 }
 0x1b7   :  { %3754 = vmatpush2.bf16.msra.mxu0 %v5541_v22  ;;  %v5609_v22 = vld [vmem:[%s7610_s1 + $0xdec] ss:$16 sps:$4 sm:$0xff]  }
 0x1b8   :  { %3797 = vmatpush2.bf16.msra.mxu1 %v5544_v23  ;;  %3755 = vmatprep.subr.bf16.mxu0 %v5549_v24  ;;  %v5612_v23 = vld [vmem:[%s7610_s1 + $0xfec] ss:$16 sps:$4 sm:$0xff]   ;;  %v557_v24 = vsub.s32 1, %v7347_v15 }
 0x1b9   :  { %3798 = vmatprep.subr.bf16.mxu1 %v5552_v25  ;;  %v7367_v25 = vld [vmem:[%s7613_s2] sm:$0xf] }
 0x1bb   :  { %3756 = vmatpush2.bf16.msra.mxu0 %v5547_v8  ;;  %v7369_v8 = vpop.f32.mrf.mxu1 }
 0x1bc   :  { %3799 = vmatpush2.bf16.msra.mxu1 %v5550_v9  ;;  %3757 = vmatprep.subr.bf16.mxu0 %v5555_v26  ;;  %v5607_v9 = vld [vmem:[%s7610_s1 + $0xde8] ss:$16 sps:$4 sm:$0xff]  }
 0x1bd   :  { %3800 = vmatprep.subr.bf16.mxu1 %v5558_v41  ;;  %v5610_v26 = vld [vmem:[%s7610_s1 + $0xfe8] ss:$16 sps:$4 sm:$0xff]   ;;  %v7377_v41 = vpop.f32.mrf.mxu0 }
 0x1bf   :  { %3758 = vmatpush2.bf16.msra.mxu0 %v5553_v43  ;;  %v5615_v43 = vld [vmem:[%s7610_s1 + $0xdcc] ss:$16 sps:$4 sm:$0xff]  }
 0x1c0   :  { %3801 = vmatpush2.bf16.msra.mxu1 %v5556_v27  ;;  %3813 = vmatprep.subr.bf16.mxu0 %v5561_v34  ;;  %v5618_v27 = vld [vmem:[%s7610_s1 + $0xfcc] ss:$16 sps:$4 sm:$0xff]   ;;  %v558_v34 = vrot.slane %v7367_v25, %v557_v24 }
 0x1c1   :  { %3856 = vmatprep.subr.bf16.mxu1 %v5564_v36  ;;  %v3462_v36 = vpop.f32.mrf.mxu1 }
 0x1c2   :  { %3760 = vmatmul.mubr.bf16.vlgmr.msra.gmra.mxu0 %v6421_v48  ;;  %v5573_v48 = vld [vmem:[%s7610_s1 + $0xcac] ss:$16 sps:$4 sm:$0xff]  }
 0x1c3   :  { %3803 = vmatmul.mubr.bf16.vlgmr.msra.gmra.mxu1 %v6425_v49  ;;  %3814 = vmatpush1.bf16.msra.mxu0 %v5559_v37  ;;  %v5576_v49 = vld [vmem:[%s7610_s1 + $0xeac] ss:$16 sps:$4 sm:$0xff]   ;;  %v3252_v37 = vadd.f32 %v7273_v29, %v558_v34  ;;  %v5619_v29 = vld [vmem:[%s7610_s1 + $0xda8] ss:$16 sps:$4 sm:$0xff]  }
 0x1c4   :  { %3857 = vmatpush1.bf16.msra.mxu1 %v5562_v38  ;;  %3815 = vmatprep.subr.bf16.mxu0 %v5567_v21  ;;  %v5613_v38 = vld [vmem:[%s7610_s1 + $0xdc8] ss:$16 sps:$4 sm:$0xff]  }
 0x1c5   :  { %3858 = vmatprep.subr.bf16.mxu1 %v5570_v39  ;;  %3845 = vmatprep.mubr.bf16.mxu0 %v6443_v30  ;;  %v5579_v30 = vld [vmem:[%s7610_s1 + $0xc8c] ss:$16 sps:$4 sm:$0xff]   ;;  %v5616_v21 = vld [vmem:[%s7610_s1 + $0xfc8] ss:$16 sps:$4 sm:$0xff]   ;;  %v3423_v39 = vpop.f32.mrf.mxu0 }
 0x1c6   :  { %3888 = vmatprep.mubr.bf16.mxu1 %v6447_v31  ;;  %v5582_v31 = vld [vmem:[%s7610_s1 + $0xe8c] ss:$16 sps:$4 sm:$0xff]  }
 0x1c7   :  { %3816 = vmatpush1.bf16.msra.mxu0 %v5565_v33  ;;  %v5621_v33 = vld [vmem:[%s7610_s1 + $0xdac] ss:$16 sps:$4 sm:$0xff]  }
 0x1c8   :  { %3859 = vmatpush1.bf16.msra.mxu1 %v5568_v35  ;;  %3817 = vmatprep.subr.bf16.mxu0 %v5573_v48  ;;  %v5624_v35 = vld [vmem:[%s7610_s1 + $0xfac] ss:$16 sps:$4 sm:$0xff]   ;;  %v3248_v48 = vadd.f32 %v7237_v20, %v558_v34 }
 0x1c9   :  { %3860 = vmatprep.subr.bf16.mxu1 %v5576_v49  ;;  %v7400_v49 = vpop.f32.mrf.mxu1  ;;  %v5627_v20 = vld [vmem:[%s7610_s1 + $0xd8c] ss:$16 sps:$4 sm:$0xff]  }
 0x1ca   :  { %v5651_v34 = vld [vmem:[%s7610_s1 + $0xd0c] ss:$16 sps:$4 sm:$0xff]  }
 0x1cb   :  { %3818 = vmatpush1.bf16.msra.mxu0 %v5571_v51  ;;  %v7402_v51 = vpop.f32.mrf.mxu0 }
 0x1cc   :  { %3861 = vmatpush1.bf16.msra.mxu1 %v5574_v28  ;;  %3819 = vmatprep.subr.bf16.mxu0 %v5579_v30  ;;  %v3295_v28 = vadd.f32 %v7297_v60, %v3252_v37  ;;  %v5622_v30 = vld [vmem:[%s7610_s1 + $0xfa8] ss:$16 sps:$4 sm:$0xff]  }
 0x1cd   :  { %3862 = vmatprep.subr.bf16.mxu1 %v5582_v31  ;;  %v5630_v31 = vld [vmem:[%s7610_s1 + $0xf8c] ss:$16 sps:$4 sm:$0xff]  }
 0x1cf   :  { %3820 = vmatpush1.bf16.msra.mxu0 %v5577_v56  ;;  %v3291_v56 = vadd.f32 %v7265_v45, %v3248_v48  ;;  %v5633_v45 = vld [vmem:[%s7610_s1 + $0xd6c] ss:$16 sps:$4 sm:$0xff]  }
 0x1d0   :  { %3863 = vmatpush1.bf16.msra.mxu1 %v5580_v57  ;;  %3821 = vmatprep.subr.bf16.mxu0 %v5585_v58  ;;  %v3338_v57 = vadd.f32 %v3337_v10, %v3295_v28  ;;  %v3466_v58 = vpop.f32.mrf.mxu1 }
 0x1d1   :  { %3864 = vmatprep.subr.bf16.mxu1 %v5588_v59  ;;  %v3505_v59 = vpop.f32.mrf.mxu0  ;;  %v3334_v60 = vadd.f32 %v7299_v61, %v3291_v56  ;;  %v5636_v61 = vld [vmem:[%s7610_s1 + $0xf6c] ss:$16 sps:$4 sm:$0xff]  }
 0x1d3   :  { %3822 = vmatpush1.bf16.msra.mxu0 %v5583_v62  ;;  %v5625_v62 = vld [vmem:[%s7610_s1 + $0xd88] ss:$16 sps:$4 sm:$0xff]  }
 0x1d4   :  { %3865 = vmatpush1.bf16.msra.mxu1 %v5586_v63  ;;  %3823 = vmatprep.subr.bf16.mxu0 %v5591_v1  ;;  %v5628_v63 = vld [vmem:[%s7610_s1 + $0xf88] ss:$16 sps:$4 sm:$0xff]   ;;  %v7425_v1 = vpop.f32.mrf.mxu1 }
 0x1d5   :  { %3866 = vmatprep.subr.bf16.mxu1 %v5594_v2  ;;  %v3381_v2 = vadd.f32 %v3380_v18, %v3338_v57  ;;  %v5658_v57 = vld [vmem:[%s7612_s3 + $0x30] sm:$0xff]  }
 0x1d6   :  { %v3548_v10 = vpop.f32.mrf.mxu1 }
 0x1d7   :  { %3824 = vmatpush1.bf16.msra.mxu0 %v5589_v6  ;;  %v7433_v6 = vpop.f32.mrf.mxu0 }
 0x1d8   :  { %3867 = vmatpush1.bf16.msra.mxu1 %v5592_v7  ;;  %3825 = vmatprep.subr.bf16.mxu0 %v5597_v46  ;;  %v3377_v7 = vadd.f32 %v7323_v44, %v3334_v60  ;;  %v3424_v46 = vadd.f32 %v3423_v39, %v3381_v2  ;;  %v5642_v44 = vld [vmem:[%s7610_s1 + $0xf4c] ss:$16 sps:$4 sm:$0xff]   ;;  %v7455_v18 = vpop.f32.mrf.mxu1  ;;  %v5652_v39 = vld [vmem:[%s7610_s1 + $0xf08] ss:$16 sps:$4 sm:$0xff]  }
 0x1d9   :  { %3868 = vmatprep.subr.bf16.mxu1 %v5600_v47  ;;  %v5631_v47 = vld [vmem:[%s7610_s1 + $0xd68] ss:$16 sps:$4 sm:$0xff]  }
 0x1db   :  { %3826 = vmatpush1.bf16.msra.mxu0 %v5595_v11  ;;  %v5639_v11 = vld [vmem:[%s7610_s1 + $0xd4c] ss:$16 sps:$4 sm:$0xff]  }
 0x1dc   :  { %3869 = vmatpush1.bf16.msra.mxu1 %v5598_v12  ;;  %3827 = vmatprep.subr.bf16.mxu0 %v5603_v53  ;;  %v3420_v12 = vadd.f32 %v7355_v19, %v3377_v7  ;;  %v3509_v53 = vpop.f32.mrf.mxu0  ;;  %v5645_v19 = vld [vmem:[%s7610_s1 + $0xd2c] ss:$16 sps:$4 sm:$0xff]   ;;  %v5674_v7 = vld [vmem:[%s7612_s3 + $0xb0] sm:$0xff]  }
 0x1dd   :  { %3870 = vmatprep.subr.bf16.mxu1 %v5606_v55  ;;  %v3467_v55 = vadd.f32 %v3466_v58, %v3424_v46  ;;  %v5675_v46 = vld [vmem:[%s7612_s3 + $0xe8] sm:$0xff]  }
 0x1df   :  { %3828 = vmatpush1.bf16.msra.mxu0 %v5601_v16  ;;  %v5637_v16 = vld [vmem:[%s7610_s1 + $0xd48] ss:$16 sps:$4 sm:$0xff]   ;;  %v3510_v24 = vadd.f32 %v3509_v53, %v3467_v55  ;;  %v5678_v53 = vld [vmem:[%s7612_s3 + $0xa0] sm:$0xff]  }
 0x1e0   :  { %3871 = vmatpush1.bf16.msra.mxu1 %v5604_v17  ;;  %3829 = vmatprep.subr.bf16.mxu0 %v5609_v22  ;;  %v5640_v17 = vld [vmem:[%s7610_s1 + $0xf48] ss:$16 sps:$4 sm:$0xff]   ;;  %v5648_v22 = vld [vmem:[%s7610_s1 + $0xf2c] ss:$16 sps:$4 sm:$0xff]  }
 0x1e1   :  { %3872 = vmatprep.subr.bf16.mxu1 %v5612_v23  ;;  %v3463_v23 = vadd.f32 %v3462_v36, %v3420_v12  ;;  %v5654_v36 = vld [vmem:[%s7610_s1 + $0xf0c] ss:$16 sps:$4 sm:$0xff]  }
 0x1e2   :  { %v5668_v55 = vld [vmem:[%s7612_s3 + $0x8] sm:$0xff]  }
 0x1e3   :  { %3830 = vmatpush2.bf16.msra.mxu0 %v5607_v9  ;;  %v3506_v9 = vadd.f32 %v3505_v59, %v3463_v23  ;;  %v5659_v59 = vld [vmem:[%s7612_s3 + $0x68] sm:$0xff]   ;;  %v5681_v23 = vld [vmem:[%s7612_s3 + $0xd0] sm:$0xff]  }
 0x1e4   :  { %3873 = vmatpush2.bf16.msra.mxu1 %v5610_v26  ;;  %3831 = vmatprep.subr.bf16.mxu0 %v5615_v43  ;;  %v5643_v26 = vld [vmem:[%s7610_s1 + $0xd28] ss:$16 sps:$4 sm:$0xff]  }
 0x1e5   :  { %3874 = vmatprep.subr.bf16.mxu1 %v5618_v27  ;;  %v5646_v43 = vld [vmem:[%s7610_s1 + $0xf28] ss:$16 sps:$4 sm:$0xff]   ;;  %v3552_v27 = vpop.f32.mrf.mxu1 }
 0x1e6   :  { %v3553_v37 = vadd.f32 %v3552_v27, %v3510_v24  ;;  %v5682_v24 = vld [vmem:[%s7612_s3 + $0x90] sm:$0xff]   ;;  %v5686_v27 = vld [vmem:[%s7612_s3 + $0x80] sm:$0xff]  }
 0x1e7   :  { %3832 = vmatpush2.bf16.msra.mxu0 %v5613_v38  ;;  %v3549_v38 = vadd.f32 %v3548_v10, %v3506_v9  ;;  %v5666_v10 = vld [vmem:[%s7612_s3 + $0x10] sm:$0xff]   ;;  %v5683_v9 = vld [vmem:[%s7612_s3 + $0xc8] sm:$0xff]  }
 0x1e8   :  { %3875 = vmatpush2.bf16.msra.mxu1 %v5616_v21  ;;  %3833 = vmatprep.subr.bf16.mxu0 %v5621_v33  ;;  %v5649_v21 = vld [vmem:[%s7610_s1 + $0xd08] ss:$16 sps:$4 sm:$0xff]   ;;  %v553_v33 = vsub.s32 0, %v7347_v15  ;;  %v3904_v48 = vmax.f32 %v3553_v37, 0.0 }
 0x1e9   :  { %3876 = vmatprep.subr.bf16.mxu1 %v5624_v35  ;;  %v5655_v35 = vld [vmem:[%s7612_s3 + $0x78] sm:$0xff]   ;;  %v3900_v28 = vmax.f32 %v3549_v38, 0.0 }
 0x1eb   :  { %3834 = vmatpush2.bf16.msra.mxu0 %v5619_v29  ;;  %v5656_v29 = vld [vmem:[%s7612_s3 + $0x38] sm:$0xff]  }
 0x1ec   :  { %3877 = vmatpush2.bf16.msra.mxu1 %v5622_v30  ;;  %3835 = vmatprep.subr.bf16.mxu0 %v5627_v20  ;;  %v554_v30 = vrot.slane %v7367_v25, %v553_v33  ;;  %v5657_v20 = vld [vmem:[%s7612_s3 + $0x70] sm:$0xff]  }
 0x1ed   :  { %3878 = vmatprep.subr.bf16.mxu1 %v5630_v31  ;;  %v3908_v31 = vpack.c.bf16 %v3904_v48, %v3900_v28 }
 0x1ee   :  { %v3250_v56 = vadd.f32 %v7255_v42, %v554_v30  ;;  %v3246_v58 = vadd.f32 %v7223_v32, %v554_v30  ;;  %v5661_v32 = vld [vmem:[%s7612_s3 + $0x60] sm:$0xff]  }
 0x1ef   :  { %3836 = vmatpush2.bf16.msra.mxu0 %v5625_v62 }
 0x1f0   :  { %3879 = vmatpush2.bf16.msra.mxu1 %v5628_v63  ;;  %3837 = vmatprep.subr.bf16.mxu0 %v5633_v45  ;;  %v3293_v60 = vadd.f32 %v7281_v52, %v3250_v56  ;;  %v5662_v52 = vld [vmem:[%s7612_s3 + $0x20] sm:$0xff]   ;;  %v5671_v63 = vld [vmem:[%s7612_s3 + $0xf8] sm:$0xff]  }
 0x1f1   :  { %3880 = vmatprep.subr.bf16.mxu1 %v5636_v61 }
 0x1f2   :  { %v3336_v42 = vadd.f32 %v7315_v3, %v3293_v60  ;;  %v5673_v3 = vld [vmem:[%s7612_s3 + $0xf0] sm:$0xff]  }
 0x1f3   :  { %3838 = vmatpush2.bf16.msra.mxu0 %v5631_v47 }
 0x1f4   :  { %3881 = vmatpush2.bf16.msra.mxu1 %v5634_v50  ;;  %3839 = vmatprep.subr.bf16.mxu0 %v5639_v11  ;;  %v3379_v45 = vadd.f32 %v7337_v13, %v3336_v42  ;;  %v5664_v13 = vld [vmem:[%s7612_s3 + $0x18] sm:$0xff]   ;;  %v5676_v50 = vld [vmem:[%s7612_s3 + $0xa8] sm:$0xff]  }
 0x1f5   :  { %3882 = vmatprep.subr.bf16.mxu1 %v5642_v44 }
 0x1f6   :  { %v3422_v2 = vadd.f32 %v7377_v41, %v3379_v45 }
 0x1f7   :  { %3840 = vmatpush2.bf16.msra.mxu0 %v5637_v16  ;;  %v5670_v16 = vld [vmem:[%s7612_s3] sm:$0xff]  }
 0x1f8   :  { %3883 = vmatpush2.bf16.msra.mxu1 %v5640_v17  ;;  %3841 = vmatprep.subr.bf16.mxu0 %v5645_v19  ;;  %v3465_v41 = vadd.f32 %v7400_v49, %v3422_v2  ;;  %v5667_v49 = vld [vmem:[%s7612_s3 + $0x48] sm:$0xff]  }
 0x1f9   :  { %3884 = vmatprep.subr.bf16.mxu1 %v5648_v22 }
 0x1fa   :  { %v3508_v44 = vadd.f32 %v7433_v6, %v3465_v41  ;;  %v5669_v6 = vld [vmem:[%s7612_s3 + $0x40] sm:$0xff]  }
 0x1fb   :  { %3842 = vmatpush2.bf16.msra.mxu0 %v5643_v26  ;;  %v5684_v26 = vld [vmem:[%s7612_s3 + $0x88] sm:$0xff]  }
 0x1fc   :  { %3885 = vmatpush2.bf16.msra.mxu1 %v5646_v43  ;;  %3843 = vmatprep.subr.bf16.mxu0 %v5651_v34  ;;  %v5685_v43 = vld [vmem:[%s7612_s3 + $0xc0] sm:$0xff]  }
 0x1fd   :  { %3886 = vmatprep.subr.bf16.mxu1 %v5654_v36 }
 0x1ff   :  { %3844 = vmatpush2.bf16.msra.mxu0 %v5649_v21 }
 0x200   :  { %3887 = vmatpush2.bf16.msra.mxu1 %v5652_v39  ;;  %4843 = vmatprep.subr.bf16.mxu0 %v5655_v35 }
 0x201   :  { %4865 = vmatprep.subr.bf16.mxu1 %v5671_v63 }
 0x202   :  { %3846 = vmatmul.mubr.bf16.vlgmr.msra.gmra.mxu0 %v6635_v4  ;;  %v5660_v4 = vld [vmem:[%s7612_s3 + $0x28] sm:$0xff]   ;;  %v3589_v34 = vpop.f32.mrf.mxu0 }
 0x203   :  { %3889 = vmatmul.mubr.bf16.vlgmr.msra.gmra.mxu1 %v6639_v5  ;;  %4844 = vmatpush3.bf16.msra.mxu0 %v5656_v29  ;;  %v3289_v5 = vadd.f32 %v7245_v40, %v3246_v58  ;;  %v5672_v40 = vld [vmem:[%s7612_s3 + $0xb8] sm:$0xff]   ;;  %v3632_v36 = vpop.f32.mrf.mxu1 }
 0x204   :  { %4206 = vmatprep.mubr.bf16.mxu0 %v3908_v31  ;;  %4845 = vmatprep.subr.bf16.mxu0 %v5657_v20  ;;  %v3591_v37 = vpop.f32.mrf.mxu0  ;;  %v565_v20 = vsub.s32 3, %v7347_v15  ;;  %v561_v31 = vsub.s32 2, %v7347_v15 }
 0x205   :  { %v3332_v62 = vadd.f32 %v7283_v54, %v3289_v5  ;;  %v5663_v54 = vld [vmem:[%s7612_s3 + $0x58] sm:$0xff]   ;;  %4866 = vmatpush3.bf16.msra.mxu1 %v5672_v40  ;;  %v3634_v38 = vpop.f32.mrf.mxu1 }
 0x206   :  { %4867 = vmatprep.subr.bf16.mxu1 %v5673_v3  ;;  %v3593_v21 = vpop.f32.mrf.mxu0  ;;  %v566_v58 = vrot.slane %v7367_v25, %v565_v20 }
 0x207   :  { %4846 = vmatpush3.bf16.msra.mxu0 %v5658_v57  ;;  %v3375_v61 = vadd.f32 %v7307_v0, %v3332_v62  ;;  %v5665_v0 = vld [vmem:[%s7612_s3 + $0x50] sm:$0xff]   ;;  %v3636_v39 = vpop.f32.mrf.mxu1 }
 0x208   :  { %4847 = vmatprep.subr.bf16.mxu0 %v5659_v59  ;;  %v3595_v33 = vpop.f32.mrf.mxu0  ;;  %v562_v59 = vrot.slane %v7367_v25, %v561_v31  ;;  %v3592_v5 = vadd.f32 %v3591_v37, %v566_v58 }
 0x209   :  { %v3418_v47 = vadd.f32 %v7339_v14, %v3375_v61  ;;  %4868 = vmatpush3.bf16.msra.mxu1 %v5674_v7  ;;  %v5677_v14 = vld [vmem:[%s7612_s3 + $0xe0] sm:$0xff]   ;;  %v3638_v35 = vpop.f32.mrf.mxu1  ;;  %v3596_v40 = vadd.f32 %v3595_v33, %v566_v58 }
 0x20a   :  { %4869 = vmatprep.subr.bf16.mxu1 %v5675_v46  ;;  %v3590_v42 = vadd.f32 %v3589_v34, %v562_v59  ;;  %v3635_v63 = vadd.f32 %v3634_v38, %v3592_v5 }
 0x20b   :  { %4848 = vmatpush3.bf16.msra.mxu0 %v5660_v4  ;;  %v3461_v11 = vadd.f32 %v7369_v8, %v3418_v47  ;;  %v3551_v8 = vadd.f32 %v7455_v18, %v3508_v44  ;;  %v5679_v18 = vld [vmem:[%s7612_s3 + $0xd8] sm:$0xff]   ;;  %v3639_v7 = vadd.f32 %v3638_v35, %v3596_v40 }
 0x20c   :  { %4849 = vmatprep.subr.bf16.mxu0 %v5661_v32  ;;  %v3633_v3 = vadd.f32 %v3632_v36, %v3590_v42 }
 0x20d   :  { %v3504_v12 = vadd.f32 %v7402_v51, %v3461_v11  ;;  %4870 = vmatpush3.bf16.msra.mxu1 %v5676_v50  ;;  %v3903_v17 = vmax.f32 %v3551_v8, 0.0 }
 0x20e   :  { %4871 = vmatprep.subr.bf16.mxu1 %v5677_v14 }
 0x20f   :  { %4850 = vmatpush3.bf16.msra.mxu0 %v5662_v52  ;;  %v3547_v51 = vadd.f32 %v7425_v1, %v3504_v12  ;;  %v5680_v1 = vld [vmem:[%s7612_s3 + $0x98] sm:$0xff]   ;;  %v3594_v52 = vadd.f32 %v3593_v21, %v562_v59 }
 0x210   :  { %4851 = vmatprep.subr.bf16.mxu0 %v5663_v54 }
 0x211   :  { %4872 = vmatpush3.bf16.msra.mxu1 %v5678_v53  ;;  %v3899_v19 = vmax.f32 %v3547_v51, 0.0  ;;  %v3637_v61 = vadd.f32 %v3636_v39, %v3594_v52 }
 0x212   :  { %4873 = vmatprep.subr.bf16.mxu1 %v5679_v18 }
 0x213   :  { %4852 = vmatpush3.bf16.msra.mxu0 %v5664_v13  ;;  %v3907_v22 = vpack.c.bf16 %v3903_v17, %v3899_v19 }
 0x214   :  { %4853 = vmatprep.subr.bf16.mxu0 %v5665_v0 }
 0x215   :  { %4874 = vmatpush3.bf16.msra.mxu1 %v5680_v1 }
 0x216   :  { %4875 = vmatprep.subr.bf16.mxu1 %v5681_v23 }
 0x217   :  { %4854 = vmatpush3.bf16.msra.mxu0 %v5666_v10 }
 0x218   :  { %4855 = vmatprep.subr.bf16.mxu0 %v5667_v49 }
 0x219   :  { %4876 = vmatpush3.bf16.msra.mxu1 %v5682_v24 }
 0x21a   :  { %4877 = vmatprep.subr.bf16.mxu1 %v5683_v9 }
 0x21b   :  { %4856 = vmatpush3.bf16.msra.mxu0 %v5668_v55 }
 0x21c   :  { %4857 = vmatprep.subr.bf16.mxu0 %v5669_v6 }
 0x21d   :  { %4878 = vmatpush3.bf16.msra.mxu1 %v5684_v26 }
 0x21e   :  { %4879 = vmatprep.subr.bf16.mxu1 %v5685_v43 }
 0x21f   :  { %4858 = vmatpush3.bf16.msra.mxu0 %v5670_v16 }
 0x221   :  { %4880 = vmatpush3.bf16.msra.mxu1 %v5686_v27 }
 0x222   :  { %4207 = vmatmul.mubr.bf16.vlgmr.msra.gmra.mxu0 %v3907_v22 }
 0x242   :  { %v3675_v48 = vpop.f32.mrf.mxu0 }
 0x243   :  { %v3718_v28 = vpop.f32.mrf.mxu1  ;;  %v3676_v2 = vadd.f32 %v3675_v48, %v3633_v3 }
 0x244   :  { %v3677_v29 = vpop.f32.mrf.mxu0 }
 0x245   :  { %v3720_v30 = vpop.f32.mrf.mxu1  ;;  %v3678_v15 = vadd.f32 %v3677_v29, %v3635_v63  ;;  %v3719_v41 = vadd.f32 %v3718_v28, %v3676_v2 }
 0x246   :  { %v3679_v56 = vpop.f32.mrf.mxu0 }
 0x247   :  { %v3722_v57 = vpop.f32.mrf.mxu1  ;;  %v3680_v13 = vadd.f32 %v3679_v56, %v3637_v61  ;;  %v3721_v25 = vadd.f32 %v3720_v30, %v3678_v15  ;;  %v4810_v56 = vld [vmem:[%s7614_s4] ss:$0 sm:$0xff] }
 0x248   :  { %v3681_v60 = vpop.f32.mrf.mxu0 }
 0x249   :  { %v3724_v4 = vpop.f32.mrf.mxu1  ;;  %v3682_v0 = vadd.f32 %v3681_v60, %v3639_v7  ;;  %v3723_v50 = vadd.f32 %v3722_v57, %v3680_v13 }
 0x24b   :  { %v3725_v49 = vadd.f32 %v3724_v4, %v3682_v0 }
 0x282   :  { %v3761_v32 = vpop.f32.mrf.mxu0 }
 0x283   :  { %v3804_v62 = vpop.f32.mrf.mxu1  ;;  %v3762_v14 = vadd.f32 %v3761_v32, %v3719_v41 }
 0x284   :  { %v3763_v45 = vpop.f32.mrf.mxu0 }
 0x285   :  { %v3806_v54 = vpop.f32.mrf.mxu1  ;;  %v3764_v10 = vadd.f32 %v3763_v45, %v3721_v25  ;;  %v3805_v51 = vadd.f32 %v3804_v62, %v3762_v14 }
 0x286   :  { %v3765_v46 = vpop.f32.mrf.mxu0 }
 0x287   :  { %v3808_v47 = vpop.f32.mrf.mxu1  ;;  %v3766_v12 = vadd.f32 %v3765_v46, %v3723_v50  ;;  %v3807_v8 = vadd.f32 %v3806_v54, %v3764_v10 }
 0x288   :  { %v3767_v11 = vpop.f32.mrf.mxu0 }
 0x289   :  { %v3810_v44 = vpop.f32.mrf.mxu1  ;;  %v3768_v6 = vadd.f32 %v3767_v11, %v3725_v49  ;;  %v3809_v19 = vadd.f32 %v3808_v47, %v3766_v12 }
 0x28b   :  { %v3811_v24 = vadd.f32 %v3810_v44, %v3768_v6 }
 0x2c2   :  { %v3847_v53 = vpop.f32.mrf.mxu0 }
 0x2c3   :  { %v3890_v55 = vpop.f32.mrf.mxu1  ;;  %v3848_v18 = vadd.f32 %v3847_v53, %v3805_v51 }
 0x2c4   :  { %v3849_v16 = vpop.f32.mrf.mxu0 }
 0x2c5   :  { %v3892_v17 = vpop.f32.mrf.mxu1  ;;  %v3850_v22 = vadd.f32 %v3849_v16, %v3807_v8  ;;  %v3891_v36 = vadd.f32 %v3890_v55, %v3848_v18 }
 0x2c6   :  { %v3851_v1 = vpop.f32.mrf.mxu0 }
 0x2c7   :  { %v3894_v23 = vpop.f32.mrf.mxu1  ;;  %v3852_v9 = vadd.f32 %v3851_v1, %v3809_v19  ;;  %v3893_v43 = vadd.f32 %v3892_v17, %v3850_v22  ;;  %v3901_v35 = vmax.f32 %v3891_v36, 0.0 }
 0x2c8   :  { %v3853_v26 = vpop.f32.mrf.mxu0 }
 0x2c9   :  { %v3895_v27 = vadd.f32 %v3894_v23, %v3852_v9  ;;  %v3854_v34 = vadd.f32 %v3853_v26, %v3811_v24  ;;  %v3896_v37 = vpop.f32.mrf.mxu1  ;;  %v3902_v39 = vmax.f32 %v3893_v43, 0.0 }
 0x2cb   :  { %v3897_v38 = vadd.f32 %v3896_v37, %v3854_v34  ;;  %v3905_v21 = vmax.f32 %v3895_v27, 0.0 }
 0x2cd   :  { %v3906_v33 = vmax.f32 %v3897_v38, 0.0  ;;  %v3909_v28 = vpack.c.bf16 %v3905_v21, %v3901_v35 }
 0x2cf   :  { %v3910_v48 = vpack.c.bf16 %v3906_v33, %v3902_v39 }
 0x2d1   :  { %4247 = vmatprep.mubr.bf16.mxu1 %v3910_v48 }
 0x2d2   :  { %4248 = vmatmul.mubr.bf16.vlgmr.msra.gmra.mxu1 %v3909_v28 }
 0x2e2   :  { %v4859_v29 = vpop.f32.mrf.mxu0 }
 0x2e4   :  { %v4860_v30 = vpop.f32.mrf.mxu0 }
 0x2e5   :  { %v4861_v31 = vadd.f32 %v4860_v30, %v4859_v29 }
 0x2e6   :  { %v4862_v20 = vpop.f32.mrf.mxu0 }
 0x2e7   :  { %v4209_v60 = vadd.f32 %v4861_v31, %v4810_v56 }
 0x2e8   :  { %v4863_v57 = vpop.f32.mrf.mxu0 }
 0x2e9   :  { %v4864_v4 = vadd.f32 %v4863_v57, %v4862_v20 }
 0x2eb   :  { %v4212_v52 = vadd.f32 %v4864_v4, %v4810_v56 }
 0x392   :  { %v4881_v58 = vpop.f32.mrf.mxu1 }
 0x394   :  { %v4882_v59 = vpop.f32.mrf.mxu1 }
 0x395   :  { %v4883_v5 = vadd.f32 %v4882_v59, %v4881_v58 }
 0x396   :  { %v4884_v42 = vpop.f32.mrf.mxu1 }
 0x397   :  { %v4250_v32 = vadd.f32 %v4883_v5, %v4209_v60 }
 0x398   :  { %v4885_v62 = vpop.f32.mrf.mxu1 }
 0x399   :  { %v4886_v63 = vadd.f32 %v4885_v62, %v4884_v42  ;;  %4256 = vmax.xlane.f32.xlu0 %v4250_v32 }
 0x39b   :  { %v4253_v40 = vadd.f32 %v4886_v63, %v4212_v52 }
 0x39d   :  { %4258 = vmax.xlane.f32.xlu0 %v4253_v40 }
 0x422   :  { %v4257_v3 = vpop.xlane.xlu0 %4256 }
 0x423   :  { %v4260_v45 = vsub.f32 %v4250_v32, %v4257_v3 }
 0x425   :  { %v4262_v54 = vmul.f32 1.442695, %v4260_v45 }
 0x426   :  { %v4259_v61 = vpop.xlane.xlu0 %4258 }
 0x427   :  { %v4261_v15 = vsub.f32 %v4253_v40, %v4259_v61  ;;  %5687 = vpow2.f32 %v4262_v54 }
 0x429   :  { %v4264_v2 = vmul.f32 1.442695, %v4261_v15 }
 0x42b   :  { %5689 = vpow2.f32 %v4264_v2 }
 0x434   :  { %v5688_v7 = vpop.eup %5687 }
 0x435   :  { %4266 = vadd.xlane.f32.xlu1 %v5688_v7 }
 0x438   :  { %v5690_v13 = vpop.eup %5689 }
 0x439   :  { %4268 = vadd.xlane.f32.xlu1 %v5690_v13 }
 0x4be   :  { %v4267_v46 = vpop.xlane.xlu1 %4266 }
 0x4bf   :  { %5691 = vlog2.f32 %v4267_v46 }
 0x4c2   :  { %v4269_v47 = vpop.xlane.xlu1 %4268 }
 0x4c3   :  { %5693 = vlog2.f32 %v4269_v47 }
 0x4cc   :  { %v5692_v25 = vpop.eup %5691 }
 0x4cd   :  { %v4271_v0 = vmul.f32 0.6931472, %v5692_v25 }
 0x4cf   :  { %v4274_v41 = vsub.f32 %v4260_v45, %v4271_v0 }
 0x4d0   :  { %v5694_v50 = vpop.eup %5693 }
 0x4d1   :  { %4276 = vst [vmem:[%s7615_s5] sm:$0xff] %v4274_v41  ;;  %v4273_v10 = vmul.f32 0.6931472, %v5694_v50 }
 0x4d3   :  { %v4275_v14 = vsub.f32 %v4261_v15, %v4273_v10 }
 0x4d5   :  { %4277 = vst [vmem:[%s7615_s5 + $0x8] sm:$0xff] %v4275_v14 }

// kernel: net_forward.4
= control target key start
LH: loop header
LB: loop body
LE: loop exit
PB: predicated region body
PF: predicated region fallthrough
CT: control target
= control target key end

     0   :  { %s15961_s4 = inlined_call_operand.vmem [shape: bf16[3200,128], index: 4, kind: input, shape index: {}]   ;;  %s15962_s0 = inlined_call_operand.vmem [shape: bf16[64,3200], index: 0, kind: input, shape index: {}]   ;;  %s15963_s1 = inlined_call_operand.vmem [shape: bf16[64,3200], index: 1, kind: input, shape index: {}]   ;;  %s15964_s2 = inlined_call_operand.vmem [shape: bf16[64,3200], index: 2, kind: input, shape index: {}]   ;;  %s15965_s3 = inlined_call_operand.vmem [shape: bf16[64,3200], index: 3, kind: input, shape index: {}]   ;;  %s15966_s5 = inlined_call_operand.vmem [shape: f32[1,128], index: 5, kind: input, shape index: {}]   ;;  %s15967_s6 = inlined_call_operand.vmem [shape: bf16[64,128], index: 6, kind: output, shape index: {}]  }
   0x1   :  { %v10231_v0 = vld [vmem:[%s15961_s4 + $0x78] sm:$0xff]   ;;  %v10235_v4 = vld [vmem:[%s15961_s4 + $0x70] sm:$0xff]   ;;  %v10239_v8 = vld [vmem:[%s15961_s4 + $0x68] sm:$0xff]  }
   0x2   :  { %v10232_v1 = vld [vmem:[%s15961_s4 + $0xf8] sm:$0xff]   ;;  %8167 = vmatprep.subr.bf16.mxu0 %v10231_v0  ;;  %v10236_v5 = vld [vmem:[%s15961_s4 + $0xf0] sm:$0xff]   ;;  %v10240_v9 = vld [vmem:[%s15961_s4 + $0xe8] sm:$0xff]  }
   0x3   :  { %v10233_v2 = vld [vmem:[%s15961_s4 + $0x38] sm:$0xff]   ;;  %8207 = vmatprep.subr.bf16.mxu1 %v10232_v1  ;;  %v10237_v6 = vld [vmem:[%s15961_s4 + $0x30] sm:$0xff]   ;;  %v10241_v10 = vld [vmem:[%s15961_s4 + $0x28] sm:$0xff]  }
   0x4   :  { %v10234_v3 = vld [vmem:[%s15961_s4 + $0xb8] sm:$0xff]   ;;  %8168 = vmatpush3.bf16.msra.mxu0 %v10233_v2  ;;  %v10238_v7 = vld [vmem:[%s15961_s4 + $0xb0] sm:$0xff]   ;;  %v10242_v11 = vld [vmem:[%s15961_s4 + $0xa8] sm:$0xff]  }
   0x5   :  { %8208 = vmatpush3.bf16.msra.mxu1 %v10234_v3  ;;  %8169 = vmatprep.subr.bf16.mxu0 %v10235_v4  ;;  %v10243_v12 = vld [vmem:[%s15961_s4 + $0x60] sm:$0xff]   ;;  %v10247_v16 = vld [vmem:[%s15961_s4 + $0x58] sm:$0xff]   ;;  %v10251_v20 = vld [vmem:[%s15961_s4 + $0x50] sm:$0xff]  }
   0x6   :  { %8209 = vmatprep.subr.bf16.mxu1 %v10236_v5  ;;  %v10244_v13 = vld [vmem:[%s15961_s4 + $0xe0] sm:$0xff]   ;;  %v10248_v17 = vld [vmem:[%s15961_s4 + $0xd8] sm:$0xff]   ;;  %v10252_v21 = vld [vmem:[%s15961_s4 + $0xd0] sm:$0xff]  }
   0x7   :  { %v10245_v14 = vld [vmem:[%s15961_s4 + $0x20] sm:$0xff]   ;;  %v10249_v18 = vld [vmem:[%s15961_s4 + $0x18] sm:$0xff]   ;;  %v10253_v22 = vld [vmem:[%s15961_s4 + $0x10] sm:$0xff]  }
   0x8   :  { %8170 = vmatpush3.bf16.msra.mxu0 %v10237_v6  ;;  %v10246_v15 = vld [vmem:[%s15961_s4 + $0xa0] sm:$0xff]   ;;  %v10250_v19 = vld [vmem:[%s15961_s4 + $0x98] sm:$0xff]   ;;  %v10254_v23 = vld [vmem:[%s15961_s4 + $0x90] sm:$0xff]  }
   0x9   :  { %8210 = vmatpush3.bf16.msra.mxu1 %v10238_v7  ;;  %8171 = vmatprep.subr.bf16.mxu0 %v10239_v8  ;;  %v10255_v24 = vld [vmem:[%s15961_s4 + $0x48] sm:$0xff]   ;;  %v10259_v28 = vld [vmem:[%s15961_s4 + $0x40] sm:$0xff]   ;;  %v10269_v36 = vld [vmem:[%s15961_s4 + $0x178] sm:$0xff]  }
   0xa   :  { %8211 = vmatprep.subr.bf16.mxu1 %v10240_v9  ;;  %v10256_v25 = vld [vmem:[%s15961_s4 + $0xc8] sm:$0xff]   ;;  %v10260_v29 = vld [vmem:[%s15961_s4 + $0xc0] sm:$0xff]   ;;  %v10270_v37 = vld [vmem:[%s15961_s4 + $0x1f8] sm:$0xff]  }
   0xb   :  { %v10257_v26 = vld [vmem:[%s15961_s4 + $0x8] sm:$0xff]   ;;  %v10261_v30 = vld [vmem:[%s15961_s4] sm:$0xff]   ;;  %v10271_v38 = vld [vmem:[%s15961_s4 + $0x138] sm:$0xff]  }
   0xc   :  { %8172 = vmatpush3.bf16.msra.mxu0 %v10241_v10  ;;  %v10258_v27 = vld [vmem:[%s15961_s4 + $0x88] sm:$0xff]   ;;  %v10262_v31 = vld [vmem:[%s15961_s4 + $0x80] sm:$0xff]   ;;  %v10272_v39 = vld [vmem:[%s15961_s4 + $0x1b8] sm:$0xff]  }
   0xd   :  { %8212 = vmatpush3.bf16.msra.mxu1 %v10242_v11  ;;  %8173 = vmatprep.subr.bf16.mxu0 %v10243_v12  ;;  %v10263_v32 = vld [vmem:[%s15962_s0] ss:$100 sps:$4 sm:$0xff]   ;;  %v10266_v34 = vld [vmem:[%s15962_s0 + $0x8] ss:$100 sps:$4 sm:$0xff]   ;;  %v10273_v40 = vld [vmem:[%s15961_s4 + $0x170] sm:$0xff]  }
   0xe   :  { %8213 = vmatprep.subr.bf16.mxu1 %v10244_v13  ;;  %v10265_v33 = vld [vmem:[%s15962_s0 + $0x4] ss:$100 sps:$4 sm:$0xff]   ;;  %v10268_v35 = vld [vmem:[%s15962_s0 + $0xc] ss:$100 sps:$4 sm:$0xff]   ;;  %v10279_v45 = vld [vmem:[%s15962_s0 + $0xd4] ss:$100 sps:$4 sm:$0xff]  }
   0xf   :  { %2264 = vmatprep.mubr.bf16.mxu0 %v10265_v33  ;;  %2329 = vmatprep.mubr.bf16.mxu1 %v10268_v35  ;;  %v10274_v41 = vld [vmem:[%s15961_s4 + $0x1f0] sm:$0xff]   ;;  %v10281_v46 = vld [vmem:[%s15962_s0 + $0xc8] ss:$100 sps:$4 sm:$0xff]   ;;  %v10287_v52 = vld [vmem:[%s15961_s4 + $0x160] sm:$0xff]  }
  0x10   :  { %8174 = vmatpush3.bf16.msra.mxu0 %v10245_v14  ;;  %v10275_v42 = vld [vmem:[%s15961_s4 + $0x130] sm:$0xff]   ;;  %v10283_v48 = vld [vmem:[%s15961_s4 + $0x168] sm:$0xff]   ;;  %v10288_v53 = vld [vmem:[%s15961_s4 + $0x1e0] sm:$0xff]  }
  0x11   :  { %8214 = vmatpush3.bf16.msra.mxu1 %v10246_v15  ;;  %8175 = vmatprep.subr.bf16.mxu0 %v10247_v16  ;;  %v10276_v43 = vld [vmem:[%s15961_s4 + $0x1b0] sm:$0xff]   ;;  %v10284_v49 = vld [vmem:[%s15961_s4 + $0x1e8] sm:$0xff]   ;;  %v10289_v54 = vld [vmem:[%s15961_s4 + $0x120] sm:$0xff]  }
  0x12   :  { %8215 = vmatprep.subr.bf16.mxu1 %v10248_v17  ;;  %v10277_v44 = vld [vmem:[%s15962_s0 + $0xcc] ss:$100 sps:$4 sm:$0xff]   ;;  %v10290_v55 = vld [vmem:[%s15961_s4 + $0x1a0] sm:$0xff]   ;;  %v10291_v56 = vld [vmem:[%s15962_s0 + $0x194] ss:$100 sps:$4 sm:$0xff]  }
  0x13   :  { %v10282_v47 = vld [vmem:[%s15962_s0 + $0xd0] ss:$100 sps:$4 sm:$0xff]   ;;  %v10285_v50 = vld [vmem:[%s15961_s4 + $0x128] sm:$0xff]   ;;  %v10293_v57 = vld [vmem:[%s15962_s0 + $0x19c] ss:$100 sps:$4 sm:$0xff]  }
  0x14   :  { %8176 = vmatpush3.bf16.msra.mxu0 %v10249_v18  ;;  %v10286_v51 = vld [vmem:[%s15961_s4 + $0x1a8] sm:$0xff]   ;;  %v10295_v58 = vld [vmem:[%s15962_s0 + $0x190] ss:$100 sps:$4 sm:$0xff]   ;;  %v10296_v59 = vld [vmem:[%s15962_s0 + $0x198] ss:$100 sps:$4 sm:$0xff]  }
  0x15   :  { %8216 = vmatpush3.bf16.msra.mxu1 %v10250_v19  ;;  %8177 = vmatprep.subr.bf16.mxu0 %v10251_v20  ;;  %v10297_v60 = vld [vmem:[%s15961_s4 + $0x158] sm:$0xff]   ;;  %v10301_v0 = vld [vmem:[%s15961_s4 + $0x150] sm:$0xff]   ;;  %v10307_v5 = vld [vmem:[%s15962_s0 + $0x264] ss:$100 sps:$4 sm:$0xff]  }
  0x16   :  { %8217 = vmatprep.subr.bf16.mxu1 %v10252_v21  ;;  %v10298_v61 = vld [vmem:[%s15961_s4 + $0x1d8] sm:$0xff]   ;;  %v10302_v1 = vld [vmem:[%s15961_s4 + $0x1d0] sm:$0xff]   ;;  %v10310_v7 = vld [vmem:[%s15962_s0 + $0x260] ss:$100 sps:$4 sm:$0xff]  }
  0x17   :  { %v10299_v62 = vld [vmem:[%s15961_s4 + $0x118] sm:$0xff]   ;;  %v10303_v2 = vld [vmem:[%s15961_s4 + $0x110] sm:$0xff]   ;;  %v10311_v8 = vld [vmem:[%s15961_s4 + $0x148] sm:$0xff]  }
  0x18   :  { %8178 = vmatpush3.bf16.msra.mxu0 %v10253_v22  ;;  %v10300_v63 = vld [vmem:[%s15961_s4 + $0x198] sm:$0xff]   ;;  %v10304_v3 = vld [vmem:[%s15961_s4 + $0x190] sm:$0xff]   ;;  %v10312_v9 = vld [vmem:[%s15961_s4 + $0x1c8] sm:$0xff]  }
  0x19   :  { %8218 = vmatpush3.bf16.msra.mxu1 %v10254_v23  ;;  %8179 = vmatprep.subr.bf16.mxu0 %v10255_v24  ;;  %v10305_v4 = vld [vmem:[%s15962_s0 + $0x25c] ss:$100 sps:$4 sm:$0xff]   ;;  %v10313_v10 = vld [vmem:[%s15961_s4 + $0x108] sm:$0xff]   ;;  %v10319_v16 = vld [vmem:[%s15962_s0 + $0x10] ss:$100 sps:$4 sm:$0xff]  }
  0x1a   :  { %8219 = vmatprep.subr.bf16.mxu1 %v10256_v25  ;;  %v10309_v6 = vld [vmem:[%s15962_s0 + $0x258] ss:$100 sps:$4 sm:$0xff]   ;;  %v10314_v11 = vld [vmem:[%s15961_s4 + $0x188] sm:$0xff]   ;;  %v10315_v12 = vld [vmem:[%s15961_s4 + $0x140] sm:$0xff]  }
  0x1b   :  { %v10316_v13 = vld [vmem:[%s15961_s4 + $0x1c0] sm:$0xff]   ;;  %v10321_v17 = vld [vmem:[%s15962_s0 + $0x14] ss:$100 sps:$4 sm:$0xff]   ;;  %v10342_v35 = vld [vmem:[%s15961_s4 + $0x2a8] sm:$0xff]  }
  0x1c   :  { %8180 = vmatpush3.bf16.msra.mxu0 %v10257_v26  ;;  %v10317_v14 = vld [vmem:[%s15961_s4 + $0x100] sm:$0xff]   ;;  %v10322_v18 = vld [vmem:[%s15962_s0 + $0x18] ss:$100 sps:$4 sm:$0xff]   ;;  %v10329_v24 = vld [vmem:[%s15961_s4 + $0x270] sm:$0xff]  }
  0x1d   :  { %8220 = vmatpush3.bf16.msra.mxu1 %v10258_v27  ;;  %8181 = vmatprep.subr.bf16.mxu0 %v10259_v28  ;;  %v10318_v15 = vld [vmem:[%s15961_s4 + $0x180] sm:$0xff]   ;;  %v10325_v20 = vld [vmem:[%s15961_s4 + $0x278] sm:$0xff]   ;;  %v10330_v25 = vld [vmem:[%s15961_s4 + $0x2f0] sm:$0xff]  }
  0x1e   :  { %8221 = vmatprep.subr.bf16.mxu1 %v10260_v29  ;;  %v10324_v19 = vld [vmem:[%s15962_s0 + $0x1c] ss:$100 sps:$4 sm:$0xff]   ;;  %v10331_v26 = vld [vmem:[%s15961_s4 + $0x230] sm:$0xff]  }
  0x1f   :  { %v10326_v21 = vld [vmem:[%s15961_s4 + $0x2f8] sm:$0xff]   ;;  %v10332_v27 = vld [vmem:[%s15961_s4 + $0x2b0] sm:$0xff]   ;;  %v10340_v33 = vld [vmem:[%s15962_s0 + $0xe0] ss:$100 sps:$4 sm:$0xff]  }
  0x20   :  { %8182 = vmatpush3.bf16.msra.mxu0 %v10261_v30  ;;  %v10327_v22 = vld [vmem:[%s15961_s4 + $0x238] sm:$0xff]   ;;  %v10336_v30 = vld [vmem:[%s15962_s0 + $0xe4] ss:$100 sps:$4 sm:$0xff]  }
  0x21   :  { %8222 = vmatpush3.bf16.msra.mxu1 %v10262_v31  ;;  %8247 = vmatprep.subr.bf16.mxu0 %v10269_v36  ;;  %v10328_v23 = vld [vmem:[%s15961_s4 + $0x2b8] sm:$0xff]   ;;  %v10338_v31 = vld [vmem:[%s15961_s4 + $0x268] sm:$0xff]   ;;  %v10343_v36 = vld [vmem:[%s15961_s4 + $0x260] sm:$0xff]  }
  0x22   :  { %8287 = vmatprep.subr.bf16.mxu1 %v10270_v37  ;;  %v10333_v28 = vld [vmem:[%s15962_s0 + $0xdc] ss:$100 sps:$4 sm:$0xff]  }
  0x23   :  { %2265 = vmatmul.mubr.bf16.vlgmr.msra.gmra.mxu0 %v10263_v32  ;;  %v10335_v29 = vld [vmem:[%s15962_s0 + $0xd8] ss:$100 sps:$4 sm:$0xff]   ;;  %v10339_v32 = vld [vmem:[%s15961_s4 + $0x2e8] sm:$0xff]   ;;  %v10344_v37 = vld [vmem:[%s15961_s4 + $0x2e0] sm:$0xff]  }
  0x24   :  { %2330 = vmatmul.mubr.bf16.vlgmr.msra.gmra.mxu1 %v10266_v34  ;;  %8248 = vmatpush3.bf16.msra.mxu0 %v10271_v38  ;;  %v10341_v34 = vld [vmem:[%s15961_s4 + $0x228] sm:$0xff]   ;;  %v10345_v38 = vld [vmem:[%s15961_s4 + $0x220] sm:$0xff]  }
  0x25   :  { %8288 = vmatpush3.bf16.msra.mxu1 %v10272_v39  ;;  %8249 = vmatprep.subr.bf16.mxu0 %v10273_v40  ;;  %v10346_v39 = vld [vmem:[%s15961_s4 + $0x2a0] sm:$0xff]  }
  0x26   :  { %8289 = vmatprep.subr.bf16.mxu1 %v10274_v41  ;;  %2272 = vmatprep.mubr.bf16.mxu0 %v10277_v44  ;;  %v10347_v40 = vld [vmem:[%s15962_s0 + $0x1a4] ss:$100 sps:$4 sm:$0xff]   ;;  %v10353_v44 = vld [vmem:[%s15961_s4 + $0x2d8] sm:$0xff]  }
  0x27   :  { %2337 = vmatprep.mubr.bf16.mxu1 %v10279_v45  ;;  %v10349_v41 = vld [vmem:[%s15962_s0 + $0x1a0] ss:$100 sps:$4 sm:$0xff]   ;;  %v10354_v45 = vld [vmem:[%s15962_s0 + $0x1a8] ss:$100 sps:$4 sm:$0xff]  }
  0x28   :  { %8250 = vmatpush3.bf16.msra.mxu0 %v10275_v42  ;;  %v10350_v42 = vld [vmem:[%s15962_s0 + $0x1ac] ss:$100 sps:$4 sm:$0xff]  }
  0x29   :  { %8290 = vmatpush3.bf16.msra.mxu1 %v10276_v43  ;;  %8251 = vmatprep.subr.bf16.mxu0 %v10283_v48  ;;  %v10352_v43 = vld [vmem:[%s15961_s4 + $0x258] sm:$0xff]   ;;  %v10357_v48 = vld [vmem:[%s15961_s4 + $0x250] sm:$0xff]  }
  0x2a   :  { %8291 = vmatprep.subr.bf16.mxu1 %v10284_v49  ;;  %v10358_v49 = vld [vmem:[%s15961_s4 + $0x2d0] sm:$0xff]  }
  0x2b   :  { %2273 = vmatmul.mubr.bf16.gmra.mxu0 %v10281_v46  ;;  %v10355_v46 = vld [vmem:[%s15961_s4 + $0x218] sm:$0xff]  }
  0x2c   :  { %2338 = vmatmul.mubr.bf16.gmra.mxu1 %v10282_v47  ;;  %8252 = vmatpush3.bf16.msra.mxu0 %v10285_v50  ;;  %v10356_v47 = vld [vmem:[%s15961_s4 + $0x298] sm:$0xff]   ;;  %v10359_v50 = vld [vmem:[%s15961_s4 + $0x210] sm:$0xff]  }
  0x2d   :  { %8292 = vmatpush3.bf16.msra.mxu1 %v10286_v51  ;;  %8253 = vmatprep.subr.bf16.mxu0 %v10287_v52  ;;  %v10360_v51 = vld [vmem:[%s15961_s4 + $0x290] sm:$0xff]  }
  0x2e   :  { %8293 = vmatprep.subr.bf16.mxu1 %v10288_v53  ;;  %2280 = vmatprep.mubr.bf16.mxu0 %v10291_v56  ;;  %v10361_v52 = vld [vmem:[%s15962_s0 + $0x26c] ss:$100 sps:$4 sm:$0xff]  }
  0x2f   :  { %2345 = vmatprep.mubr.bf16.mxu1 %v10293_v57  ;;  %v10363_v53 = vld [vmem:[%s15962_s0 + $0x268] ss:$100 sps:$4 sm:$0xff]   ;;  %v10368_v57 = vld [vmem:[%s15962_s0 + $0x270] ss:$100 sps:$4 sm:$0xff]  }
  0x30   :  { %8254 = vmatpush3.bf16.msra.mxu0 %v10289_v54  ;;  %v10364_v54 = vld [vmem:[%s15962_s0 + $0x274] ss:$100 sps:$4 sm:$0xff]   ;;  %v10367_v56 = vld [vmem:[%s15961_s4 + $0x2c8] sm:$0xff]  }
  0x31   :  { %8294 = vmatpush3.bf16.msra.mxu1 %v10290_v55  ;;  %8255 = vmatprep.subr.bf16.mxu0 %v10297_v60  ;;  %v10366_v55 = vld [vmem:[%s15961_s4 + $0x248] sm:$0xff]   ;;  %v10371_v60 = vld [vmem:[%s15961_s4 + $0x240] sm:$0xff]  }
  0x32   :  { %8295 = vmatprep.subr.bf16.mxu1 %v10298_v61  ;;  %v10372_v61 = vld [vmem:[%s15961_s4 + $0x2c0] sm:$0xff]  }
  0x33   :  { %2281 = vmatmul.mubr.bf16.gmra.mxu0 %v10295_v58  ;;  %v10369_v58 = vld [vmem:[%s15961_s4 + $0x208] sm:$0xff]  }
  0x34   :  { %2346 = vmatmul.mubr.bf16.gmra.mxu1 %v10296_v59  ;;  %8256 = vmatpush3.bf16.msra.mxu0 %v10299_v62  ;;  %v10370_v59 = vld [vmem:[%s15961_s4 + $0x288] sm:$0xff]   ;;  %v10373_v62 = vld [vmem:[%s15961_s4 + $0x200] sm:$0xff]  }
  0x35   :  { %8296 = vmatpush3.bf16.msra.mxu1 %v10300_v63  ;;  %8257 = vmatprep.subr.bf16.mxu0 %v10301_v0  ;;  %v10374_v63 = vld [vmem:[%s15961_s4 + $0x280] sm:$0xff]  }
  0x36   :  { %8297 = vmatprep.subr.bf16.mxu1 %v10302_v1  ;;  %2288 = vmatprep.mubr.bf16.mxu0 %v10305_v4  ;;  %v10375_v0 = vld [vmem:[%s15962_s0 + $0x20] ss:$100 sps:$4 sm:$0xff]   ;;  %v10381_v4 = vld [vmem:[%s15961_s4 + $0x378] sm:$0xff]  }
  0x37   :  { %2353 = vmatprep.mubr.bf16.mxu1 %v10307_v5  ;;  %v10377_v1 = vld [vmem:[%s15962_s0 + $0x24] ss:$100 sps:$4 sm:$0xff]   ;;  %v10382_v5 = vld [vmem:[%s15961_s4 + $0x3f8] sm:$0xff]  }
  0x38   :  { %8258 = vmatpush3.bf16.msra.mxu0 %v10303_v2  ;;  %v10378_v2 = vld [vmem:[%s15962_s0 + $0x28] ss:$100 sps:$4 sm:$0xff]  }
  0x39   :  { %8298 = vmatpush3.bf16.msra.mxu1 %v10304_v3  ;;  %8259 = vmatprep.subr.bf16.mxu0 %v10311_v8  ;;  %v10380_v3 = vld [vmem:[%s15962_s0 + $0x2c] ss:$100 sps:$4 sm:$0xff]  }
  0x3a   :  { %8299 = vmatprep.subr.bf16.mxu1 %v10312_v9  ;;  %v10385_v8 = vld [vmem:[%s15961_s4 + $0x370] sm:$0xff]  }
  0x3b   :  { %2289 = vmatmul.mubr.bf16.gmra.mxu0 %v10309_v6  ;;  %v10383_v6 = vld [vmem:[%s15961_s4 + $0x338] sm:$0xff]   ;;  %v10386_v9 = vld [vmem:[%s15961_s4 + $0x3f0] sm:$0xff]  }
  0x3c   :  { %2354 = vmatmul.mubr.bf16.gmra.mxu1 %v10310_v7  ;;  %8260 = vmatpush3.bf16.msra.mxu0 %v10313_v10  ;;  %v10384_v7 = vld [vmem:[%s15961_s4 + $0x3b8] sm:$0xff]   ;;  %v10387_v10 = vld [vmem:[%s15961_s4 + $0x330] sm:$0xff]  }
  0x3d   :  { %8300 = vmatpush3.bf16.msra.mxu1 %v10314_v11  ;;  %8261 = vmatprep.subr.bf16.mxu0 %v10315_v12  ;;  %v10388_v11 = vld [vmem:[%s15961_s4 + $0x3b0] sm:$0xff]  }
  0x3e   :  { %8301 = vmatprep.subr.bf16.mxu1 %v10316_v13  ;;  %2394 = vmatprep.mubr.bf16.mxu0 %v10321_v17  ;;  %v10389_v12 = vld [vmem:[%s15962_s0 + $0xec] ss:$100 sps:$4 sm:$0xff]  }
  0x3f   :  { %2459 = vmatprep.mubr.bf16.mxu1 %v10324_v19  ;;  %v10391_v13 = vld [vmem:[%s15962_s0 + $0xe8] ss:$100 sps:$4 sm:$0xff]   ;;  %v10396_v17 = vld [vmem:[%s15962_s0 + $0xf0] ss:$100 sps:$4 sm:$0xff]  }
  0x40   :  { %8262 = vmatpush3.bf16.msra.mxu0 %v10317_v14  ;;  %v10392_v14 = vld [vmem:[%s15962_s0 + $0xf4] ss:$100 sps:$4 sm:$0xff]   ;;  %v10398_v19 = vld [vmem:[%s15961_s4 + $0x3a8] sm:$0xff]  }
  0x41   :  { %8302 = vmatpush3.bf16.msra.mxu1 %v10318_v15  ;;  %8327 = vmatprep.subr.bf16.mxu0 %v10325_v20  ;;  %v10394_v15 = vld [vmem:[%s15961_s4 + $0x368] sm:$0xff]   ;;  %v10399_v20 = vld [vmem:[%s15961_s4 + $0x360] sm:$0xff]  }
  0x42   :  { %8367 = vmatprep.subr.bf16.mxu1 %v10326_v21  ;;  %v10400_v21 = vld [vmem:[%s15961_s4 + $0x3e0] sm:$0xff]  }
  0x43   :  { %2395 = vmatmul.mubr.bf16.vlgmr.msra.gmra.mxu0 %v10319_v16  ;;  %v10395_v16 = vld [vmem:[%s15961_s4 + $0x3e8] sm:$0xff]  }
  0x44   :  { %2460 = vmatmul.mubr.bf16.vlgmr.msra.gmra.mxu1 %v10322_v18  ;;  %8328 = vmatpush3.bf16.msra.mxu0 %v10327_v22  ;;  %v10397_v18 = vld [vmem:[%s15961_s4 + $0x328] sm:$0xff]   ;;  %v10401_v22 = vld [vmem:[%s15961_s4 + $0x320] sm:$0xff]  }
  0x45   :  { %8368 = vmatpush3.bf16.msra.mxu1 %v10328_v23  ;;  %8329 = vmatprep.subr.bf16.mxu0 %v10329_v24  ;;  %v10402_v23 = vld [vmem:[%s15961_s4 + $0x3a0] sm:$0xff]   ;;  %v10403_v24 = vld [vmem:[%s15962_s0 + $0x1b4] ss:$100 sps:$4 sm:$0xff]  }
  0x46   :  { %8369 = vmatprep.subr.bf16.mxu1 %v10330_v25  ;;  %2402 = vmatprep.mubr.bf16.mxu0 %v10333_v28  ;;  %v10405_v25 = vld [vmem:[%s15962_s0 + $0x1b0] ss:$100 sps:$4 sm:$0xff]   ;;  %v10409_v28 = vld [vmem:[%s15961_s4 + $0x3d8] sm:$0xff]  }
  0x47   :  { %2467 = vmatprep.mubr.bf16.mxu1 %v10336_v30  ;;  %v10411_v30 = vld [vmem:[%s15961_s4 + $0x318] sm:$0xff]  }
  0x48   :  { %8330 = vmatpush3.bf16.msra.mxu0 %v10331_v26  ;;  %v10406_v26 = vld [vmem:[%s15962_s0 + $0x1bc] ss:$100 sps:$4 sm:$0xff]  }
  0x49   :  { %8370 = vmatpush3.bf16.msra.mxu1 %v10332_v27  ;;  %8331 = vmatprep.subr.bf16.mxu0 %v10338_v31  ;;  %v10408_v27 = vld [vmem:[%s15961_s4 + $0x358] sm:$0xff]  }
  0x4a   :  { %8371 = vmatprep.subr.bf16.mxu1 %v10339_v32  ;;  %v10412_v31 = vld [vmem:[%s15961_s4 + $0x398] sm:$0xff]   ;;  %v10413_v32 = vld [vmem:[%s15961_s4 + $0x350] sm:$0xff]  }
  0x4b   :  { %2403 = vmatmul.mubr.bf16.gmra.mxu0 %v10335_v29  ;;  %v10410_v29 = vld [vmem:[%s15962_s0 + $0x1b8] ss:$100 sps:$4 sm:$0xff]  }
  0x4c   :  { %2468 = vmatmul.mubr.bf16.gmra.mxu1 %v10340_v33  ;;  %8332 = vmatpush3.bf16.msra.mxu0 %v10341_v34  ;;  %v10414_v33 = vld [vmem:[%s15961_s4 + $0x3d0] sm:$0xff]  }
  0x4d   :  { %8372 = vmatpush3.bf16.msra.mxu1 %v10342_v35  ;;  %8333 = vmatprep.subr.bf16.mxu0 %v10343_v36  ;;  %v10415_v34 = vld [vmem:[%s15961_s4 + $0x310] sm:$0xff]   ;;  %v10417_v36 = vld [vmem:[%s15962_s0 + $0x27c] ss:$100 sps:$4 sm:$0xff]  }
  0x4e   :  { %8373 = vmatprep.subr.bf16.mxu1 %v10344_v37  ;;  %2410 = vmatprep.mubr.bf16.mxu0 %v10347_v40  ;;  %v10416_v35 = vld [vmem:[%s15961_s4 + $0x390] sm:$0xff]   ;;  %v10419_v37 = vld [vmem:[%s15962_s0 + $0x278] ss:$100 sps:$4 sm:$0xff]   ;;  %v10423_v40 = vld [vmem:[%s15961_s4 + $0x3c8] sm:$0xff]  }
  0x4f   :  { %2475 = vmatprep.mubr.bf16.mxu1 %v10350_v42  ;;  %v10425_v42 = vld [vmem:[%s15961_s4 + $0x308] sm:$0xff]  }
  0x50   :  { %8334 = vmatpush3.bf16.msra.mxu0 %v10345_v38  ;;  %v10420_v38 = vld [vmem:[%s15962_s0 + $0x284] ss:$100 sps:$4 sm:$0xff]  }
  0x51   :  { %8374 = vmatpush3.bf16.msra.mxu1 %v10346_v39  ;;  %8335 = vmatprep.subr.bf16.mxu0 %v10352_v43  ;;  %v10422_v39 = vld [vmem:[%s15961_s4 + $0x348] sm:$0xff]  }
  0x52   :  { %8375 = vmatprep.subr.bf16.mxu1 %v10353_v44  ;;  %v10426_v43 = vld [vmem:[%s15961_s4 + $0x388] sm:$0xff]   ;;  %v10427_v44 = vld [vmem:[%s15961_s4 + $0x340] sm:$0xff]  }
  0x53   :  { %2411 = vmatmul.mubr.bf16.gmra.mxu0 %v10349_v41  ;;  %v10424_v41 = vld [vmem:[%s15962_s0 + $0x280] ss:$100 sps:$4 sm:$0xff]  }
  0x54   :  { %2476 = vmatmul.mubr.bf16.gmra.mxu1 %v10354_v45  ;;  %8336 = vmatpush3.bf16.msra.mxu0 %v10355_v46  ;;  %v10428_v45 = vld [vmem:[%s15961_s4 + $0x3c0] sm:$0xff]  }
  0x55   :  { %8376 = vmatpush3.bf16.msra.mxu1 %v10356_v47  ;;  %8337 = vmatprep.subr.bf16.mxu0 %v10357_v48  ;;  %v10429_v46 = vld [vmem:[%s15961_s4 + $0x300] sm:$0xff]   ;;  %v10431_v48 = vld [vmem:[%s15962_s0 + $0x30] ss:$100 sps:$4 sm:$0xff]  }
  0x56   :  { %8377 = vmatprep.subr.bf16.mxu1 %v10358_v49  ;;  %2418 = vmatprep.mubr.bf16.mxu0 %v10361_v52  ;;  %v10430_v47 = vld [vmem:[%s15961_s4 + $0x380] sm:$0xff]   ;;  %v10433_v49 = vld [vmem:[%s15962_s0 + $0x34] ss:$100 sps:$4 sm:$0xff]  }
  0x57   :  { %2483 = vmatprep.mubr.bf16.mxu1 %v10364_v54  ;;  %v10437_v52 = vld [vmem:[%s15961_s4 + $0x478] sm:$0xff]  }
  0x58   :  { %8338 = vmatpush3.bf16.msra.mxu0 %v10359_v50  ;;  %v10434_v50 = vld [vmem:[%s15962_s0 + $0x38] ss:$100 sps:$4 sm:$0xff]  }
  0x59   :  { %8378 = vmatpush3.bf16.msra.mxu1 %v10360_v51  ;;  %8339 = vmatprep.subr.bf16.mxu0 %v10366_v55  ;;  %v10436_v51 = vld [vmem:[%s15962_s0 + $0x3c] ss:$100 sps:$4 sm:$0xff]  }
  0x5a   :  { %8379 = vmatprep.subr.bf16.mxu1 %v10367_v56  ;;  %v10439_v54 = vld [vmem:[%s15961_s4 + $0x438] sm:$0xff]   ;;  %v10441_v56 = vld [vmem:[%s15961_s4 + $0x470] sm:$0xff]  }
  0x5b   :  { %2419 = vmatmul.mubr.bf16.gmra.mxu0 %v10363_v53  ;;  %v10438_v53 = vld [vmem:[%s15961_s4 + $0x4f8] sm:$0xff]  }
  0x5c   :  { %2484 = vmatmul.mubr.bf16.gmra.mxu1 %v10368_v57  ;;  %8340 = vmatpush3.bf16.msra.mxu0 %v10369_v58  ;;  %v10440_v55 = vld [vmem:[%s15961_s4 + $0x4b8] sm:$0xff]   ;;  %v10442_v57 = vld [vmem:[%s15961_s4 + $0x4f0] sm:$0xff]  }
  0x5d   :  { %8380 = vmatpush3.bf16.msra.mxu1 %v10370_v59  ;;  %8341 = vmatprep.subr.bf16.mxu0 %v10371_v60  ;;  %v10443_v58 = vld [vmem:[%s15961_s4 + $0x430] sm:$0xff]   ;;  %v10445_v60 = vld [vmem:[%s15962_s0 + $0xfc] ss:$100 sps:$4 sm:$0xff]  }
  0x5e   :  { %8381 = vmatprep.subr.bf16.mxu1 %v10372_v61  ;;  %2524 = vmatprep.mubr.bf16.mxu0 %v10377_v1  ;;  %v10444_v59 = vld [vmem:[%s15961_s4 + $0x4b0] sm:$0xff]   ;;  %v10447_v61 = vld [vmem:[%s15962_s0 + $0xf8] ss:$100 sps:$4 sm:$0xff]   ;;  %v10452_v1 = vld [vmem:[%s15962_s0 + $0x100] ss:$100 sps:$4 sm:$0xff]  }
  0x5f   :  { %2589 = vmatprep.mubr.bf16.mxu1 %v10380_v3  ;;  %v10454_v3 = vld [vmem:[%s15961_s4 + $0x4a8] sm:$0xff]  }
  0x60   :  { %8342 = vmatpush3.bf16.msra.mxu0 %v10373_v62  ;;  %v10448_v62 = vld [vmem:[%s15962_s0 + $0x104] ss:$100 sps:$4 sm:$0xff]  }
  0x61   :  { %8382 = vmatpush3.bf16.msra.mxu1 %v10374_v63  ;;  %8407 = vmatprep.subr.bf16.mxu0 %v10381_v4  ;;  %v10450_v63 = vld [vmem:[%s15961_s4 + $0x468] sm:$0xff]   ;;  %v10455_v4 = vld [vmem:[%s15961_s4 + $0x460] sm:$0xff]  }
  0x62   :  { %8447 = vmatprep.subr.bf16.mxu1 %v10382_v5  ;;  %v10456_v5 = vld [vmem:[%s15961_s4 + $0x4e0] sm:$0xff]  }
  0x63   :  { %2525 = vmatmul.mubr.bf16.vlgmr.msra.gmra.mxu0 %v10375_v0  ;;  %v10451_v0 = vld [vmem:[%s15961_s4 + $0x4e8] sm:$0xff]  }
  0x64   :  { %2590 = vmatmul.mubr.bf16.vlgmr.msra.gmra.mxu1 %v10378_v2  ;;  %8408 = vmatpush3.bf16.msra.mxu0 %v10383_v6  ;;  %v10453_v2 = vld [vmem:[%s15961_s4 + $0x428] sm:$0xff]   ;;  %v10457_v6 = vld [vmem:[%s15961_s4 + $0x420] sm:$0xff]  }
  0x65   :  { %8448 = vmatpush3.bf16.msra.mxu1 %v10384_v7  ;;  %8409 = vmatprep.subr.bf16.mxu0 %v10385_v8  ;;  %v10458_v7 = vld [vmem:[%s15961_s4 + $0x4a0] sm:$0xff]  }
  0x66   :  { %8449 = vmatprep.subr.bf16.mxu1 %v10386_v9  ;;  %2532 = vmatprep.mubr.bf16.mxu0 %v10389_v12  ;;  %v10459_v8 = vld [vmem:[%s15962_s0 + $0x1c4] ss:$100 sps:$4 sm:$0xff]   ;;  %v10465_v12 = vld [vmem:[%s15961_s4 + $0x4d8] sm:$0xff]  }
  0x67   :  { %2597 = vmatprep.mubr.bf16.mxu1 %v10392_v14  ;;  %v10461_v9 = vld [vmem:[%s15962_s0 + $0x1c0] ss:$100 sps:$4 sm:$0xff]   ;;  %v10467_v14 = vld [vmem:[%s15961_s4 + $0x418] sm:$0xff]  }
  0x68   :  { %8410 = vmatpush3.bf16.msra.mxu0 %v10387_v10  ;;  %v10462_v10 = vld [vmem:[%s15962_s0 + $0x1cc] ss:$100 sps:$4 sm:$0xff]  }
  0x69   :  { %8450 = vmatpush3.bf16.msra.mxu1 %v10388_v11  ;;  %8411 = vmatprep.subr.bf16.mxu0 %v10394_v15  ;;  %v10464_v11 = vld [vmem:[%s15961_s4 + $0x458] sm:$0xff]  }
  0x6a   :  { %8451 = vmatprep.subr.bf16.mxu1 %v10395_v16  ;;  %v10468_v15 = vld [vmem:[%s15961_s4 + $0x498] sm:$0xff]   ;;  %v10469_v16 = vld [vmem:[%s15961_s4 + $0x450] sm:$0xff]  }
  0x6b   :  { %2533 = vmatmul.mubr.bf16.gmra.mxu0 %v10391_v13  ;;  %v10466_v13 = vld [vmem:[%s15962_s0 + $0x1c8] ss:$100 sps:$4 sm:$0xff]  }
  0x6c   :  { %2598 = vmatmul.mubr.bf16.gmra.mxu1 %v10396_v17  ;;  %8412 = vmatpush3.bf16.msra.mxu0 %v10397_v18  ;;  %v10470_v17 = vld [vmem:[%s15961_s4 + $0x4d0] sm:$0xff]  }
  0x6d   :  { %8452 = vmatpush3.bf16.msra.mxu1 %v10398_v19  ;;  %8413 = vmatprep.subr.bf16.mxu0 %v10399_v20  ;;  %v10471_v18 = vld [vmem:[%s15961_s4 + $0x410] sm:$0xff]  }
  0x6e   :  { %8453 = vmatprep.subr.bf16.mxu1 %v10400_v21  ;;  %2540 = vmatprep.mubr.bf16.mxu0 %v10403_v24  ;;  %v10472_v19 = vld [vmem:[%s15961_s4 + $0x490] sm:$0xff]   ;;  %v10475_v21 = vld [vmem:[%s15962_s0 + $0x288] ss:$100 sps:$4 sm:$0xff]  }
  0x6f   :  { %2605 = vmatprep.mubr.bf16.mxu1 %v10406_v26  ;;  %v10473_v20 = vld [vmem:[%s15962_s0 + $0x28c] ss:$100 sps:$4 sm:$0xff]  }
  0x70   :  { %8414 = vmatpush3.bf16.msra.mxu0 %v10401_v22  ;;  %v10476_v22 = vld [vmem:[%s15962_s0 + $0x294] ss:$100 sps:$4 sm:$0xff]   ;;  %v10479_v24 = vld [vmem:[%s15961_s4 + $0x4c8] sm:$0xff]  }
  0x71   :  { %8454 = vmatpush3.bf16.msra.mxu1 %v10402_v23  ;;  %8415 = vmatprep.subr.bf16.mxu0 %v10408_v27  ;;  %v10478_v23 = vld [vmem:[%s15961_s4 + $0x448] sm:$0xff]  }
  0x72   :  { %8455 = vmatprep.subr.bf16.mxu1 %v10409_v28  ;;  %v10481_v26 = vld [vmem:[%s15961_s4 + $0x408] sm:$0xff]   ;;  %v10483_v28 = vld [vmem:[%s15961_s4 + $0x440] sm:$0xff]  }
  0x73   :  { %2541 = vmatmul.mubr.bf16.gmra.mxu0 %v10405_v25  ;;  %v10480_v25 = vld [vmem:[%s15962_s0 + $0x290] ss:$100 sps:$4 sm:$0xff]   ;;  %v10482_v27 = vld [vmem:[%s15961_s4 + $0x488] sm:$0xff]  }
  0x74   :  { %2606 = vmatmul.mubr.bf16.gmra.mxu1 %v10410_v29  ;;  %8416 = vmatpush3.bf16.msra.mxu0 %v10411_v30  ;;  %v10484_v29 = vld [vmem:[%s15961_s4 + $0x4c0] sm:$0xff]  }
  0x75   :  { %8456 = vmatpush3.bf16.msra.mxu1 %v10412_v31  ;;  %8417 = vmatprep.subr.bf16.mxu0 %v10413_v32  ;;  %v10485_v30 = vld [vmem:[%s15961_s4 + $0x400] sm:$0xff]  }
  0x76   :  { %8457 = vmatprep.subr.bf16.mxu1 %v10414_v33  ;;  %2548 = vmatprep.mubr.bf16.mxu0 %v10417_v36  ;;  %v10486_v31 = vld [vmem:[%s15961_s4 + $0x480] sm:$0xff]   ;;  %v10493_v36 = vld [vmem:[%s15961_s4 + $0x578] sm:$0xff]  }
  0x77   :  { %2613 = vmatprep.mubr.bf16.mxu1 %v10420_v38  ;;  %v10487_v32 = vld [vmem:[%s15962_s0 + $0x40] ss:$100 sps:$4 sm:$0xff]   ;;  %v10495_v38 = vld [vmem:[%s15961_s4 + $0x538] sm:$0xff]  }
  0x78   :  { %8418 = vmatpush3.bf16.msra.mxu0 %v10415_v34  ;;  %v10489_v33 = vld [vmem:[%s15962_s0 + $0x44] ss:$100 sps:$4 sm:$0xff]  }
  0x79   :  { %8458 = vmatpush3.bf16.msra.mxu1 %v10416_v35  ;;  %8419 = vmatprep.subr.bf16.mxu0 %v10422_v39  ;;  %v10490_v34 = vld [vmem:[%s15962_s0 + $0x48] ss:$100 sps:$4 sm:$0xff]   ;;  %v10496_v39 = vld [vmem:[%s15961_s4 + $0x5b8] sm:$0xff]  }
  0x7a   :  { %8459 = vmatprep.subr.bf16.mxu1 %v10423_v40  ;;  %v10492_v35 = vld [vmem:[%s15962_s0 + $0x4c] ss:$100 sps:$4 sm:$0xff]  }
  0x7b   :  { %2549 = vmatmul.mubr.bf16.gmra.mxu0 %v10419_v37  ;;  %v10494_v37 = vld [vmem:[%s15961_s4 + $0x5f8] sm:$0xff]   ;;  %v10497_v40 = vld [vmem:[%s15961_s4 + $0x570] sm:$0xff]  }
  0x7c   :  { %2614 = vmatmul.mubr.bf16.gmra.mxu1 %v10424_v41  ;;  %8420 = vmatpush3.bf16.msra.mxu0 %v10425_v42  ;;  %v10498_v41 = vld [vmem:[%s15961_s4 + $0x5f0] sm:$0xff]  }
  0x7d   :  { %8460 = vmatpush3.bf16.msra.mxu1 %v10426_v43  ;;  %8421 = vmatprep.subr.bf16.mxu0 %v10427_v44  ;;  %v10499_v42 = vld [vmem:[%s15961_s4 + $0x530] sm:$0xff]  }
  0x7e   :  { %8461 = vmatprep.subr.bf16.mxu1 %v10428_v45  ;;  %2654 = vmatprep.mubr.bf16.mxu0 %v10433_v49  ;;  %v10500_v43 = vld [vmem:[%s15961_s4 + $0x5b0] sm:$0xff]   ;;  %v10503_v45 = vld [vmem:[%s15962_s0 + $0x108] ss:$100 sps:$4 sm:$0xff]  }
  0x7f   :  { %2719 = vmatprep.mubr.bf16.mxu1 %v10436_v51  ;;  %v10501_v44 = vld [vmem:[%s15962_s0 + $0x10c] ss:$100 sps:$4 sm:$0xff]  }
  0x80   :  { %8422 = vmatpush3.bf16.msra.mxu0 %v10429_v46  ;;  %v10504_v46 = vld [vmem:[%s15962_s0 + $0x114] ss:$100 sps:$4 sm:$0xff]   ;;  %v10510_v51 = vld [vmem:[%s15961_s4 + $0x5a8] sm:$0xff]  }
  0x81   :  { %8462 = vmatpush3.bf16.msra.mxu1 %v10430_v47  ;;  %8487 = vmatprep.subr.bf16.mxu0 %v10437_v52  ;;  %v10506_v47 = vld [vmem:[%s15961_s4 + $0x568] sm:$0xff]   ;;  %v10508_v49 = vld [vmem:[%s15962_s0 + $0x110] ss:$100 sps:$4 sm:$0xff]   ;;  %v10511_v52 = vld [vmem:[%s15961_s4 + $0x560] sm:$0xff]  }
  0x82   :  { %8527 = vmatprep.subr.bf16.mxu1 %v10438_v53  ;;  %v10512_v53 = vld [vmem:[%s15961_s4 + $0x5e0] sm:$0xff]  }
  0x83   :  { %2655 = vmatmul.mubr.bf16.vlgmr.msra.gmra.mxu0 %v10431_v48  ;;  %v10507_v48 = vld [vmem:[%s15961_s4 + $0x5e8] sm:$0xff]  }
  0x84   :  { %2720 = vmatmul.mubr.bf16.vlgmr.msra.gmra.mxu1 %v10434_v50  ;;  %8488 = vmatpush3.bf16.msra.mxu0 %v10439_v54  ;;  %v10509_v50 = vld [vmem:[%s15961_s4 + $0x528] sm:$0xff]   ;;  %v10513_v54 = vld [vmem:[%s15961_s4 + $0x520] sm:$0xff]  }
  0x85   :  { %8528 = vmatpush3.bf16.msra.mxu1 %v10440_v55  ;;  %8489 = vmatprep.subr.bf16.mxu0 %v10441_v56  ;;  %v10514_v55 = vld [vmem:[%s15961_s4 + $0x5a0] sm:$0xff]   ;;  %v10515_v56 = vld [vmem:[%s15962_s0 + $0x1d4] ss:$100 sps:$4 sm:$0xff]  }
  0x86   :  { %8529 = vmatprep.subr.bf16.mxu1 %v10442_v57  ;;  %2662 = vmatprep.mubr.bf16.mxu0 %v10445_v60  ;;  %v10517_v57 = vld [vmem:[%s15962_s0 + $0x1d0] ss:$100 sps:$4 sm:$0xff]   ;;  %v10521_v60 = vld [vmem:[%s15961_s4 + $0x5d8] sm:$0xff]  }
  0x87   :  { %2727 = vmatprep.mubr.bf16.mxu1 %v10448_v62 }
  0x88   :  { %8490 = vmatpush3.bf16.msra.mxu0 %v10443_v58  ;;  %v10518_v58 = vld [vmem:[%s15962_s0 + $0x1dc] ss:$100 sps:$4 sm:$0xff]  }
  0x89   :  { %8530 = vmatpush3.bf16.msra.mxu1 %v10444_v59  ;;  %8491 = vmatprep.subr.bf16.mxu0 %v10450_v63  ;;  %v10520_v59 = vld [vmem:[%s15961_s4 + $0x558] sm:$0xff]  }
  0x8a   :  { %8531 = vmatprep.subr.bf16.mxu1 %v10451_v0  ;;  %v10523_v63 = vld [vmem:[%s15961_s4 + $0x518] sm:$0xff]  }
  0x8b   :  { %2663 = vmatmul.mubr.bf16.gmra.mxu0 %v10447_v61  ;;  %v10522_v61 = vld [vmem:[%s15962_s0 + $0x1d8] ss:$100 sps:$4 sm:$0xff]  }
  0x8c   :  { %2728 = vmatmul.mubr.bf16.gmra.mxu1 %v10452_v1  ;;  %8492 = vmatpush3.bf16.msra.mxu0 %v10453_v2  ;;  %v10524_v1 = vld [vmem:[%s15961_s4 + $0x598] sm:$0xff]  }
  0x8d   :  { %8532 = vmatpush3.bf16.msra.mxu1 %v10454_v3  ;;  %8493 = vmatprep.subr.bf16.mxu0 %v10455_v4  ;;  %v10525_v3 = vld [vmem:[%s15961_s4 + $0x550] sm:$0xff]  }
  0x8e   :  { %8533 = vmatprep.subr.bf16.mxu1 %v10456_v5  ;;  %2670 = vmatprep.mubr.bf16.mxu0 %v10459_v8 }
  0x8f   :  { %2735 = vmatprep.mubr.bf16.mxu1 %v10462_v10 }
  0x90   :  { %8494 = vmatpush3.bf16.msra.mxu0 %v10457_v6  ;;  %v10526_v6 = vld [vmem:[%s15961_s4 + $0x5d0] sm:$0xff]  }
  0x91   :  { %8534 = vmatpush3.bf16.msra.mxu1 %v10458_v7  ;;  %8495 = vmatprep.subr.bf16.mxu0 %v10464_v11  ;;  %v10528_v11 = vld [vmem:[%s15961_s4 + $0x590] sm:$0xff]  }
  0x92   :  { %8535 = vmatprep.subr.bf16.mxu1 %v10465_v12 }
  0x93   :  { %2671 = vmatmul.mubr.bf16.gmra.mxu0 %v10461_v9  ;;  %v10527_v9 = vld [vmem:[%s15961_s4 + $0x510] sm:$0xff]  }
  0x94   :  { %2736 = vmatmul.mubr.bf16.gmra.mxu1 %v10466_v13  ;;  %8496 = vmatpush3.bf16.msra.mxu0 %v10467_v14  ;;  %v10529_v14 = vld [vmem:[%s15962_s0 + $0x29c] ss:$100 sps:$4 sm:$0xff]  }
  0x95   :  { %8536 = vmatpush3.bf16.msra.mxu1 %v10468_v15  ;;  %8497 = vmatprep.subr.bf16.mxu0 %v10469_v16  ;;  %v10531_v15 = vld [vmem:[%s15962_s0 + $0x298] ss:$100 sps:$4 sm:$0xff]  }
  0x96   :  { %8537 = vmatprep.subr.bf16.mxu1 %v10470_v17  ;;  %2678 = vmatprep.mubr.bf16.mxu0 %v10473_v20  ;;  %v10534_v20 = vld [vmem:[%s15961_s4 + $0x548] sm:$0xff]  }
  0x97   :  { %2743 = vmatprep.mubr.bf16.mxu1 %v10476_v22 }
  0x98   :  { %8498 = vmatpush3.bf16.msra.mxu0 %v10471_v18  ;;  %v10532_v18 = vld [vmem:[%s15962_s0 + $0x2a4] ss:$100 sps:$4 sm:$0xff]  }
  0x99   :  { %8538 = vmatpush3.bf16.msra.mxu1 %v10472_v19  ;;  %8499 = vmatprep.subr.bf16.mxu0 %v10478_v23 }
  0x9a   :  { %8539 = vmatprep.subr.bf16.mxu1 %v10479_v24  ;;  %v10536_v24 = vld [vmem:[%s15962_s0 + $0x2a0] ss:$100 sps:$4 sm:$0xff]  }
  0x9b   :  { %2679 = vmatmul.mubr.bf16.gmra.mxu0 %v10475_v21  ;;  %v10535_v21 = vld [vmem:[%s15961_s4 + $0x5c8] sm:$0xff]  }
  0x9c   :  { %2744 = vmatmul.mubr.bf16.gmra.mxu1 %v10480_v25  ;;  %8500 = vmatpush3.bf16.msra.mxu0 %v10481_v26  ;;  %v10537_v26 = vld [vmem:[%s15961_s4 + $0x508] sm:$0xff]  }
  0x9d   :  { %8540 = vmatpush3.bf16.msra.mxu1 %v10482_v27  ;;  %8501 = vmatprep.subr.bf16.mxu0 %v10483_v28  ;;  %v10538_v28 = vld [vmem:[%s15961_s4 + $0x588] sm:$0xff]  }
  0x9e   :  { %8541 = vmatprep.subr.bf16.mxu1 %v10484_v29  ;;  %2784 = vmatprep.mubr.bf16.mxu0 %v10489_v33 }
  0x9f   :  { %2849 = vmatprep.mubr.bf16.mxu1 %v10492_v35 }
  0xa0   :  { %8502 = vmatpush3.bf16.msra.mxu0 %v10485_v30 }
  0xa1   :  { %8542 = vmatpush3.bf16.msra.mxu1 %v10486_v31  ;;  %8567 = vmatprep.subr.bf16.mxu0 %v10493_v36  ;;  %v10539_v31 = vld [vmem:[%s15961_s4 + $0x540] sm:$0xff]  }
  0xa2   :  { %8607 = vmatprep.subr.bf16.mxu1 %v10494_v37  ;;  %v10541_v36 = vld [vmem:[%s15961_s4 + $0x500] sm:$0xff]  }
  0xa3   :  { %2785 = vmatmul.mubr.bf16.vlgmr.msra.gmra.mxu0 %v10487_v32 }
  0xa4   :  { %2850 = vmatmul.mubr.bf16.vlgmr.msra.gmra.mxu1 %v10490_v34  ;;  %8568 = vmatpush3.bf16.msra.mxu0 %v10495_v38  ;;  %v10540_v34 = vld [vmem:[%s15961_s4 + $0x5c0] sm:$0xff]  }
  0xa5   :  { %8608 = vmatpush3.bf16.msra.mxu1 %v10496_v39  ;;  %8569 = vmatprep.subr.bf16.mxu0 %v10497_v40  ;;  %v10542_v39 = vld [vmem:[%s15961_s4 + $0x580] sm:$0xff]  }
  0xa6   :  { %8609 = vmatprep.subr.bf16.mxu1 %v10498_v41  ;;  %2792 = vmatprep.mubr.bf16.mxu0 %v10501_v44 }
  0xa7   :  { %2857 = vmatprep.mubr.bf16.mxu1 %v10504_v46  ;;  %v10548_v46 = vld [vmem:[%s15962_s0 + $0x5c] ss:$100 sps:$4 sm:$0xff]  }
  0xa8   :  { %8570 = vmatpush3.bf16.msra.mxu0 %v10499_v42  ;;  %v10543_v42 = vld [vmem:[%s15962_s0 + $0x50] ss:$100 sps:$4 sm:$0xff]  }
  0xa9   :  { %8610 = vmatpush3.bf16.msra.mxu1 %v10500_v43  ;;  %8571 = vmatprep.subr.bf16.mxu0 %v10506_v47  ;;  %v10545_v43 = vld [vmem:[%s15962_s0 + $0x54] ss:$100 sps:$4 sm:$0xff]  }
  0xaa   :  { %8611 = vmatprep.subr.bf16.mxu1 %v10507_v48  ;;  %v10549_v47 = vld [vmem:[%s15961_s4 + $0x638] sm:$0xff]  }
  0xab   :  { %2793 = vmatmul.mubr.bf16.gmra.mxu0 %v10503_v45  ;;  %v10546_v45 = vld [vmem:[%s15962_s0 + $0x58] ss:$100 sps:$4 sm:$0xff]  }
  0xac   :  { %2858 = vmatmul.mubr.bf16.gmra.mxu1 %v10508_v49  ;;  %8572 = vmatpush3.bf16.msra.mxu0 %v10509_v50  ;;  %v11023_v48 = vld [vmem:[%s15961_s4 + $0x78] sm:$0xff]   ;;  %v10550_v50 = vld [vmem:[%s15961_s4 + $0x630] sm:$0xff]  }
  0xad   :  { %8612 = vmatpush3.bf16.msra.mxu1 %v10510_v51  ;;  %8573 = vmatprep.subr.bf16.mxu0 %v10511_v52  ;;  %v10551_v52 = vld [vmem:[%s15962_s0 + $0x11c] ss:$100 sps:$4 sm:$0xff]  }
  0xae   :  { %8613 = vmatprep.subr.bf16.mxu1 %v10512_v53  ;;  %2800 = vmatprep.mubr.bf16.mxu0 %v10515_v56  ;;  %v11025_v56 = vld [vmem:[%s15961_s4 + $0x70] sm:$0xff]  }
  0xaf   :  { %2865 = vmatprep.mubr.bf16.mxu1 %v10518_v58 }
  0xb0   :  { %8574 = vmatpush3.bf16.msra.mxu0 %v10513_v54  ;;  %v11024_v54 = vld [vmem:[%s15961_s4 + $0x38] sm:$0xff]  }
  0xb1   :  { %8614 = vmatpush3.bf16.msra.mxu1 %v10514_v55  ;;  %8575 = vmatprep.subr.bf16.mxu0 %v10520_v59 }
  0xb2   :  { %8615 = vmatprep.subr.bf16.mxu1 %v10521_v60  ;;  %v10553_v60 = vld [vmem:[%s15962_s0 + $0x118] ss:$100 sps:$4 sm:$0xff]  }
  0xb3   :  { %2801 = vmatmul.mubr.bf16.gmra.mxu0 %v10517_v57  ;;  %v10554_v57 = vld [vmem:[%s15962_s0 + $0x124] ss:$100 sps:$4 sm:$0xff]  }
  0xb4   :  { %2866 = vmatmul.mubr.bf16.gmra.mxu1 %v10522_v61  ;;  %8576 = vmatpush3.bf16.msra.mxu0 %v10523_v63  ;;  %v10556_v61 = vld [vmem:[%s15961_s4 + $0x628] sm:$0xff]  }
  0xb5   :  { %8616 = vmatpush3.bf16.msra.mxu1 %v10524_v1  ;;  %8577 = vmatprep.subr.bf16.mxu0 %v10525_v3  ;;  %v10559_v3 = vld [vmem:[%s15962_s0 + $0x1e4] ss:$100 sps:$4 sm:$0xff]  }
  0xb6   :  { %8617 = vmatprep.subr.bf16.mxu1 %v10526_v6  ;;  %2808 = vmatprep.mubr.bf16.mxu0 %v10529_v14  ;;  %v11027_v6 = vld [vmem:[%s15961_s4 + $0x68] sm:$0xff]  }
  0xb7   :  { %2873 = vmatprep.mubr.bf16.mxu1 %v10532_v18 }
  0xb8   :  { %8578 = vmatpush3.bf16.msra.mxu0 %v10527_v9 }
  0xb9   :  { %8618 = vmatpush3.bf16.msra.mxu1 %v10528_v11  ;;  %8579 = vmatprep.subr.bf16.mxu0 %v10534_v20  ;;  %v10565_v20 = vld [vmem:[%s15962_s0 + $0x1e8] ss:$100 sps:$4 sm:$0xff]  }
  0xba   :  { %8619 = vmatprep.subr.bf16.mxu1 %v10535_v21  ;;  %v10567_v21 = vld [vmem:[%s15962_s0 + $0x2ac] ss:$100 sps:$4 sm:$0xff]  }
  0xbb   :  { %2809 = vmatmul.mubr.bf16.gmra.mxu0 %v10531_v15  ;;  %v11029_v15 = vld [vmem:[%s15961_s4 + $0x60] sm:$0xff]  }
  0xbc   :  { %2874 = vmatmul.mubr.bf16.gmra.mxu1 %v10536_v24  ;;  %8580 = vmatpush3.bf16.msra.mxu0 %v10537_v26 }
  0xbd   :  { %8620 = vmatpush3.bf16.msra.mxu1 %v10538_v28  ;;  %8581 = vmatprep.subr.bf16.mxu0 %v10539_v31  ;;  %v11031_v28 = vld [vmem:[%s15961_s4 + $0x58] sm:$0xff]  }
  0xbe   :  { %8621 = vmatprep.subr.bf16.mxu1 %v10540_v34  ;;  %2914 = vmatprep.mubr.bf16.mxu0 %v10545_v43 }
  0xbf   :  { %2979 = vmatprep.mubr.bf16.mxu1 %v10548_v46 }
  0xc0   :  { %8582 = vmatpush3.bf16.msra.mxu0 %v10541_v36  ;;  %v11032_v36 = vld [vmem:[%s15961_s4 + $0x18] sm:$0xff]  }
  0xc1   :  { %8622 = vmatpush3.bf16.msra.mxu1 %v10542_v39  ;;  %10135 = vmatprep.subr.bf16.mxu0 %v10549_v47 }
  0xc2   :  { %8659 = vmatprep.subr.bf16.mxu1 %v11023_v48  ;;  %v11035_v48 = vld [vmem:[%s15961_s4 + $0x48] sm:$0xff]  }
  0xc3   :  { %2915 = vmatmul.mubr.bf16.vlgmr.msra.gmra.mxu0 %v10543_v42  ;;  %v10569_v42 = vld [vmem:[%s15962_s0 + $0x2a8] ss:$100 sps:$4 sm:$0xff]  }
  0xc4   :  { %2980 = vmatmul.mubr.bf16.vlgmr.msra.gmra.mxu1 %v10546_v45  ;;  %10136 = vmatpush3.bf16.msra.mxu0 %v10549_v47  ;;  %v10575_v45 = vld [vmem:[%s15962_s0 + $0x60] ss:$100 sps:$4 sm:$0xff]   ;;  %v11034_v47 = vld [vmem:[%s15961_s4 + $0x10] sm:$0xff]  }
  0xc5   :  { %8660 = vmatpush3.bf16.msra.mxu1 %v11024_v54  ;;  %10137 = vmatprep.subr.bf16.mxu0 %v10550_v50 }
  0xc6   :  { %8661 = vmatprep.subr.bf16.mxu1 %v11025_v56  ;;  %2922 = vmatprep.mubr.bf16.mxu0 %v10551_v52 }
  0xc7   :  { %2987 = vmatprep.mubr.bf16.mxu1 %v10554_v57  ;;  %v11036_v57 = vld [vmem:[%s15961_s4 + $0x8] sm:$0xff]  }
  0xc8   :  { %10138 = vmatpush3.bf16.msra.mxu0 %v10550_v50  ;;  %v10574_v50 = vld [vmem:[%s15961_s4 + $0x600] sm:$0xff]  }
  0xc9   :  { %10139 = vmatprep.subr.bf16.mxu0 %v10556_v61 }
  0xcb   :  { %2923 = vmatmul.mubr.bf16.gmra.mxu0 %v10553_v60  ;;  %v11037_v60 = vld [vmem:[%s15961_s4 + $0x40] sm:$0xff]  }
  0xcc   :  { %2930 = vmatprep.mubr.bf16.mxu0 %v10559_v3  ;;  %10140 = vmatpush3.bf16.msra.mxu0 %v10556_v61  ;;  %v11038_v3 = vld [vmem:[%s15961_s4] sm:$0xff]  }
  0xe3   :  { %v8183_v62 = vpop.f32.mrf.mxu0 }
  0xe4   :  { %v8223_v0 = vpop.f32.mrf.mxu1 }
  0xe5   :  { %v8184_v2 = vpop.f32.mrf.mxu0 }
  0xe6   :  { %v8185_v4 = vadd.f32 %v8184_v2, %v8183_v62  ;;  %v8224_v5 = vpop.f32.mrf.mxu1  ;;  %v11026_v2 = vld [vmem:[%s15961_s4 + $0x30] sm:$0xff]  }
  0xe7   :  { %v8225_v7 = vadd.f32 %v8224_v5, %v8223_v0  ;;  %v8186_v8 = vpop.f32.mrf.mxu0  ;;  %v10557_v0 = vld [vmem:[%s15962_s0 + $0x120] ss:$100 sps:$4 sm:$0xff]   ;;  %8662 = vmatpush3.bf16.msra.mxu1 %v11026_v2 }
  0xe8   :  { %v8226_v10 = vpop.f32.mrf.mxu1  ;;  %8663 = vmatprep.subr.bf16.mxu1 %v11027_v6  ;;  %2988 = vmatmul.mubr.bf16.gmra.mxu1 %v10557_v0 }
  0xe9   :  { %v12438_v12 = vadd.f32 %v8225_v7, %v8185_v4  ;;  %v8187_v13 = vpop.f32.mrf.mxu0  ;;  %v10558_v7 = vld [vmem:[%s15961_s4 + $0x620] sm:$0xff]  }
  0xea   :  { %v8188_v16 = vadd.f32 %v8187_v13, %v8186_v8  ;;  %v8227_v17 = vpop.f32.mrf.mxu1  ;;  %v11028_v13 = vld [vmem:[%s15961_s4 + $0x28] sm:$0xff]   ;;  %10141 = vmatprep.subr.bf16.mxu0 %v10558_v7 }
  0xeb   :  { %v8228_v19 = vadd.f32 %v8227_v17, %v8226_v10  ;;  %v8189_v23 = vpop.f32.mrf.mxu0  ;;  %v10562_v10 = vld [vmem:[%s15962_s0 + $0x1ec] ss:$100 sps:$4 sm:$0xff]   ;;  %8664 = vmatpush3.bf16.msra.mxu1 %v11028_v13  ;;  %10142 = vmatpush3.bf16.msra.mxu0 %v10558_v7  ;;  %v11039_v7 = vld [vmem:[%s15961_s4 + $0xf8] sm:$0xff]  }
  0xec   :  { %v8229_v25 = vpop.f32.mrf.mxu1  ;;  %8665 = vmatprep.subr.bf16.mxu1 %v11029_v15  ;;  %2995 = vmatprep.mubr.bf16.mxu1 %v10562_v10  ;;  %v10582_v10 = vld [vmem:[%s15963_s1 + $0xcc] ss:$100 sps:$4 sm:$0xff]   ;;  %v11041_v13 = vld [vmem:[%s15961_s4 + $0xb8] sm:$0xff]  }
  0xed   :  { %v12455_v22 = vadd.f32 %v8228_v19, %v8188_v16  ;;  %v8190_v27 = vpop.f32.mrf.mxu0  ;;  %v10564_v16 = vld [vmem:[%s15961_s4 + $0x618] sm:$0xff]   ;;  %v10561_v19 = vld [vmem:[%s15962_s0 + $0x1e0] ss:$100 sps:$4 sm:$0xff]  }
  0xee   :  { %v8191_v29 = vadd.f32 %v8190_v27, %v8189_v23  ;;  %v8230_v30 = vpop.f32.mrf.mxu1  ;;  %10143 = vmatprep.subr.bf16.mxu0 %v10564_v16  ;;  %2931 = vmatmul.mubr.bf16.gmra.mxu0 %v10561_v19  ;;  %v11042_v15 = vld [vmem:[%s15961_s4 + $0x138] sm:$0xff]   ;;  %v11044_v19 = vld [vmem:[%s15961_s4 + $0x170] sm:$0xff]  }
  0xef   :  { %v8231_v32 = vadd.f32 %v8230_v30, %v8229_v25  ;;  %v8192_v33 = vpop.f32.mrf.mxu0  ;;  %v11030_v25 = vld [vmem:[%s15961_s4 + $0x20] sm:$0xff]   ;;  %2938 = vmatprep.mubr.bf16.mxu0 %v10567_v21  ;;  %10144 = vmatpush3.bf16.msra.mxu0 %v10564_v16 }
  0xf0   :  { %v8232_v35 = vpop.f32.mrf.mxu1  ;;  %8666 = vmatpush3.bf16.msra.mxu1 %v11030_v25  ;;  %v10584_v25 = vld [vmem:[%s15963_s1 + $0xc8] ss:$100 sps:$4 sm:$0xff]  }
  0xf1   :  { %v12475_v37 = vadd.f32 %v8231_v32, %v8191_v29  ;;  %v8193_v38 = vpop.f32.mrf.mxu0  ;;  %8667 = vmatprep.subr.bf16.mxu1 %v11031_v28  ;;  %v10566_v29 = vld [vmem:[%s15961_s4 + $0x610] sm:$0xff]   ;;  %2996 = vmatmul.mubr.bf16.gmra.mxu1 %v10565_v20 }
  0xf2   :  { %v8194_v40 = vadd.f32 %v8193_v38, %v8192_v33  ;;  %v8233_v41 = vpop.f32.mrf.mxu1  ;;  %v10570_v32 = vld [vmem:[%s15962_s0 + $0x2b4] ss:$100 sps:$4 sm:$0xff]   ;;  %10145 = vmatprep.subr.bf16.mxu0 %v10566_v29 }
  0xf3   :  { %v8234_v44 = vadd.f32 %v8233_v41, %v8232_v35  ;;  %v8195_v51 = vpop.f32.mrf.mxu0  ;;  %v10572_v41 = vld [vmem:[%s15961_s4 + $0x608] sm:$0xff]   ;;  %3003 = vmatprep.mubr.bf16.mxu1 %v10570_v32  ;;  %10146 = vmatpush3.bf16.msra.mxu0 %v10566_v29  ;;  %v11045_v28 = vld [vmem:[%s15961_s4 + $0xb0] sm:$0xff]  }
  0xf4   :  { %v8235_v53 = vpop.f32.mrf.mxu1  ;;  %8668 = vmatpush3.bf16.msra.mxu1 %v11032_v36  ;;  %10147 = vmatprep.subr.bf16.mxu0 %v10572_v41  ;;  %v11046_v29 = vld [vmem:[%s15961_s4 + $0x130] sm:$0xff]   ;;  %v11047_v32 = vld [vmem:[%s15961_s4 + $0xe8] sm:$0xff]  }
  0xf5   :  { %v12498_v49 = vadd.f32 %v8234_v44, %v8194_v40  ;;  %v8196_v55 = vpop.f32.mrf.mxu0  ;;  %v11033_v40 = vld [vmem:[%s15961_s4 + $0x50] sm:$0xff]  }
  0xf6   :  { %v8197_v58 = vadd.f32 %v8196_v55, %v8195_v51  ;;  %v8236_v59 = vpop.f32.mrf.mxu1  ;;  %8669 = vmatprep.subr.bf16.mxu1 %v11033_v40  ;;  %v10573_v44 = vld [vmem:[%s15962_s0 + $0x2b0] ss:$100 sps:$4 sm:$0xff]   ;;  %2939 = vmatmul.mubr.bf16.gmra.mxu0 %v10569_v42  ;;  %v11049_v42 = vld [vmem:[%s15961_s4 + $0xa8] sm:$0xff]  }
  0xf7   :  { %v8237_v62 = vadd.f32 %v8236_v59, %v8235_v53  ;;  %v8198_v63 = vpop.f32.mrf.mxu0  ;;  %v10579_v53 = vld [vmem:[%s15963_s1 + $0x4] ss:$100 sps:$4 sm:$0xff]   ;;  %10151 = vmatprep.mubr.bf16.mxu0 %v10575_v45  ;;  %10148 = vmatpush3.bf16.msra.mxu0 %v10572_v41 }
  0xf8   :  { %v8238_v1 = vpop.f32.mrf.mxu1  ;;  %8670 = vmatpush3.bf16.msra.mxu1 %v11034_v47  ;;  %10149 = vmatprep.subr.bf16.mxu0 %v10574_v50 }
  0xf9   :  { %v12530_v4 = vadd.f32 %v8237_v62, %v8197_v58  ;;  %v8199_v5 = vpop.f32.mrf.mxu0  ;;  %8671 = vmatprep.subr.bf16.mxu1 %v11035_v48  ;;  %3004 = vmatmul.mubr.bf16.gmra.mxu1 %v10573_v44  ;;  %v11050_v44 = vld [vmem:[%s15961_s4 + $0x128] sm:$0xff]  }
  0xfa   :  { %v8200_v8 = vadd.f32 %v8199_v5, %v8198_v63  ;;  %v8239_v9 = vpop.f32.mrf.mxu1  ;;  %3717 = vmatprep.mubr.bf16.mxu1 %v10579_v53  ;;  %v11053_v53 = vld [vmem:[%s15961_s4 + $0xa0] sm:$0xff]  }
  0xfb   :  { %v8240_v11 = vadd.f32 %v8239_v9, %v8238_v1  ;;  %v8201_v17 = vpop.f32.mrf.mxu0  ;;  %v10576_v1 = vld [vmem:[%s15962_s0 + $0x128] ss:$100 sps:$4 sm:$0xff]   ;;  %10150 = vmatpush3.bf16.msra.mxu0 %v10574_v50  ;;  %v10580_v9 = vld [vmem:[%s15962_s0 + $0x1f0] ss:$100 sps:$4 sm:$0xff]  }
  0xfc   :  { %v8241_v18 = vpop.f32.mrf.mxu1  ;;  %8672 = vmatpush3.bf16.msra.mxu1 %v11036_v57  ;;  %8699 = vmatprep.subr.bf16.mxu0 %v11039_v7  ;;  %v10587_v50 = vld [vmem:[%s15963_s1 + $0x190] ss:$100 sps:$4 sm:$0xff]   ;;  %v11056_v57 = vld [vmem:[%s15961_s4 + $0x158] sm:$0xff]  }
  0xfd   :  { %v12544_v14 = vadd.f32 %v8240_v11, %v8200_v8  ;;  %v8202_v23 = vpop.f32.mrf.mxu0  ;;  %8673 = vmatprep.subr.bf16.mxu1 %v11037_v60  ;;  %v11040_v8 = vld [vmem:[%s15961_s4 + $0x178] sm:$0xff]  }
  0xfe   :  { %v8242_v24 = vpop.f32.mrf.mxu1  ;;  %v8203_v26 = vadd.f32 %v8202_v23, %v8201_v17  ;;  %10152 = vmatmul.mubr.bf16.vlgmr.msra.gmra.mxu0 %v10576_v1  ;;  %v10588_v60 = vld [vmem:[%s15963_s1 + $0x25c] ss:$100 sps:$4 sm:$0xff]  }
  0xff   :  { %v8243_v27 = vadd.f32 %v8242_v24, %v8241_v18  ;;  %v8204_v30 = vpop.f32.mrf.mxu0  ;;  %8700 = vmatpush3.bf16.msra.mxu0 %v11041_v13  ;;  %v11043_v18 = vld [vmem:[%s15961_s4 + $0xf0] sm:$0xff]   ;;  %10155 = vmatprep.mubr.bf16.mxu0 %v10580_v9  ;;  %v10581_v24 = vld [vmem:[%s15962_s0 + $0x2b8] ss:$100 sps:$4 sm:$0xff]  }
 0x100   :  { %v8244_v31 = vpop.f32.mrf.mxu1  ;;  %8674 = vmatpush3.bf16.msra.mxu1 %v11038_v3  ;;  %8701 = vmatprep.subr.bf16.mxu0 %v11043_v18  ;;  %v11059_v3 = vld [vmem:[%s15961_s4 + $0xd0] sm:$0xff]   ;;  %v10590_v9 = vld [vmem:[%s15963_s1 + $0x258] ss:$100 sps:$4 sm:$0xff]  }
 0x101   :  { %v12573_v33 = vadd.f32 %v8243_v27, %v8203_v26  ;;  %v8205_v34 = vpop.f32.mrf.mxu0  ;;  %8739 = vmatprep.subr.bf16.mxu1 %v11040_v8  ;;  %v11062_v13 = vld [vmem:[%s15961_s4 + $0x110] sm:$0xff]  }
 0x102   :  { %v8245_v35 = vpop.f32.mrf.mxu1  ;;  %v8206_v38 = vadd.f32 %v8205_v34, %v8204_v30  ;;  %v10585_v34 = vld [vmem:[%s15963_s1 + $0x194] ss:$100 sps:$4 sm:$0xff]  }
 0x103   :  { %v8246_v39 = vadd.f32 %v8245_v35, %v8244_v31  ;;  %v8263_v46 = vpop.f32.mrf.mxu0  ;;  %8702 = vmatpush3.bf16.msra.mxu0 %v11045_v28  ;;  %v10596_v18 = vld [vmem:[%s15963_s1 + $0x14] ss:$100 sps:$4 sm:$0xff]   ;;  %v11068_v28 = vld [vmem:[%s15961_s4 + $0x140] sm:$0xff]  }
 0x104   :  { %v8303_v52 = vpop.f32.mrf.mxu1  ;;  %8703 = vmatprep.subr.bf16.mxu0 %v11047_v32 }
 0x105   :  { %v12587_v43 = vadd.f32 %v8246_v39, %v8206_v38  ;;  %v8264_v51 = vpop.f32.mrf.mxu0  ;;  %v10593_v38 = vld [vmem:[%s15963_s1 + $0xc] ss:$100 sps:$4 sm:$0xff]  }
 0x106   :  { %v8265_v54 = vadd.f32 %v8264_v51, %v8263_v46  ;;  %v8304_v56 = vpop.f32.mrf.mxu1  ;;  %10156 = vmatmul.mubr.bf16.gmra.mxu0 %v10581_v24  ;;  %v11051_v46 = vld [vmem:[%s15961_s4 + $0xe0] sm:$0xff]   ;;  %v11066_v24 = vld [vmem:[%s15961_s4 + $0x108] sm:$0xff]  }
 0x107   :  { %v8266_v55 = vpop.f32.mrf.mxu0  ;;  %v8305_v59 = vadd.f32 %v8304_v56, %v8303_v52  ;;  %8704 = vmatpush3.bf16.msra.mxu0 %v11049_v42  ;;  %3782 = vmatprep.mubr.bf16.mxu0 %v10593_v38  ;;  %v11055_v56 = vld [vmem:[%s15961_s4 + $0xd8] sm:$0xff]   ;;  %v11070_v38 = vld [vmem:[%s15961_s4 + $0x100] sm:$0xff]  }
 0x108   :  { %v2397_v58 = vadd.f32 %v8265_v54, %v12438_v12  ;;  %v8306_v62 = vpop.f32.mrf.mxu1  ;;  %v10577_v12 = vld [vmem:[%s15963_s1] ss:$100 sps:$4 sm:$0xff]   ;;  %8705 = vmatprep.subr.bf16.mxu0 %v11051_v46  ;;  %v11072_v42 = vld [vmem:[%s15961_s4 + $0x278] sm:$0xff]  }
 0x109   :  { %v8267_v61 = vpop.f32.mrf.mxu0  ;;  %3718 = vmatmul.mubr.bf16.vlgmr.msra.gmra.mxu1 %v10577_v12  ;;  %v11054_v54 = vld [vmem:[%s15961_s4 + $0x120] sm:$0xff]   ;;  %v11057_v12 = vld [vmem:[%s15961_s4 + $0x98] sm:$0xff]  }
 0x10a   :  { %v12614_v63 = vadd.f32 %v8305_v59, %v2397_v58  ;;  %v8268_v0 = vadd.f32 %v8267_v61, %v8266_v55  ;;  %v8307_v2 = vpop.f32.mrf.mxu1  ;;  %8740 = vmatpush3.bf16.msra.mxu1 %v11042_v15  ;;  %3725 = vmatprep.mubr.bf16.mxu1 %v10582_v10 }
 0x10b   :  { %v8308_v6 = vadd.f32 %v8307_v2, %v8306_v62  ;;  %8741 = vmatprep.subr.bf16.mxu1 %v11044_v19  ;;  %8706 = vmatpush3.bf16.msra.mxu0 %v11053_v53  ;;  %v11058_v2 = vld [vmem:[%s15961_s4 + $0x118] sm:$0xff]   ;;  %v11075_v53 = vld [vmem:[%s15961_s4 + $0x1f0] sm:$0xff]  }
 0x10c   :  { %v2400_v5 = vadd.f32 %v8268_v0, %v12455_v22  ;;  %v8269_v22 = vpop.f32.mrf.mxu0  ;;  %v8309_v17 = vpop.f32.mrf.mxu1  ;;  %8707 = vmatprep.subr.bf16.mxu0 %v11055_v56 }
 0x10e   :  { %v12638_v11 = vadd.f32 %v8308_v6, %v2400_v5  ;;  %v8270_v16 = vpop.f32.mrf.mxu0  ;;  %v8310_v23 = vpop.f32.mrf.mxu1  ;;  %8742 = vmatpush3.bf16.msra.mxu1 %v11046_v29  ;;  %v11060_v5 = vld [vmem:[%s15961_s4 + $0x150] sm:$0xff]  }
 0x10f   :  { %v8271_v20 = vadd.f32 %v8270_v16, %v8269_v22  ;;  %v8311_v27 = vadd.f32 %v8310_v23, %v8309_v17  ;;  %8708 = vmatpush3.bf16.msra.mxu0 %v11057_v12  ;;  %v11061_v22 = vld [vmem:[%s15961_s4 + $0x90] sm:$0xff]   ;;  %v11064_v16 = vld [vmem:[%s15961_s4 + $0x148] sm:$0xff]  }
 0x110   :  { %v8272_v21 = vpop.f32.mrf.mxu0  ;;  %v8312_v31 = vpop.f32.mrf.mxu1  ;;  %8709 = vmatprep.subr.bf16.mxu0 %v11059_v3  ;;  %v11065_v23 = vld [vmem:[%s15961_s4 + $0x88] sm:$0xff]   ;;  %v10605_v3 = vld [vmem:[%s15963_s1 + $0x19c] ss:$100 sps:$4 sm:$0xff]  }
 0x111   :  { %v2405_v26 = vadd.f32 %v8271_v20, %v12475_v37  ;;  %v11048_v37 = vld [vmem:[%s15961_s4 + $0x168] sm:$0xff]   ;;  %3726 = vmatmul.mubr.bf16.gmra.mxu1 %v10584_v25 }
 0x112   :  { %v8273_v30 = vpop.f32.mrf.mxu0  ;;  %8743 = vmatprep.subr.bf16.mxu1 %v11048_v37  ;;  %v8313_v39 = vpop.f32.mrf.mxu1  ;;  %3733 = vmatprep.mubr.bf16.mxu1 %v10585_v34  ;;  %v10594_v37 = vld [vmem:[%s15963_s1 + $0x10] ss:$100 sps:$4 sm:$0xff]  }
 0x113   :  { %v12674_v35 = vadd.f32 %v8311_v27, %v2405_v26  ;;  %v8274_v36 = vadd.f32 %v8273_v30, %v8272_v21  ;;  %v8314_v41 = vadd.f32 %v8313_v39, %v8312_v31  ;;  %8744 = vmatpush3.bf16.msra.mxu1 %v11050_v44  ;;  %8710 = vmatpush3.bf16.msra.mxu0 %v11061_v22  ;;  %v11067_v27 = vld [vmem:[%s15961_s4 + $0xc0] sm:$0xff]   ;;  %v10597_v44 = vld [vmem:[%s15963_s1 + $0xd4] ss:$100 sps:$4 sm:$0xff]   ;;  %v11081_v22 = vld [vmem:[%s15961_s4 + $0x1a8] sm:$0xff]  }
 0x114   :  { %v8275_v45 = vpop.f32.mrf.mxu0  ;;  %v8315_v52 = vpop.f32.mrf.mxu1 }
 0x115   :  { %v2408_v40 = vadd.f32 %v8274_v36, %v12498_v49  ;;  %v11052_v49 = vld [vmem:[%s15961_s4 + $0x160] sm:$0xff]  }
 0x116   :  { %8745 = vmatprep.subr.bf16.mxu1 %v11052_v49  ;;  %v8276_v48 = vpop.f32.mrf.mxu0  ;;  %v8316_v59 = vpop.f32.mrf.mxu1  ;;  %v11069_v36 = vld [vmem:[%s15961_s4 + $0x80] sm:$0xff]  }
 0x117   :  { %v12692_v47 = vadd.f32 %v8314_v41, %v2408_v40  ;;  %v8277_v51 = vadd.f32 %v8276_v48, %v8275_v45  ;;  %8746 = vmatpush3.bf16.msra.mxu1 %v11054_v54  ;;  %v8317_v61 = vadd.f32 %v8316_v59, %v8315_v52  ;;  %v11071_v41 = vld [vmem:[%s15961_s4 + $0x1f8] sm:$0xff]   ;;  %v11076_v54 = vld [vmem:[%s15961_s4 + $0x270] sm:$0xff]  }
 0x118   :  { %v8278_v55 = vpop.f32.mrf.mxu0  ;;  %8747 = vmatprep.subr.bf16.mxu1 %v11056_v57  ;;  %v8318_v1 = vpop.f32.mrf.mxu1  ;;  %v10599_v59 = vld [vmem:[%s15963_s1 + $0xd0] ss:$100 sps:$4 sm:$0xff]  }
 0x119   :  { %v2413_v58 = vadd.f32 %v8277_v51, %v12530_v4  ;;  %3734 = vmatmul.mubr.bf16.gmra.mxu1 %v10587_v50  ;;  %v11073_v50 = vld [vmem:[%s15961_s4 + $0x1b8] sm:$0xff]  }
 0x11a   :  { %v8279_v62 = vpop.f32.mrf.mxu0  ;;  %v8319_v7 = vpop.f32.mrf.mxu1  ;;  %3741 = vmatprep.mubr.bf16.mxu1 %v10588_v60  ;;  %v11074_v51 = vld [vmem:[%s15961_s4 + $0x238] sm:$0xff]  }
 0x11b   :  { %v8280_v0 = vadd.f32 %v8279_v62, %v8278_v55  ;;  %8748 = vmatpush3.bf16.msra.mxu1 %v11058_v2  ;;  %v12719_v4 = vadd.f32 %v8317_v61, %v2413_v58  ;;  %v8320_v8 = vadd.f32 %v8319_v7, %v8318_v1  ;;  %v10600_v60 = vld [vmem:[%s15963_s1 + $0xd8] ss:$100 sps:$4 sm:$0xff]   ;;  %v11078_v1 = vld [vmem:[%s15961_s4 + $0x230] sm:$0xff]   ;;  %v11079_v2 = vld [vmem:[%s15961_s4 + $0x1e8] sm:$0xff]  }
 0x11c   :  { %8749 = vmatprep.subr.bf16.mxu1 %v11060_v5  ;;  %v8281_v10 = vpop.f32.mrf.mxu0  ;;  %v8321_v20 = vpop.f32.mrf.mxu1 }
 0x11d   :  { %v2416_v6 = vadd.f32 %v8280_v0, %v12544_v14  ;;  %v11063_v14 = vld [vmem:[%s15961_s4 + $0xc8] sm:$0xff]   ;;  %v11077_v0 = vld [vmem:[%s15961_s4 + $0x1b0] sm:$0xff]  }
 0x11e   :  { %8711 = vmatprep.subr.bf16.mxu0 %v11063_v14  ;;  %v8282_v17 = vpop.f32.mrf.mxu0  ;;  %v8322_v26 = vpop.f32.mrf.mxu1 }
 0x11f   :  { %8750 = vmatpush3.bf16.msra.mxu1 %v11062_v13  ;;  %v12737_v15 = vadd.f32 %v8320_v8, %v2416_v6  ;;  %v8283_v19 = vadd.f32 %v8282_v17, %v8281_v10  ;;  %8712 = vmatpush3.bf16.msra.mxu0 %v11065_v23  ;;  %v8323_v29 = vadd.f32 %v8322_v26, %v8321_v20  ;;  %v10608_v8 = vld [vmem:[%s15963_s1 + $0x1a4] ss:$100 sps:$4 sm:$0xff]   ;;  %v10603_v17 = vld [vmem:[%s15963_s1 + $0x198] ss:$100 sps:$4 sm:$0xff]  }
 0x120   :  { %8751 = vmatprep.subr.bf16.mxu1 %v11064_v16  ;;  %v8284_v21 = vpop.f32.mrf.mxu0  ;;  %8713 = vmatprep.subr.bf16.mxu0 %v11067_v27  ;;  %v8324_v32 = vpop.f32.mrf.mxu1  ;;  %v11082_v13 = vld [vmem:[%s15961_s4 + $0x228] sm:$0xff]   ;;  %v11083_v16 = vld [vmem:[%s15961_s4 + $0x1e0] sm:$0xff]   ;;  %v11087_v27 = vld [vmem:[%s15961_s4 + $0x1d8] sm:$0xff]  }
 0x121   :  { %3742 = vmatmul.mubr.bf16.gmra.mxu1 %v10590_v9  ;;  %v2421_v25 = vadd.f32 %v8283_v19, %v12573_v33  ;;  %v10591_v33 = vld [vmem:[%s15963_s1 + $0x8] ss:$100 sps:$4 sm:$0xff]  }
 0x122   :  { %v8285_v30 = vpop.f32.mrf.mxu0  ;;  %3847 = vmatprep.mubr.bf16.mxu1 %v10596_v18  ;;  %v8325_v40 = vpop.f32.mrf.mxu1  ;;  %v10606_v18 = vld [vmem:[%s15963_s1 + $0x1a0] ss:$100 sps:$4 sm:$0xff]  }
 0x123   :  { %8752 = vmatpush3.bf16.msra.mxu1 %v11066_v24  ;;  %v8286_v31 = vadd.f32 %v8285_v30, %v8284_v21  ;;  %v12767_v34 = vadd.f32 %v8323_v29, %v2421_v25  ;;  %8714 = vmatpush3.bf16.msra.mxu0 %v11069_v36  ;;  %v8326_v45 = vadd.f32 %v8325_v40, %v8324_v32  ;;  %v11085_v24 = vld [vmem:[%s15961_s4 + $0x1a0] sm:$0xff]   ;;  %v10614_v32 = vld [vmem:[%s15963_s1 + $0x26c] ss:$100 sps:$4 sm:$0xff]  }
 0x124   :  { %8753 = vmatprep.subr.bf16.mxu1 %v11068_v28  ;;  %8779 = vmatprep.subr.bf16.mxu0 %v11071_v41  ;;  %v8343_v46 = vpop.f32.mrf.mxu0  ;;  %v8383_v48 = vpop.f32.mrf.mxu1  ;;  %v11086_v25 = vld [vmem:[%s15961_s4 + $0x220] sm:$0xff]   ;;  %v11088_v28 = vld [vmem:[%s15961_s4 + $0x258] sm:$0xff]   ;;  %v11091_v41 = vld [vmem:[%s15961_s4 + $0x1d0] sm:$0xff]  }
 0x125   :  { %v2424_v39 = vadd.f32 %v8286_v31, %v12587_v43  ;;  %v10602_v43 = vld [vmem:[%s15963_s1 + $0xdc] ss:$100 sps:$4 sm:$0xff]   ;;  %v10611_v29 = vld [vmem:[%s15963_s1 + $0x264] ss:$100 sps:$4 sm:$0xff]  }
 0x126   :  { %3783 = vmatmul.mubr.bf16.vlgmr.msra.gmra.mxu0 %v10591_v33  ;;  %v8344_v52 = vpop.f32.mrf.mxu0  ;;  %v8384_v56 = vpop.f32.mrf.mxu1 }
 0x127   :  { %8754 = vmatpush3.bf16.msra.mxu1 %v11070_v38  ;;  %v12788_v49 = vadd.f32 %v8326_v45, %v2424_v39  ;;  %8780 = vmatpush3.bf16.msra.mxu0 %v11073_v50  ;;  %v8345_v55 = vadd.f32 %v8344_v52, %v8343_v46  ;;  %v8385_v58 = vadd.f32 %v8384_v56, %v8383_v48  ;;  %v11089_v39 = vld [vmem:[%s15961_s4 + $0x198] sm:$0xff]   ;;  %v10609_v46 = vld [vmem:[%s15963_s1 + $0x260] ss:$100 sps:$4 sm:$0xff]   ;;  %v10612_v48 = vld [vmem:[%s15963_s1 + $0x268] ss:$100 sps:$4 sm:$0xff]  }
 0x128   :  { %8819 = vmatprep.subr.bf16.mxu1 %v11072_v42  ;;  %8781 = vmatprep.subr.bf16.mxu0 %v11075_v53  ;;  %v8346_v57 = vpop.f32.mrf.mxu0  ;;  %v8386_v62 = vpop.f32.mrf.mxu1  ;;  %v11092_v42 = vld [vmem:[%s15961_s4 + $0x250] sm:$0xff]   ;;  %v11095_v53 = vld [vmem:[%s15961_s4 + $0x1c8] sm:$0xff]   ;;  %v10617_v56 = vld [vmem:[%s15963_s1 + $0x1c] ss:$100 sps:$4 sm:$0xff]  }
 0x129   :  { %3790 = vmatprep.mubr.bf16.mxu0 %v10597_v44  ;;  %v2527_v61 = vadd.f32 %v8345_v55, %v12614_v63  ;;  %v11080_v63 = vld [vmem:[%s15961_s4 + $0x268] sm:$0xff]  }
 0x12a   :  { %3848 = vmatmul.mubr.bf16.vlgmr.msra.gmra.mxu1 %v10594_v37  ;;  %v8347_v12 = vpop.f32.mrf.mxu0  ;;  %v8387_v7 = vpop.f32.mrf.mxu1 }
 0x12b   :  { %8820 = vmatpush3.bf16.msra.mxu1 %v11074_v51  ;;  %3855 = vmatprep.mubr.bf16.mxu1 %v10602_v43  ;;  %v12824_v5 = vadd.f32 %v8385_v58, %v2527_v61  ;;  %v8348_v6 = vadd.f32 %v8347_v12, %v8346_v57  ;;  %v8388_v9 = vadd.f32 %v8387_v7, %v8386_v62  ;;  %v11093_v51 = vld [vmem:[%s15961_s4 + $0x190] sm:$0xff]   ;;  %v10620_v57 = vld [vmem:[%s15963_s1 + $0x24] ss:$100 sps:$4 sm:$0xff]  }
 0x12c   :  { %8821 = vmatprep.subr.bf16.mxu1 %v11076_v54  ;;  %8782 = vmatpush3.bf16.msra.mxu0 %v11077_v0  ;;  %v8349_v14 = vpop.f32.mrf.mxu0  ;;  %v8389_v23 = vpop.f32.mrf.mxu1  ;;  %v11096_v54 = vld [vmem:[%s15961_s4 + $0x248] sm:$0xff]   ;;  %v11099_v12 = vld [vmem:[%s15961_s4 + $0x1c0] sm:$0xff]  }
 0x12d   :  { %8783 = vmatprep.subr.bf16.mxu0 %v11079_v2  ;;  %v2530_v10 = vadd.f32 %v8348_v6, %v12638_v11  ;;  %v11084_v11 = vld [vmem:[%s15961_s4 + $0x260] sm:$0xff]   ;;  %v11097_v61 = vld [vmem:[%s15961_s4 + $0x188] sm:$0xff]  }
 0x12e   :  { %3791 = vmatmul.mubr.bf16.gmra.mxu0 %v10599_v59  ;;  %v8350_v20 = vpop.f32.mrf.mxu0  ;;  %v8390_v31 = vpop.f32.mrf.mxu1  ;;  %v11098_v62 = vld [vmem:[%s15961_s4 + $0x208] sm:$0xff]   ;;  %v11100_v2 = vld [vmem:[%s15961_s4 + $0x240] sm:$0xff]  }
 0x12f   :  { %8822 = vmatpush3.bf16.msra.mxu1 %v11078_v1  ;;  %v12848_v19 = vadd.f32 %v8388_v9, %v2530_v10  ;;  %3798 = vmatprep.mubr.bf16.mxu0 %v10605_v3  ;;  %v8351_v21 = vadd.f32 %v8350_v20, %v8349_v14  ;;  %v8391_v33 = vadd.f32 %v8390_v31, %v8389_v23  ;;  %v11101_v10 = vld [vmem:[%s15961_s4 + $0x180] sm:$0xff]   ;;  %v11105_v23 = vld [vmem:[%s15961_s4 + $0x2b8] sm:$0xff]  }
 0x130   :  { %8823 = vmatprep.subr.bf16.mxu1 %v11080_v63  ;;  %8784 = vmatpush3.bf16.msra.mxu0 %v11081_v22  ;;  %v8352_v26 = vpop.f32.mrf.mxu0  ;;  %v8392_v38 = vpop.f32.mrf.mxu1  ;;  %v11102_v22 = vld [vmem:[%s15961_s4 + $0x200] sm:$0xff]  }
 0x131   :  { %8785 = vmatprep.subr.bf16.mxu0 %v11083_v16  ;;  %v2535_v30 = vadd.f32 %v8351_v21, %v12674_v35  ;;  %v11090_v35 = vld [vmem:[%s15961_s4 + $0x218] sm:$0xff]  }
 0x132   :  { %3856 = vmatmul.mubr.bf16.gmra.mxu1 %v10600_v60  ;;  %v8353_v37 = vpop.f32.mrf.mxu0  ;;  %v8393_v45 = vpop.f32.mrf.mxu1  ;;  %v11103_v16 = vld [vmem:[%s15961_s4 + $0x2f8] sm:$0xff]  }
 0x133   :  { %8824 = vmatpush3.bf16.msra.mxu1 %v11082_v13  ;;  %3863 = vmatprep.mubr.bf16.mxu1 %v10608_v8  ;;  %v8354_v36 = vadd.f32 %v8353_v37, %v8352_v26  ;;  %v12875_v40 = vadd.f32 %v8391_v33, %v2535_v30  ;;  %v8394_v43 = vadd.f32 %v8393_v45, %v8392_v38  ;;  %v10618_v8 = vld [vmem:[%s15963_s1 + $0x20] ss:$100 sps:$4 sm:$0xff]   ;;  %v10624_v33 = vld [vmem:[%s15963_s1 + $0xe8] ss:$100 sps:$4 sm:$0xff]   ;;  %v11109_v38 = vld [vmem:[%s15961_s4 + $0x2b0] sm:$0xff]  }
 0x134   :  { %8825 = vmatprep.subr.bf16.mxu1 %v11084_v11  ;;  %8786 = vmatpush3.bf16.msra.mxu0 %v11085_v24  ;;  %v8355_v50 = vpop.f32.mrf.mxu0  ;;  %v8395_v59 = vpop.f32.mrf.mxu1  ;;  %v11104_v11 = vld [vmem:[%s15961_s4 + $0x378] sm:$0xff]  }
 0x135   :  { %8787 = vmatprep.subr.bf16.mxu0 %v11087_v27  ;;  %v2538_v44 = vadd.f32 %v8354_v36, %v12692_v47  ;;  %v11094_v47 = vld [vmem:[%s15961_s4 + $0x210] sm:$0xff]   ;;  %v11106_v24 = vld [vmem:[%s15961_s4 + $0x338] sm:$0xff]  }
 0x136   :  { %3799 = vmatmul.mubr.bf16.gmra.mxu0 %v10603_v17  ;;  %v8356_v55 = vpop.f32.mrf.mxu0  ;;  %v8396_v1 = vpop.f32.mrf.mxu1  ;;  %v11107_v27 = vld [vmem:[%s15961_s4 + $0x2f0] sm:$0xff]  }
 0x137   :  { %8826 = vmatpush3.bf16.msra.mxu1 %v11086_v25  ;;  %3806 = vmatprep.mubr.bf16.mxu0 %v10611_v29  ;;  %v12896_v52 = vadd.f32 %v8394_v43, %v2538_v44  ;;  %v8357_v58 = vadd.f32 %v8356_v55, %v8355_v50  ;;  %v8397_v63 = vadd.f32 %v8396_v1, %v8395_v59  ;;  %v10629_v43 = vld [vmem:[%s15963_s1 + $0x1ac] ss:$100 sps:$4 sm:$0xff]  }
 0x138   :  { %8827 = vmatprep.subr.bf16.mxu1 %v11088_v28  ;;  %8788 = vmatpush3.bf16.msra.mxu0 %v11089_v39  ;;  %v8358_v60 = vpop.f32.mrf.mxu0  ;;  %v8398_v7 = vpop.f32.mrf.mxu1  ;;  %v11108_v28 = vld [vmem:[%s15961_s4 + $0x370] sm:$0xff]  }
 0x139   :  { %8789 = vmatprep.subr.bf16.mxu0 %v11091_v41  ;;  %v2543_v0 = vadd.f32 %v8357_v58, %v12719_v4  ;;  %v10615_v4 = vld [vmem:[%s15963_s1 + $0x18] ss:$100 sps:$4 sm:$0xff]   ;;  %v11110_v39 = vld [vmem:[%s15961_s4 + $0x330] sm:$0xff]   ;;  %v10627_v58 = vld [vmem:[%s15963_s1 + $0x1a8] ss:$100 sps:$4 sm:$0xff]  }
 0x13a   :  { %3864 = vmatmul.mubr.bf16.gmra.mxu1 %v10606_v18  ;;  %v8359_v3 = vpop.f32.mrf.mxu0  ;;  %v8399_v14 = vpop.f32.mrf.mxu1  ;;  %v10623_v18 = vld [vmem:[%s15963_s1 + $0xe4] ss:$100 sps:$4 sm:$0xff]   ;;  %v10630_v59 = vld [vmem:[%s15963_s1 + $0x1b0] ss:$100 sps:$4 sm:$0xff]  }
 0x13b   :  { %8828 = vmatpush3.bf16.msra.mxu1 %v11090_v35  ;;  %3871 = vmatprep.mubr.bf16.mxu1 %v10614_v32  ;;  %v8360_v6 = vadd.f32 %v8359_v3, %v8358_v60  ;;  %v12929_v9 = vadd.f32 %v8397_v63, %v2543_v0  ;;  %v8400_v17 = vadd.f32 %v8399_v14, %v8398_v7  ;;  %v10621_v32 = vld [vmem:[%s15963_s1 + $0xe0] ss:$100 sps:$4 sm:$0xff]  }
 0x13c   :  { %8829 = vmatprep.subr.bf16.mxu1 %v11092_v42  ;;  %8790 = vmatpush3.bf16.msra.mxu0 %v11093_v51  ;;  %v8361_v20 = vpop.f32.mrf.mxu0  ;;  %v8401_v26 = vpop.f32.mrf.mxu1  ;;  %v11111_v42 = vld [vmem:[%s15961_s4 + $0x2e8] sm:$0xff]   ;;  %v10638_v7 = vld [vmem:[%s15963_s1 + $0x27c] ss:$100 sps:$4 sm:$0xff]  }
 0x13d   :  { %8791 = vmatprep.subr.bf16.mxu0 %v11095_v53  ;;  %v2546_v13 = vadd.f32 %v8360_v6, %v12737_v15  ;;  %v10626_v15 = vld [vmem:[%s15963_s1 + $0xec] ss:$100 sps:$4 sm:$0xff]   ;;  %v10635_v6 = vld [vmem:[%s15963_s1 + $0x274] ss:$100 sps:$4 sm:$0xff]  }
 0x13e   :  { %3807 = vmatmul.mubr.bf16.gmra.mxu0 %v10609_v46  ;;  %v8362_v25 = vpop.f32.mrf.mxu0  ;;  %v8402_v31 = vpop.f32.mrf.mxu1  ;;  %v10632_v46 = vld [vmem:[%s15963_s1 + $0x1b4] ss:$100 sps:$4 sm:$0xff]   ;;  %v11114_v53 = vld [vmem:[%s15961_s4 + $0x328] sm:$0xff]  }
 0x13f   :  { %8830 = vmatpush3.bf16.msra.mxu1 %v11094_v47  ;;  %3912 = vmatprep.mubr.bf16.mxu0 %v10617_v56  ;;  %v12950_v21 = vadd.f32 %v8400_v17, %v2546_v13  ;;  %v8363_v29 = vadd.f32 %v8362_v25, %v8361_v20  ;;  %v8403_v36 = vadd.f32 %v8402_v31, %v8401_v26  ;;  %v11113_v47 = vld [vmem:[%s15961_s4 + $0x2a8] sm:$0xff]   ;;  %v11122_v13 = vld [vmem:[%s15961_s4 + $0x318] sm:$0xff]   ;;  %v11124_v17 = vld [vmem:[%s15961_s4 + $0x350] sm:$0xff]  }
 0x140   :  { %8831 = vmatprep.subr.bf16.mxu1 %v11096_v54  ;;  %8792 = vmatpush3.bf16.msra.mxu0 %v11097_v61  ;;  %v8364_v30 = vpop.f32.mrf.mxu0  ;;  %v8404_v41 = vpop.f32.mrf.mxu1  ;;  %v11115_v54 = vld [vmem:[%s15961_s4 + $0x2e0] sm:$0xff]   ;;  %v10633_v20 = vld [vmem:[%s15963_s1 + $0x270] ss:$100 sps:$4 sm:$0xff]  }
 0x141   :  { %8793 = vmatprep.subr.bf16.mxu0 %v11099_v12  ;;  %v2551_v37 = vadd.f32 %v8363_v29, %v12767_v34  ;;  %v11112_v34 = vld [vmem:[%s15961_s4 + $0x368] sm:$0xff]   ;;  %v11117_v61 = vld [vmem:[%s15961_s4 + $0x2a0] sm:$0xff]   ;;  %v11119_v12 = vld [vmem:[%s15961_s4 + $0x2d8] sm:$0xff]  }
 0x142   :  { %3872 = vmatmul.mubr.bf16.gmra.mxu1 %v10612_v48  ;;  %v8365_v35 = vpop.f32.mrf.mxu0  ;;  %v8405_v48 = vpop.f32.mrf.mxu1  ;;  %v11125_v25 = vld [vmem:[%s15961_s4 + $0x290] sm:$0xff]  }
 0x143   :  { %8832 = vmatpush3.bf16.msra.mxu1 %v11098_v62  ;;  %3977 = vmatprep.mubr.bf16.mxu1 %v10620_v57  ;;  %v12983_v44 = vadd.f32 %v8403_v36, %v2551_v37  ;;  %v8366_v45 = vadd.f32 %v8365_v35, %v8364_v30  ;;  %v8406_v51 = vadd.f32 %v8405_v48, %v8404_v41  ;;  %v11118_v62 = vld [vmem:[%s15961_s4 + $0x320] sm:$0xff]   ;;  %v11126_v26 = vld [vmem:[%s15961_s4 + $0x310] sm:$0xff]   ;;  %v11129_v36 = vld [vmem:[%s15961_s4 + $0x288] sm:$0xff]  }
 0x144   :  { %8833 = vmatprep.subr.bf16.mxu1 %v11100_v2  ;;  %8794 = vmatpush3.bf16.msra.mxu0 %v11101_v10  ;;  %v8423_v56 = vpop.f32.mrf.mxu0  ;;  %v8463_v57 = vpop.f32.mrf.mxu1  ;;  %v11120_v2 = vld [vmem:[%s15961_s4 + $0x358] sm:$0xff]   ;;  %v10641_v30 = vld [vmem:[%s15963_s1 + $0x2c] ss:$100 sps:$4 sm:$0xff]   ;;  %v11131_v41 = vld [vmem:[%s15961_s4 + $0x2c0] sm:$0xff]  }
 0x145   :  { %8859 = vmatprep.subr.bf16.mxu0 %v11103_v16  ;;  %v2554_v50 = vadd.f32 %v8366_v45, %v12788_v49  ;;  %v11116_v49 = vld [vmem:[%s15961_s4 + $0x360] sm:$0xff]   ;;  %v10644_v31 = vld [vmem:[%s15963_s1 + $0x34] ss:$100 sps:$4 sm:$0xff]  }
 0x146   :  { %v8424_v60 = vpop.f32.mrf.mxu0  ;;  %v8464_v1 = vpop.f32.mrf.mxu1  ;;  %v10642_v48 = vld [vmem:[%s15963_s1 + $0x30] ss:$100 sps:$4 sm:$0xff]  }
 0x147   :  { %8834 = vmatpush3.bf16.msra.mxu1 %v11102_v22  ;;  %3913 = vmatmul.mubr.bf16.vlgmr.msra.gmra.mxu0 %v10615_v4  ;;  %v13004_v55 = vadd.f32 %v8406_v51, %v2554_v50  ;;  %v8425_v0 = vadd.f32 %v8424_v60, %v8423_v56  ;;  %v8465_v3 = vadd.f32 %v8464_v1, %v8463_v57  ;;  %v11121_v22 = vld [vmem:[%s15961_s4 + $0x298] sm:$0xff]   ;;  %v11133_v51 = vld [vmem:[%s15961_s4 + $0x280] sm:$0xff]  }
 0x148   :  { %8899 = vmatprep.subr.bf16.mxu1 %v11104_v11  ;;  %8860 = vmatpush3.bf16.msra.mxu0 %v11105_v23  ;;  %v8426_v63 = vpop.f32.mrf.mxu0  ;;  %v10636_v23 = vld [vmem:[%s15963_s1 + $0x278] ss:$100 sps:$4 sm:$0xff]  }
 0x149   :  { %8861 = vmatprep.subr.bf16.mxu0 %v11107_v27  ;;  %3920 = vmatprep.mubr.bf16.mxu0 %v10623_v18  ;;  %v2657_v4 = vadd.f32 %v8425_v0, %v12824_v5  ;;  %v11123_v5 = vld [vmem:[%s15961_s4 + $0x2d0] sm:$0xff]   ;;  %v11127_v27 = vld [vmem:[%s15961_s4 + $0x2c8] sm:$0xff]   ;;  %v11136_v56 = vld [vmem:[%s15961_s4 + $0x478] sm:$0xff]  }
 0x14a   :  { %3978 = vmatmul.mubr.bf16.vlgmr.msra.gmra.mxu1 %v10618_v8  ;;  %v8466_v8 = vpop.f32.mrf.mxu1  ;;  %v8427_v10 = vpop.f32.mrf.mxu0 }
 0x14b   :  { %8900 = vmatpush3.bf16.msra.mxu1 %v11106_v24  ;;  %3985 = vmatprep.mubr.bf16.mxu1 %v10626_v15  ;;  %v13037_v14 = vadd.f32 %v8465_v3, %v2657_v4  ;;  %v8428_v16 = vadd.f32 %v8427_v10, %v8426_v63  ;;  %v10645_v63 = vld [vmem:[%s15963_s1 + $0xf0] ss:$100 sps:$4 sm:$0xff]   ;;  %v10648_v3 = vld [vmem:[%s15963_s1 + $0xf8] ss:$100 sps:$4 sm:$0xff]  }
 0x14c   :  { %8901 = vmatprep.subr.bf16.mxu1 %v11108_v28  ;;  %8862 = vmatpush3.bf16.msra.mxu0 %v11109_v38  ;;  %v8467_v11 = vpop.f32.mrf.mxu1  ;;  %v8429_v24 = vpop.f32.mrf.mxu0  ;;  %v11128_v28 = vld [vmem:[%s15961_s4 + $0x348] sm:$0xff]  }
 0x14d   :  { %8863 = vmatprep.subr.bf16.mxu0 %v11111_v42  ;;  %v8468_v18 = vadd.f32 %v8467_v11, %v8466_v8  ;;  %v2660_v15 = vadd.f32 %v8428_v16, %v12848_v19  ;;  %v11130_v38 = vld [vmem:[%s15961_s4 + $0x308] sm:$0xff]   ;;  %v11132_v42 = vld [vmem:[%s15961_s4 + $0x340] sm:$0xff]  }
 0x14e   :  { %v8430_v29 = vpop.f32.mrf.mxu0 }
 0x14f   :  { %8902 = vmatpush3.bf16.msra.mxu1 %v11110_v39  ;;  %3921 = vmatmul.mubr.bf16.gmra.mxu0 %v10621_v32  ;;  %v13058_v19 = vadd.f32 %v8468_v18, %v2660_v15  ;;  %v8431_v32 = vadd.f32 %v8430_v29, %v8429_v24  ;;  %v10656_v18 = vld [vmem:[%s15963_s1 + $0x1c4] ss:$100 sps:$4 sm:$0xff]  }
 0x150   :  { %8903 = vmatprep.subr.bf16.mxu1 %v11112_v34  ;;  %8864 = vmatpush3.bf16.msra.mxu0 %v11113_v47  ;;  %v8432_v37 = vpop.f32.mrf.mxu0  ;;  %v11134_v47 = vld [vmem:[%s15961_s4 + $0x300] sm:$0xff]  }
 0x151   :  { %8865 = vmatprep.subr.bf16.mxu0 %v11115_v54  ;;  %3928 = vmatprep.mubr.bf16.mxu0 %v10629_v43  ;;  %v2665_v39 = vadd.f32 %v8431_v32, %v12875_v40  ;;  %v10639_v40 = vld [vmem:[%s15963_s1 + $0x28] ss:$100 sps:$4 sm:$0xff]   ;;  %v11147_v29 = vld [vmem:[%s15961_s4 + $0x3e0] sm:$0xff]  }
 0x152   :  { %3986 = vmatmul.mubr.bf16.gmra.mxu1 %v10624_v33  ;;  %v8469_v33 = vpop.f32.mrf.mxu1  ;;  %v8433_v45 = vpop.f32.mrf.mxu0 }
 0x153   :  { %8904 = vmatpush3.bf16.msra.mxu1 %v11114_v53  ;;  %3993 = vmatprep.mubr.bf16.mxu1 %v10632_v46  ;;  %v8434_v43 = vadd.f32 %v8433_v45, %v8432_v37  ;;  %v10662_v45 = vld [vmem:[%s15963_s1 + $0x28c] ss:$100 sps:$4 sm:$0xff]  }
 0x154   :  { %8905 = vmatprep.subr.bf16.mxu1 %v11116_v49  ;;  %8866 = vmatpush3.bf16.msra.mxu0 %v11117_v61  ;;  %v8470_v35 = vpop.f32.mrf.mxu1  ;;  %v11135_v49 = vld [vmem:[%s15961_s4 + $0x3f8] sm:$0xff]  }
 0x155   :  { %8867 = vmatprep.subr.bf16.mxu0 %v11119_v12  ;;  %v8471_v34 = vadd.f32 %v8470_v35, %v8469_v33  ;;  %v2668_v53 = vadd.f32 %v8434_v43, %v12896_v52  ;;  %v10650_v52 = vld [vmem:[%s15963_s1 + $0xfc] ss:$100 sps:$4 sm:$0xff]   ;;  %v11139_v12 = vld [vmem:[%s15961_s4 + $0x3f0] sm:$0xff]  }
 0x156   :  { %v8472_v46 = vpop.f32.mrf.mxu1  ;;  %v11137_v61 = vld [vmem:[%s15961_s4 + $0x3b8] sm:$0xff]  }
 0x157   :  { %8906 = vmatpush3.bf16.msra.mxu1 %v11118_v62  ;;  %3929 = vmatmul.mubr.bf16.gmra.mxu0 %v10627_v58  ;;  %v13091_v50 = vadd.f32 %v8471_v34, %v2665_v39  ;;  %v10647_v58 = vld [vmem:[%s15963_s1 + $0xf4] ss:$100 sps:$4 sm:$0xff]   ;;  %v11150_v39 = vld [vmem:[%s15961_s4 + $0x420] sm:$0xff]  }
 0x158   :  { %8907 = vmatprep.subr.bf16.mxu1 %v11120_v2  ;;  %8868 = vmatpush3.bf16.msra.mxu0 %v11121_v22  ;;  %v8473_v54 = vpop.f32.mrf.mxu1  ;;  %v11138_v62 = vld [vmem:[%s15961_s4 + $0x438] sm:$0xff]   ;;  %v11140_v2 = vld [vmem:[%s15961_s4 + $0x470] sm:$0xff]   ;;  %v10659_v34 = vld [vmem:[%s15963_s1 + $0x284] ss:$100 sps:$4 sm:$0xff]  }
 0x159   :  { %8869 = vmatprep.subr.bf16.mxu0 %v11123_v5  ;;  %3936 = vmatprep.mubr.bf16.mxu0 %v10635_v6  ;;  %v8474_v57 = vadd.f32 %v8473_v54, %v8472_v46  ;;  %v11141_v22 = vld [vmem:[%s15961_s4 + $0x3b0] sm:$0xff]   ;;  %v11143_v5 = vld [vmem:[%s15961_s4 + $0x3e8] sm:$0xff]   ;;  %v11154_v54 = vld [vmem:[%s15961_s4 + $0x418] sm:$0xff]  }
 0x15a   :  { %3994 = vmatmul.mubr.bf16.gmra.mxu1 %v10630_v59  ;;  %v8435_v59 = vpop.f32.mrf.mxu0  ;;  %v8475_v1 = vpop.f32.mrf.mxu1 }
 0x15b   :  { %8908 = vmatpush3.bf16.msra.mxu1 %v11122_v13  ;;  %4001 = vmatprep.mubr.bf16.mxu1 %v10638_v7  ;;  %v13112_v60 = vadd.f32 %v8474_v57, %v2668_v53  ;;  %v11142_v13 = vld [vmem:[%s15961_s4 + $0x430] sm:$0xff]   ;;  %v11153_v53 = vld [vmem:[%s15961_s4 + $0x398] sm:$0xff]   ;;  %v10657_v57 = vld [vmem:[%s15963_s1 + $0x280] ss:$100 sps:$4 sm:$0xff]  }
 0x15c   :  { %8909 = vmatprep.subr.bf16.mxu1 %v11124_v17  ;;  %8870 = vmatpush3.bf16.msra.mxu0 %v11125_v25  ;;  %v8436_v0 = vpop.f32.mrf.mxu0  ;;  %v8476_v4 = vpop.f32.mrf.mxu1  ;;  %v10653_v17 = vld [vmem:[%s15963_s1 + $0x1bc] ss:$100 sps:$4 sm:$0xff]  }
 0x15d   :  { %8871 = vmatprep.subr.bf16.mxu0 %v11127_v27  ;;  %v8437_v6 = vadd.f32 %v8436_v0, %v8435_v59  ;;  %v8477_v10 = vadd.f32 %v8476_v4, %v8475_v1  ;;  %v11146_v27 = vld [vmem:[%s15961_s4 + $0x428] sm:$0xff]   ;;  %v11157_v0 = vld [vmem:[%s15961_s4 + $0x390] sm:$0xff]  }
 0x15e   :  { %v8438_v7 = vpop.f32.mrf.mxu0  ;;  %v8478_v11 = vpop.f32.mrf.mxu1  ;;  %v11158_v1 = vld [vmem:[%s15961_s4 + $0x410] sm:$0xff]  }
 0x15f   :  { %8910 = vmatpush3.bf16.msra.mxu1 %v11126_v26  ;;  %3937 = vmatmul.mubr.bf16.gmra.mxu0 %v10633_v20  ;;  %v2673_v8 = vadd.f32 %v8437_v6, %v12929_v9  ;;  %v11144_v9 = vld [vmem:[%s15961_s4 + $0x468] sm:$0xff]  }
 0x160   :  { %8911 = vmatprep.subr.bf16.mxu1 %v11128_v28  ;;  %8872 = vmatpush3.bf16.msra.mxu0 %v11129_v36  ;;  %v8439_v16 = vpop.f32.mrf.mxu0  ;;  %v11145_v26 = vld [vmem:[%s15961_s4 + $0x3a8] sm:$0xff]  }
 0x161   :  { %8873 = vmatprep.subr.bf16.mxu0 %v11131_v41  ;;  %4042 = vmatprep.mubr.bf16.mxu0 %v10641_v30  ;;  %v13151_v15 = vadd.f32 %v8477_v10, %v2673_v8  ;;  %v8440_v20 = vadd.f32 %v8439_v16, %v8438_v7  ;;  %v10651_v30 = vld [vmem:[%s15963_s1 + $0x1b8] ss:$100 sps:$4 sm:$0xff]  }
 0x162   :  { %4002 = vmatmul.mubr.bf16.gmra.mxu1 %v10636_v23  ;;  %v8479_v23 = vpop.f32.mrf.mxu1  ;;  %v8441_v28 = vpop.f32.mrf.mxu0  ;;  %v11151_v41 = vld [vmem:[%s15961_s4 + $0x3d8] sm:$0xff]  }
 0x163   :  { %8912 = vmatpush3.bf16.msra.mxu1 %v11130_v38  ;;  %4107 = vmatprep.mubr.bf16.mxu1 %v10644_v31  ;;  %v2676_v24 = vadd.f32 %v8440_v20, %v12950_v21  ;;  %v8480_v25 = vadd.f32 %v8479_v23, %v8478_v11  ;;  %v11148_v21 = vld [vmem:[%s15961_s4 + $0x460] sm:$0xff]  }
 0x164   :  { %8913 = vmatprep.subr.bf16.mxu1 %v11132_v42  ;;  %8874 = vmatpush3.bf16.msra.mxu0 %v11133_v51  ;;  %v10654_v31 = vld [vmem:[%s15963_s1 + $0x1c0] ss:$100 sps:$4 sm:$0xff]   ;;  %v8442_v33 = vpop.f32.mrf.mxu0  ;;  %v8481_v36 = vpop.f32.mrf.mxu1  ;;  %v11152_v42 = vld [vmem:[%s15961_s4 + $0x458] sm:$0xff]  }
 0x165   :  { %8939 = vmatprep.subr.bf16.mxu0 %v11135_v49  ;;  %v13172_v32 = vadd.f32 %v8480_v25, %v2676_v24  ;;  %v8443_v37 = vadd.f32 %v8442_v33, %v8441_v28  ;;  %v11149_v38 = vld [vmem:[%s15961_s4 + $0x3a0] sm:$0xff]  }
 0x166   :  { %v8444_v35 = vpop.f32.mrf.mxu0  ;;  %v8482_v46 = vpop.f32.mrf.mxu1 }
 0x167   :  { %8914 = vmatpush3.bf16.msra.mxu1 %v11134_v47  ;;  %4043 = vmatmul.mubr.bf16.vlgmr.msra.gmra.mxu0 %v10639_v40  ;;  %v2681_v43 = vadd.f32 %v8443_v37, %v12983_v44  ;;  %v8483_v40 = vadd.f32 %v8482_v46, %v8481_v36  ;;  %v11155_v44 = vld [vmem:[%s15961_s4 + $0x3d0] sm:$0xff]   ;;  %v11169_v36 = vld [vmem:[%s15961_s4 + $0x4b8] sm:$0xff]  }
 0x168   :  { %8979 = vmatprep.subr.bf16.mxu1 %v11136_v56  ;;  %8940 = vmatpush3.bf16.msra.mxu0 %v11137_v61  ;;  %v8484_v47 = vpop.f32.mrf.mxu1  ;;  %v11156_v56 = vld [vmem:[%s15961_s4 + $0x450] sm:$0xff]  }
 0x169   :  { %8941 = vmatprep.subr.bf16.mxu0 %v11139_v12  ;;  %4050 = vmatprep.mubr.bf16.mxu0 %v10647_v58  ;;  %v13199_v49 = vadd.f32 %v8483_v40, %v2681_v43  ;;  %v10660_v58 = vld [vmem:[%s15963_s1 + $0x288] ss:$100 sps:$4 sm:$0xff]  }
 0x16a   :  { %4108 = vmatmul.mubr.bf16.vlgmr.msra.gmra.mxu1 %v10642_v48  ;;  %v8445_v48 = vpop.f32.mrf.mxu0  ;;  %v8485_v59 = vpop.f32.mrf.mxu1 }
 0x16b   :  { %8980 = vmatpush3.bf16.msra.mxu1 %v11138_v62  ;;  %4115 = vmatprep.mubr.bf16.mxu1 %v10650_v52  ;;  %v8446_v51 = vadd.f32 %v8445_v48, %v8444_v35  ;;  %v8486_v61 = vadd.f32 %v8485_v59, %v8484_v47  ;;  %v11173_v47 = vld [vmem:[%s15961_s4 + $0x4b0] sm:$0xff]  }
 0x16c   :  { %8981 = vmatprep.subr.bf16.mxu1 %v11140_v2  ;;  %8942 = vmatpush3.bf16.msra.mxu0 %v11141_v22  ;;  %v8503_v62 = vpop.f32.mrf.mxu0  ;;  %v11160_v2 = vld [vmem:[%s15961_s4 + $0x448] sm:$0xff]   ;;  %v8543_v7 = vpop.f32.mrf.mxu1 }
 0x16d   :  { %8943 = vmatprep.subr.bf16.mxu0 %v11143_v5  ;;  %v2684_v52 = vadd.f32 %v8446_v51, %v13004_v55  ;;  %v11159_v55 = vld [vmem:[%s15961_s4 + $0x3c8] sm:$0xff]   ;;  %v11163_v5 = vld [vmem:[%s15961_s4 + $0x3c0] sm:$0xff]  }
 0x16e   :  { %v8504_v6 = vpop.f32.mrf.mxu0  ;;  %v8544_v10 = vpop.f32.mrf.mxu1  ;;  %v11161_v22 = vld [vmem:[%s15961_s4 + $0x388] sm:$0xff]  }
 0x16f   :  { %8982 = vmatpush3.bf16.msra.mxu1 %v11142_v13  ;;  %4051 = vmatmul.mubr.bf16.gmra.mxu0 %v10645_v63  ;;  %v13220_v12 = vadd.f32 %v8486_v61, %v2684_v52  ;;  %v10665_v63 = vld [vmem:[%s15963_s1 + $0x3c] ss:$100 sps:$4 sm:$0xff]   ;;  %v8505_v4 = vadd.f32 %v8504_v6, %v8503_v62  ;;  %v11162_v13 = vld [vmem:[%s15961_s4 + $0x408] sm:$0xff]   ;;  %v8545_v11 = vadd.f32 %v8544_v10, %v8543_v7  ;;  %v10680_v61 = vld [vmem:[%s15963_s1 + $0x1d4] ss:$100 sps:$4 sm:$0xff]  }
 0x170   :  { %8983 = vmatprep.subr.bf16.mxu1 %v11144_v9  ;;  %8944 = vmatpush3.bf16.msra.mxu0 %v11145_v26  ;;  %v8506_v8 = vpop.f32.mrf.mxu0  ;;  %v11164_v9 = vld [vmem:[%s15961_s4 + $0x440] sm:$0xff]   ;;  %v8546_v20 = vpop.f32.mrf.mxu1  ;;  %v10677_v52 = vld [vmem:[%s15963_s1 + $0x1cc] ss:$100 sps:$4 sm:$0xff]  }
 0x171   :  { %8945 = vmatprep.subr.bf16.mxu0 %v11147_v29  ;;  %4058 = vmatprep.mubr.bf16.mxu0 %v10653_v17  ;;  %v2787_v16 = vadd.f32 %v8505_v4, %v13037_v14  ;;  %v10663_v17 = vld [vmem:[%s15963_s1 + $0x38] ss:$100 sps:$4 sm:$0xff]   ;;  %v11165_v26 = vld [vmem:[%s15961_s4 + $0x380] sm:$0xff]   ;;  %v10675_v7 = vld [vmem:[%s15963_s1 + $0x1c8] ss:$100 sps:$4 sm:$0xff]  }
 0x172   :  { %4116 = vmatmul.mubr.bf16.gmra.mxu1 %v10648_v3  ;;  %v10668_v3 = vld [vmem:[%s15963_s1 + $0x44] ss:$100 sps:$4 sm:$0xff]   ;;  %v8507_v14 = vpop.f32.mrf.mxu0  ;;  %v8547_v25 = vpop.f32.mrf.mxu1  ;;  %v10678_v4 = vld [vmem:[%s15963_s1 + $0x1d0] ss:$100 sps:$4 sm:$0xff]  }
 0x173   :  { %8984 = vmatpush3.bf16.msra.mxu1 %v11146_v27  ;;  %4123 = vmatprep.mubr.bf16.mxu1 %v10656_v18  ;;  %v10666_v18 = vld [vmem:[%s15963_s1 + $0x40] ss:$100 sps:$4 sm:$0xff]   ;;  %v13253_v23 = vadd.f32 %v8545_v11, %v2787_v16  ;;  %v8508_v24 = vadd.f32 %v8507_v14, %v8506_v8  ;;  %v8548_v29 = vadd.f32 %v8547_v25, %v8546_v20  ;;  %v11183_v11 = vld [vmem:[%s15961_s4 + $0x4d8] sm:$0xff]  }
 0x174   :  { %8985 = vmatprep.subr.bf16.mxu1 %v11148_v21  ;;  %8946 = vmatpush3.bf16.msra.mxu0 %v11149_v38  ;;  %v11166_v27 = vld [vmem:[%s15961_s4 + $0x400] sm:$0xff]   ;;  %v11167_v21 = vld [vmem:[%s15961_s4 + $0x4f8] sm:$0xff]   ;;  %v8509_v33 = vpop.f32.mrf.mxu0  ;;  %v8549_v35 = vpop.f32.mrf.mxu1 }
 0x175   :  { %8947 = vmatprep.subr.bf16.mxu0 %v11151_v41  ;;  %v2790_v28 = vadd.f32 %v8508_v24, %v13058_v19  ;;  %v10674_v19 = vld [vmem:[%s15963_s1 + $0x10c] ss:$100 sps:$4 sm:$0xff]   ;;  %v11170_v38 = vld [vmem:[%s15961_s4 + $0x538] sm:$0xff]  }
 0x176   :  { %v11171_v41 = vld [vmem:[%s15961_s4 + $0x4f0] sm:$0xff]   ;;  %v8550_v40 = vpop.f32.mrf.mxu1  ;;  %v10686_v24 = vld [vmem:[%s15963_s1 + $0x29c] ss:$100 sps:$4 sm:$0xff]  }
 0x177   :  { %8986 = vmatpush3.bf16.msra.mxu1 %v11150_v39  ;;  %4059 = vmatmul.mubr.bf16.gmra.mxu0 %v10651_v30  ;;  %v11168_v30 = vld [vmem:[%s15961_s4 + $0x578] sm:$0xff]   ;;  %v13271_v37 = vadd.f32 %v8548_v29, %v2790_v28  ;;  %v8510_v39 = vpop.f32.mrf.mxu0  ;;  %v8551_v51 = vadd.f32 %v8550_v40, %v8549_v35  ;;  %v11187_v29 = vld [vmem:[%s15961_s4 + $0x4d0] sm:$0xff]  }
 0x178   :  { %8987 = vmatprep.subr.bf16.mxu1 %v11152_v42  ;;  %8948 = vmatpush3.bf16.msra.mxu0 %v11153_v53  ;;  %v11172_v42 = vld [vmem:[%s15961_s4 + $0x570] sm:$0xff]   ;;  %v8511_v43 = vadd.f32 %v8510_v39, %v8509_v33 }
 0x179   :  { %8949 = vmatprep.subr.bf16.mxu0 %v11155_v44  ;;  %4066 = vmatprep.mubr.bf16.mxu0 %v10659_v34  ;;  %v10669_v34 = vld [vmem:[%s15963_s1 + $0x100] ss:$100 sps:$4 sm:$0xff]   ;;  %v8512_v46 = vpop.f32.mrf.mxu0  ;;  %v11174_v53 = vld [vmem:[%s15961_s4 + $0x530] sm:$0xff]   ;;  %v8552_v44 = vpop.f32.mrf.mxu1 }
 0x17a   :  { %4124 = vmatmul.mubr.bf16.gmra.mxu1 %v10654_v31  ;;  %v10671_v31 = vld [vmem:[%s15963_s1 + $0x104] ss:$100 sps:$4 sm:$0xff]   ;;  %v2795_v48 = vadd.f32 %v8511_v43, %v13091_v50  ;;  %v10683_v20 = vld [vmem:[%s15963_s1 + $0x294] ss:$100 sps:$4 sm:$0xff]  }
 0x17b   :  { %8988 = vmatpush3.bf16.msra.mxu1 %v11154_v54  ;;  %4131 = vmatprep.mubr.bf16.mxu1 %v10662_v45  ;;  %v10672_v45 = vld [vmem:[%s15963_s1 + $0x108] ss:$100 sps:$4 sm:$0xff]   ;;  %v8513_v54 = vpop.f32.mrf.mxu0  ;;  %v8553_v59 = vpop.f32.mrf.mxu1  ;;  %v11189_v39 = vld [vmem:[%s15961_s4 + $0x490] sm:$0xff]  }
 0x17c   :  { %8989 = vmatprep.subr.bf16.mxu1 %v11156_v56  ;;  %8950 = vmatpush3.bf16.msra.mxu0 %v11157_v0  ;;  %v11175_v56 = vld [vmem:[%s15961_s4 + $0x4e8] sm:$0xff]   ;;  %v8554_v0 = vadd.f32 %v8553_v59, %v8552_v44  ;;  %v10692_v40 = vld [vmem:[%s15963_s1 + $0x54] ss:$100 sps:$4 sm:$0xff]  }
 0x17d   :  { %8951 = vmatprep.subr.bf16.mxu0 %v11159_v55  ;;  %v11176_v50 = vld [vmem:[%s15961_s4 + $0x568] sm:$0xff]   ;;  %v8555_v10 = vpop.f32.mrf.mxu1 }
 0x17e   :  { %v11178_v55 = vld [vmem:[%s15961_s4 + $0x528] sm:$0xff]  }
 0x17f   :  { %8990 = vmatpush3.bf16.msra.mxu1 %v11158_v1  ;;  %4067 = vmatmul.mubr.bf16.gmra.mxu0 %v10657_v57  ;;  %v13307_v57 = vadd.f32 %v8551_v51, %v2795_v48  ;;  %v11177_v1 = vld [vmem:[%s15961_s4 + $0x4a8] sm:$0xff]  }
 0x180   :  { %8991 = vmatprep.subr.bf16.mxu1 %v11160_v2  ;;  %8952 = vmatpush3.bf16.msra.mxu0 %v11161_v22  ;;  %v8515_v2 = vpop.f32.mrf.mxu0  ;;  %v11181_v22 = vld [vmem:[%s15961_s4 + $0x4a0] sm:$0xff]   ;;  %v11193_v51 = vld [vmem:[%s15961_s4 + $0x488] sm:$0xff]  }
 0x181   :  { %8953 = vmatprep.subr.bf16.mxu0 %v11163_v5  ;;  %4172 = vmatprep.mubr.bf16.mxu0 %v10665_v63  ;;  %v11179_v63 = vld [vmem:[%s15961_s4 + $0x4e0] sm:$0xff]   ;;  %v11184_v5 = vld [vmem:[%s15961_s4 + $0x558] sm:$0xff]  }
 0x182   :  { %4132 = vmatmul.mubr.bf16.gmra.mxu1 %v10660_v58  ;;  %v8514_v58 = vadd.f32 %v8513_v54, %v8512_v46  ;;  %v8516_v6 = vpop.f32.mrf.mxu0  ;;  %v10689_v46 = vld [vmem:[%s15963_s1 + $0x4c] ss:$100 sps:$4 sm:$0xff]  }
 0x183   :  { %8992 = vmatpush3.bf16.msra.mxu1 %v11162_v13  ;;  %4237 = vmatprep.mubr.bf16.mxu1 %v10668_v3  ;;  %v8517_v8 = vadd.f32 %v8516_v6, %v8515_v2  ;;  %v11182_v13 = vld [vmem:[%s15961_s4 + $0x520] sm:$0xff]   ;;  %v11200_v6 = vld [vmem:[%s15961_s4 + $0x638] sm:$0xff]  }
 0x184   :  { %8993 = vmatprep.subr.bf16.mxu1 %v11164_v9  ;;  %8954 = vmatpush3.bf16.msra.mxu0 %v11165_v26  ;;  %v2798_v62 = vadd.f32 %v8514_v58, %v13112_v60  ;;  %v11180_v60 = vld [vmem:[%s15961_s4 + $0x560] sm:$0xff]   ;;  %v8518_v16 = vpop.f32.mrf.mxu0 }
 0x185   :  { %9019 = vmatprep.subr.bf16.mxu0 %v11167_v21  ;;  %v2803_v9 = vadd.f32 %v8517_v8, %v13151_v15  ;;  %v11186_v15 = vld [vmem:[%s15961_s4 + $0x518] sm:$0xff]   ;;  %v11188_v21 = vld [vmem:[%s15961_s4 + $0x550] sm:$0xff]  }
 0x186   :  { %v13328_v3 = vadd.f32 %v8554_v0, %v2798_v62  ;;  %v8519_v14 = vpop.f32.mrf.mxu0  ;;  %v10690_v62 = vld [vmem:[%s15963_s1 + $0x50] ss:$100 sps:$4 sm:$0xff]   ;;  %v11197_v0 = vld [vmem:[%s15961_s4 + $0x480] sm:$0xff]  }
 0x187   :  { %8994 = vmatpush3.bf16.msra.mxu1 %v11166_v27  ;;  %4173 = vmatmul.mubr.bf16.vlgmr.msra.gmra.mxu0 %v10663_v17  ;;  %v8556_v17 = vpop.f32.mrf.mxu1  ;;  %v8520_v25 = vadd.f32 %v8519_v14, %v8518_v16  ;;  %v11185_v27 = vld [vmem:[%s15961_s4 + $0x498] sm:$0xff]  }
 0x188   :  { %9059 = vmatprep.subr.bf16.mxu1 %v11168_v30  ;;  %9020 = vmatpush3.bf16.msra.mxu0 %v11169_v36  ;;  %v8521_v36 = vpop.f32.mrf.mxu0 }
 0x189   :  { %9021 = vmatprep.subr.bf16.mxu0 %v11171_v41  ;;  %4180 = vmatprep.mubr.bf16.mxu0 %v10671_v31  ;;  %v8558_v26 = vpop.f32.mrf.mxu1  ;;  %v2806_v30 = vadd.f32 %v8520_v25, %v13172_v32  ;;  %v11190_v32 = vld [vmem:[%s15961_s4 + $0x510] sm:$0xff]   ;;  %v11191_v41 = vld [vmem:[%s15961_s4 + $0x4c8] sm:$0xff]   ;;  %v10696_v25 = vld [vmem:[%s15963_s1 + $0x118] ss:$100 sps:$4 sm:$0xff]  }
 0x18a   :  { %4238 = vmatmul.mubr.bf16.vlgmr.msra.gmra.mxu1 %v10666_v18  ;;  %v8557_v18 = vadd.f32 %v8556_v17, %v8555_v10 }
 0x18b   :  { %9060 = vmatpush3.bf16.msra.mxu1 %v11170_v38  ;;  %4245 = vmatprep.mubr.bf16.mxu1 %v10674_v19  ;;  %v8559_v31 = vpop.f32.mrf.mxu1  ;;  %v10681_v19 = vld [vmem:[%s15963_s1 + $0x290] ss:$100 sps:$4 sm:$0xff]   ;;  %v10684_v38 = vld [vmem:[%s15963_s1 + $0x298] ss:$100 sps:$4 sm:$0xff]  }
 0x18c   :  { %9061 = vmatprep.subr.bf16.mxu1 %v11172_v42  ;;  %9022 = vmatpush3.bf16.msra.mxu0 %v11173_v47  ;;  %v13361_v28 = vadd.f32 %v8557_v18, %v2803_v9  ;;  %v8560_v33 = vadd.f32 %v8559_v31, %v8558_v26  ;;  %v11192_v42 = vld [vmem:[%s15961_s4 + $0x548] sm:$0xff]   ;;  %v11203_v9 = vld [vmem:[%s15961_s4 + $0x630] sm:$0xff]  }
 0x18d   :  { %9023 = vmatprep.subr.bf16.mxu0 %v11175_v56  ;;  %v8561_v43 = vpop.f32.mrf.mxu1  ;;  %v11194_v47 = vld [vmem:[%s15961_s4 + $0x508] sm:$0xff]   ;;  %v11195_v56 = vld [vmem:[%s15961_s4 + $0x4c0] sm:$0xff]   ;;  %v11204_v26 = vld [vmem:[%s15961_s4 + $0x5b0] sm:$0xff]  }
 0x18e   :  { %v13382_v35 = vadd.f32 %v8560_v33, %v2806_v30 }
 0x18f   :  { %9062 = vmatpush3.bf16.msra.mxu1 %v11174_v53  ;;  %4181 = vmatmul.mubr.bf16.gmra.mxu0 %v10669_v34  ;;  %v8522_v34 = vpop.f32.mrf.mxu0  ;;  %v8562_v54 = vpop.f32.mrf.mxu1 }
 0x190   :  { %9063 = vmatprep.subr.bf16.mxu1 %v11176_v50  ;;  %9024 = vmatpush3.bf16.msra.mxu0 %v11177_v1  ;;  %v8563_v44 = vadd.f32 %v8562_v54, %v8561_v43  ;;  %v11196_v50 = vld [vmem:[%s15961_s4 + $0x540] sm:$0xff]  }
 0x191   :  { %9025 = vmatprep.subr.bf16.mxu0 %v11179_v63  ;;  %4188 = vmatprep.mubr.bf16.mxu0 %v10677_v52  ;;  %v8524_v48 = vpop.f32.mrf.mxu0  ;;  %v8564_v59 = vpop.f32.mrf.mxu1  ;;  %v11198_v1 = vld [vmem:[%s15961_s4 + $0x500] sm:$0xff]  }
 0x192   :  { %4246 = vmatmul.mubr.bf16.gmra.mxu1 %v10672_v45  ;;  %v8523_v45 = vadd.f32 %v8522_v34, %v8521_v36  ;;  %v10704_v36 = vld [vmem:[%s15963_s1 + $0x1e4] ss:$100 sps:$4 sm:$0xff]  }
 0x193   :  { %9064 = vmatpush3.bf16.msra.mxu1 %v11178_v55  ;;  %4253 = vmatprep.mubr.bf16.mxu1 %v10680_v61  ;;  %v8525_v58 = vpop.f32.mrf.mxu0  ;;  %v8565_v2 = vpop.f32.mrf.mxu1  ;;  %v11210_v54 = vld [vmem:[%s15961_s4 + $0x5a0] sm:$0xff]  }
 0x194   :  { %9065 = vmatprep.subr.bf16.mxu1 %v11180_v60  ;;  %9026 = vmatpush3.bf16.msra.mxu0 %v11181_v22  ;;  %v2811_v53 = vadd.f32 %v8523_v45, %v13199_v49  ;;  %v8526_v52 = vadd.f32 %v8525_v58, %v8524_v48  ;;  %v10687_v49 = vld [vmem:[%s15963_s1 + $0x48] ss:$100 sps:$4 sm:$0xff]   ;;  %v8566_v63 = vadd.f32 %v8565_v2, %v8564_v59  ;;  %v11199_v60 = vld [vmem:[%s15961_s4 + $0x5f8] sm:$0xff]   ;;  %v11208_v45 = vld [vmem:[%s15961_s4 + $0x5e0] sm:$0xff]  }
 0x195   :  { %9027 = vmatprep.subr.bf16.mxu0 %v11183_v11  ;;  %v8623_v10 = vpop.f32.mrf.mxu1  ;;  %v11201_v22 = vld [vmem:[%s15961_s4 + $0x5b8] sm:$0xff]  }
 0x196   :  { %v13409_v61 = vadd.f32 %v8563_v44, %v2811_v53  ;;  %v2814_v55 = vadd.f32 %v8526_v52, %v13220_v12  ;;  %v10698_v12 = vld [vmem:[%s15963_s1 + $0x11c] ss:$100 sps:$4 sm:$0xff]  }
 0x197   :  { %9066 = vmatpush3.bf16.msra.mxu1 %v11182_v13  ;;  %4189 = vmatmul.mubr.bf16.gmra.mxu0 %v10675_v7  ;;  %v8583_v7 = vpop.f32.mrf.mxu0  ;;  %v8624_v11 = vpop.f32.mrf.mxu1  ;;  %v10702_v53 = vld [vmem:[%s15963_s1 + $0x1e0] ss:$100 sps:$4 sm:$0xff]   ;;  %v11212_v58 = vld [vmem:[%s15961_s4 + $0x618] sm:$0xff]  }
 0x198   :  { %9067 = vmatprep.subr.bf16.mxu1 %v11184_v5  ;;  %9028 = vmatpush3.bf16.msra.mxu0 %v11185_v27  ;;  %v13436_v8 = vadd.f32 %v8566_v63, %v2814_v55  ;;  %v11202_v5 = vld [vmem:[%s15961_s4 + $0x5f0] sm:$0xff]   ;;  %v8625_v18 = vadd.f32 %v8624_v11, %v8623_v10  ;;  %v11213_v2 = vld [vmem:[%s15961_s4 + $0x598] sm:$0xff]   ;;  %v10708_v11 = vld [vmem:[%s15963_s1 + $0x2a8] ss:$100 sps:$4 sm:$0xff]  }
 0x199   :  { %9029 = vmatprep.subr.bf16.mxu0 %v11187_v29  ;;  %4196 = vmatprep.mubr.bf16.mxu0 %v10683_v20  ;;  %v8584_v13 = vpop.f32.mrf.mxu0  ;;  %v8626_v20 = vpop.f32.mrf.mxu1 }
 0x19a   :  { %4254 = vmatmul.mubr.bf16.gmra.mxu1 %v10678_v4  ;;  %v10695_v4 = vld [vmem:[%s15963_s1 + $0x114] ss:$100 sps:$4 sm:$0xff]   ;;  %v8585_v16 = vadd.f32 %v8584_v13, %v8583_v7 }
 0x19b   :  { %9068 = vmatpush3.bf16.msra.mxu1 %v11186_v15  ;;  %4261 = vmatprep.mubr.bf16.mxu1 %v10686_v24  ;;  %v8586_v17 = vpop.f32.mrf.mxu0  ;;  %v10693_v24 = vld [vmem:[%s15963_s1 + $0x110] ss:$100 sps:$4 sm:$0xff]   ;;  %v8627_v29 = vpop.f32.mrf.mxu1 }
 0x19c   :  { %9069 = vmatprep.subr.bf16.mxu1 %v11188_v21  ;;  %9030 = vmatpush3.bf16.msra.mxu0 %v11189_v39  ;;  %v2917_v14 = vadd.f32 %v8585_v16, %v13253_v23  ;;  %v11205_v23 = vld [vmem:[%s15961_s4 + $0x5e8] sm:$0xff]   ;;  %v8628_v33 = vadd.f32 %v8627_v29, %v8626_v20  ;;  %v11214_v7 = vld [vmem:[%s15961_s4 + $0x5d0] sm:$0xff]   ;;  %v10705_v16 = vld [vmem:[%s15963_s1 + $0x2a0] ss:$100 sps:$4 sm:$0xff]  }
 0x19d   :  { %9031 = vmatprep.subr.bf16.mxu0 %v11191_v41  ;;  %v8587_v27 = vpop.f32.mrf.mxu0  ;;  %v11206_v21 = vld [vmem:[%s15961_s4 + $0x628] sm:$0xff]  }
 0x19e   :  { %v8588_v15 = vadd.f32 %v8587_v27, %v8586_v17  ;;  %v13463_v30 = vadd.f32 %v8625_v18, %v2917_v14  ;;  %v11218_v14 = vld [vmem:[%s15961_s4 + $0x608] sm:$0xff]   ;;  %v10714_v27 = vld [vmem:[%s15963_s1 + $0x60] ss:$100 sps:$4 sm:$0xff]  }
 0x19f   :  { %9070 = vmatpush3.bf16.msra.mxu1 %v11190_v32  ;;  %4197 = vmatmul.mubr.bf16.gmra.mxu0 %v10681_v19  ;;  %v8589_v31 = vpop.f32.mrf.mxu0  ;;  %v10701_v19 = vld [vmem:[%s15963_s1 + $0x1dc] ss:$100 sps:$4 sm:$0xff]   ;;  %v11207_v32 = vld [vmem:[%s15961_s4 + $0x5a8] sm:$0xff]  }
 0x1a0   :  { %9071 = vmatprep.subr.bf16.mxu1 %v11192_v42  ;;  %9032 = vmatpush3.bf16.msra.mxu0 %v11193_v51 }
 0x1a1   :  { %9033 = vmatprep.subr.bf16.mxu0 %v11195_v56  ;;  %4302 = vmatprep.mubr.bf16.mxu0 %v10689_v46  ;;  %v8590_v41 = vpop.f32.mrf.mxu0 }
 0x1a2   :  { %4262 = vmatmul.mubr.bf16.gmra.mxu1 %v10684_v38  ;;  %v2920_v38 = vadd.f32 %v8588_v15, %v13271_v37  ;;  %v8591_v42 = vadd.f32 %v8590_v41, %v8589_v31  ;;  %v11209_v37 = vld [vmem:[%s15961_s4 + $0x620] sm:$0xff]  }
 0x1a3   :  { %9072 = vmatpush3.bf16.msra.mxu1 %v11194_v47  ;;  %4367 = vmatprep.mubr.bf16.mxu1 %v10692_v40  ;;  %v8592_v46 = vpop.f32.mrf.mxu0  ;;  %v10699_v47 = vld [vmem:[%s15963_s1 + $0x1d8] ss:$100 sps:$4 sm:$0xff]  }
 0x1a4   :  { %9073 = vmatprep.subr.bf16.mxu1 %v11196_v50  ;;  %9034 = vmatpush3.bf16.msra.mxu0 %v11197_v0  ;;  %v13481_v43 = vadd.f32 %v8628_v33, %v2920_v38  ;;  %v2925_v48 = vadd.f32 %v8591_v42, %v13307_v57  ;;  %v11211_v57 = vld [vmem:[%s15961_s4 + $0x5d8] sm:$0xff]   ;;  %v10710_v0 = vld [vmem:[%s15963_s1 + $0x2ac] ss:$100 sps:$4 sm:$0xff]  }
 0x1a5   :  { %9099 = vmatprep.subr.bf16.mxu0 %v11199_v60  ;;  %v8593_v44 = vpop.f32.mrf.mxu0  ;;  %v10711_v42 = vld [vmem:[%s15963_s1 + $0x58] ss:$100 sps:$4 sm:$0xff]  }
 0x1a6   :  { %v8594_v56 = vadd.f32 %v8593_v44, %v8592_v46 }
 0x1a7   :  { %9074 = vmatpush3.bf16.msra.mxu1 %v11198_v1  ;;  %4303 = vmatmul.mubr.bf16.vlgmr.msra.gmra.mxu0 %v10687_v49 }
 0x1a8   :  { %10159 = vmatprep.subr.bf16.mxu1 %v11200_v6  ;;  %9100 = vmatpush3.bf16.msra.mxu0 %v11201_v22  ;;  %v8629_v39 = vpop.f32.mrf.mxu1  ;;  %v2928_v1 = vadd.f32 %v8594_v56, %v13328_v3  ;;  %v11215_v3 = vld [vmem:[%s15961_s4 + $0x610] sm:$0xff]  }
 0x1a9   :  { %9101 = vmatprep.subr.bf16.mxu0 %v11202_v5  ;;  %4310 = vmatprep.mubr.bf16.mxu0 %v10695_v4  ;;  %v11216_v5 = vld [vmem:[%s15961_s4 + $0x590] sm:$0xff]  }
 0x1aa   :  { %4368 = vmatmul.mubr.bf16.vlgmr.msra.gmra.mxu1 %v10690_v62  ;;  %v8630_v34 = vpop.f32.mrf.mxu1  ;;  %v10707_v62 = vld [vmem:[%s15963_s1 + $0x2a4] ss:$100 sps:$4 sm:$0xff]  }
 0x1ab   :  { %10160 = vmatpush3.bf16.msra.mxu1 %v11200_v6  ;;  %4375 = vmatprep.mubr.bf16.mxu1 %v10698_v12  ;;  %v8631_v40 = vadd.f32 %v8630_v34, %v8629_v39  ;;  %v10715_v34 = vld [vmem:[%s15963_s1 + $0x128] ss:$100 sps:$4 sm:$0xff]  }
 0x1ac   :  { %10161 = vmatprep.subr.bf16.mxu1 %v11203_v9  ;;  %9102 = vmatpush3.bf16.msra.mxu0 %v11204_v26  ;;  %v8632_v51 = vpop.f32.mrf.mxu1  ;;  %v10713_v26 = vld [vmem:[%s15963_s1 + $0x5c] ss:$100 sps:$4 sm:$0xff]  }
 0x1ad   :  { %9103 = vmatprep.subr.bf16.mxu0 %v11205_v23  ;;  %v13499_v52 = vadd.f32 %v8631_v40, %v2925_v48  ;;  %v11219_v23 = vld [vmem:[%s15961_s4 + $0x588] sm:$0xff]   ;;  %v11224_v48 = vld [vmem:[%s15961_s4 + $0xf8] sm:$0xff]  }
 0x1ae   :  { %v8633_v50 = vpop.f32.mrf.mxu1  ;;  %v8595_v59 = vpop.f32.mrf.mxu0 }
 0x1af   :  { %10162 = vmatpush3.bf16.msra.mxu1 %v11203_v9  ;;  %4311 = vmatmul.mubr.bf16.gmra.mxu0 %v10693_v24  ;;  %v8634_v49 = vadd.f32 %v8633_v50, %v8632_v51 }
 0x1b0   :  { %10163 = vmatprep.subr.bf16.mxu1 %v11206_v21  ;;  %9104 = vmatpush3.bf16.msra.mxu0 %v11207_v32  ;;  %v8596_v63 = vpop.f32.mrf.mxu0 }
 0x1b1   :  { %9105 = vmatprep.subr.bf16.mxu0 %v11208_v45  ;;  %4318 = vmatprep.mubr.bf16.mxu0 %v10701_v19  ;;  %v8635_v55 = vpop.f32.mrf.mxu1  ;;  %v8597_v60 = vadd.f32 %v8596_v63, %v8595_v59  ;;  %v13517_v4 = vadd.f32 %v8634_v49, %v2928_v1  ;;  %v11220_v19 = vld [vmem:[%s15961_s4 + $0x5c0] sm:$0xff]   ;;  %v11226_v59 = vld [vmem:[%s15961_s4 + $0xb8] sm:$0xff]  }
 0x1b2   :  { %4376 = vmatmul.mubr.bf16.gmra.mxu1 %v10696_v25  ;;  %v8598_v12 = vpop.f32.mrf.mxu0  ;;  %v11222_v45 = vld [vmem:[%s15961_s4 + $0x580] sm:$0xff]  }
 0x1b3   :  { %10164 = vmatpush3.bf16.msra.mxu1 %v11206_v21  ;;  %4383 = vmatprep.mubr.bf16.mxu1 %v10704_v36  ;;  %v8636_v6 = vpop.f32.mrf.mxu1  ;;  %v2933_v22 = vadd.f32 %v8597_v60, %v13361_v28  ;;  %v11217_v28 = vld [vmem:[%s15961_s4 + $0x5c8] sm:$0xff]   ;;  %v10716_v60 = vld [vmem:[%s15963_s1 + $0x120] ss:$100 sps:$4 sm:$0xff]  }
 0x1b4   :  { %10165 = vmatprep.subr.bf16.mxu1 %v11209_v37  ;;  %9106 = vmatpush3.bf16.msra.mxu0 %v11210_v54  ;;  %v8637_v10 = vadd.f32 %v8636_v6, %v8635_v55  ;;  %v8599_v9 = vpop.f32.mrf.mxu0  ;;  %v10722_v54 = vld [vmem:[%s15963_s1 + $0x1f0] ss:$100 sps:$4 sm:$0xff]   ;;  %v10723_v6 = vld [vmem:[%s15963_s1 + $0x2b8] ss:$100 sps:$4 sm:$0xff]  }
 0x1b5   :  { %9107 = vmatprep.subr.bf16.mxu0 %v11211_v57  ;;  %v8638_v13 = vpop.f32.mrf.mxu1  ;;  %v8600_v17 = vadd.f32 %v8599_v9, %v8598_v12 }
 0x1b6   :  { %v13535_v20 = vadd.f32 %v8637_v10, %v2933_v22  ;;  %v8601_v24 = vpop.f32.mrf.mxu0  ;;  %v11231_v22 = vld [vmem:[%s15961_s4 + $0x68] sm:$0xff]  }
 0x1b7   :  { %10166 = vmatpush3.bf16.msra.mxu1 %v11209_v37  ;;  %4319 = vmatmul.mubr.bf16.gmra.mxu0 %v10699_v47  ;;  %v8639_v18 = vpop.f32.mrf.mxu1  ;;  %v2936_v15 = vadd.f32 %v8600_v17, %v13382_v35  ;;  %v11221_v35 = vld [vmem:[%s15961_s4 + $0x600] sm:$0xff]  }
 0x1b8   :  { %10167 = vmatprep.subr.bf16.mxu1 %v11212_v58  ;;  %9108 = vmatpush3.bf16.msra.mxu0 %v11213_v2  ;;  %v8640_v25 = vadd.f32 %v8639_v18, %v8638_v13  ;;  %v8602_v21 = vpop.f32.mrf.mxu0 }
 0x1b9   :  { %9109 = vmatprep.subr.bf16.mxu0 %v11214_v7  ;;  %4326 = vmatprep.mubr.bf16.mxu0 %v10707_v62  ;;  %v8641_v29 = vpop.f32.mrf.mxu1  ;;  %v8603_v31 = vadd.f32 %v8602_v21, %v8601_v24  ;;  %v10719_v21 = vld [vmem:[%s15963_s1 + $0x1e8] ss:$100 sps:$4 sm:$0xff]  }
 0x1ba   :  { %4384 = vmatmul.mubr.bf16.gmra.mxu1 %v10702_v53  ;;  %v13553_v36 = vadd.f32 %v8640_v25, %v2936_v15  ;;  %v8604_v38 = vpop.f32.mrf.mxu0  ;;  %v10718_v53 = vld [vmem:[%s15963_s1 + $0x124] ss:$100 sps:$4 sm:$0xff]  }
 0x1bb   :  { %10168 = vmatpush3.bf16.msra.mxu1 %v11212_v58  ;;  %4391 = vmatprep.mubr.bf16.mxu1 %v10710_v0  ;;  %v8642_v33 = vpop.f32.mrf.mxu1  ;;  %v2941_v32 = vadd.f32 %v8603_v31, %v13409_v61  ;;  %v11223_v61 = vld [vmem:[%s15961_s4 + $0x78] sm:$0xff]   ;;  %v11235_v25 = vld [vmem:[%s15961_s4 + $0x60] sm:$0xff]  }
 0x1bc   :  { %10169 = vmatprep.subr.bf16.mxu1 %v11215_v3  ;;  %9110 = vmatpush3.bf16.msra.mxu0 %v11216_v5  ;;  %v8643_v39 = vadd.f32 %v8642_v33, %v8641_v29  ;;  %v8605_v37 = vpop.f32.mrf.mxu0  ;;  %v11225_v58 = vld [vmem:[%s15961_s4 + $0x38] sm:$0xff]   ;;  %v10732_v5 = vld [vmem:[%s15964_s2 + $0xc] ss:$100 sps:$4 sm:$0xff]   ;;  %v11237_v33 = vld [vmem:[%s15961_s4 + $0x20] sm:$0xff]  }
 0x1bd   :  { %9111 = vmatprep.subr.bf16.mxu0 %v11217_v28  ;;  %v8644_v41 = vpop.f32.mrf.mxu1  ;;  %v8606_v46 = vadd.f32 %v8605_v37, %v8604_v38  ;;  %v11234_v28 = vld [vmem:[%s15961_s4 + $0xa8] sm:$0xff]   ;;  %v11239_v38 = vld [vmem:[%s15961_s4 + $0x58] sm:$0xff]  }
 0x1be   :  { %v3006_v51 = vadd.f32 %v8643_v39, %v2941_v32  ;;  %v10153_v56 = vpop.f32.mrf.mxu0  ;;  %v11240_v39 = vld [vmem:[%s15961_s4 + $0xd8] sm:$0xff]  }
 0x1bf   :  { %10170 = vmatpush3.bf16.msra.mxu1 %v11215_v3  ;;  %4327 = vmatmul.mubr.bf16.gmra.mxu0 %v10705_v16  ;;  %v8645_v40 = vpop.f32.mrf.mxu1  ;;  %v2944_v44 = vadd.f32 %v8606_v46, %v13436_v8  ;;  %v13579_v57 = vadd.f32 %v10153_v56, %v13499_v52  ;;  %v11227_v8 = vld [vmem:[%s15961_s4 + $0x70] sm:$0xff]   ;;  %v11242_v37 = vld [vmem:[%s15961_s4 + $0x98] sm:$0xff]   ;;  %v11248_v56 = vld [vmem:[%s15961_s4 + $0xc8] sm:$0xff]  }
 0x1c0   :  { %10171 = vmatprep.subr.bf16.mxu1 %v11218_v14  ;;  %9112 = vmatpush3.bf16.msra.mxu0 %v11219_v23  ;;  %v8646_v47 = vadd.f32 %v8645_v40, %v8644_v41  ;;  %v3046_v49 = vpop.f32.mrf.mxu0  ;;  %v11228_v52 = vld [vmem:[%s15961_s4 + $0xf0] sm:$0xff]  }
 0x1c1   :  { %9113 = vmatprep.subr.bf16.mxu0 %v11220_v19  ;;  %4432 = vmatprep.mubr.bf16.mxu0 %v10713_v26  ;;  %v13594_v1 = vadd.f32 %v3046_v49, %v13463_v30  ;;  %v11229_v30 = vld [vmem:[%s15961_s4 + $0x30] sm:$0xff]   ;;  %v11236_v26 = vld [vmem:[%s15961_s4 + $0xe0] sm:$0xff]   ;;  %v11249_v49 = vld [vmem:[%s15961_s4 + $0x8] sm:$0xff]  }
 0x1c2   :  { %4392 = vmatmul.mubr.bf16.gmra.mxu1 %v10708_v11  ;;  %v3009_v0 = vadd.f32 %v8646_v47, %v2944_v44  ;;  %v10154_v2 = vpop.f32.mrf.mxu0  ;;  %v11230_v3 = vld [vmem:[%s15961_s4 + $0xb0] sm:$0xff]   ;;  %v11247_v44 = vld [vmem:[%s15961_s4 + $0x48] sm:$0xff]  }
 0x1c3   :  { %10172 = vmatpush3.bf16.msra.mxu1 %v11218_v14  ;;  %10175 = vmatprep.mubr.bf16.mxu1 %v10714_v27  ;;  %v13605_v7 = vadd.f32 %v10154_v2, %v13517_v4  ;;  %v11232_v4 = vld [vmem:[%s15961_s4 + $0xe8] sm:$0xff]   ;;  %v11243_v46 = vld [vmem:[%s15961_s4 + $0x50] sm:$0xff]  }
 0x1c4   :  { %10173 = vmatprep.subr.bf16.mxu1 %v11221_v35  ;;  %9114 = vmatpush3.bf16.msra.mxu0 %v11222_v45  ;;  %v3049_v12 = vpop.f32.mrf.mxu0  ;;  %v10721_v11 = vld [vmem:[%s15963_s1 + $0x1ec] ss:$100 sps:$4 sm:$0xff]   ;;  %v11241_v45 = vld [vmem:[%s15961_s4 + $0x18] sm:$0xff]  }
 0x1c5   :  { %9151 = vmatprep.subr.bf16.mxu0 %v11223_v61  ;;  %v13620_v13 = vadd.f32 %v3049_v12, %v13481_v43  ;;  %v11233_v43 = vld [vmem:[%s15961_s4 + $0x28] sm:$0xff]   ;;  %v11244_v40 = vld [vmem:[%s15961_s4 + $0xd0] sm:$0xff]  }
 0x1c6   :  { %v10157_v9 = vpop.f32.mrf.mxu0  ;;  %v11245_v47 = vld [vmem:[%s15961_s4 + $0x10] sm:$0xff]  }
 0x1c7   :  { %10174 = vmatpush3.bf16.msra.mxu1 %v11221_v35  ;;  %4433 = vmatmul.mubr.bf16.vlgmr.msra.gmra.mxu0 %v10711_v42  ;;  %v13630_v18 = vadd.f32 %v10157_v9, %v3006_v51  ;;  %v10726_v42 = vld [vmem:[%s15963_s1 + $0x2b4] ss:$100 sps:$4 sm:$0xff]  }
 0x1c8   :  { %9191 = vmatprep.subr.bf16.mxu1 %v11224_v48  ;;  %9152 = vmatpush3.bf16.msra.mxu0 %v11225_v58  ;;  %v3062_v14 = vpop.f32.mrf.mxu0  ;;  %v10724_v51 = vld [vmem:[%s15963_s1 + $0x2b0] ss:$100 sps:$4 sm:$0xff]   ;;  %v10729_v58 = vld [vmem:[%s15964_s2 + $0x4] ss:$100 sps:$4 sm:$0xff]  }
 0x1c9   :  { %v8675_v50 = vpop.f32.mrf.mxu1  ;;  %9153 = vmatprep.subr.bf16.mxu0 %v11227_v8  ;;  %4440 = vmatprep.mubr.bf16.mxu0 %v10718_v53  ;;  %v13645_v27 = vadd.f32 %v3062_v14, %v13535_v20  ;;  %v11238_v20 = vld [vmem:[%s15961_s4 + $0xa0] sm:$0xff]   ;;  %v11246_v53 = vld [vmem:[%s15961_s4 + $0x90] sm:$0xff]  }
 0x1ca   :  { %10176 = vmatmul.mubr.bf16.vlgmr.msra.gmra.mxu1 %v10715_v34  ;;  %v10158_v29 = vpop.f32.mrf.mxu0 }
 0x1cb   :  { %9192 = vmatpush3.bf16.msra.mxu1 %v11226_v59  ;;  %v8676_v62 = vpop.f32.mrf.mxu1  ;;  %10179 = vmatprep.mubr.bf16.mxu1 %v10722_v54  ;;  %v13652_v31 = vadd.f32 %v10158_v29, %v3009_v0  ;;  %v11252_v0 = vld [vmem:[%s15961_s4 + $0xc0] sm:$0xff]  }
 0x1cc   :  { %9193 = vmatprep.subr.bf16.mxu1 %v11228_v52  ;;  %v13596_v55 = vadd.f32 %v8676_v62, %v8675_v50  ;;  %9154 = vmatpush3.bf16.msra.mxu0 %v11229_v30  ;;  %v3065_v19 = vpop.f32.mrf.mxu0  ;;  %v11250_v62 = vld [vmem:[%s15961_s4 + $0x88] sm:$0xff]   ;;  %v11251_v52 = vld [vmem:[%s15961_s4 + $0x40] sm:$0xff]  }
 0x1cd   :  { %v8678_v63 = vpop.f32.mrf.mxu1  ;;  %9155 = vmatprep.subr.bf16.mxu0 %v11231_v22  ;;  %v13667_v32 = vadd.f32 %v3065_v19, %v13553_v36  ;;  %v11253_v30 = vld [vmem:[%s15961_s4] sm:$0xff]   ;;  %v11256_v22 = vld [vmem:[%s15961_s4 + $0x1f8] sm:$0xff]   ;;  %v10736_v19 = vld [vmem:[%s15964_s2 + $0xd0] ss:$100 sps:$4 sm:$0xff]  }
 0x1cf   :  { %9194 = vmatpush3.bf16.msra.mxu1 %v11230_v3  ;;  %v8679_v10 = vpop.f32.mrf.mxu1  ;;  %4441 = vmatmul.mubr.bf16.gmra.mxu0 %v10716_v60  ;;  %v10727_v60 = vld [vmem:[%s15964_s2] ss:$100 sps:$4 sm:$0xff]  }
 0x1d0   :  { %9195 = vmatprep.subr.bf16.mxu1 %v11232_v4  ;;  %v13622_v16 = vadd.f32 %v8679_v10, %v8678_v63  ;;  %9156 = vmatpush3.bf16.msra.mxu0 %v11233_v43  ;;  %v11254_v3 = vld [vmem:[%s15961_s4 + $0x80] sm:$0xff]   ;;  %v11255_v10 = vld [vmem:[%s15961_s4 + $0x178] sm:$0xff]  }
 0x1d1   :  { %v8681_v17 = vpop.f32.mrf.mxu1  ;;  %9157 = vmatprep.subr.bf16.mxu0 %v11235_v25  ;;  %4448 = vmatprep.mubr.bf16.mxu0 %v10721_v11  ;;  %v10735_v11 = vld [vmem:[%s15964_s2 + $0xcc] ss:$100 sps:$4 sm:$0xff]   ;;  %v11257_v43 = vld [vmem:[%s15961_s4 + $0x138] sm:$0xff]  }
 0x1d2   :  { %10180 = vmatmul.mubr.bf16.gmra.mxu1 %v10723_v6  ;;  %v10730_v6 = vld [vmem:[%s15964_s2 + $0x8] ss:$100 sps:$4 sm:$0xff]   ;;  %v11259_v25 = vld [vmem:[%s15961_s4 + $0x170] sm:$0xff]  }
 0x1d3   :  { %9196 = vmatpush3.bf16.msra.mxu1 %v11234_v28  ;;  %v8682_v24 = vpop.f32.mrf.mxu1  ;;  %5243 = vmatprep.mubr.bf16.mxu1 %v10732_v5  ;;  %v10738_v5 = vld [vmem:[%s15964_s2 + $0xd4] ss:$100 sps:$4 sm:$0xff]  }
 0x1d4   :  { %9197 = vmatprep.subr.bf16.mxu1 %v11236_v26  ;;  %v13647_v15 = vadd.f32 %v8682_v24, %v8681_v17  ;;  %9158 = vmatpush3.bf16.msra.mxu0 %v11237_v33  ;;  %v11258_v28 = vld [vmem:[%s15961_s4 + $0x1b8] sm:$0xff]   ;;  %v11260_v26 = vld [vmem:[%s15961_s4 + $0x1f0] sm:$0xff]  }
 0x1d5   :  { %v8684_v23 = vpop.f32.mrf.mxu1  ;;  %9159 = vmatprep.subr.bf16.mxu0 %v11239_v38  ;;  %v11261_v38 = vld [vmem:[%s15961_s4 + $0x130] sm:$0xff]  }
 0x1d7   :  { %9198 = vmatpush3.bf16.msra.mxu1 %v11238_v20  ;;  %v8685_v35 = vpop.f32.mrf.mxu1  ;;  %4449 = vmatmul.mubr.bf16.gmra.mxu0 %v10719_v21  ;;  %v10733_v20 = vld [vmem:[%s15964_s2 + $0xc8] ss:$100 sps:$4 sm:$0xff]  }
 0x1d8   :  { %9199 = vmatprep.subr.bf16.mxu1 %v11240_v39  ;;  %v13669_v41 = vadd.f32 %v8685_v35, %v8684_v23  ;;  %9160 = vmatpush3.bf16.msra.mxu0 %v11241_v45  ;;  %v11262_v39 = vld [vmem:[%s15961_s4 + $0x1b0] sm:$0xff]   ;;  %v11263_v45 = vld [vmem:[%s15961_s4 + $0x168] sm:$0xff]  }
 0x1d9   :  { %v8687_v34 = vpop.f32.mrf.mxu1  ;;  %9161 = vmatprep.subr.bf16.mxu0 %v11243_v46  ;;  %4456 = vmatprep.mubr.bf16.mxu0 %v10726_v42 }
 0x1db   :  { %9200 = vmatpush3.bf16.msra.mxu1 %v11242_v37  ;;  %v8688_v36 = vpop.f32.mrf.mxu1 }
 0x1dc   :  { %9201 = vmatprep.subr.bf16.mxu1 %v11244_v40  ;;  %v13686_v61 = vadd.f32 %v8688_v36, %v8687_v34  ;;  %9162 = vmatpush3.bf16.msra.mxu0 %v11245_v47  ;;  %v10741_v40 = vld [vmem:[%s15964_s2 + $0x194] ss:$100 sps:$4 sm:$0xff]  }
 0x1dd   :  { %v8690_v48 = vpop.f32.mrf.mxu1  ;;  %9163 = vmatprep.subr.bf16.mxu0 %v11247_v44  ;;  %v11266_v44 = vld [vmem:[%s15961_s4 + $0x1a8] sm:$0xff]  }
 0x1df   :  { %9202 = vmatpush3.bf16.msra.mxu1 %v11246_v53  ;;  %v8691_v54 = vpop.f32.mrf.mxu1  ;;  %4457 = vmatmul.mubr.bf16.gmra.mxu0 %v10724_v51 }
 0x1e0   :  { %9203 = vmatprep.subr.bf16.mxu1 %v11248_v56  ;;  %v13703_v50 = vadd.f32 %v8691_v54, %v8690_v48  ;;  %9164 = vmatpush3.bf16.msra.mxu0 %v11249_v49  ;;  %v10744_v48 = vld [vmem:[%s15964_s2 + $0x19c] ss:$100 sps:$4 sm:$0xff]   ;;  %v11265_v54 = vld [vmem:[%s15961_s4 + $0x128] sm:$0xff]  }
 0x1e1   :  { %v8693_v59 = vpop.f32.mrf.mxu1  ;;  %9165 = vmatprep.subr.bf16.mxu0 %v11251_v52  ;;  %5178 = vmatprep.mubr.bf16.mxu0 %v10729_v58 }
 0x1e3   :  { %9204 = vmatpush3.bf16.msra.mxu1 %v11250_v62  ;;  %v8694_v8 = vpop.f32.mrf.mxu1 }
 0x1e4   :  { %9205 = vmatprep.subr.bf16.mxu1 %v11252_v0  ;;  %v13720_v2 = vadd.f32 %v8694_v8, %v8693_v59  ;;  %9166 = vmatpush3.bf16.msra.mxu0 %v11253_v30  ;;  %v11267_v59 = vld [vmem:[%s15961_s4 + $0x160] sm:$0xff]  }
 0x1e5   :  { %v8696_v63 = vpop.f32.mrf.mxu1  ;;  %9231 = vmatprep.subr.bf16.mxu0 %v11255_v10  ;;  %v11269_v30 = vld [vmem:[%s15961_s4 + $0x120] sm:$0xff]  }
 0x1e6   :  { %v8715_v9 = vpop.f32.mrf.mxu0 }
 0x1e7   :  { %9206 = vmatpush3.bf16.msra.mxu1 %v11254_v3  ;;  %v8697_v12 = vpop.f32.mrf.mxu1  ;;  %5179 = vmatmul.mubr.bf16.vlgmr.msra.gmra.mxu0 %v10727_v60  ;;  %v10742_v60 = vld [vmem:[%s15964_s2 + $0x198] ss:$100 sps:$4 sm:$0xff]   ;;  %v11270_v3 = vld [vmem:[%s15961_s4 + $0x1a0] sm:$0xff]  }
 0x1e8   :  { %9271 = vmatprep.subr.bf16.mxu1 %v11256_v22  ;;  %v13740_v4 = vadd.f32 %v8697_v12, %v8696_v63  ;;  %9232 = vmatpush3.bf16.msra.mxu0 %v11257_v43  ;;  %v8716_v14 = vpop.f32.mrf.mxu0  ;;  %v10739_v63 = vld [vmem:[%s15964_s2 + $0x190] ss:$100 sps:$4 sm:$0xff]   ;;  %v11271_v22 = vld [vmem:[%s15961_s4 + $0x158] sm:$0xff]   ;;  %v10750_v43 = vld [vmem:[%s15964_s2 + $0x264] ss:$100 sps:$4 sm:$0xff]  }
 0x1e9   :  { %9233 = vmatprep.subr.bf16.mxu0 %v11259_v25  ;;  %v8717_v29 = vadd.f32 %v8716_v14, %v8715_v9  ;;  %5186 = vmatprep.mubr.bf16.mxu0 %v10735_v11  ;;  %v11273_v25 = vld [vmem:[%s15961_s4 + $0x118] sm:$0xff]  }
 0x1ea   :  { %5244 = vmatmul.mubr.bf16.vlgmr.msra.gmra.mxu1 %v10730_v6  ;;  %v8755_v17 = vpop.f32.mrf.mxu1  ;;  %v8718_v21 = vpop.f32.mrf.mxu0 }
 0x1eb   :  { %9272 = vmatpush3.bf16.msra.mxu1 %v11258_v28  ;;  %5251 = vmatprep.mubr.bf16.mxu1 %v10738_v5  ;;  %v3785_v35 = vadd.f32 %v8717_v29, %v13596_v55  ;;  %v11264_v55 = vld [vmem:[%s15961_s4 + $0x1e8] sm:$0xff]  }
 0x1ec   :  { %v8756_v24 = vpop.f32.mrf.mxu1  ;;  %9273 = vmatprep.subr.bf16.mxu1 %v11260_v26  ;;  %9234 = vmatpush3.bf16.msra.mxu0 %v11261_v38  ;;  %v8719_v42 = vpop.f32.mrf.mxu0  ;;  %v11274_v26 = vld [vmem:[%s15961_s4 + $0x198] sm:$0xff]  }
 0x1ed   :  { %v8757_v23 = vadd.f32 %v8756_v24, %v8755_v17  ;;  %9235 = vmatprep.subr.bf16.mxu0 %v11263_v45  ;;  %v8720_v36 = vadd.f32 %v8719_v42, %v8718_v21  ;;  %v10747_v17 = vld [vmem:[%s15964_s2 + $0x25c] ss:$100 sps:$4 sm:$0xff]   ;;  %v11275_v21 = vld [vmem:[%s15961_s4 + $0x150] sm:$0xff]  }
 0x1ee   :  { %v8758_v33 = vpop.f32.mrf.mxu1  ;;  %v8721_v51 = vpop.f32.mrf.mxu0  ;;  %v10748_v42 = vld [vmem:[%s15964_s2 + $0x260] ss:$100 sps:$4 sm:$0xff]   ;;  %v11277_v45 = vld [vmem:[%s15961_s4 + $0x110] sm:$0xff]  }
 0x1ef   :  { %9274 = vmatpush3.bf16.msra.mxu1 %v11262_v39  ;;  %v13779_v37 = vadd.f32 %v8757_v23, %v3785_v35  ;;  %5187 = vmatmul.mubr.bf16.gmra.mxu0 %v10733_v20  ;;  %v3788_v53 = vadd.f32 %v8720_v36, %v13622_v16  ;;  %v11268_v16 = vld [vmem:[%s15961_s4 + $0x1e0] sm:$0xff]   ;;  %v10745_v39 = vld [vmem:[%s15964_s2 + $0x258] ss:$100 sps:$4 sm:$0xff]  }
 0x1f0   :  { %v8759_v34 = vpop.f32.mrf.mxu1  ;;  %9275 = vmatprep.subr.bf16.mxu1 %v11264_v55  ;;  %9236 = vmatpush3.bf16.msra.mxu0 %v11265_v54  ;;  %v8722_v56 = vpop.f32.mrf.mxu0  ;;  %v11278_v55 = vld [vmem:[%s15961_s4 + $0x190] sm:$0xff]   ;;  %v10756_v54 = vld [vmem:[%s15964_s2 + $0x1c] ss:$100 sps:$4 sm:$0xff]  }
 0x1f1   :  { %v8760_v46 = vadd.f32 %v8759_v34, %v8758_v33  ;;  %9237 = vmatprep.subr.bf16.mxu0 %v11267_v59  ;;  %v8723_v62 = vadd.f32 %v8722_v56, %v8721_v51  ;;  %5194 = vmatprep.mubr.bf16.mxu0 %v10741_v40  ;;  %v11279_v40 = vld [vmem:[%s15961_s4 + $0x148] sm:$0xff]  }
 0x1f2   :  { %5252 = vmatmul.mubr.bf16.gmra.mxu1 %v10736_v19  ;;  %v8761_v47 = vpop.f32.mrf.mxu1  ;;  %v8724_v52 = vpop.f32.mrf.mxu0  ;;  %v11281_v59 = vld [vmem:[%s15961_s4 + $0x108] sm:$0xff]  }
 0x1f3   :  { %9276 = vmatpush3.bf16.msra.mxu1 %v11266_v44  ;;  %v13800_v49 = vadd.f32 %v8760_v46, %v3788_v53  ;;  %5259 = vmatprep.mubr.bf16.mxu1 %v10744_v48  ;;  %v3793_v6 = vadd.f32 %v8723_v62, %v13647_v15  ;;  %v11272_v15 = vld [vmem:[%s15961_s4 + $0x1d8] sm:$0xff]  }
 0x1f4   :  { %v8762_v58 = vpop.f32.mrf.mxu1  ;;  %9277 = vmatprep.subr.bf16.mxu1 %v11268_v16  ;;  %9238 = vmatpush3.bf16.msra.mxu0 %v11269_v30  ;;  %v8725_v12 = vpop.f32.mrf.mxu0  ;;  %v10753_v53 = vld [vmem:[%s15964_s2 + $0x14] ss:$100 sps:$4 sm:$0xff]   ;;  %v11282_v16 = vld [vmem:[%s15961_s4 + $0x188] sm:$0xff]  }
 0x1f5   :  { %v8763_v8 = vadd.f32 %v8762_v58, %v8761_v47  ;;  %9239 = vmatprep.subr.bf16.mxu0 %v11271_v22  ;;  %v8726_v5 = vadd.f32 %v8725_v12, %v8724_v52  ;;  %v11283_v52 = vld [vmem:[%s15961_s4 + $0x140] sm:$0xff]   ;;  %v10754_v12 = vld [vmem:[%s15964_s2 + $0x18] ss:$100 sps:$4 sm:$0xff]  }
 0x1f6   :  { %v8764_v0 = vpop.f32.mrf.mxu1  ;;  %v8727_v28 = vpop.f32.mrf.mxu0  ;;  %v11285_v22 = vld [vmem:[%s15961_s4 + $0x100] sm:$0xff]  }
 0x1f7   :  { %9278 = vmatpush3.bf16.msra.mxu1 %v11270_v3  ;;  %v13821_v11 = vadd.f32 %v8763_v8, %v3793_v6  ;;  %5195 = vmatmul.mubr.bf16.gmra.mxu0 %v10739_v63  ;;  %v3796_v24 = vadd.f32 %v8726_v5, %v13669_v41  ;;  %v11276_v41 = vld [vmem:[%s15961_s4 + $0x1d0] sm:$0xff]  }
 0x1f8   :  { %v8765_v10 = vpop.f32.mrf.mxu1  ;;  %9279 = vmatprep.subr.bf16.mxu1 %v11272_v15  ;;  %9240 = vmatpush3.bf16.msra.mxu0 %v11273_v25  ;;  %v8728_v29 = vpop.f32.mrf.mxu0  ;;  %v10751_v3 = vld [vmem:[%s15964_s2 + $0x10] ss:$100 sps:$4 sm:$0xff]   ;;  %v11286_v15 = vld [vmem:[%s15961_s4 + $0x180] sm:$0xff]  }
 0x1f9   :  { %v8766_v9 = vadd.f32 %v8765_v10, %v8764_v0  ;;  %9241 = vmatprep.subr.bf16.mxu0 %v11275_v21  ;;  %v8729_v20 = vadd.f32 %v8728_v29, %v8727_v28  ;;  %5202 = vmatprep.mubr.bf16.mxu0 %v10747_v17  ;;  %v11287_v17 = vld [vmem:[%s15961_s4 + $0x278] sm:$0xff]   ;;  %v10762_v25 = vld [vmem:[%s15964_s2 + $0xe4] ss:$100 sps:$4 sm:$0xff]  }
 0x1fa   :  { %5260 = vmatmul.mubr.bf16.gmra.mxu1 %v10742_v60  ;;  %v8767_v14 = vpop.f32.mrf.mxu1  ;;  %v8730_v35 = vpop.f32.mrf.mxu0  ;;  %v11289_v21 = vld [vmem:[%s15961_s4 + $0x238] sm:$0xff]  }
 0x1fb   :  { %9280 = vmatpush3.bf16.msra.mxu1 %v11274_v26  ;;  %v13842_v33 = vadd.f32 %v8766_v9, %v3796_v24  ;;  %5267 = vmatprep.mubr.bf16.mxu1 %v10750_v43  ;;  %v3801_v34 = vadd.f32 %v8729_v20, %v13686_v61  ;;  %v11280_v61 = vld [vmem:[%s15961_s4 + $0x1c8] sm:$0xff]   ;;  %v10759_v24 = vld [vmem:[%s15964_s2 + $0xdc] ss:$100 sps:$4 sm:$0xff]  }
 0x1fc   :  { %v8768_v23 = vpop.f32.mrf.mxu1  ;;  %9281 = vmatprep.subr.bf16.mxu1 %v11276_v41  ;;  %9242 = vmatpush3.bf16.msra.mxu0 %v11277_v45  ;;  %v8731_v36 = vpop.f32.mrf.mxu0  ;;  %v11290_v41 = vld [vmem:[%s15961_s4 + $0x2b8] sm:$0xff]  }
 0x1fd   :  { %v8769_v19 = vadd.f32 %v8768_v23, %v8767_v14  ;;  %9243 = vmatprep.subr.bf16.mxu0 %v11279_v40  ;;  %v8732_v51 = vadd.f32 %v8731_v36, %v8730_v35  ;;  %v11291_v35 = vld [vmem:[%s15961_s4 + $0x270] sm:$0xff]   ;;  %v10760_v36 = vld [vmem:[%s15964_s2 + $0xe0] ss:$100 sps:$4 sm:$0xff]  }
 0x1fe   :  { %v8770_v38 = vpop.f32.mrf.mxu1  ;;  %v8733_v44 = vpop.f32.mrf.mxu0  ;;  %v11293_v40 = vld [vmem:[%s15961_s4 + $0x230] sm:$0xff]  }
 0x1ff   :  { %9282 = vmatpush3.bf16.msra.mxu1 %v11278_v55  ;;  %v13863_v48 = vadd.f32 %v8769_v19, %v3801_v34  ;;  %5203 = vmatmul.mubr.bf16.gmra.mxu0 %v10745_v39  ;;  %v3804_v58 = vadd.f32 %v8732_v51, %v13703_v50  ;;  %v11284_v50 = vld [vmem:[%s15961_s4 + $0x1c0] sm:$0xff]   ;;  %v10757_v55 = vld [vmem:[%s15964_s2 + $0xd8] ss:$100 sps:$4 sm:$0xff]  }
 0x200   :  { %v8771_v46 = vpop.f32.mrf.mxu1  ;;  %9283 = vmatprep.subr.bf16.mxu1 %v11280_v61  ;;  %9244 = vmatpush3.bf16.msra.mxu0 %v11281_v59  ;;  %v8734_v62 = vpop.f32.mrf.mxu0  ;;  %v11294_v61 = vld [vmem:[%s15961_s4 + $0x2b0] sm:$0xff]  }
 0x201   :  { %v8772_v47 = vadd.f32 %v8771_v46, %v8770_v38  ;;  %9245 = vmatprep.subr.bf16.mxu0 %v11283_v52  ;;  %v8735_v63 = vadd.f32 %v8734_v62, %v8733_v44  ;;  %5308 = vmatprep.mubr.bf16.mxu0 %v10753_v53  ;;  %v11295_v53 = vld [vmem:[%s15961_s4 + $0x268] sm:$0xff]  }
 0x202   :  { %5268 = vmatmul.mubr.bf16.gmra.mxu1 %v10748_v42  ;;  %v8773_v56 = vpop.f32.mrf.mxu1  ;;  %v8736_v6 = vpop.f32.mrf.mxu0  ;;  %v10768_v59 = vld [vmem:[%s15964_s2 + $0x1ac] ss:$100 sps:$4 sm:$0xff]  }
 0x203   :  { %9284 = vmatpush3.bf16.msra.mxu1 %v11282_v16  ;;  %v13884_v0 = vadd.f32 %v8772_v47, %v3804_v58  ;;  %5373 = vmatprep.mubr.bf16.mxu1 %v10756_v54  ;;  %v3809_v10 = vadd.f32 %v8735_v63, %v13720_v2  ;;  %v11288_v2 = vld [vmem:[%s15961_s4 + $0x2f8] sm:$0xff]   ;;  %v10765_v58 = vld [vmem:[%s15964_s2 + $0x1a4] ss:$100 sps:$4 sm:$0xff]  }
 0x204   :  { %v8774_v8 = vpop.f32.mrf.mxu1  ;;  %9285 = vmatprep.subr.bf16.mxu1 %v11284_v50  ;;  %9246 = vmatpush3.bf16.msra.mxu0 %v11285_v22  ;;  %v8737_v5 = vpop.f32.mrf.mxu0  ;;  %v11297_v52 = vld [vmem:[%s15961_s4 + $0x228] sm:$0xff]  }
 0x205   :  { %v8775_v60 = vadd.f32 %v8774_v8, %v8773_v56  ;;  %9311 = vmatprep.subr.bf16.mxu0 %v11287_v17  ;;  %v8738_v28 = vadd.f32 %v8737_v5, %v8736_v6  ;;  %v11298_v50 = vld [vmem:[%s15961_s4 + $0x2a8] sm:$0xff]   ;;  %v11299_v6 = vld [vmem:[%s15961_s4 + $0x260] sm:$0xff]  }
 0x206   :  { %v8776_v30 = vpop.f32.mrf.mxu1  ;;  %v10766_v5 = vld [vmem:[%s15964_s2 + $0x1a8] ss:$100 sps:$4 sm:$0xff]   ;;  %v11301_v17 = vld [vmem:[%s15961_s4 + $0x220] sm:$0xff]  }
 0x207   :  { %9286 = vmatpush3.bf16.msra.mxu1 %v11286_v15  ;;  %v13905_v43 = vadd.f32 %v8775_v60, %v3809_v10  ;;  %v8795_v26 = vpop.f32.mrf.mxu0  ;;  %5309 = vmatmul.mubr.bf16.vlgmr.msra.gmra.mxu0 %v10751_v3  ;;  %v3812_v23 = vadd.f32 %v8738_v28, %v13740_v4  ;;  %v11292_v4 = vld [vmem:[%s15961_s4 + $0x2f0] sm:$0xff]   ;;  %v10763_v15 = vld [vmem:[%s15964_s2 + $0x1a0] ss:$100 sps:$4 sm:$0xff]  }
 0x208   :  { %v8777_v9 = vpop.f32.mrf.mxu1  ;;  %9351 = vmatprep.subr.bf16.mxu1 %v11288_v2  ;;  %9312 = vmatpush3.bf16.msra.mxu0 %v11289_v21  ;;  %v11302_v2 = vld [vmem:[%s15961_s4 + $0x2a0] sm:$0xff]   ;;  %v10774_v21 = vld [vmem:[%s15964_s2 + $0x274] ss:$100 sps:$4 sm:$0xff]  }
 0x209   :  { %v8778_v14 = vadd.f32 %v8777_v9, %v8776_v30  ;;  %v8796_v20 = vpop.f32.mrf.mxu0  ;;  %9313 = vmatprep.subr.bf16.mxu0 %v11291_v35  ;;  %5316 = vmatprep.mubr.bf16.mxu0 %v10759_v24  ;;  %v11303_v24 = vld [vmem:[%s15961_s4 + $0x258] sm:$0xff]  }
 0x20a   :  { %v8835_v29 = vpop.f32.mrf.mxu1  ;;  %5374 = vmatmul.mubr.bf16.vlgmr.msra.gmra.mxu1 %v10754_v12  ;;  %v8797_v39 = vadd.f32 %v8796_v20, %v8795_v26  ;;  %v11305_v35 = vld [vmem:[%s15961_s4 + $0x218] sm:$0xff]  }
 0x20b   :  { %9352 = vmatpush3.bf16.msra.mxu1 %v11290_v41  ;;  %v13926_v38 = vadd.f32 %v8778_v14, %v3812_v23  ;;  %5381 = vmatprep.mubr.bf16.mxu1 %v10762_v25  ;;  %v8798_v34 = vpop.f32.mrf.mxu0  ;;  %v10771_v23 = vld [vmem:[%s15964_s2 + $0x26c] ss:$100 sps:$4 sm:$0xff]  }
 0x20c   :  { %v8836_v19 = vpop.f32.mrf.mxu1  ;;  %9353 = vmatprep.subr.bf16.mxu1 %v11292_v4  ;;  %v3915_v46 = vadd.f32 %v8797_v39, %v13779_v37  ;;  %9314 = vmatpush3.bf16.msra.mxu0 %v11293_v40  ;;  %v11296_v37 = vld [vmem:[%s15961_s4 + $0x2e8] sm:$0xff]   ;;  %v11306_v4 = vld [vmem:[%s15961_s4 + $0x298] sm:$0xff]  }
 0x20d   :  { %v8837_v42 = vadd.f32 %v8836_v19, %v8835_v29  ;;  %v8799_v51 = vpop.f32.mrf.mxu0  ;;  %9315 = vmatprep.subr.bf16.mxu0 %v11295_v53  ;;  %v11309_v53 = vld [vmem:[%s15961_s4 + $0x210] sm:$0xff]  }
 0x20e   :  { %v8838_v45 = vpop.f32.mrf.mxu1  ;;  %v8800_v44 = vadd.f32 %v8799_v51, %v8798_v34  ;;  %v11307_v34 = vld [vmem:[%s15961_s4 + $0x250] sm:$0xff]  }
 0x20f   :  { %9354 = vmatpush3.bf16.msra.mxu1 %v11294_v61  ;;  %v13947_v54 = vadd.f32 %v8837_v42, %v3915_v46  ;;  %v8801_v16 = vpop.f32.mrf.mxu0  ;;  %5317 = vmatmul.mubr.bf16.gmra.mxu0 %v10757_v55  ;;  %v10769_v61 = vld [vmem:[%s15964_s2 + $0x268] ss:$100 sps:$4 sm:$0xff]   ;;  %v10772_v51 = vld [vmem:[%s15964_s2 + $0x270] ss:$100 sps:$4 sm:$0xff]  }
 0x210   :  { %v8839_v47 = vpop.f32.mrf.mxu1  ;;  %9355 = vmatprep.subr.bf16.mxu1 %v11296_v37  ;;  %v3918_v8 = vadd.f32 %v8800_v44, %v13800_v49  ;;  %9316 = vmatpush3.bf16.msra.mxu0 %v11297_v52  ;;  %v11300_v49 = vld [vmem:[%s15961_s4 + $0x2e0] sm:$0xff]   ;;  %v11310_v37 = vld [vmem:[%s15961_s4 + $0x290] sm:$0xff]  }
 0x211   :  { %v8840_v56 = vadd.f32 %v8839_v47, %v8838_v45  ;;  %v8802_v63 = vpop.f32.mrf.mxu0  ;;  %9317 = vmatprep.subr.bf16.mxu0 %v11299_v6  ;;  %5324 = vmatprep.mubr.bf16.mxu0 %v10765_v58  ;;  %v11311_v58 = vld [vmem:[%s15961_s4 + $0x248] sm:$0xff]  }
 0x212   :  { %v8841_v62 = vpop.f32.mrf.mxu1  ;;  %5382 = vmatmul.mubr.bf16.gmra.mxu1 %v10760_v36  ;;  %v8803_v3 = vadd.f32 %v8802_v63, %v8801_v16  ;;  %v10780_v52 = vld [vmem:[%s15964_s2 + $0x2c] ss:$100 sps:$4 sm:$0xff]  }
 0x213   :  { %9356 = vmatpush3.bf16.msra.mxu1 %v11298_v50  ;;  %v13968_v30 = vadd.f32 %v8840_v56, %v3918_v8  ;;  %5389 = vmatprep.mubr.bf16.mxu1 %v10768_v59  ;;  %v8804_v10 = vpop.f32.mrf.mxu0  ;;  %v10777_v8 = vld [vmem:[%s15964_s2 + $0x24] ss:$100 sps:$4 sm:$0xff]  }
 0x214   :  { %v8842_v60 = vpop.f32.mrf.mxu1  ;;  %9357 = vmatprep.subr.bf16.mxu1 %v11300_v49  ;;  %v3923_v9 = vadd.f32 %v8803_v3, %v13821_v11  ;;  %9318 = vmatpush3.bf16.msra.mxu0 %v11301_v17  ;;  %v11304_v11 = vld [vmem:[%s15961_s4 + $0x2d8] sm:$0xff]   ;;  %v11313_v6 = vld [vmem:[%s15961_s4 + $0x208] sm:$0xff]  }
 0x215   :  { %v8843_v12 = vadd.f32 %v8842_v60, %v8841_v62  ;;  %v8805_v28 = vpop.f32.mrf.mxu0  ;;  %9319 = vmatprep.subr.bf16.mxu0 %v11303_v24  ;;  %v11314_v49 = vld [vmem:[%s15961_s4 + $0x288] sm:$0xff]   ;;  %v11317_v24 = vld [vmem:[%s15961_s4 + $0x200] sm:$0xff]  }
 0x216   :  { %v8844_v22 = vpop.f32.mrf.mxu1  ;;  %v8806_v26 = vadd.f32 %v8805_v28, %v8804_v10  ;;  %v11315_v10 = vld [vmem:[%s15961_s4 + $0x240] sm:$0xff]   ;;  %v10778_v28 = vld [vmem:[%s15964_s2 + $0x28] ss:$100 sps:$4 sm:$0xff]  }
 0x217   :  { %9358 = vmatpush3.bf16.msra.mxu1 %v11302_v2  ;;  %v13989_v25 = vadd.f32 %v8843_v12, %v3923_v9  ;;  %v8807_v41 = vpop.f32.mrf.mxu0  ;;  %5325 = vmatmul.mubr.bf16.gmra.mxu0 %v10763_v15  ;;  %v10775_v2 = vld [vmem:[%s15964_s2 + $0x20] ss:$100 sps:$4 sm:$0xff]  }
 0x218   :  { %v8845_v14 = vpop.f32.mrf.mxu1  ;;  %9359 = vmatprep.subr.bf16.mxu1 %v11304_v11  ;;  %v3926_v19 = vadd.f32 %v8806_v26, %v13842_v33  ;;  %9320 = vmatpush3.bf16.msra.mxu0 %v11305_v35  ;;  %v11308_v33 = vld [vmem:[%s15961_s4 + $0x2d0] sm:$0xff]   ;;  %v11318_v11 = vld [vmem:[%s15961_s4 + $0x280] sm:$0xff]  }
 0x219   :  { %v8846_v29 = vadd.f32 %v8845_v14, %v8844_v22  ;;  %v8808_v39 = vpop.f32.mrf.mxu0  ;;  %9321 = vmatprep.subr.bf16.mxu0 %v11307_v34  ;;  %5332 = vmatprep.mubr.bf16.mxu0 %v10771_v23  ;;  %v11319_v23 = vld [vmem:[%s15961_s4 + $0x378] sm:$0xff]  }
 0x21a   :  { %v8847_v20 = vpop.f32.mrf.mxu1  ;;  %5390 = vmatmul.mubr.bf16.gmra.mxu1 %v10766_v5  ;;  %v8809_v55 = vadd.f32 %v8808_v39, %v8807_v41  ;;  %v10786_v35 = vld [vmem:[%s15964_s2 + $0xf4] ss:$100 sps:$4 sm:$0xff]  }
 0x21b   :  { %9360 = vmatpush3.bf16.msra.mxu1 %v11306_v4  ;;  %v14010_v45 = vadd.f32 %v8846_v29, %v3926_v19  ;;  %5397 = vmatprep.mubr.bf16.mxu1 %v10774_v21  ;;  %v8810_v46 = vpop.f32.mrf.mxu0  ;;  %v10783_v21 = vld [vmem:[%s15964_s2 + $0xec] ss:$100 sps:$4 sm:$0xff]   ;;  %v11321_v34 = vld [vmem:[%s15961_s4 + $0x338] sm:$0xff]  }
 0x21c   :  { %v8848_v42 = vpop.f32.mrf.mxu1  ;;  %9361 = vmatprep.subr.bf16.mxu1 %v11308_v33  ;;  %v3931_v47 = vadd.f32 %v8809_v55, %v13863_v48  ;;  %9322 = vmatpush3.bf16.msra.mxu0 %v11309_v53  ;;  %v11312_v48 = vld [vmem:[%s15961_s4 + $0x2c8] sm:$0xff]   ;;  %v11322_v33 = vld [vmem:[%s15961_s4 + $0x3b8] sm:$0xff]  }
 0x21d   :  { %v8849_v36 = vadd.f32 %v8848_v42, %v8847_v20  ;;  %v8811_v44 = vpop.f32.mrf.mxu0  ;;  %9323 = vmatprep.subr.bf16.mxu0 %v11311_v58  ;;  %v11325_v58 = vld [vmem:[%s15961_s4 + $0x330] sm:$0xff]  }
 0x21e   :  { %v8850_v40 = vpop.f32.mrf.mxu1  ;;  %v8812_v16 = vadd.f32 %v8811_v44, %v8810_v46  ;;  %v11323_v46 = vld [vmem:[%s15961_s4 + $0x370] sm:$0xff]  }
 0x21f   :  { %9362 = vmatpush3.bf16.msra.mxu1 %v11310_v37  ;;  %v14031_v59 = vadd.f32 %v8849_v36, %v3931_v47  ;;  %v8813_v50 = vpop.f32.mrf.mxu0  ;;  %5333 = vmatmul.mubr.bf16.gmra.mxu0 %v10769_v61  ;;  %v10784_v61 = vld [vmem:[%s15964_s2 + $0xf0] ss:$100 sps:$4 sm:$0xff]  }
 0x220   :  { %v8851_v56 = vpop.f32.mrf.mxu1  ;;  %9363 = vmatprep.subr.bf16.mxu1 %v11312_v48  ;;  %v3934_v60 = vadd.f32 %v8812_v16, %v13884_v0  ;;  %9324 = vmatpush3.bf16.msra.mxu0 %v11313_v6  ;;  %v11316_v0 = vld [vmem:[%s15961_s4 + $0x2c0] sm:$0xff]   ;;  %v11326_v48 = vld [vmem:[%s15961_s4 + $0x3b0] sm:$0xff]  }
 0x221   :  { %v8852_v62 = vadd.f32 %v8851_v56, %v8850_v40  ;;  %v8814_v3 = vpop.f32.mrf.mxu0  ;;  %9325 = vmatprep.subr.bf16.mxu0 %v11315_v10  ;;  %5438 = vmatprep.mubr.bf16.mxu0 %v10777_v8  ;;  %v10781_v40 = vld [vmem:[%s15964_s2 + $0xe8] ss:$100 sps:$4 sm:$0xff]   ;;  %v10792_v6 = vld [vmem:[%s15964_s2 + $0x1bc] ss:$100 sps:$4 sm:$0xff]  }
 0x222   :  { %v8853_v63 = vpop.f32.mrf.mxu1  ;;  %5398 = vmatmul.mubr.bf16.gmra.mxu1 %v10772_v51  ;;  %v8815_v15 = vadd.f32 %v8814_v3, %v8813_v50  ;;  %v11327_v8 = vld [vmem:[%s15961_s4 + $0x368] sm:$0xff]  }
 0x223   :  { %9364 = vmatpush3.bf16.msra.mxu1 %v11314_v49  ;;  %v14052_v22 = vadd.f32 %v8852_v62, %v3934_v60  ;;  %5503 = vmatprep.mubr.bf16.mxu1 %v10780_v52  ;;  %v8816_v9 = vpop.f32.mrf.mxu0  ;;  %v10789_v52 = vld [vmem:[%s15964_s2 + $0x1b4] ss:$100 sps:$4 sm:$0xff]   ;;  %v11329_v10 = vld [vmem:[%s15961_s4 + $0x328] sm:$0xff]  }
 0x224   :  { %v8854_v12 = vpop.f32.mrf.mxu1  ;;  %9365 = vmatprep.subr.bf16.mxu1 %v11316_v0  ;;  %v3939_v14 = vadd.f32 %v8815_v15, %v13905_v43  ;;  %9326 = vmatpush3.bf16.msra.mxu0 %v11317_v24  ;;  %v11320_v43 = vld [vmem:[%s15961_s4 + $0x3f8] sm:$0xff]   ;;  %v11330_v0 = vld [vmem:[%s15961_s4 + $0x3a8] sm:$0xff]  }
 0x225   :  { %v8855_v5 = vadd.f32 %v8854_v12, %v8853_v63  ;;  %v8817_v26 = vpop.f32.mrf.mxu0  ;;  %9391 = vmatprep.subr.bf16.mxu0 %v11319_v23  ;;  %v11333_v23 = vld [vmem:[%s15961_s4 + $0x320] sm:$0xff]  }
 0x226   :  { %v8856_v17 = vpop.f32.mrf.mxu1  ;;  %v8818_v20 = vadd.f32 %v8817_v26, %v8816_v9  ;;  %v11331_v9 = vld [vmem:[%s15961_s4 + $0x360] sm:$0xff]  }
 0x227   :  { %9366 = vmatpush3.bf16.msra.mxu1 %v11318_v11  ;;  %v14076_v41 = vadd.f32 %v8855_v5, %v3939_v14  ;;  %v8875_v4 = vpop.f32.mrf.mxu0  ;;  %5439 = vmatmul.mubr.bf16.vlgmr.msra.gmra.mxu0 %v10775_v2  ;;  %v10790_v2 = vld [vmem:[%s15964_s2 + $0x1b8] ss:$100 sps:$4 sm:$0xff]  }
 0x228   :  { %v8857_v29 = vpop.f32.mrf.mxu1  ;;  %9431 = vmatprep.subr.bf16.mxu1 %v11320_v43  ;;  %v3942_v42 = vadd.f32 %v8818_v20, %v13926_v38  ;;  %9392 = vmatpush3.bf16.msra.mxu0 %v11321_v34  ;;  %v11324_v38 = vld [vmem:[%s15961_s4 + $0x3f0] sm:$0xff]   ;;  %v11334_v43 = vld [vmem:[%s15961_s4 + $0x3a0] sm:$0xff]  }
 0x229   :  { %v8858_v19 = vadd.f32 %v8857_v29, %v8856_v17  ;;  %v8876_v55 = vpop.f32.mrf.mxu0  ;;  %9393 = vmatprep.subr.bf16.mxu0 %v11323_v46  ;;  %5446 = vmatprep.mubr.bf16.mxu0 %v10783_v21  ;;  %v10787_v17 = vld [vmem:[%s15964_s2 + $0x1b0] ss:$100 sps:$4 sm:$0xff]   ;;  %v10795_v21 = vld [vmem:[%s15964_s2 + $0x27c] ss:$100 sps:$4 sm:$0xff]   ;;  %v10798_v34 = vld [vmem:[%s15964_s2 + $0x284] ss:$100 sps:$4 sm:$0xff]  }
 0x22a   :  { %v8915_v39 = vpop.f32.mrf.mxu1  ;;  %5504 = vmatmul.mubr.bf16.vlgmr.msra.gmra.mxu1 %v10778_v28  ;;  %v8877_v47 = vadd.f32 %v8876_v55, %v8875_v4  ;;  %v11337_v46 = vld [vmem:[%s15961_s4 + $0x318] sm:$0xff]  }
 0x22b   :  { %9432 = vmatpush3.bf16.msra.mxu1 %v11322_v33  ;;  %v14100_v51 = vadd.f32 %v8858_v19, %v3942_v42  ;;  %5511 = vmatprep.mubr.bf16.mxu1 %v10786_v35  ;;  %v8878_v37 = vpop.f32.mrf.mxu0  ;;  %v11336_v35 = vld [vmem:[%s15961_s4 + $0x3d8] sm:$0xff]  }
 0x22c   :  { %v8916_v36 = vpop.f32.mrf.mxu1  ;;  %9433 = vmatprep.subr.bf16.mxu1 %v11324_v38  ;;  %v4045_v56 = vadd.f32 %v8877_v47, %v13947_v54  ;;  %9394 = vmatpush3.bf16.msra.mxu0 %v11325_v58  ;;  %v11328_v54 = vld [vmem:[%s15961_s4 + $0x3e8] sm:$0xff]   ;;  %v11338_v38 = vld [vmem:[%s15961_s4 + $0x398] sm:$0xff]   ;;  %v11339_v47 = vld [vmem:[%s15961_s4 + $0x350] sm:$0xff]  }
 0x22d   :  { %v8917_v53 = vadd.f32 %v8916_v36, %v8915_v39  ;;  %v8879_v16 = vpop.f32.mrf.mxu0  ;;  %9395 = vmatprep.subr.bf16.mxu0 %v11327_v8  ;;  %v11341_v8 = vld [vmem:[%s15961_s4 + $0x310] sm:$0xff]  }
 0x22e   :  { %v8918_v44 = vpop.f32.mrf.mxu1  ;;  %v8880_v63 = vadd.f32 %v8879_v16, %v8878_v37  ;;  %v10796_v37 = vld [vmem:[%s15964_s2 + $0x280] ss:$100 sps:$4 sm:$0xff]  }
 0x22f   :  { %9434 = vmatpush3.bf16.msra.mxu1 %v11326_v48  ;;  %v14118_v50 = vadd.f32 %v8917_v53, %v4045_v56  ;;  %v8881_v49 = vpop.f32.mrf.mxu0  ;;  %5447 = vmatmul.mubr.bf16.gmra.mxu0 %v10781_v40  ;;  %v10793_v53 = vld [vmem:[%s15964_s2 + $0x278] ss:$100 sps:$4 sm:$0xff]  }
 0x230   :  { %v8919_v62 = vpop.f32.mrf.mxu1  ;;  %9435 = vmatprep.subr.bf16.mxu1 %v11328_v54  ;;  %v4048_v12 = vadd.f32 %v8880_v63, %v13968_v30  ;;  %9396 = vmatpush3.bf16.msra.mxu0 %v11329_v10  ;;  %v11332_v30 = vld [vmem:[%s15961_s4 + $0x3e0] sm:$0xff]   ;;  %v11342_v54 = vld [vmem:[%s15961_s4 + $0x390] sm:$0xff]  }
 0x231   :  { %v8920_v60 = vadd.f32 %v8919_v62, %v8918_v44  ;;  %v8882_v15 = vpop.f32.mrf.mxu0  ;;  %9397 = vmatprep.subr.bf16.mxu0 %v11331_v9  ;;  %5454 = vmatprep.mubr.bf16.mxu0 %v10789_v52  ;;  %v10801_v52 = vld [vmem:[%s15964_s2 + $0x34] ss:$100 sps:$4 sm:$0xff]   ;;  %v10804_v10 = vld [vmem:[%s15964_s2 + $0x3c] ss:$100 sps:$4 sm:$0xff]   ;;  %v11345_v9 = vld [vmem:[%s15961_s4 + $0x308] sm:$0xff]  }
 0x232   :  { %v8921_v3 = vpop.f32.mrf.mxu1  ;;  %5512 = vmatmul.mubr.bf16.gmra.mxu1 %v10784_v61  ;;  %v8883_v14 = vadd.f32 %v8882_v15, %v8881_v49 }
 0x233   :  { %9436 = vmatpush3.bf16.msra.mxu1 %v11330_v0  ;;  %v14142_v28 = vadd.f32 %v8920_v60, %v4048_v12  ;;  %5519 = vmatprep.mubr.bf16.mxu1 %v10792_v6  ;;  %v8884_v11 = vpop.f32.mrf.mxu0  ;;  %v11344_v6 = vld [vmem:[%s15961_s4 + $0x3c8] sm:$0xff]  }
 0x234   :  { %v8922_v5 = vpop.f32.mrf.mxu1  ;;  %9437 = vmatprep.subr.bf16.mxu1 %v11332_v30  ;;  %v4053_v29 = vadd.f32 %v8883_v14, %v13989_v25  ;;  %9398 = vmatpush3.bf16.msra.mxu0 %v11333_v23  ;;  %v11335_v25 = vld [vmem:[%s15961_s4 + $0x358] sm:$0xff]   ;;  %v11346_v30 = vld [vmem:[%s15961_s4 + $0x388] sm:$0xff]   ;;  %v11347_v14 = vld [vmem:[%s15961_s4 + $0x340] sm:$0xff]  }
 0x235   :  { %v8923_v24 = vadd.f32 %v8922_v5, %v8921_v3  ;;  %v8885_v20 = vpop.f32.mrf.mxu0  ;;  %9399 = vmatprep.subr.bf16.mxu0 %v11335_v25  ;;  %v11350_v25 = vld [vmem:[%s15961_s4 + $0x380] sm:$0xff]  }
 0x236   :  { %v8924_v26 = vpop.f32.mrf.mxu1  ;;  %v8886_v39 = vadd.f32 %v8885_v20, %v8884_v11  ;;  %v10802_v11 = vld [vmem:[%s15964_s2 + $0x38] ss:$100 sps:$4 sm:$0xff]  }
 0x237   :  { %9438 = vmatpush3.bf16.msra.mxu1 %v11334_v43  ;;  %v14160_v4 = vadd.f32 %v8923_v24, %v4053_v29  ;;  %v8887_v33 = vpop.f32.mrf.mxu0  ;;  %5455 = vmatmul.mubr.bf16.gmra.mxu0 %v10787_v17  ;;  %v10799_v24 = vld [vmem:[%s15964_s2 + $0x30] ss:$100 sps:$4 sm:$0xff]  }
 0x238   :  { %v8925_v19 = vpop.f32.mrf.mxu1  ;;  %9439 = vmatprep.subr.bf16.mxu1 %v11336_v35  ;;  %v4056_v36 = vadd.f32 %v8886_v39, %v14010_v45  ;;  %9400 = vmatpush3.bf16.msra.mxu0 %v11337_v46  ;;  %v11340_v45 = vld [vmem:[%s15961_s4 + $0x3d0] sm:$0xff]   ;;  %v10810_v46 = vld [vmem:[%s15964_s2 + $0x104] ss:$100 sps:$4 sm:$0xff]  }
 0x239   :  { %v8926_v42 = vadd.f32 %v8925_v19, %v8924_v26  ;;  %v8888_v40 = vpop.f32.mrf.mxu0  ;;  %9401 = vmatprep.subr.bf16.mxu0 %v11339_v47  ;;  %5462 = vmatprep.mubr.bf16.mxu0 %v10795_v21  ;;  %v11349_v19 = vld [vmem:[%s15961_s4 + $0x300] sm:$0xff]   ;;  %v11353_v47 = vld [vmem:[%s15961_s4 + $0x438] sm:$0xff]  }
 0x23a   :  { %v8927_v55 = vpop.f32.mrf.mxu1  ;;  %5520 = vmatmul.mubr.bf16.gmra.mxu1 %v10790_v2  ;;  %v8889_v56 = vadd.f32 %v8888_v40, %v8887_v33 }
 0x23b   :  { %9440 = vmatpush3.bf16.msra.mxu1 %v11338_v38  ;;  %v14184_v44 = vadd.f32 %v8926_v42, %v4056_v36  ;;  %5527 = vmatprep.mubr.bf16.mxu1 %v10798_v34  ;;  %v8890_v48 = vpop.f32.mrf.mxu0  ;;  %v11351_v42 = vld [vmem:[%s15961_s4 + $0x478] sm:$0xff]  }
 0x23c   :  { %v8928_v61 = vpop.f32.mrf.mxu1  ;;  %9441 = vmatprep.subr.bf16.mxu1 %v11340_v45  ;;  %v4061_v62 = vadd.f32 %v8889_v56, %v14031_v59  ;;  %9402 = vmatpush3.bf16.msra.mxu0 %v11341_v8  ;;  %v11343_v59 = vld [vmem:[%s15961_s4 + $0x348] sm:$0xff]   ;;  %v10807_v34 = vld [vmem:[%s15964_s2 + $0xfc] ss:$100 sps:$4 sm:$0xff]   ;;  %v11355_v56 = vld [vmem:[%s15961_s4 + $0x470] sm:$0xff]  }
 0x23d   :  { %v8929_v58 = vadd.f32 %v8928_v61, %v8927_v55  ;;  %v8891_v63 = vpop.f32.mrf.mxu0  ;;  %9403 = vmatprep.subr.bf16.mxu0 %v11343_v59  ;;  %v11354_v45 = vld [vmem:[%s15961_s4 + $0x4b8] sm:$0xff]   ;;  %v11358_v59 = vld [vmem:[%s15961_s4 + $0x4b0] sm:$0xff]  }
 0x23e   :  { %v8930_v16 = vpop.f32.mrf.mxu1  ;;  %v8892_v3 = vadd.f32 %v8891_v63, %v8890_v48  ;;  %v10808_v48 = vld [vmem:[%s15964_s2 + $0x100] ss:$100 sps:$4 sm:$0xff]  }
 0x23f   :  { %9442 = vmatpush3.bf16.msra.mxu1 %v11342_v54  ;;  %v14202_v49 = vadd.f32 %v8929_v58, %v4061_v62  ;;  %v8893_v0 = vpop.f32.mrf.mxu0  ;;  %5463 = vmatmul.mubr.bf16.gmra.mxu0 %v10793_v53  ;;  %v10805_v58 = vld [vmem:[%s15964_s2 + $0xf8] ss:$100 sps:$4 sm:$0xff]  }
 0x240   :  { %v8931_v60 = vpop.f32.mrf.mxu1  ;;  %9443 = vmatprep.subr.bf16.mxu1 %v11344_v6  ;;  %v4064_v5 = vadd.f32 %v8892_v3, %v14052_v22  ;;  %9404 = vmatpush3.bf16.msra.mxu0 %v11345_v9  ;;  %v11348_v22 = vld [vmem:[%s15961_s4 + $0x3c0] sm:$0xff]   ;;  %v10816_v9 = vld [vmem:[%s15964_s2 + $0x1cc] ss:$100 sps:$4 sm:$0xff]  }
 0x241   :  { %v8932_v12 = vadd.f32 %v8931_v60, %v8930_v16  ;;  %v8894_v17 = vpop.f32.mrf.mxu0  ;;  %9405 = vmatprep.subr.bf16.mxu0 %v11347_v14  ;;  %5568 = vmatprep.mubr.bf16.mxu0 %v10801_v52  ;;  %v11357_v60 = vld [vmem:[%s15961_s4 + $0x430] sm:$0xff]   ;;  %v11361_v14 = vld [vmem:[%s15961_s4 + $0x428] sm:$0xff]  }
 0x242   :  { %v8933_v15 = vpop.f32.mrf.mxu1  ;;  %5528 = vmatmul.mubr.bf16.gmra.mxu1 %v10796_v37  ;;  %v8895_v29 = vadd.f32 %v8894_v17, %v8893_v0 }
 0x243   :  { %9444 = vmatpush3.bf16.msra.mxu1 %v11346_v30  ;;  %v14226_v26 = vadd.f32 %v8932_v12, %v4064_v5  ;;  %5633 = vmatprep.mubr.bf16.mxu1 %v10804_v10  ;;  %v8896_v43 = vpop.f32.mrf.mxu0  ;;  %v11359_v12 = vld [vmem:[%s15961_s4 + $0x468] sm:$0xff]  }
 0x244   :  { %v8934_v2 = vpop.f32.mrf.mxu1  ;;  %9445 = vmatprep.subr.bf16.mxu1 %v11348_v22  ;;  %v4069_v20 = vadd.f32 %v8895_v29, %v14076_v41  ;;  %9406 = vmatpush3.bf16.msra.mxu0 %v11349_v19  ;;  %v11352_v41 = vld [vmem:[%s15961_s4 + $0x4f8] sm:$0xff]   ;;  %v10813_v5 = vld [vmem:[%s15964_s2 + $0x1c4] ss:$100 sps:$4 sm:$0xff]  }
 0x245   :  { %v8935_v23 = vadd.f32 %v8934_v2, %v8933_v15  ;;  %v8897_v35 = vpop.f32.mrf.mxu0  ;;  %9471 = vmatprep.subr.bf16.mxu0 %v11351_v42  ;;  %v11362_v22 = vld [vmem:[%s15961_s4 + $0x4a8] sm:$0xff]   ;;  %v11363_v29 = vld [vmem:[%s15961_s4 + $0x460] sm:$0xff]  }
 0x246   :  { %v8936_v21 = vpop.f32.mrf.mxu1  ;;  %v8898_v55 = vadd.f32 %v8897_v35, %v8896_v43  ;;  %v10814_v35 = vld [vmem:[%s15964_s2 + $0x1c8] ss:$100 sps:$4 sm:$0xff]   ;;  %v11365_v42 = vld [vmem:[%s15961_s4 + $0x420] sm:$0xff]  }
 0x247   :  { %9446 = vmatpush3.bf16.msra.mxu1 %v11350_v25  ;;  %v14244_v33 = vadd.f32 %v8935_v23, %v4069_v20  ;;  %v8955_v38 = vpop.f32.mrf.mxu0  ;;  %5569 = vmatmul.mubr.bf16.vlgmr.msra.gmra.mxu0 %v10799_v24  ;;  %v10811_v25 = vld [vmem:[%s15964_s2 + $0x1c0] ss:$100 sps:$4 sm:$0xff]  }
 0x248   :  { %v8937_v39 = vpop.f32.mrf.mxu1  ;;  %9511 = vmatprep.subr.bf16.mxu1 %v11352_v41  ;;  %v4072_v61 = vadd.f32 %v8898_v55, %v14100_v51  ;;  %9472 = vmatpush3.bf16.msra.mxu0 %v11353_v47  ;;  %v11356_v51 = vld [vmem:[%s15961_s4 + $0x4f0] sm:$0xff]   ;;  %v11366_v41 = vld [vmem:[%s15961_s4 + $0x4a0] sm:$0xff]  }
 0x249   :  { %v8938_v36 = vadd.f32 %v8937_v39, %v8936_v21  ;;  %v8956_v53 = vpop.f32.mrf.mxu0  ;;  %9473 = vmatprep.subr.bf16.mxu0 %v11355_v56  ;;  %5576 = vmatprep.mubr.bf16.mxu0 %v10807_v34  ;;  %v10822_v47 = vld [vmem:[%s15964_s2 + $0x294] ss:$100 sps:$4 sm:$0xff]  }
 0x24a   :  { %v8995_v40 = vpop.f32.mrf.mxu1  ;;  %5634 = vmatmul.mubr.bf16.vlgmr.msra.gmra.mxu1 %v10802_v11  ;;  %v8957_v62 = vadd.f32 %v8956_v53, %v8955_v38  ;;  %v11369_v56 = vld [vmem:[%s15961_s4 + $0x418] sm:$0xff]  }
 0x24b   :  { %9512 = vmatpush3.bf16.msra.mxu1 %v11354_v45  ;;  %v14268_v16 = vadd.f32 %v8938_v36, %v4072_v61  ;;  %5641 = vmatprep.mubr.bf16.mxu1 %v10810_v46  ;;  %v8958_v54 = vpop.f32.mrf.mxu0  ;;  %v11367_v36 = vld [vmem:[%s15961_s4 + $0x458] sm:$0xff]   ;;  %v10819_v61 = vld [vmem:[%s15964_s2 + $0x28c] ss:$100 sps:$4 sm:$0xff]  }
 0x24c   :  { %v8996_v37 = vpop.f32.mrf.mxu1  ;;  %9513 = vmatprep.subr.bf16.mxu1 %v11356_v51  ;;  %v4175_v63 = vadd.f32 %v8957_v62, %v14118_v50  ;;  %9474 = vmatpush3.bf16.msra.mxu0 %v11357_v60  ;;  %v11360_v50 = vld [vmem:[%s15961_s4 + $0x4e8] sm:$0xff]   ;;  %v11370_v51 = vld [vmem:[%s15961_s4 + $0x498] sm:$0xff]   ;;  %v11371_v62 = vld [vmem:[%s15961_s4 + $0x450] sm:$0xff]  }
 0x24d   :  { %v8997_v8 = vadd.f32 %v8996_v37, %v8995_v40  ;;  %v8959_v6 = vpop.f32.mrf.mxu0  ;;  %9475 = vmatprep.subr.bf16.mxu0 %v11359_v12  ;;  %v11373_v12 = vld [vmem:[%s15961_s4 + $0x410] sm:$0xff]  }
 0x24e   :  { %v8998_v52 = vpop.f32.mrf.mxu1  ;;  %v8960_v0 = vadd.f32 %v8959_v6, %v8958_v54  ;;  %v10820_v6 = vld [vmem:[%s15964_s2 + $0x290] ss:$100 sps:$4 sm:$0xff]  }
 0x24f   :  { %9514 = vmatpush3.bf16.msra.mxu1 %v11358_v59  ;;  %v14283_v10 = vadd.f32 %v8997_v8, %v4175_v63  ;;  %v8961_v30 = vpop.f32.mrf.mxu0  ;;  %5577 = vmatmul.mubr.bf16.gmra.mxu0 %v10805_v58  ;;  %v10817_v59 = vld [vmem:[%s15964_s2 + $0x288] ss:$100 sps:$4 sm:$0xff]  }
 0x250   :  { %v8999_v3 = vpop.f32.mrf.mxu1  ;;  %9515 = vmatprep.subr.bf16.mxu1 %v11360_v50  ;;  %v4178_v2 = vadd.f32 %v8960_v0, %v14142_v28  ;;  %9476 = vmatpush3.bf16.msra.mxu0 %v11361_v14  ;;  %v11364_v28 = vld [vmem:[%s15961_s4 + $0x4e0] sm:$0xff]   ;;  %v11374_v50 = vld [vmem:[%s15961_s4 + $0x490] sm:$0xff]  }
 0x251   :  { %v9000_v15 = vadd.f32 %v8999_v3, %v8998_v52  ;;  %v8962_v24 = vpop.f32.mrf.mxu0  ;;  %9477 = vmatprep.subr.bf16.mxu0 %v11363_v29  ;;  %5584 = vmatprep.mubr.bf16.mxu0 %v10813_v5  ;;  %v11375_v5 = vld [vmem:[%s15961_s4 + $0x448] sm:$0xff]  }
 0x252   :  { %v9001_v17 = vpop.f32.mrf.mxu1  ;;  %5642 = vmatmul.mubr.bf16.gmra.mxu1 %v10808_v48  ;;  %v8963_v43 = vadd.f32 %v8962_v24, %v8961_v30  ;;  %v10828_v14 = vld [vmem:[%s15964_s2 + $0x4c] ss:$100 sps:$4 sm:$0xff]  }
 0x253   :  { %9516 = vmatpush3.bf16.msra.mxu1 %v11362_v22  ;;  %v14304_v23 = vadd.f32 %v9000_v15, %v4178_v2  ;;  %5649 = vmatprep.mubr.bf16.mxu1 %v10816_v9  ;;  %v8964_v20 = vpop.f32.mrf.mxu0  ;;  %v10825_v2 = vld [vmem:[%s15964_s2 + $0x44] ss:$100 sps:$4 sm:$0xff]  }
 0x254   :  { %v9002_v11 = vpop.f32.mrf.mxu1  ;;  %9517 = vmatprep.subr.bf16.mxu1 %v11364_v28  ;;  %v4183_v39 = vadd.f32 %v8963_v43, %v14160_v4  ;;  %9478 = vmatpush3.bf16.msra.mxu0 %v11365_v42  ;;  %v11368_v4 = vld [vmem:[%s15961_s4 + $0x4d8] sm:$0xff]   ;;  %v11377_v29 = vld [vmem:[%s15961_s4 + $0x408] sm:$0xff]  }
 0x255   :  { %v9003_v21 = vadd.f32 %v9002_v11, %v9001_v17  ;;  %v8965_v34 = vpop.f32.mrf.mxu0  ;;  %9479 = vmatprep.subr.bf16.mxu0 %v11367_v36  ;;  %v11378_v28 = vld [vmem:[%s15961_s4 + $0x488] sm:$0xff]   ;;  %v11381_v36 = vld [vmem:[%s15961_s4 + $0x400] sm:$0xff]  }
 0x256   :  { %v9004_v19 = vpop.f32.mrf.mxu1  ;;  %v8966_v38 = vadd.f32 %v8965_v34, %v8964_v20  ;;  %v11379_v20 = vld [vmem:[%s15961_s4 + $0x440] sm:$0xff]   ;;  %v10826_v34 = vld [vmem:[%s15964_s2 + $0x48] ss:$100 sps:$4 sm:$0xff]  }
 0x257   :  { %9518 = vmatpush3.bf16.msra.mxu1 %v11366_v41  ;;  %v14325_v46 = vadd.f32 %v9003_v21, %v4183_v39  ;;  %v8967_v45 = vpop.f32.mrf.mxu0  ;;  %5585 = vmatmul.mubr.bf16.gmra.mxu0 %v10811_v25  ;;  %v10823_v41 = vld [vmem:[%s15964_s2 + $0x40] ss:$100 sps:$4 sm:$0xff]  }
 0x258   :  { %v9005_v55 = vpop.f32.mrf.mxu1  ;;  %9519 = vmatprep.subr.bf16.mxu1 %v11368_v4  ;;  %v4186_v37 = vadd.f32 %v8966_v38, %v14184_v44  ;;  %9480 = vmatpush3.bf16.msra.mxu0 %v11369_v56  ;;  %v11372_v44 = vld [vmem:[%s15961_s4 + $0x4d0] sm:$0xff]   ;;  %v11382_v4 = vld [vmem:[%s15961_s4 + $0x480] sm:$0xff]  }
 0x259   :  { %v9006_v40 = vadd.f32 %v9005_v55, %v9004_v19  ;;  %v8968_v58 = vpop.f32.mrf.mxu0  ;;  %9481 = vmatprep.subr.bf16.mxu0 %v11371_v62  ;;  %5592 = vmatprep.mubr.bf16.mxu0 %v10819_v61  ;;  %v11383_v61 = vld [vmem:[%s15961_s4 + $0x578] sm:$0xff]  }
 0x25a   :  { %v9007_v53 = vpop.f32.mrf.mxu1  ;;  %5650 = vmatmul.mubr.bf16.gmra.mxu1 %v10814_v35  ;;  %v8969_v54 = vadd.f32 %v8968_v58, %v8967_v45  ;;  %v10834_v56 = vld [vmem:[%s15964_s2 + $0x114] ss:$100 sps:$4 sm:$0xff]  }
 0x25b   :  { %9520 = vmatpush3.bf16.msra.mxu1 %v11370_v51  ;;  %v14346_v8 = vadd.f32 %v9006_v40, %v4186_v37  ;;  %5657 = vmatprep.mubr.bf16.mxu1 %v10822_v47  ;;  %v8970_v63 = vpop.f32.mrf.mxu0  ;;  %v10831_v37 = vld [vmem:[%s15964_s2 + $0x10c] ss:$100 sps:$4 sm:$0xff]   ;;  %v11385_v62 = vld [vmem:[%s15961_s4 + $0x538] sm:$0xff]  }
 0x25c   :  { %v9008_v48 = vpop.f32.mrf.mxu1  ;;  %9521 = vmatprep.subr.bf16.mxu1 %v11372_v44  ;;  %v4191_v3 = vadd.f32 %v8969_v54, %v14202_v49  ;;  %9482 = vmatpush3.bf16.msra.mxu0 %v11373_v12  ;;  %v11376_v49 = vld [vmem:[%s15961_s4 + $0x4c8] sm:$0xff]   ;;  %v11386_v44 = vld [vmem:[%s15961_s4 + $0x5b8] sm:$0xff]  }
 0x25d   :  { %v9009_v52 = vadd.f32 %v9008_v48, %v9007_v53  ;;  %v8971_v0 = vpop.f32.mrf.mxu0  ;;  %9483 = vmatprep.subr.bf16.mxu0 %v11375_v5  ;;  %v11389_v5 = vld [vmem:[%s15961_s4 + $0x530] sm:$0xff]  }
 0x25e   :  { %v9010_v60 = vpop.f32.mrf.mxu1  ;;  %v8972_v30 = vadd.f32 %v8971_v0, %v8970_v63  ;;  %v11387_v63 = vld [vmem:[%s15961_s4 + $0x570] sm:$0xff]  }
 0x25f   :  { %9522 = vmatpush3.bf16.msra.mxu1 %v11374_v50  ;;  %v14367_v9 = vadd.f32 %v9009_v52, %v4191_v3  ;;  %v8973_v22 = vpop.f32.mrf.mxu0  ;;  %5593 = vmatmul.mubr.bf16.gmra.mxu0 %v10817_v59  ;;  %v10829_v50 = vld [vmem:[%s15964_s2 + $0x108] ss:$100 sps:$4 sm:$0xff]   ;;  %v10832_v0 = vld [vmem:[%s15964_s2 + $0x110] ss:$100 sps:$4 sm:$0xff]  }
 0x260   :  { %v9011_v15 = vpop.f32.mrf.mxu1  ;;  %9523 = vmatprep.subr.bf16.mxu1 %v11376_v49  ;;  %v4194_v11 = vadd.f32 %v8972_v30, %v14226_v26  ;;  %9484 = vmatpush3.bf16.msra.mxu0 %v11377_v29  ;;  %v11380_v26 = vld [vmem:[%s15961_s4 + $0x4c0] sm:$0xff]   ;;  %v11390_v49 = vld [vmem:[%s15961_s4 + $0x5b0] sm:$0xff]  }
 0x261   :  { %v9012_v17 = vadd.f32 %v9011_v15, %v9010_v60  ;;  %v8974_v43 = vpop.f32.mrf.mxu0  ;;  %9485 = vmatprep.subr.bf16.mxu0 %v11379_v20  ;;  %5698 = vmatprep.mubr.bf16.mxu0 %v10825_v2  ;;  %v11391_v2 = vld [vmem:[%s15961_s4 + $0x568] sm:$0xff]   ;;  %v10840_v29 = vld [vmem:[%s15964_s2 + $0x1dc] ss:$100 sps:$4 sm:$0xff]  }
 0x262   :  { %v9013_v24 = vpop.f32.mrf.mxu1  ;;  %5658 = vmatmul.mubr.bf16.gmra.mxu1 %v10820_v6  ;;  %v8975_v25 = vadd.f32 %v8974_v43, %v8973_v22  ;;  %v11393_v20 = vld [vmem:[%s15961_s4 + $0x528] sm:$0xff]  }
 0x263   :  { %9524 = vmatpush3.bf16.msra.mxu1 %v11378_v28  ;;  %v14388_v19 = vadd.f32 %v9012_v17, %v4194_v11  ;;  %5763 = vmatprep.mubr.bf16.mxu1 %v10828_v14  ;;  %v8976_v39 = vpop.f32.mrf.mxu0  ;;  %v10837_v11 = vld [vmem:[%s15964_s2 + $0x1d4] ss:$100 sps:$4 sm:$0xff]  }
 0x264   :  { %v9014_v21 = vpop.f32.mrf.mxu1  ;;  %9525 = vmatprep.subr.bf16.mxu1 %v11380_v26  ;;  %v4199_v55 = vadd.f32 %v8975_v25, %v14244_v33  ;;  %9486 = vmatpush3.bf16.msra.mxu0 %v11381_v36  ;;  %v11384_v33 = vld [vmem:[%s15961_s4 + $0x5f8] sm:$0xff]   ;;  %v11394_v26 = vld [vmem:[%s15961_s4 + $0x5a8] sm:$0xff]  }
 0x265   :  { %v9015_v35 = vadd.f32 %v9014_v21, %v9013_v24  ;;  %v8977_v38 = vpop.f32.mrf.mxu0  ;;  %9551 = vmatprep.subr.bf16.mxu0 %v11383_v61  ;;  %v11397_v61 = vld [vmem:[%s15961_s4 + $0x520] sm:$0xff]  }
 0x266   :  { %v9016_v42 = vpop.f32.mrf.mxu1  ;;  %v8978_v45 = vadd.f32 %v8977_v38, %v8976_v39  ;;  %v11395_v39 = vld [vmem:[%s15961_s4 + $0x560] sm:$0xff]   ;;  %v10838_v38 = vld [vmem:[%s15964_s2 + $0x1d8] ss:$100 sps:$4 sm:$0xff]  }
 0x267   :  { %9526 = vmatpush3.bf16.msra.mxu1 %v11382_v4  ;;  %v14409_v47 = vadd.f32 %v9015_v35, %v4199_v55  ;;  %v9035_v51 = vpop.f32.mrf.mxu0  ;;  %5699 = vmatmul.mubr.bf16.vlgmr.msra.gmra.mxu0 %v10823_v41  ;;  %v10835_v4 = vld [vmem:[%s15964_s2 + $0x1d0] ss:$100 sps:$4 sm:$0xff]  }
 0x268   :  { %v9017_v40 = vpop.f32.mrf.mxu1  ;;  %9591 = vmatprep.subr.bf16.mxu1 %v11384_v33  ;;  %v4202_v48 = vadd.f32 %v8978_v45, %v14268_v16  ;;  %9552 = vmatpush3.bf16.msra.mxu0 %v11385_v62  ;;  %v11388_v16 = vld [vmem:[%s15961_s4 + $0x5f0] sm:$0xff]   ;;  %v11398_v33 = vld [vmem:[%s15961_s4 + $0x5a0] sm:$0xff]  }
 0x269   :  { %v9018_v53 = vadd.f32 %v9017_v40, %v9016_v42  ;;  %v9036_v54 = vpop.f32.mrf.mxu0  ;;  %9553 = vmatprep.subr.bf16.mxu0 %v11387_v63  ;;  %5706 = vmatprep.mubr.bf16.mxu0 %v10831_v37  ;;  %v11399_v37 = vld [vmem:[%s15961_s4 + $0x558] sm:$0xff]   ;;  %v10846_v62 = vld [vmem:[%s15964_s2 + $0x2a4] ss:$100 sps:$4 sm:$0xff]  }
 0x26a   :  { %v9075_v58 = vpop.f32.mrf.mxu1  ;;  %5764 = vmatmul.mubr.bf16.vlgmr.msra.gmra.mxu1 %v10826_v34  ;;  %v9037_v59 = vadd.f32 %v9036_v54, %v9035_v51  ;;  %v11401_v63 = vld [vmem:[%s15961_s4 + $0x518] sm:$0xff]  }
 0x26b   :  { %9592 = vmatpush3.bf16.msra.mxu1 %v11386_v44  ;;  %v14430_v60 = vadd.f32 %v9018_v53, %v4202_v48  ;;  %5771 = vmatprep.mubr.bf16.mxu1 %v10834_v56  ;;  %v9038_v3 = vpop.f32.mrf.mxu0  ;;  %v10843_v48 = vld [vmem:[%s15964_s2 + $0x29c] ss:$100 sps:$4 sm:$0xff]  }
 0x26c   :  { %v9076_v52 = vpop.f32.mrf.mxu1  ;;  %9593 = vmatprep.subr.bf16.mxu1 %v11388_v16  ;;  %v4305_v15 = vadd.f32 %v9037_v59, %v14283_v10  ;;  %9554 = vmatpush3.bf16.msra.mxu0 %v11389_v5  ;;  %v11392_v10 = vld [vmem:[%s15961_s4 + $0x5e8] sm:$0xff]   ;;  %v11402_v16 = vld [vmem:[%s15961_s4 + $0x598] sm:$0xff]  }
 0x26d   :  { %v9077_v6 = vadd.f32 %v9076_v52, %v9075_v58  ;;  %v9039_v30 = vpop.f32.mrf.mxu0  ;;  %9555 = vmatprep.subr.bf16.mxu0 %v11391_v2  ;;  %v11405_v2 = vld [vmem:[%s15961_s4 + $0x510] sm:$0xff]  }
 0x26e   :  { %v9078_v12 = vpop.f32.mrf.mxu1  ;;  %v9040_v22 = vadd.f32 %v9039_v30, %v9038_v3  ;;  %v11403_v3 = vld [vmem:[%s15961_s4 + $0x550] sm:$0xff]   ;;  %v10844_v30 = vld [vmem:[%s15964_s2 + $0x2a0] ss:$100 sps:$4 sm:$0xff]  }
 0x26f   :  { %9594 = vmatpush3.bf16.msra.mxu1 %v11390_v49  ;;  %v14451_v14 = vadd.f32 %v9077_v6, %v4305_v15  ;;  %v9041_v28 = vpop.f32.mrf.mxu0  ;;  %5707 = vmatmul.mubr.bf16.gmra.mxu0 %v10829_v50  ;;  %v10841_v49 = vld [vmem:[%s15964_s2 + $0x298] ss:$100 sps:$4 sm:$0xff]  }
 0x270   :  { %v9079_v17 = vpop.f32.mrf.mxu1  ;;  %9595 = vmatprep.subr.bf16.mxu1 %v11392_v10  ;;  %v4308_v21 = vadd.f32 %v9040_v22, %v14304_v23  ;;  %9556 = vmatpush3.bf16.msra.mxu0 %v11393_v20  ;;  %v11396_v23 = vld [vmem:[%s15961_s4 + $0x5e0] sm:$0xff]   ;;  %v11406_v10 = vld [vmem:[%s15961_s4 + $0x590] sm:$0xff]  }
 0x271   :  { %v9080_v24 = vadd.f32 %v9079_v17, %v9078_v12  ;;  %v9042_v25 = vpop.f32.mrf.mxu0  ;;  %9557 = vmatprep.subr.bf16.mxu0 %v11395_v39  ;;  %5714 = vmatprep.mubr.bf16.mxu0 %v10837_v11  ;;  %v11407_v11 = vld [vmem:[%s15961_s4 + $0x548] sm:$0xff]   ;;  %v10852_v20 = vld [vmem:[%s15964_s2 + $0x5c] ss:$100 sps:$4 sm:$0xff]  }
 0x272   :  { %v9081_v43 = vpop.f32.mrf.mxu1  ;;  %5772 = vmatmul.mubr.bf16.gmra.mxu1 %v10832_v0  ;;  %v9043_v41 = vadd.f32 %v9042_v25, %v9041_v28  ;;  %v11409_v39 = vld [vmem:[%s15961_s4 + $0x508] sm:$0xff]  }
 0x273   :  { %9596 = vmatpush3.bf16.msra.mxu1 %v11394_v26  ;;  %v14472_v42 = vadd.f32 %v9080_v24, %v4308_v21  ;;  %5779 = vmatprep.mubr.bf16.mxu1 %v10840_v29  ;;  %v9044_v55 = vpop.f32.mrf.mxu0  ;;  %v10849_v21 = vld [vmem:[%s15964_s2 + $0x54] ss:$100 sps:$4 sm:$0xff]  }
 0x274   :  { %v9082_v35 = vpop.f32.mrf.mxu1  ;;  %9597 = vmatprep.subr.bf16.mxu1 %v11396_v23  ;;  %v4313_v40 = vadd.f32 %v9043_v41, %v14325_v46  ;;  %9558 = vmatpush3.bf16.msra.mxu0 %v11397_v61  ;;  %v11400_v46 = vld [vmem:[%s15961_s4 + $0x5d8] sm:$0xff]   ;;  %v11410_v23 = vld [vmem:[%s15961_s4 + $0x588] sm:$0xff]  }
 0x275   :  { %v9083_v34 = vadd.f32 %v9082_v35, %v9081_v43  ;;  %v9045_v45 = vpop.f32.mrf.mxu0  ;;  %9559 = vmatprep.subr.bf16.mxu0 %v11399_v37  ;;  %v11413_v37 = vld [vmem:[%s15961_s4 + $0x500] sm:$0xff]  }
 0x276   :  { %v9084_v36 = vpop.f32.mrf.mxu1  ;;  %v9046_v51 = vadd.f32 %v9045_v45, %v9044_v55  ;;  %v11411_v55 = vld [vmem:[%s15961_s4 + $0x540] sm:$0xff]   ;;  %v10850_v45 = vld [vmem:[%s15964_s2 + $0x58] ss:$100 sps:$4 sm:$0xff]  }
 0x277   :  { %9598 = vmatpush3.bf16.msra.mxu1 %v11398_v33  ;;  %v14493_v56 = vadd.f32 %v9083_v34, %v4313_v40  ;;  %v9047_v44 = vpop.f32.mrf.mxu0  ;;  %5715 = vmatmul.mubr.bf16.gmra.mxu0 %v10835_v4  ;;  %v10847_v33 = vld [vmem:[%s15964_s2 + $0x50] ss:$100 sps:$4 sm:$0xff]  }
 0x278   :  { %v9085_v53 = vpop.f32.mrf.mxu1  ;;  %9599 = vmatprep.subr.bf16.mxu1 %v11400_v46  ;;  %v4316_v52 = vadd.f32 %v9046_v51, %v14346_v8  ;;  %9560 = vmatpush3.bf16.msra.mxu0 %v11401_v63  ;;  %v11404_v8 = vld [vmem:[%s15961_s4 + $0x5d0] sm:$0xff]   ;;  %v11414_v46 = vld [vmem:[%s15961_s4 + $0x580] sm:$0xff]  }
 0x279   :  { %v9086_v58 = vadd.f32 %v9085_v53, %v9084_v36  ;;  %v9048_v59 = vpop.f32.mrf.mxu0  ;;  %9561 = vmatprep.subr.bf16.mxu0 %v11403_v3  ;;  %5722 = vmatprep.mubr.bf16.mxu0 %v10843_v48  ;;  %v11415_v48 = vld [vmem:[%s15961_s4 + $0x638] sm:$0xff]   ;;  %v10858_v63 = vld [vmem:[%s15964_s2 + $0x124] ss:$100 sps:$4 sm:$0xff]  }
 0x27a   :  { %v9087_v54 = vpop.f32.mrf.mxu1  ;;  %5780 = vmatmul.mubr.bf16.gmra.mxu1 %v10838_v38  ;;  %v9049_v50 = vadd.f32 %v9048_v59, %v9047_v44  ;;  %v11417_v3 = vld [vmem:[%s15961_s4 + $0x38] sm:$0xff]  }
 0x27b   :  { %9600 = vmatpush3.bf16.msra.mxu1 %v11402_v16  ;;  %v14514_v12 = vadd.f32 %v9086_v58, %v4316_v52  ;;  %5787 = vmatprep.mubr.bf16.mxu1 %v10846_v62  ;;  %v9050_v15 = vpop.f32.mrf.mxu0  ;;  %v10855_v52 = vld [vmem:[%s15964_s2 + $0x11c] ss:$100 sps:$4 sm:$0xff]  }
 0x27c   :  { %v9088_v6 = vpop.f32.mrf.mxu1  ;;  %9601 = vmatprep.subr.bf16.mxu1 %v11404_v8  ;;  %v4321_v17 = vadd.f32 %v9049_v50, %v14367_v9  ;;  %9562 = vmatpush3.bf16.msra.mxu0 %v11405_v2  ;;  %v11408_v9 = vld [vmem:[%s15961_s4 + $0x5c8] sm:$0xff]   ;;  %v11418_v50 = vld [vmem:[%s15961_s4 + $0x630] sm:$0xff]   ;;  %v10856_v2 = vld [vmem:[%s15964_s2 + $0x120] ss:$100 sps:$4 sm:$0xff]  }
 0x27d   :  { %v9089_v0 = vadd.f32 %v9088_v6, %v9087_v54  ;;  %v9051_v22 = vpop.f32.mrf.mxu0  ;;  %9563 = vmatprep.subr.bf16.mxu0 %v11407_v11  ;;  %v11421_v11 = vld [vmem:[%s15961_s4 + $0x628] sm:$0xff]  }
 0x27e   :  { %v9090_v5 = vpop.f32.mrf.mxu1  ;;  %v9052_v28 = vadd.f32 %v9051_v22, %v9050_v15  ;;  %v11419_v15 = vld [vmem:[%s15961_s4 + $0x70] sm:$0xff]  }
 0x27f   :  { %9602 = vmatpush3.bf16.msra.mxu1 %v11406_v10  ;;  %v14535_v29 = vadd.f32 %v9089_v0, %v4321_v17  ;;  %v9053_v26 = vpop.f32.mrf.mxu0  ;;  %5723 = vmatmul.mubr.bf16.gmra.mxu0 %v10841_v49  ;;  %v11420_v22 = vld [vmem:[%s15961_s4 + $0x30] sm:$0xff]  }
 0x280   :  { %v9091_v24 = vpop.f32.mrf.mxu1  ;;  %9603 = vmatprep.subr.bf16.mxu1 %v11408_v9  ;;  %v4324_v35 = vadd.f32 %v9052_v28, %v14388_v19  ;;  %9564 = vmatpush3.bf16.msra.mxu0 %v11409_v39  ;;  %v11412_v19 = vld [vmem:[%s15961_s4 + $0x5c0] sm:$0xff]   ;;  %v11422_v9 = vld [vmem:[%s15961_s4 + $0x68] sm:$0xff]  }
 0x281   :  { %v9092_v43 = vadd.f32 %v9091_v24, %v9090_v5  ;;  %v9054_v41 = vpop.f32.mrf.mxu0  ;;  %9565 = vmatprep.subr.bf16.mxu0 %v11411_v55  ;;  %5828 = vmatprep.mubr.bf16.mxu0 %v10849_v21  ;;  %v10864_v21 = vld [vmem:[%s15964_s2 + $0x1ec] ss:$100 sps:$4 sm:$0xff]  }
 0x282   :  { %v9093_v25 = vpop.f32.mrf.mxu1  ;;  %5788 = vmatmul.mubr.bf16.gmra.mxu1 %v10844_v30  ;;  %v9055_v4 = vadd.f32 %v9054_v41, %v9053_v26  ;;  %v10853_v30 = vld [vmem:[%s15964_s2 + $0x118] ss:$100 sps:$4 sm:$0xff]   ;;  %v11423_v39 = vld [vmem:[%s15961_s4 + $0x28] sm:$0xff]   ;;  %v11424_v41 = vld [vmem:[%s15961_s4 + $0x620] sm:$0xff]  }
 0x283   :  { %9604 = vmatpush3.bf16.msra.mxu1 %v11410_v23  ;;  %v14556_v36 = vadd.f32 %v9092_v43, %v4324_v35  ;;  %5893 = vmatprep.mubr.bf16.mxu1 %v10852_v20  ;;  %v9056_v40 = vpop.f32.mrf.mxu0 }
 0x284   :  { %v9094_v34 = vpop.f32.mrf.mxu1  ;;  %9605 = vmatprep.subr.bf16.mxu1 %v11412_v19  ;;  %v4329_v53 = vadd.f32 %v9055_v4, %v14409_v47  ;;  %9566 = vmatpush3.bf16.msra.mxu0 %v11413_v37  ;;  %v11416_v47 = vld [vmem:[%s15961_s4 + $0x78] sm:$0xff]   ;;  %v10859_v4 = vld [vmem:[%s15964_s2 + $0x1e0] ss:$100 sps:$4 sm:$0xff]  }
 0x285   :  { %v9095_v38 = vadd.f32 %v9094_v34, %v9093_v25  ;;  %v9057_v51 = vpop.f32.mrf.mxu0  ;;  %10183 = vmatprep.subr.bf16.mxu0 %v11415_v48  ;;  %v11425_v34 = vld [vmem:[%s15961_s4 + $0x60] sm:$0xff]   ;;  %v11427_v37 = vld [vmem:[%s15961_s4 + $0x618] sm:$0xff]  }
 0x286   :  { %v9096_v61 = vpop.f32.mrf.mxu1  ;;  %v9058_v44 = vadd.f32 %v9057_v51, %v9056_v40 }
 0x287   :  { %9606 = vmatpush3.bf16.msra.mxu1 %v11414_v46  ;;  %v14577_v62 = vadd.f32 %v9095_v38, %v4329_v53  ;;  %v9115_v16 = vpop.f32.mrf.mxu0  ;;  %5829 = vmatmul.mubr.bf16.vlgmr.msra.gmra.mxu0 %v10847_v33  ;;  %v10862_v38 = vld [vmem:[%s15964_s2 + $0x1e8] ss:$100 sps:$4 sm:$0xff]   ;;  %v11428_v46 = vld [vmem:[%s15961_s4 + $0x58] sm:$0xff]  }
 0x288   :  { %v9097_v58 = vpop.f32.mrf.mxu1  ;;  %9643 = vmatprep.subr.bf16.mxu1 %v11416_v47  ;;  %v4332_v6 = vadd.f32 %v9058_v44, %v14430_v60  ;;  %10184 = vmatpush3.bf16.msra.mxu0 %v11415_v48  ;;  %v10870_v48 = vld [vmem:[%s15964_s2 + $0x2b4] ss:$100 sps:$4 sm:$0xff]  }
 0x289   :  { %v9098_v54 = vadd.f32 %v9097_v58, %v9096_v61  ;;  %v9116_v8 = vpop.f32.mrf.mxu0  ;;  %10185 = vmatprep.subr.bf16.mxu0 %v11418_v50  ;;  %5836 = vmatprep.mubr.bf16.mxu0 %v10855_v52  ;;  %v10867_v58 = vld [vmem:[%s15964_s2 + $0x2ac] ss:$100 sps:$4 sm:$0xff]   ;;  %v11429_v52 = vld [vmem:[%s15961_s4 + $0x18] sm:$0xff]  }
 0x28a   :  { %5894 = vmatmul.mubr.bf16.vlgmr.msra.gmra.mxu1 %v10850_v45  ;;  %v14585_v59 = vpop.f32.mrf.mxu1  ;;  %v9117_v60 = vadd.f32 %v9116_v8, %v9115_v16  ;;  %v11426_v45 = vld [vmem:[%s15961_s4 + $0x20] sm:$0xff]  }
 0x28b   :  { %9644 = vmatpush3.bf16.msra.mxu1 %v11417_v3  ;;  %v14597_v5 = vadd.f32 %v9098_v54, %v4332_v6  ;;  %5901 = vmatprep.mubr.bf16.mxu1 %v10858_v63  ;;  %v9118_v49 = vpop.f32.mrf.mxu0  ;;  %v11431_v6 = vld [vmem:[%s15961_s4 + $0x50] sm:$0xff]  }
 0x28c   :  { %v4499_v0 = vpop.f32.mrf.mxu1  ;;  %9645 = vmatprep.subr.bf16.mxu1 %v11419_v15  ;;  %10186 = vmatpush3.bf16.msra.mxu0 %v11418_v50  ;;  %v4435_v10 = vadd.f32 %v9117_v60, %v14451_v14  ;;  %v10861_v14 = vld [vmem:[%s15964_s2 + $0x1e4] ss:$100 sps:$4 sm:$0xff]   ;;  %v10868_v15 = vld [vmem:[%s15964_s2 + $0x2b0] ss:$100 sps:$4 sm:$0xff]  }
 0x28d   :  { %v9119_v24 = vpop.f32.mrf.mxu0  ;;  %10187 = vmatprep.subr.bf16.mxu0 %v11421_v11  ;;  %v10865_v50 = vld [vmem:[%s15964_s2 + $0x2a8] ss:$100 sps:$4 sm:$0xff]  }
 0x28e   :  { %v14602_v17 = vpop.f32.mrf.mxu1  ;;  %v9120_v28 = vadd.f32 %v9119_v24, %v9118_v49  ;;  %v14617_v43 = vadd.f32 %v4499_v0, %v4435_v10  ;;  %v11432_v49 = vld [vmem:[%s15961_s4 + $0x10] sm:$0xff]   ;;  %v11434_v10 = vld [vmem:[%s15961_s4 + $0x48] sm:$0xff]   ;;  %v10871_v24 = vld [vmem:[%s15964_s2 + $0x60] ss:$100 sps:$4 sm:$0xff]  }
 0x28f   :  { %9646 = vmatpush3.bf16.msra.mxu1 %v11420_v22  ;;  %v9121_v20 = vpop.f32.mrf.mxu0  ;;  %5837 = vmatmul.mubr.bf16.gmra.mxu0 %v10853_v30 }
 0x290   :  { %9647 = vmatprep.subr.bf16.mxu1 %v11422_v9  ;;  %v4502_v26 = vpop.f32.mrf.mxu1  ;;  %v4530_v25 = vmax.f32 %v13594_v1, %v14617_v43  ;;  %10188 = vmatpush3.bf16.msra.mxu0 %v11421_v11  ;;  %v4438_v35 = vadd.f32 %v9120_v28, %v14472_v42  ;;  %v10875_v11 = vld [vmem:[%s15965_s3 + $0x4] ss:$100 sps:$4 sm:$0xff]  }
 0x291   :  { %v9122_v23 = vpop.f32.mrf.mxu0  ;;  %10189 = vmatprep.subr.bf16.mxu0 %v11424_v41  ;;  %5844 = vmatprep.mubr.bf16.mxu0 %v10861_v14 }
 0x292   :  { %5902 = vmatmul.mubr.bf16.gmra.mxu1 %v10856_v2  ;;  %v9123_v55 = vadd.f32 %v9122_v23, %v9121_v20  ;;  %v14637_v19 = vadd.f32 %v4502_v26, %v4438_v35  ;;  %v14645_v40 = vpop.f32.mrf.mxu1  ;;  %v11433_v2 = vld [vmem:[%s15961_s4 + $0x608] sm:$0xff]   ;;  %v11436_v35 = vld [vmem:[%s15961_s4 + $0x600] sm:$0xff]  }
 0x293   :  { %9648 = vmatpush3.bf16.msra.mxu1 %v11423_v39  ;;  %5909 = vmatprep.mubr.bf16.mxu1 %v10864_v21  ;;  %v9124_v42 = vpop.f32.mrf.mxu0  ;;  %v11435_v20 = vld [vmem:[%s15961_s4 + $0x8] sm:$0xff]   ;;  %v11437_v39 = vld [vmem:[%s15961_s4 + $0x40] sm:$0xff]  }
 0x294   :  { %9649 = vmatprep.subr.bf16.mxu1 %v11425_v34  ;;  %v4443_v61 = vadd.f32 %v9123_v55, %v14493_v56  ;;  %v4531_v33 = vmax.f32 %v13620_v13, %v14637_v19  ;;  %10190 = vmatpush3.bf16.msra.mxu0 %v11424_v41  ;;  %v4515_v44 = vpop.f32.mrf.mxu1  ;;  %v10872_v34 = vld [vmem:[%s15964_s2 + $0x128] ss:$100 sps:$4 sm:$0xff]   ;;  %v10873_v55 = vld [vmem:[%s15965_s3] ss:$100 sps:$4 sm:$0xff]  }
 0x295   :  { %v9125_v53 = vpop.f32.mrf.mxu0  ;;  %10191 = vmatprep.subr.bf16.mxu0 %v11427_v37  ;;  %v11015_v13 = vld [vmem:[%s15965_s3 + $0x1e8] ss:$100 sps:$4 sm:$0xff]  }
 0x296   :  { %v14660_v56 = vadd.f32 %v14585_v59, %v4443_v61  ;;  %v9126_v51 = vadd.f32 %v9125_v53, %v9124_v42  ;;  %v11430_v59 = vld [vmem:[%s15961_s4 + $0x610] sm:$0xff]   ;;  %v14686_v0 = vpop.f32.mrf.mxu1  ;;  %v11440_v53 = vld [vmem:[%s15961_s4 + $0x178] sm:$0xff]  }
 0x297   :  { %9650 = vmatpush3.bf16.msra.mxu1 %v11426_v45  ;;  %v9127_v47 = vpop.f32.mrf.mxu0  ;;  %5845 = vmatmul.mubr.bf16.gmra.mxu0 %v10859_v4  ;;  %v11439_v45 = vld [vmem:[%s15961_s4 + $0xf8] sm:$0xff]  }
 0x298   :  { %9651 = vmatprep.subr.bf16.mxu1 %v11428_v46  ;;  %v4446_v54 = vadd.f32 %v9126_v51, %v14514_v12  ;;  %10192 = vmatpush3.bf16.msra.mxu0 %v11427_v37  ;;  %v4532_v63 = vmax.f32 %v13579_v57, %v14660_v56  ;;  %v4518_v28 = vpop.f32.mrf.mxu1  ;;  %v10876_v46 = vld [vmem:[%s15964_s2 + $0x1f0] ss:$100 sps:$4 sm:$0xff]  }
 0x299   :  { %v9128_v16 = vpop.f32.mrf.mxu0  ;;  %10193 = vmatprep.subr.bf16.mxu0 %v11430_v59  ;;  %5852 = vmatprep.mubr.bf16.mxu0 %v10867_v58  ;;  %v10880_v51 = vld [vmem:[%s15965_s3 + $0xcc] ss:$100 sps:$4 sm:$0xff]  }
 0x29a   :  { %5910 = vmatmul.mubr.bf16.gmra.mxu1 %v10862_v38  ;;  %v14681_v12 = vadd.f32 %v14602_v17, %v4446_v54  ;;  %v9129_v3 = vadd.f32 %v9128_v16, %v9127_v47  ;;  %v11438_v38 = vld [vmem:[%s15961_s4] sm:$0xff]  }
 0x29b   :  { %9652 = vmatpush3.bf16.msra.mxu1 %v11429_v52  ;;  %5917 = vmatprep.mubr.bf16.mxu1 %v10870_v48  ;;  %v9130_v8 = vpop.f32.mrf.mxu0 }
 0x29c   :  { %9653 = vmatprep.subr.bf16.mxu1 %v11431_v6  ;;  %10194 = vmatpush3.bf16.msra.mxu0 %v11430_v59  ;;  %v4451_v60 = vadd.f32 %v9129_v3, %v14535_v29  ;;  %v4533_v30 = vmax.f32 %v13605_v7, %v14681_v12  ;;  %v11443_v59 = vld [vmem:[%s15961_s4 + $0xf0] sm:$0xff]  }
 0x29d   :  { %v9131_v17 = vpop.f32.mrf.mxu0  ;;  %10195 = vmatprep.subr.bf16.mxu0 %v11433_v2 }
 0x29e   :  { %v9132_v29 = vadd.f32 %v9131_v17, %v9130_v8  ;;  %v14703_v22 = vadd.f32 %v4515_v44, %v4451_v60  ;;  %v11442_v44 = vld [vmem:[%s15961_s4 + $0x138] sm:$0xff]  }
 0x29f   :  { %9654 = vmatpush3.bf16.msra.mxu1 %v11432_v49  ;;  %v9133_v9 = vpop.f32.mrf.mxu0  ;;  %5853 = vmatmul.mubr.bf16.gmra.mxu0 %v10865_v50  ;;  %v10877_v60 = vld [vmem:[%s15964_s2 + $0x2b8] ss:$100 sps:$4 sm:$0xff]   ;;  %v10878_v49 = vld [vmem:[%s15965_s3 + $0xc8] ss:$100 sps:$4 sm:$0xff]  }
 0x2a0   :  { %9655 = vmatprep.subr.bf16.mxu1 %v11434_v10  ;;  %v4534_v14 = vmax.f32 %v13645_v27, %v14703_v22  ;;  %10196 = vmatpush3.bf16.msra.mxu0 %v11433_v2  ;;  %v4454_v21 = vadd.f32 %v9132_v29, %v14556_v36  ;;  %v11446_v2 = vld [vmem:[%s15961_s4 + $0x130] sm:$0xff]  }
 0x2a1   :  { %v9134_v26 = vpop.f32.mrf.mxu0  ;;  %10197 = vmatprep.subr.bf16.mxu0 %v11436_v35  ;;  %10199 = vmatprep.mubr.bf16.mxu0 %v10871_v24 }
 0x2a2   :  { %5918 = vmatmul.mubr.bf16.gmra.mxu1 %v10868_v15  ;;  %v9135_v23 = vadd.f32 %v9134_v26, %v9133_v9  ;;  %v14723_v41 = vadd.f32 %v4518_v28, %v4454_v21  ;;  %v11448_v9 = vld [vmem:[%s15961_s4 + $0x168] sm:$0xff]  }
 0x2a3   :  { %9656 = vmatpush3.bf16.msra.mxu1 %v11435_v20  ;;  %6639 = vmatprep.mubr.bf16.mxu1 %v10875_v11  ;;  %v9136_v36 = vpop.f32.mrf.mxu0  ;;  %v11447_v11 = vld [vmem:[%s15961_s4 + $0xe8] sm:$0xff]   ;;  %v10883_v20 = vld [vmem:[%s15965_s3 + $0x194] ss:$100 sps:$4 sm:$0xff]  }
 0x2a4   :  { %9657 = vmatprep.subr.bf16.mxu1 %v11437_v39  ;;  %v4459_v42 = vadd.f32 %v9135_v23, %v14577_v62  ;;  %v4535_v4 = vmax.f32 %v13667_v32, %v14723_v41  ;;  %10198 = vmatpush3.bf16.msra.mxu0 %v11436_v35  ;;  %v10889_v26 = vld [vmem:[%s15965_s3 + $0xc] ss:$100 sps:$4 sm:$0xff]  }
 0x2a5   :  { %v9137_v61 = vpop.f32.mrf.mxu0  ;;  %9683 = vmatprep.subr.bf16.mxu0 %v11439_v45 }
 0x2a6   :  { %v14744_v62 = vadd.f32 %v14645_v40, %v4459_v42  ;;  %v9138_v37 = vadd.f32 %v9137_v61, %v9136_v36  ;;  %v11441_v40 = vld [vmem:[%s15961_s4 + $0xb8] sm:$0xff]   ;;  %v11449_v36 = vld [vmem:[%s15961_s4 + $0xa8] sm:$0xff]   ;;  %v11452_v61 = vld [vmem:[%s15961_s4 + $0x160] sm:$0xff]  }
 0x2a7   :  { %9658 = vmatpush3.bf16.msra.mxu1 %v11438_v38  ;;  %v9167_v58 = vpop.f32.mrf.mxu0  ;;  %10200 = vmatmul.mubr.bf16.vlgmr.msra.gmra.mxu0 %v10872_v34  ;;  %v11450_v34 = vld [vmem:[%s15961_s4 + $0x128] sm:$0xff]   ;;  %v11451_v38 = vld [vmem:[%s15961_s4 + $0xe0] sm:$0xff]  }
 0x2a8   :  { %9723 = vmatprep.subr.bf16.mxu1 %v11440_v53  ;;  %v4462_v47 = vadd.f32 %v9138_v37, %v14597_v5  ;;  %9684 = vmatpush3.bf16.msra.mxu0 %v11441_v40  ;;  %v4536_v54 = vmax.f32 %v13630_v18, %v14744_v62  ;;  %v11444_v5 = vld [vmem:[%s15961_s4 + $0x170] sm:$0xff]  }
 0x2a9   :  { %v9168_v52 = vpop.f32.mrf.mxu0  ;;  %9685 = vmatprep.subr.bf16.mxu0 %v11443_v59  ;;  %10203 = vmatprep.mubr.bf16.mxu0 %v10876_v46  ;;  %v11022_v18 = vld [vmem:[%s15965_s3 + $0x2b4] ss:$100 sps:$4 sm:$0xff]  }
 0x2aa   :  { %v9207_v48 = vpop.f32.mrf.mxu1  ;;  %6640 = vmatmul.mubr.bf16.vlgmr.msra.gmra.mxu1 %v10873_v55  ;;  %v14768_v6 = vadd.f32 %v14686_v0, %v4462_v47  ;;  %v9169_v3 = vadd.f32 %v9168_v52, %v9167_v58  ;;  %v11445_v0 = vld [vmem:[%s15961_s4 + $0xb0] sm:$0xff]   ;;  %v11454_v47 = vld [vmem:[%s15961_s4 + $0x120] sm:$0xff]   ;;  %v11455_v52 = vld [vmem:[%s15961_s4 + $0xd8] sm:$0xff]  }
 0x2ab   :  { %9724 = vmatpush3.bf16.msra.mxu1 %v11442_v44  ;;  %6647 = vmatprep.mubr.bf16.mxu1 %v10880_v51  ;;  %v9170_v50 = vpop.f32.mrf.mxu0  ;;  %v10881_v51 = vld [vmem:[%s15965_s3 + $0x190] ss:$100 sps:$4 sm:$0xff]  }
 0x2ac   :  { %v9208_v16 = vpop.f32.mrf.mxu1  ;;  %9725 = vmatprep.subr.bf16.mxu1 %v11444_v5  ;;  %9686 = vmatpush3.bf16.msra.mxu0 %v11445_v0  ;;  %v4537_v10 = vmax.f32 %v13652_v31, %v14768_v6  ;;  %v11020_v31 = vld [vmem:[%s15965_s3 + $0x2b0] ss:$100 sps:$4 sm:$0xff]  }
 0x2ad   :  { %v9209_v8 = vadd.f32 %v9208_v16, %v9207_v48  ;;  %v9171_v29 = vpop.f32.mrf.mxu0  ;;  %9687 = vmatprep.subr.bf16.mxu0 %v11447_v11  ;;  %v11453_v48 = vld [vmem:[%s15961_s4 + $0xa0] sm:$0xff]   ;;  %v11456_v16 = vld [vmem:[%s15961_s4 + $0x158] sm:$0xff]  }
 0x2ae   :  { %v9210_v15 = vpop.f32.mrf.mxu1  ;;  %v9172_v28 = vadd.f32 %v9171_v29, %v9170_v50  ;;  %v11459_v29 = vld [vmem:[%s15961_s4 + $0xd0] sm:$0xff]  }
 0x2af   :  { %v14776_v17 = vadd.f32 %v9209_v8, %v9169_v3  ;;  %9726 = vmatpush3.bf16.msra.mxu1 %v11446_v2  ;;  %v9173_v35 = vpop.f32.mrf.mxu0  ;;  %10204 = vmatmul.mubr.bf16.gmra.mxu0 %v10877_v60  ;;  %v10886_v3 = vld [vmem:[%s15965_s3 + $0x25c] ss:$100 sps:$4 sm:$0xff]  }
 0x2b0   :  { %v9211_v24 = vpop.f32.mrf.mxu1  ;;  %9727 = vmatprep.subr.bf16.mxu1 %v11448_v9  ;;  %9688 = vmatpush3.bf16.msra.mxu0 %v11449_v36  ;;  %v11457_v60 = vld [vmem:[%s15961_s4 + $0x98] sm:$0xff]  }
 0x2b1   :  { %v9212_v21 = vadd.f32 %v9211_v24, %v9210_v15  ;;  %v9174_v55 = vpop.f32.mrf.mxu0  ;;  %9689 = vmatprep.subr.bf16.mxu0 %v11451_v38  ;;  %6704 = vmatprep.mubr.bf16.mxu0 %v10889_v26  ;;  %v11460_v24 = vld [vmem:[%s15961_s4 + $0x150] sm:$0xff]  }
 0x2b2   :  { %v9213_v39 = vpop.f32.mrf.mxu1  ;;  %6648 = vmatmul.mubr.bf16.gmra.mxu1 %v10878_v49  ;;  %v9175_v45 = vadd.f32 %v9174_v55, %v9173_v35  ;;  %v11458_v49 = vld [vmem:[%s15961_s4 + $0x118] sm:$0xff]   ;;  %v11461_v35 = vld [vmem:[%s15961_s4 + $0x90] sm:$0xff]   ;;  %v11463_v55 = vld [vmem:[%s15961_s4 + $0xc8] sm:$0xff]  }
 0x2b3   :  { %v14798_v23 = vadd.f32 %v9212_v21, %v9172_v28  ;;  %9728 = vmatpush3.bf16.msra.mxu1 %v11450_v34  ;;  %6655 = vmatprep.mubr.bf16.mxu1 %v10883_v20  ;;  %v9176_v37 = vpop.f32.mrf.mxu0  ;;  %v10884_v20 = vld [vmem:[%s15965_s3 + $0x258] ss:$100 sps:$4 sm:$0xff]  }
 0x2b4   :  { %v9214_v42 = vpop.f32.mrf.mxu1  ;;  %9729 = vmatprep.subr.bf16.mxu1 %v11452_v61  ;;  %9690 = vmatpush3.bf16.msra.mxu0 %v11453_v48  ;;  %v11466_v48 = vld [vmem:[%s15961_s4 + $0x108] sm:$0xff]  }
 0x2b5   :  { %v9215_v53 = vadd.f32 %v9214_v42, %v9213_v39  ;;  %v9177_v40 = vpop.f32.mrf.mxu0  ;;  %9691 = vmatprep.subr.bf16.mxu0 %v11455_v52  ;;  %v11462_v39 = vld [vmem:[%s15961_s4 + $0x110] sm:$0xff]   ;;  %v11464_v42 = vld [vmem:[%s15961_s4 + $0x148] sm:$0xff]   ;;  %v11468_v52 = vld [vmem:[%s15961_s4 + $0x140] sm:$0xff]  }
 0x2b6   :  { %v9216_v46 = vpop.f32.mrf.mxu1  ;;  %v9178_v59 = vadd.f32 %v9177_v40, %v9176_v37 }
 0x2b7   :  { %v14815_v58 = vadd.f32 %v9215_v53, %v9175_v45  ;;  %9730 = vmatpush3.bf16.msra.mxu1 %v11454_v47  ;;  %v9179_v8 = vpop.f32.mrf.mxu0  ;;  %v10892_v45 = vld [vmem:[%s15965_s3 + $0x14] ss:$100 sps:$4 sm:$0xff]  }
 0x2b8   :  { %v9217_v44 = vpop.f32.mrf.mxu1  ;;  %9731 = vmatprep.subr.bf16.mxu1 %v11456_v16  ;;  %9692 = vmatpush3.bf16.msra.mxu0 %v11457_v60 }
 0x2b9   :  { %v9218_v5 = vadd.f32 %v9217_v44, %v9216_v46  ;;  %v9180_v0 = vpop.f32.mrf.mxu0  ;;  %9693 = vmatprep.subr.bf16.mxu0 %v11459_v29  ;;  %v11467_v44 = vld [vmem:[%s15961_s4 + $0xc0] sm:$0xff]  }
 0x2ba   :  { %v9219_v50 = vpop.f32.mrf.mxu1  ;;  %6656 = vmatmul.mubr.bf16.gmra.mxu1 %v10881_v51  ;;  %v9181_v11 = vadd.f32 %v9180_v0, %v9179_v8  ;;  %v11465_v51 = vld [vmem:[%s15961_s4 + $0x88] sm:$0xff]   ;;  %v11470_v0 = vld [vmem:[%s15961_s4 + $0x100] sm:$0xff]  }
 0x2bb   :  { %v14832_v15 = vadd.f32 %v9218_v5, %v9178_v59  ;;  %9732 = vmatpush3.bf16.msra.mxu1 %v11458_v49  ;;  %6663 = vmatprep.mubr.bf16.mxu1 %v10886_v3  ;;  %v9182_v28 = vpop.f32.mrf.mxu0  ;;  %v10887_v8 = vld [vmem:[%s15965_s3 + $0x8] ss:$100 sps:$4 sm:$0xff]   ;;  %v11469_v49 = vld [vmem:[%s15961_s4 + $0x80] sm:$0xff]  }
 0x2bc   :  { %v9220_v2 = vpop.f32.mrf.mxu1  ;;  %9733 = vmatprep.subr.bf16.mxu1 %v11460_v24  ;;  %9694 = vmatpush3.bf16.msra.mxu0 %v11461_v35  ;;  %v11471_v24 = vld [vmem:[%s15961_s4 + $0x1f8] sm:$0xff]  }
 0x2bd   :  { %v9221_v9 = vadd.f32 %v9220_v2, %v9219_v50  ;;  %v9183_v36 = vpop.f32.mrf.mxu0  ;;  %9695 = vmatprep.subr.bf16.mxu0 %v11463_v55  ;;  %v10890_v50 = vld [vmem:[%s15965_s3 + $0x10] ss:$100 sps:$4 sm:$0xff]   ;;  %v11474_v55 = vld [vmem:[%s15961_s4 + $0x238] sm:$0xff]  }
 0x2be   :  { %v9222_v21 = vpop.f32.mrf.mxu1  ;;  %v9184_v38 = vadd.f32 %v9183_v36, %v9182_v28 }
 0x2bf   :  { %v14849_v26 = vadd.f32 %v9221_v9, %v9181_v11  ;;  %9734 = vmatpush3.bf16.msra.mxu1 %v11462_v39  ;;  %v9185_v53 = vpop.f32.mrf.mxu0  ;;  %v11472_v11 = vld [vmem:[%s15961_s4 + $0x278] sm:$0xff]  }
 0x2c0   :  { %v9223_v34 = vpop.f32.mrf.mxu1  ;;  %9735 = vmatprep.subr.bf16.mxu1 %v11464_v42  ;;  %9696 = vmatpush3.bf16.msra.mxu0 %v11465_v51 }
 0x2c1   :  { %v9224_v61 = vadd.f32 %v9223_v34, %v9222_v21  ;;  %v9186_v47 = vpop.f32.mrf.mxu0  ;;  %9697 = vmatprep.subr.bf16.mxu0 %v11467_v44  ;;  %v10895_v21 = vld [vmem:[%s15965_s3 + $0xd4] ss:$100 sps:$4 sm:$0xff]  }
 0x2c2   :  { %v9225_v37 = vpop.f32.mrf.mxu1  ;;  %6664 = vmatmul.mubr.bf16.gmra.mxu1 %v10884_v20  ;;  %v9187_v16 = vadd.f32 %v9186_v47, %v9185_v53  ;;  %v10898_v20 = vld [vmem:[%s15965_s3 + $0xdc] ss:$100 sps:$4 sm:$0xff]   ;;  %v10893_v47 = vld [vmem:[%s15965_s3 + $0xd0] ss:$100 sps:$4 sm:$0xff]  }
 0x2c3   :  { %v14866_v46 = vadd.f32 %v9224_v61, %v9184_v38  ;;  %9736 = vmatpush3.bf16.msra.mxu1 %v11466_v48  ;;  %6769 = vmatprep.mubr.bf16.mxu1 %v10892_v45  ;;  %v9188_v5 = vpop.f32.mrf.mxu0  ;;  %v11473_v34 = vld [vmem:[%s15961_s4 + $0x1b8] sm:$0xff]   ;;  %v11475_v61 = vld [vmem:[%s15961_s4 + $0x1f0] sm:$0xff]  }
 0x2c4   :  { %v9226_v40 = vpop.f32.mrf.mxu1  ;;  %9737 = vmatprep.subr.bf16.mxu1 %v11468_v52  ;;  %9698 = vmatpush3.bf16.msra.mxu0 %v11469_v49  ;;  %v11476_v45 = vld [vmem:[%s15961_s4 + $0x270] sm:$0xff]  }
 0x2c5   :  { %v9227_v59 = vadd.f32 %v9226_v40, %v9225_v37  ;;  %v9189_v2 = vpop.f32.mrf.mxu0  ;;  %9763 = vmatprep.subr.bf16.mxu0 %v11471_v24  ;;  %v10896_v40 = vld [vmem:[%s15965_s3 + $0xd8] ss:$100 sps:$4 sm:$0xff]   ;;  %v11477_v52 = vld [vmem:[%s15961_s4 + $0x1b0] sm:$0xff]  }
 0x2c6   :  { %v9228_v3 = vpop.f32.mrf.mxu1  ;;  %v9190_v9 = vadd.f32 %v9189_v2, %v9188_v5  ;;  %v10904_v2 = vld [vmem:[%s15965_s3 + $0x1a4] ss:$100 sps:$4 sm:$0xff]  }
 0x2c7   :  { %v14886_v60 = vadd.f32 %v9227_v59, %v9187_v16  ;;  %9738 = vmatpush3.bf16.msra.mxu1 %v11470_v0  ;;  %v9247_v35 = vpop.f32.mrf.mxu0  ;;  %6705 = vmatmul.mubr.bf16.vlgmr.msra.gmra.mxu0 %v10887_v8  ;;  %v11478_v16 = vld [vmem:[%s15961_s4 + $0x230] sm:$0xff]   ;;  %v10901_v0 = vld [vmem:[%s15965_s3 + $0x19c] ss:$100 sps:$4 sm:$0xff]  }
 0x2c8   :  { %v9229_v29 = vpop.f32.mrf.mxu1  ;;  %9803 = vmatprep.subr.bf16.mxu1 %v11472_v11  ;;  %9764 = vmatpush3.bf16.msra.mxu0 %v11473_v34 }
 0x2c9   :  { %v9230_v28 = vadd.f32 %v9229_v29, %v9228_v3  ;;  %v9248_v42 = vpop.f32.mrf.mxu0  ;;  %9765 = vmatprep.subr.bf16.mxu0 %v11475_v61  ;;  %6712 = vmatprep.mubr.bf16.mxu0 %v10895_v21  ;;  %v11479_v3 = vld [vmem:[%s15961_s4 + $0x1e8] sm:$0xff]   ;;  %v10899_v61 = vld [vmem:[%s15965_s3 + $0x198] ss:$100 sps:$4 sm:$0xff]  }
 0x2ca   :  { %v9287_v39 = vpop.f32.mrf.mxu1  ;;  %6770 = vmatmul.mubr.bf16.vlgmr.msra.gmra.mxu1 %v10890_v50  ;;  %v9249_v53 = vadd.f32 %v9248_v42, %v9247_v35  ;;  %v11483_v35 = vld [vmem:[%s15961_s4 + $0x1e0] sm:$0xff]  }
 0x2cb   :  { %v14906_v36 = vadd.f32 %v9230_v28, %v9190_v9  ;;  %9804 = vmatpush3.bf16.msra.mxu1 %v11474_v55  ;;  %6777 = vmatprep.mubr.bf16.mxu1 %v10898_v20  ;;  %v9250_v51 = vpop.f32.mrf.mxu0  ;;  %v11481_v9 = vld [vmem:[%s15961_s4 + $0x1a8] sm:$0xff]  }
 0x2cc   :  { %v9288_v38 = vpop.f32.mrf.mxu1  ;;  %9805 = vmatprep.subr.bf16.mxu1 %v11476_v45  ;;  %v5311_v44 = vadd.f32 %v9249_v53, %v14776_v17  ;;  %9766 = vmatpush3.bf16.msra.mxu0 %v11477_v52  ;;  %v11480_v17 = vld [vmem:[%s15961_s4 + $0x268] sm:$0xff]   ;;  %v10902_v45 = vld [vmem:[%s15965_s3 + $0x1a0] ss:$100 sps:$4 sm:$0xff]  }
 0x2cd   :  { %v9289_v37 = vadd.f32 %v9288_v38, %v9287_v39  ;;  %v9251_v59 = vpop.f32.mrf.mxu0  ;;  %9767 = vmatprep.subr.bf16.mxu0 %v11479_v3  ;;  %v11482_v28 = vld [vmem:[%s15961_s4 + $0x228] sm:$0xff]  }
 0x2ce   :  { %v9290_v48 = vpop.f32.mrf.mxu1  ;;  %v9252_v50 = vadd.f32 %v9251_v59, %v9250_v51  ;;  %v11486_v51 = vld [vmem:[%s15961_s4 + $0x220] sm:$0xff]  }
 0x2cf   :  { %9806 = vmatpush3.bf16.msra.mxu1 %v11478_v16  ;;  %v14939_v8 = vadd.f32 %v9289_v37, %v5311_v44  ;;  %v9253_v29 = vpop.f32.mrf.mxu0  ;;  %6713 = vmatmul.mubr.bf16.gmra.mxu0 %v10893_v47  ;;  %v11485_v37 = vld [vmem:[%s15961_s4 + $0x1a0] sm:$0xff]  }
 0x2d0   :  { %v9291_v5 = vpop.f32.mrf.mxu1  ;;  %9807 = vmatprep.subr.bf16.mxu1 %v11480_v17  ;;  %v5314_v11 = vadd.f32 %v9252_v50, %v14798_v23  ;;  %9768 = vmatpush3.bf16.msra.mxu0 %v11481_v9  ;;  %v11484_v23 = vld [vmem:[%s15961_s4 + $0x260] sm:$0xff]  }
 0x2d1   :  { %v9292_v49 = vadd.f32 %v9291_v5, %v9290_v48  ;;  %v9254_v21 = vpop.f32.mrf.mxu0  ;;  %9769 = vmatprep.subr.bf16.mxu0 %v11483_v35  ;;  %6720 = vmatprep.mubr.bf16.mxu0 %v10901_v0  ;;  %v10907_v59 = vld [vmem:[%s15965_s3 + $0x264] ss:$100 sps:$4 sm:$0xff]   ;;  %v10910_v5 = vld [vmem:[%s15965_s3 + $0x26c] ss:$100 sps:$4 sm:$0xff]   ;;  %v11490_v0 = vld [vmem:[%s15961_s4 + $0x218] sm:$0xff]  }
 0x2d2   :  { %v9293_v24 = vpop.f32.mrf.mxu1  ;;  %6778 = vmatmul.mubr.bf16.gmra.mxu1 %v10896_v40  ;;  %v9255_v34 = vadd.f32 %v9254_v21, %v9253_v29  ;;  %v11487_v40 = vld [vmem:[%s15961_s4 + $0x1d8] sm:$0xff]   ;;  %v10905_v35 = vld [vmem:[%s15965_s3 + $0x260] ss:$100 sps:$4 sm:$0xff]  }
 0x2d3   :  { %9808 = vmatpush3.bf16.msra.mxu1 %v11482_v28  ;;  %v14960_v39 = vadd.f32 %v9292_v49, %v5314_v11  ;;  %6785 = vmatprep.mubr.bf16.mxu1 %v10904_v2  ;;  %v9256_v42 = vpop.f32.mrf.mxu0  ;;  %v11489_v49 = vld [vmem:[%s15961_s4 + $0x198] sm:$0xff]  }
 0x2d4   :  { %v9294_v20 = vpop.f32.mrf.mxu1  ;;  %9809 = vmatprep.subr.bf16.mxu1 %v11484_v23  ;;  %v5319_v53 = vadd.f32 %v9255_v34, %v14815_v58  ;;  %9770 = vmatpush3.bf16.msra.mxu0 %v11485_v37  ;;  %v11488_v58 = vld [vmem:[%s15961_s4 + $0x258] sm:$0xff]   ;;  %v10908_v23 = vld [vmem:[%s15965_s3 + $0x268] ss:$100 sps:$4 sm:$0xff]  }
 0x2d5   :  { %v9295_v55 = vadd.f32 %v9294_v20, %v9293_v24  ;;  %v9257_v48 = vpop.f32.mrf.mxu0  ;;  %9771 = vmatprep.subr.bf16.mxu0 %v11487_v40  ;;  %v11491_v24 = vld [vmem:[%s15961_s4 + $0x1d0] sm:$0xff]  }
 0x2d6   :  { %v9296_v38 = vpop.f32.mrf.mxu1  ;;  %v9258_v52 = vadd.f32 %v9257_v48, %v9256_v42  ;;  %v11494_v42 = vld [vmem:[%s15961_s4 + $0x210] sm:$0xff]   ;;  %v10913_v48 = vld [vmem:[%s15965_s3 + $0x1c] ss:$100 sps:$4 sm:$0xff]  }
 0x2d7   :  { %9810 = vmatpush3.bf16.msra.mxu1 %v11486_v51  ;;  %v14981_v44 = vadd.f32 %v9295_v55, %v5319_v53  ;;  %v9259_v3 = vpop.f32.mrf.mxu0  ;;  %6721 = vmatmul.mubr.bf16.gmra.mxu0 %v10899_v61  ;;  %v11493_v55 = vld [vmem:[%s15961_s4 + $0x190] sm:$0xff]  }
 0x2d8   :  { %v9297_v47 = vpop.f32.mrf.mxu1  ;;  %9811 = vmatprep.subr.bf16.mxu1 %v11488_v58  ;;  %v5322_v50 = vadd.f32 %v9258_v52, %v14832_v15  ;;  %9772 = vmatpush3.bf16.msra.mxu0 %v11489_v49  ;;  %v11492_v15 = vld [vmem:[%s15961_s4 + $0x250] sm:$0xff]  }
 0x2d9   :  { %v9298_v16 = vadd.f32 %v9297_v47, %v9296_v38  ;;  %v9260_v2 = vpop.f32.mrf.mxu0  ;;  %9773 = vmatprep.subr.bf16.mxu0 %v11491_v24  ;;  %6728 = vmatprep.mubr.bf16.mxu0 %v10907_v59  ;;  %v10916_v47 = vld [vmem:[%s15965_s3 + $0x24] ss:$100 sps:$4 sm:$0xff]   ;;  %v10911_v24 = vld [vmem:[%s15965_s3 + $0x18] ss:$100 sps:$4 sm:$0xff]  }
 0x2da   :  { %v9299_v17 = vpop.f32.mrf.mxu1  ;;  %6786 = vmatmul.mubr.bf16.gmra.mxu1 %v10902_v45  ;;  %v9261_v9 = vadd.f32 %v9260_v2, %v9259_v3  ;;  %v11495_v45 = vld [vmem:[%s15961_s4 + $0x1c8] sm:$0xff]  }
 0x2db   :  { %9812 = vmatpush3.bf16.msra.mxu1 %v11490_v0  ;;  %v15002_v11 = vadd.f32 %v9298_v16, %v5322_v50  ;;  %6793 = vmatprep.mubr.bf16.mxu1 %v10910_v5  ;;  %v9262_v21 = vpop.f32.mrf.mxu0  ;;  %v11497_v16 = vld [vmem:[%s15961_s4 + $0x188] sm:$0xff]  }
 0x2dc   :  { %v9300_v29 = vpop.f32.mrf.mxu1  ;;  %9813 = vmatprep.subr.bf16.mxu1 %v11492_v15  ;;  %v5327_v34 = vadd.f32 %v9261_v9, %v14849_v26  ;;  %9774 = vmatpush3.bf16.msra.mxu0 %v11493_v55  ;;  %v11496_v26 = vld [vmem:[%s15961_s4 + $0x248] sm:$0xff]   ;;  %v10914_v15 = vld [vmem:[%s15965_s3 + $0x20] ss:$100 sps:$4 sm:$0xff]  }
 0x2dd   :  { %v9301_v28 = vadd.f32 %v9300_v29, %v9299_v17  ;;  %v9263_v38 = vpop.f32.mrf.mxu0  ;;  %9775 = vmatprep.subr.bf16.mxu0 %v11495_v45  ;;  %v11498_v59 = vld [vmem:[%s15961_s4 + $0x208] sm:$0xff]   ;;  %v11499_v17 = vld [vmem:[%s15961_s4 + $0x1c0] sm:$0xff]  }
 0x2de   :  { %v9302_v20 = vpop.f32.mrf.mxu1  ;;  %v9264_v37 = vadd.f32 %v9263_v38, %v9262_v21  ;;  %v11502_v21 = vld [vmem:[%s15961_s4 + $0x200] sm:$0xff]  }
 0x2df   :  { %9814 = vmatpush3.bf16.msra.mxu1 %v11494_v42  ;;  %v15023_v53 = vadd.f32 %v9301_v28, %v5327_v34  ;;  %v9265_v40 = vpop.f32.mrf.mxu0  ;;  %6729 = vmatmul.mubr.bf16.gmra.mxu0 %v10905_v35  ;;  %v11501_v28 = vld [vmem:[%s15961_s4 + $0x180] sm:$0xff]  }
 0x2e0   :  { %v9303_v61 = vpop.f32.mrf.mxu1  ;;  %9815 = vmatprep.subr.bf16.mxu1 %v11496_v26  ;;  %v5330_v52 = vadd.f32 %v9264_v37, %v14866_v46  ;;  %9776 = vmatpush3.bf16.msra.mxu0 %v11497_v16  ;;  %v11500_v46 = vld [vmem:[%s15961_s4 + $0x240] sm:$0xff]  }
 0x2e1   :  { %v9304_v51 = vadd.f32 %v9303_v61, %v9302_v20  ;;  %v9266_v5 = vpop.f32.mrf.mxu0  ;;  %9777 = vmatprep.subr.bf16.mxu0 %v11499_v17  ;;  %6834 = vmatprep.mubr.bf16.mxu0 %v10913_v48  ;;  %v10919_v38 = vld [vmem:[%s15965_s3 + $0xe4] ss:$100 sps:$4 sm:$0xff]   ;;  %v10922_v61 = vld [vmem:[%s15965_s3 + $0xec] ss:$100 sps:$4 sm:$0xff]   ;;  %v11506_v48 = vld [vmem:[%s15961_s4 + $0x338] sm:$0xff]  }
 0x2e2   :  { %v9305_v58 = vpop.f32.mrf.mxu1  ;;  %6794 = vmatmul.mubr.bf16.gmra.mxu1 %v10908_v23  ;;  %v9267_v49 = vadd.f32 %v9266_v5, %v9265_v40  ;;  %v11503_v23 = vld [vmem:[%s15961_s4 + $0x2f8] sm:$0xff]   ;;  %v10917_v17 = vld [vmem:[%s15965_s3 + $0xe0] ss:$100 sps:$4 sm:$0xff]  }
 0x2e3   :  { %9816 = vmatpush3.bf16.msra.mxu1 %v11498_v59  ;;  %v15044_v50 = vadd.f32 %v9304_v51, %v5330_v52  ;;  %6899 = vmatprep.mubr.bf16.mxu1 %v10916_v47  ;;  %v9268_v2 = vpop.f32.mrf.mxu0  ;;  %v11505_v51 = vld [vmem:[%s15961_s4 + $0x2b8] sm:$0xff]  }
 0x2e4   :  { %v9306_v3 = vpop.f32.mrf.mxu1  ;;  %9817 = vmatprep.subr.bf16.mxu1 %v11500_v46  ;;  %v5335_v9 = vadd.f32 %v9267_v49, %v14886_v60  ;;  %9778 = vmatpush3.bf16.msra.mxu0 %v11501_v28  ;;  %v11504_v60 = vld [vmem:[%s15961_s4 + $0x378] sm:$0xff]   ;;  %v10920_v46 = vld [vmem:[%s15965_s3 + $0xe8] ss:$100 sps:$4 sm:$0xff]  }
 0x2e5   :  { %v9307_v0 = vadd.f32 %v9306_v3, %v9305_v58  ;;  %v9269_v20 = vpop.f32.mrf.mxu0  ;;  %9843 = vmatprep.subr.bf16.mxu0 %v11503_v23  ;;  %v11507_v58 = vld [vmem:[%s15961_s4 + $0x2f0] sm:$0xff]  }
 0x2e6   :  { %v9308_v29 = vpop.f32.mrf.mxu1  ;;  %v9270_v55 = vadd.f32 %v9269_v20, %v9268_v2  ;;  %v11510_v2 = vld [vmem:[%s15961_s4 + $0x330] sm:$0xff]  }
 0x2e7   :  { %9818 = vmatpush3.bf16.msra.mxu1 %v11502_v21  ;;  %v15065_v34 = vadd.f32 %v9307_v0, %v5335_v9  ;;  %v9327_v45 = vpop.f32.mrf.mxu0  ;;  %6835 = vmatmul.mubr.bf16.vlgmr.msra.gmra.mxu0 %v10911_v24  ;;  %v11509_v0 = vld [vmem:[%s15961_s4 + $0x2b0] sm:$0xff]  }
 0x2e8   :  { %v9309_v35 = vpop.f32.mrf.mxu1  ;;  %9883 = vmatprep.subr.bf16.mxu1 %v11504_v60  ;;  %v5338_v37 = vadd.f32 %v9270_v55, %v14906_v36  ;;  %9844 = vmatpush3.bf16.msra.mxu0 %v11505_v51  ;;  %v11508_v36 = vld [vmem:[%s15961_s4 + $0x370] sm:$0xff]  }
 0x2e9   :  { %v9310_v42 = vadd.f32 %v9309_v35, %v9308_v29  ;;  %v9328_v47 = vpop.f32.mrf.mxu0  ;;  %9845 = vmatprep.subr.bf16.mxu0 %v11507_v58  ;;  %6842 = vmatprep.mubr.bf16.mxu0 %v10919_v38  ;;  %v10925_v20 = vld [vmem:[%s15965_s3 + $0x1ac] ss:$100 sps:$4 sm:$0xff]   ;;  %v10928_v35 = vld [vmem:[%s15965_s3 + $0x1b4] ss:$100 sps:$4 sm:$0xff]  }
 0x2ea   :  { %v9367_v26 = vpop.f32.mrf.mxu1  ;;  %6900 = vmatmul.mubr.bf16.vlgmr.msra.gmra.mxu1 %v10914_v15  ;;  %v9329_v16 = vadd.f32 %v9328_v47, %v9327_v45  ;;  %v11511_v15 = vld [vmem:[%s15961_s4 + $0x2e8] sm:$0xff]  }
 0x2eb   :  { %9884 = vmatpush3.bf16.msra.mxu1 %v11506_v48  ;;  %v15086_v52 = vadd.f32 %v9310_v42, %v5338_v37  ;;  %6907 = vmatprep.mubr.bf16.mxu1 %v10922_v61  ;;  %v9330_v5 = vpop.f32.mrf.mxu0  ;;  %v11513_v42 = vld [vmem:[%s15961_s4 + $0x2a8] sm:$0xff]  }
 0x2ec   :  { %v9368_v40 = vpop.f32.mrf.mxu1  ;;  %9885 = vmatprep.subr.bf16.mxu1 %v11508_v36  ;;  %v5441_v49 = vadd.f32 %v9329_v16, %v14939_v8  ;;  %9846 = vmatpush3.bf16.msra.mxu0 %v11509_v0  ;;  %v11512_v8 = vld [vmem:[%s15961_s4 + $0x368] sm:$0xff]   ;;  %v10926_v36 = vld [vmem:[%s15965_s3 + $0x1b0] ss:$100 sps:$4 sm:$0xff]  }
 0x2ed   :  { %v9369_v59 = vadd.f32 %v9368_v40, %v9367_v26  ;;  %v9331_v29 = vpop.f32.mrf.mxu0  ;;  %9847 = vmatprep.subr.bf16.mxu0 %v11511_v15  ;;  %v11514_v38 = vld [vmem:[%s15961_s4 + $0x328] sm:$0xff]   ;;  %v11515_v26 = vld [vmem:[%s15961_s4 + $0x2e0] sm:$0xff]  }
 0x2ee   :  { %v9370_v3 = vpop.f32.mrf.mxu1  ;;  %v9332_v28 = vadd.f32 %v9331_v29, %v9330_v5  ;;  %v10923_v58 = vld [vmem:[%s15965_s3 + $0x1a8] ss:$100 sps:$4 sm:$0xff]   ;;  %v11518_v5 = vld [vmem:[%s15961_s4 + $0x320] sm:$0xff]   ;;  %v10931_v29 = vld [vmem:[%s15965_s3 + $0x274] ss:$100 sps:$4 sm:$0xff]  }
 0x2ef   :  { %9886 = vmatpush3.bf16.msra.mxu1 %v11510_v2  ;;  %v15107_v9 = vadd.f32 %v9369_v59, %v5441_v49  ;;  %v9333_v23 = vpop.f32.mrf.mxu0  ;;  %6843 = vmatmul.mubr.bf16.gmra.mxu0 %v10917_v17  ;;  %v11517_v59 = vld [vmem:[%s15961_s4 + $0x2a0] sm:$0xff]  }
 0x2f0   :  { %v9371_v24 = vpop.f32.mrf.mxu1  ;;  %9887 = vmatprep.subr.bf16.mxu1 %v11512_v8  ;;  %v5444_v55 = vadd.f32 %v9332_v28, %v14960_v39  ;;  %9848 = vmatpush3.bf16.msra.mxu0 %v11513_v42  ;;  %v11516_v39 = vld [vmem:[%s15961_s4 + $0x360] sm:$0xff]  }
 0x2f1   :  { %v9372_v21 = vadd.f32 %v9371_v24, %v9370_v3  ;;  %v9334_v61 = vpop.f32.mrf.mxu0  ;;  %9849 = vmatprep.subr.bf16.mxu0 %v11515_v26  ;;  %6850 = vmatprep.mubr.bf16.mxu0 %v10925_v20  ;;  %v10934_v24 = vld [vmem:[%s15965_s3 + $0x27c] ss:$100 sps:$4 sm:$0xff]   ;;  %v10929_v26 = vld [vmem:[%s15965_s3 + $0x270] ss:$100 sps:$4 sm:$0xff]  }
 0x2f2   :  { %v9373_v60 = vpop.f32.mrf.mxu1  ;;  %6908 = vmatmul.mubr.bf16.gmra.mxu1 %v10920_v46  ;;  %v9335_v51 = vadd.f32 %v9334_v61, %v9333_v23  ;;  %v11519_v46 = vld [vmem:[%s15961_s4 + $0x2d8] sm:$0xff]  }
 0x2f3   :  { %9888 = vmatpush3.bf16.msra.mxu1 %v11514_v38  ;;  %v15128_v37 = vadd.f32 %v9372_v21, %v5444_v55  ;;  %6915 = vmatprep.mubr.bf16.mxu1 %v10928_v35  ;;  %v9336_v47 = vpop.f32.mrf.mxu0  ;;  %v11521_v21 = vld [vmem:[%s15961_s4 + $0x298] sm:$0xff]  }
 0x2f4   :  { %v9374_v45 = vpop.f32.mrf.mxu1  ;;  %9889 = vmatprep.subr.bf16.mxu1 %v11516_v39  ;;  %v5449_v16 = vadd.f32 %v9335_v51, %v14981_v44  ;;  %9850 = vmatpush3.bf16.msra.mxu0 %v11517_v59  ;;  %v11520_v44 = vld [vmem:[%s15961_s4 + $0x358] sm:$0xff]  }
 0x2f5   :  { %v9375_v48 = vadd.f32 %v9374_v45, %v9373_v60  ;;  %v9337_v3 = vpop.f32.mrf.mxu0  ;;  %9851 = vmatprep.subr.bf16.mxu0 %v11519_v46  ;;  %v11522_v20 = vld [vmem:[%s15961_s4 + $0x318] sm:$0xff]   ;;  %v11523_v60 = vld [vmem:[%s15961_s4 + $0x2d0] sm:$0xff]  }
 0x2f6   :  { %v9376_v40 = vpop.f32.mrf.mxu1  ;;  %v9338_v0 = vadd.f32 %v9337_v3, %v9336_v47  ;;  %v10932_v39 = vld [vmem:[%s15965_s3 + $0x278] ss:$100 sps:$4 sm:$0xff]   ;;  %v11526_v47 = vld [vmem:[%s15961_s4 + $0x310] sm:$0xff]  }
 0x2f7   :  { %9890 = vmatpush3.bf16.msra.mxu1 %v11518_v5  ;;  %v15149_v49 = vadd.f32 %v9375_v48, %v5449_v16  ;;  %v9339_v15 = vpop.f32.mrf.mxu0  ;;  %6851 = vmatmul.mubr.bf16.gmra.mxu0 %v10923_v58  ;;  %v11525_v48 = vld [vmem:[%s15961_s4 + $0x290] sm:$0xff]  }
 0x2f8   :  { %v9377_v17 = vpop.f32.mrf.mxu1  ;;  %9891 = vmatprep.subr.bf16.mxu1 %v11520_v44  ;;  %v5452_v28 = vadd.f32 %v9338_v0, %v15002_v11  ;;  %9852 = vmatpush3.bf16.msra.mxu0 %v11521_v21  ;;  %v11524_v11 = vld [vmem:[%s15961_s4 + $0x350] sm:$0xff]  }
 0x2f9   :  { %v9378_v2 = vadd.f32 %v9377_v17, %v9376_v40  ;;  %v9340_v35 = vpop.f32.mrf.mxu0  ;;  %9853 = vmatprep.subr.bf16.mxu0 %v11523_v60  ;;  %6858 = vmatprep.mubr.bf16.mxu0 %v10931_v29  ;;  %v10937_v3 = vld [vmem:[%s15965_s3 + $0x2c] ss:$100 sps:$4 sm:$0xff]   ;;  %v10940_v17 = vld [vmem:[%s15965_s3 + $0x34] ss:$100 sps:$4 sm:$0xff]  }
 0x2fa   :  { %v9379_v8 = vpop.f32.mrf.mxu1  ;;  %6916 = vmatmul.mubr.bf16.gmra.mxu1 %v10926_v36  ;;  %v9341_v42 = vadd.f32 %v9340_v35, %v9339_v15  ;;  %v11527_v36 = vld [vmem:[%s15961_s4 + $0x2c8] sm:$0xff]  }
 0x2fb   :  { %9892 = vmatpush3.bf16.msra.mxu1 %v11522_v20  ;;  %v15170_v55 = vadd.f32 %v9378_v2, %v5452_v28  ;;  %6923 = vmatprep.mubr.bf16.mxu1 %v10934_v24  ;;  %v9342_v61 = vpop.f32.mrf.mxu0  ;;  %v11529_v2 = vld [vmem:[%s15961_s4 + $0x288] sm:$0xff]  }
 0x2fc   :  { %v9380_v23 = vpop.f32.mrf.mxu1  ;;  %9893 = vmatprep.subr.bf16.mxu1 %v11524_v11  ;;  %v5457_v51 = vadd.f32 %v9341_v42, %v15023_v53  ;;  %9854 = vmatpush3.bf16.msra.mxu0 %v11525_v48  ;;  %v11528_v53 = vld [vmem:[%s15961_s4 + $0x348] sm:$0xff]   ;;  %v10938_v11 = vld [vmem:[%s15965_s3 + $0x30] ss:$100 sps:$4 sm:$0xff]  }
 0x2fd   :  { %v9381_v38 = vadd.f32 %v9380_v23, %v9379_v8  ;;  %v9343_v40 = vpop.f32.mrf.mxu0  ;;  %9855 = vmatprep.subr.bf16.mxu0 %v11527_v36  ;;  %v11530_v29 = vld [vmem:[%s15961_s4 + $0x308] sm:$0xff]   ;;  %v11531_v8 = vld [vmem:[%s15961_s4 + $0x2c0] sm:$0xff]  }
 0x2fe   :  { %v9382_v45 = vpop.f32.mrf.mxu1  ;;  %v9344_v59 = vadd.f32 %v9343_v40, %v9342_v61  ;;  %v10935_v60 = vld [vmem:[%s15965_s3 + $0x28] ss:$100 sps:$4 sm:$0xff]   ;;  %v11534_v61 = vld [vmem:[%s15961_s4 + $0x300] sm:$0xff]   ;;  %v10943_v40 = vld [vmem:[%s15965_s3 + $0xf4] ss:$100 sps:$4 sm:$0xff]  }
 0x2ff   :  { %9894 = vmatpush3.bf16.msra.mxu1 %v11526_v47  ;;  %v15191_v16 = vadd.f32 %v9381_v38, %v5457_v51  ;;  %v9345_v46 = vpop.f32.mrf.mxu0  ;;  %6859 = vmatmul.mubr.bf16.gmra.mxu0 %v10929_v26  ;;  %v11533_v38 = vld [vmem:[%s15961_s4 + $0x280] sm:$0xff]  }
 0x300   :  { %v9383_v58 = vpop.f32.mrf.mxu1  ;;  %9895 = vmatprep.subr.bf16.mxu1 %v11528_v53  ;;  %v5460_v0 = vadd.f32 %v9344_v59, %v15044_v50  ;;  %9856 = vmatpush3.bf16.msra.mxu0 %v11529_v2  ;;  %v11532_v50 = vld [vmem:[%s15961_s4 + $0x340] sm:$0xff]  }
 0x301   :  { %v9384_v5 = vadd.f32 %v9383_v58, %v9382_v45  ;;  %v9346_v24 = vpop.f32.mrf.mxu0  ;;  %9857 = vmatprep.subr.bf16.mxu0 %v11531_v8  ;;  %6964 = vmatprep.mubr.bf16.mxu0 %v10937_v3  ;;  %v10946_v58 = vld [vmem:[%s15965_s3 + $0xfc] ss:$100 sps:$4 sm:$0xff]   ;;  %v10941_v8 = vld [vmem:[%s15965_s3 + $0xf0] ss:$100 sps:$4 sm:$0xff]  }
 0x302   :  { %v9385_v44 = vpop.f32.mrf.mxu1  ;;  %6924 = vmatmul.mubr.bf16.gmra.mxu1 %v10932_v39  ;;  %v9347_v21 = vadd.f32 %v9346_v24, %v9345_v46  ;;  %v11535_v39 = vld [vmem:[%s15961_s4 + $0x3f8] sm:$0xff]  }
 0x303   :  { %9896 = vmatpush3.bf16.msra.mxu1 %v11530_v29  ;;  %v15212_v28 = vadd.f32 %v9384_v5, %v5460_v0  ;;  %7029 = vmatprep.mubr.bf16.mxu1 %v10940_v17  ;;  %v9348_v35 = vpop.f32.mrf.mxu0  ;;  %v11537_v5 = vld [vmem:[%s15961_s4 + $0x3b8] sm:$0xff]  }
 0x304   :  { %v9386_v15 = vpop.f32.mrf.mxu1  ;;  %9897 = vmatprep.subr.bf16.mxu1 %v11532_v50  ;;  %v5465_v42 = vadd.f32 %v9347_v21, %v15065_v34  ;;  %9858 = vmatpush3.bf16.msra.mxu0 %v11533_v38  ;;  %v11536_v34 = vld [vmem:[%s15961_s4 + $0x478] sm:$0xff]  }
 0x305   :  { %v9387_v20 = vadd.f32 %v9386_v15, %v9385_v44  ;;  %v9349_v45 = vpop.f32.mrf.mxu0  ;;  %9923 = vmatprep.subr.bf16.mxu0 %v11535_v39  ;;  %v11538_v3 = vld [vmem:[%s15961_s4 + $0x438] sm:$0xff]   ;;  %v11539_v44 = vld [vmem:[%s15961_s4 + $0x3f0] sm:$0xff]  }
 0x306   :  { %v9388_v23 = vpop.f32.mrf.mxu1  ;;  %v9350_v48 = vadd.f32 %v9349_v45, %v9348_v35  ;;  %v10944_v50 = vld [vmem:[%s15965_s3 + $0xf8] ss:$100 sps:$4 sm:$0xff]   ;;  %v11542_v35 = vld [vmem:[%s15961_s4 + $0x430] sm:$0xff]  }
 0x307   :  { %9898 = vmatpush3.bf16.msra.mxu1 %v11534_v61  ;;  %v15233_v51 = vadd.f32 %v9387_v20, %v5465_v42  ;;  %v9407_v36 = vpop.f32.mrf.mxu0  ;;  %6965 = vmatmul.mubr.bf16.vlgmr.msra.gmra.mxu0 %v10935_v60  ;;  %v11541_v20 = vld [vmem:[%s15961_s4 + $0x3b0] sm:$0xff]   ;;  %v10949_v45 = vld [vmem:[%s15965_s3 + $0x1bc] ss:$100 sps:$4 sm:$0xff]  }
 0x308   :  { %v9389_v26 = vpop.f32.mrf.mxu1  ;;  %9963 = vmatprep.subr.bf16.mxu1 %v11536_v34  ;;  %v5468_v59 = vadd.f32 %v9350_v48, %v15086_v52  ;;  %9924 = vmatpush3.bf16.msra.mxu0 %v11537_v5  ;;  %v11540_v52 = vld [vmem:[%s15961_s4 + $0x470] sm:$0xff]  }
 0x309   :  { %v9390_v47 = vadd.f32 %v9389_v26, %v9388_v23  ;;  %v9408_v17 = vpop.f32.mrf.mxu0  ;;  %9925 = vmatprep.subr.bf16.mxu0 %v11539_v44  ;;  %6972 = vmatprep.mubr.bf16.mxu0 %v10943_v40  ;;  %v10952_v26 = vld [vmem:[%s15965_s3 + $0x1c4] ss:$100 sps:$4 sm:$0xff]   ;;  %v10947_v44 = vld [vmem:[%s15965_s3 + $0x1b8] ss:$100 sps:$4 sm:$0xff]  }
 0x30a   :  { %v9447_v53 = vpop.f32.mrf.mxu1  ;;  %7030 = vmatmul.mubr.bf16.vlgmr.msra.gmra.mxu1 %v10938_v11  ;;  %v9409_v2 = vadd.f32 %v9408_v17, %v9407_v36  ;;  %v11543_v11 = vld [vmem:[%s15961_s4 + $0x3e8] sm:$0xff]  }
 0x30b   :  { %9964 = vmatpush3.bf16.msra.mxu1 %v11538_v3  ;;  %v15254_v0 = vadd.f32 %v9390_v47, %v5468_v59  ;;  %7037 = vmatprep.mubr.bf16.mxu1 %v10946_v58  ;;  %v9410_v24 = vpop.f32.mrf.mxu0  ;;  %v11545_v47 = vld [vmem:[%s15961_s4 + $0x3a8] sm:$0xff]  }
 0x30c   :  { %v9448_v46 = vpop.f32.mrf.mxu1  ;;  %9965 = vmatprep.subr.bf16.mxu1 %v11540_v52  ;;  %v5571_v21 = vadd.f32 %v9409_v2, %v15107_v9  ;;  %9926 = vmatpush3.bf16.msra.mxu0 %v11541_v20  ;;  %v11544_v9 = vld [vmem:[%s15961_s4 + $0x468] sm:$0xff]   ;;  %v10950_v52 = vld [vmem:[%s15965_s3 + $0x1c0] ss:$100 sps:$4 sm:$0xff]  }
 0x30d   :  { %v9449_v29 = vadd.f32 %v9448_v46, %v9447_v53  ;;  %v9411_v23 = vpop.f32.mrf.mxu0  ;;  %9927 = vmatprep.subr.bf16.mxu0 %v11543_v11  ;;  %v11546_v40 = vld [vmem:[%s15961_s4 + $0x428] sm:$0xff]   ;;  %v11547_v53 = vld [vmem:[%s15961_s4 + $0x3e0] sm:$0xff]  }
 0x30e   :  { %v9450_v15 = vpop.f32.mrf.mxu1  ;;  %v9412_v38 = vadd.f32 %v9411_v23, %v9410_v24  ;;  %v11550_v24 = vld [vmem:[%s15961_s4 + $0x420] sm:$0xff]  }
 0x30f   :  { %9966 = vmatpush3.bf16.msra.mxu1 %v11542_v35  ;;  %v15275_v42 = vadd.f32 %v9449_v29, %v5571_v21  ;;  %v9413_v39 = vpop.f32.mrf.mxu0  ;;  %6973 = vmatmul.mubr.bf16.gmra.mxu0 %v10941_v8  ;;  %v11549_v29 = vld [vmem:[%s15961_s4 + $0x3a0] sm:$0xff]  }
 0x310   :  { %v9451_v60 = vpop.f32.mrf.mxu1  ;;  %9967 = vmatprep.subr.bf16.mxu1 %v11544_v9  ;;  %v5574_v48 = vadd.f32 %v9412_v38, %v15128_v37  ;;  %9928 = vmatpush3.bf16.msra.mxu0 %v11545_v47  ;;  %v11548_v37 = vld [vmem:[%s15961_s4 + $0x460] sm:$0xff]  }
 0x311   :  { %v9452_v61 = vadd.f32 %v9451_v60, %v9450_v15  ;;  %v9414_v58 = vpop.f32.mrf.mxu0  ;;  %9929 = vmatprep.subr.bf16.mxu0 %v11547_v53  ;;  %6980 = vmatprep.mubr.bf16.mxu0 %v10949_v45  ;;  %v10955_v23 = vld [vmem:[%s15965_s3 + $0x284] ss:$100 sps:$4 sm:$0xff]   ;;  %v10958_v60 = vld [vmem:[%s15965_s3 + $0x28c] ss:$100 sps:$4 sm:$0xff]   ;;  %v11554_v45 = vld [vmem:[%s15961_s4 + $0x418] sm:$0xff]  }
 0x312   :  { %v9453_v34 = vpop.f32.mrf.mxu1  ;;  %7038 = vmatmul.mubr.bf16.gmra.mxu1 %v10944_v50  ;;  %v9415_v5 = vadd.f32 %v9414_v58, %v9413_v39  ;;  %v11551_v50 = vld [vmem:[%s15961_s4 + $0x3d8] sm:$0xff]   ;;  %v10953_v53 = vld [vmem:[%s15965_s3 + $0x280] ss:$100 sps:$4 sm:$0xff]  }
 0x313   :  { %9968 = vmatpush3.bf16.msra.mxu1 %v11546_v40  ;;  %v15296_v59 = vadd.f32 %v9452_v61, %v5574_v48  ;;  %7045 = vmatprep.mubr.bf16.mxu1 %v10952_v26  ;;  %v9416_v17 = vpop.f32.mrf.mxu0  ;;  %v11553_v61 = vld [vmem:[%s15961_s4 + $0x398] sm:$0xff]  }
 0x314   :  { %v9454_v36 = vpop.f32.mrf.mxu1  ;;  %9969 = vmatprep.subr.bf16.mxu1 %v11548_v37  ;;  %v5579_v2 = vadd.f32 %v9415_v5, %v15149_v49  ;;  %9930 = vmatpush3.bf16.msra.mxu0 %v11549_v29  ;;  %v11552_v49 = vld [vmem:[%s15961_s4 + $0x458] sm:$0xff]   ;;  %v10956_v37 = vld [vmem:[%s15965_s3 + $0x288] ss:$100 sps:$4 sm:$0xff]  }
 0x315   :  { %v9455_v3 = vadd.f32 %v9454_v36, %v9453_v34  ;;  %v9417_v15 = vpop.f32.mrf.mxu0  ;;  %9931 = vmatprep.subr.bf16.mxu0 %v11551_v50  ;;  %v11555_v34 = vld [vmem:[%s15961_s4 + $0x3d0] sm:$0xff]  }
 0x316   :  { %v9456_v46 = vpop.f32.mrf.mxu1  ;;  %v9418_v20 = vadd.f32 %v9417_v15, %v9416_v17  ;;  %v11558_v17 = vld [vmem:[%s15961_s4 + $0x410] sm:$0xff]   ;;  %v10961_v15 = vld [vmem:[%s15965_s3 + $0x3c] ss:$100 sps:$4 sm:$0xff]  }
 0x317   :  { %9970 = vmatpush3.bf16.msra.mxu1 %v11550_v24  ;;  %v15317_v21 = vadd.f32 %v9455_v3, %v5579_v2  ;;  %v9419_v11 = vpop.f32.mrf.mxu0  ;;  %6981 = vmatmul.mubr.bf16.gmra.mxu0 %v10947_v44  ;;  %v11557_v3 = vld [vmem:[%s15961_s4 + $0x390] sm:$0xff]  }
 0x318   :  { %v9457_v8 = vpop.f32.mrf.mxu1  ;;  %9971 = vmatprep.subr.bf16.mxu1 %v11552_v49  ;;  %v5582_v38 = vadd.f32 %v9418_v20, %v15170_v55  ;;  %9932 = vmatpush3.bf16.msra.mxu0 %v11553_v61  ;;  %v11556_v55 = vld [vmem:[%s15961_s4 + $0x450] sm:$0xff]  }
 0x319   :  { %v9458_v35 = vadd.f32 %v9457_v8, %v9456_v46  ;;  %v9420_v26 = vpop.f32.mrf.mxu0  ;;  %9933 = vmatprep.subr.bf16.mxu0 %v11555_v34  ;;  %6988 = vmatprep.mubr.bf16.mxu0 %v10955_v23  ;;  %v10964_v8 = vld [vmem:[%s15965_s3 + $0x44] ss:$100 sps:$4 sm:$0xff]   ;;  %v10959_v34 = vld [vmem:[%s15965_s3 + $0x38] ss:$100 sps:$4 sm:$0xff]  }
 0x31a   :  { %v9459_v9 = vpop.f32.mrf.mxu1  ;;  %7046 = vmatmul.mubr.bf16.gmra.mxu1 %v10950_v52  ;;  %v9421_v47 = vadd.f32 %v9420_v26, %v9419_v11  ;;  %v11559_v52 = vld [vmem:[%s15961_s4 + $0x3c8] sm:$0xff]  }
 0x31b   :  { %9972 = vmatpush3.bf16.msra.mxu1 %v11554_v45  ;;  %v15338_v48 = vadd.f32 %v9458_v35, %v5582_v38  ;;  %7053 = vmatprep.mubr.bf16.mxu1 %v10958_v60  ;;  %v9422_v58 = vpop.f32.mrf.mxu0  ;;  %v11561_v35 = vld [vmem:[%s15961_s4 + $0x388] sm:$0xff]  }
 0x31c   :  { %v9460_v39 = vpop.f32.mrf.mxu1  ;;  %9973 = vmatprep.subr.bf16.mxu1 %v11556_v55  ;;  %v5587_v5 = vadd.f32 %v9421_v47, %v15191_v16  ;;  %9934 = vmatpush3.bf16.msra.mxu0 %v11557_v3  ;;  %v11560_v16 = vld [vmem:[%s15961_s4 + $0x448] sm:$0xff]   ;;  %v10962_v55 = vld [vmem:[%s15965_s3 + $0x40] ss:$100 sps:$4 sm:$0xff]  }
 0x31d   :  { %v9461_v40 = vadd.f32 %v9460_v39, %v9459_v9  ;;  %v9423_v46 = vpop.f32.mrf.mxu0  ;;  %9935 = vmatprep.subr.bf16.mxu0 %v11559_v52  ;;  %v11562_v23 = vld [vmem:[%s15961_s4 + $0x408] sm:$0xff]   ;;  %v11563_v9 = vld [vmem:[%s15961_s4 + $0x3c0] sm:$0xff]  }
 0x31e   :  { %v9462_v36 = vpop.f32.mrf.mxu1  ;;  %v9424_v29 = vadd.f32 %v9423_v46, %v9422_v58  ;;  %v11566_v58 = vld [vmem:[%s15961_s4 + $0x400] sm:$0xff]  }
 0x31f   :  { %9974 = vmatpush3.bf16.msra.mxu1 %v11558_v17  ;;  %v15359_v2 = vadd.f32 %v9461_v40, %v5587_v5  ;;  %v9425_v50 = vpop.f32.mrf.mxu0  ;;  %6989 = vmatmul.mubr.bf16.gmra.mxu0 %v10953_v53  ;;  %v11565_v40 = vld [vmem:[%s15961_s4 + $0x380] sm:$0xff]  }
 0x320   :  { %v9463_v44 = vpop.f32.mrf.mxu1  ;;  %9975 = vmatprep.subr.bf16.mxu1 %v11560_v16  ;;  %v5590_v20 = vadd.f32 %v9424_v29, %v15212_v28  ;;  %9936 = vmatpush3.bf16.msra.mxu0 %v11561_v35  ;;  %v11564_v28 = vld [vmem:[%s15961_s4 + $0x440] sm:$0xff]  }
 0x321   :  { %v9464_v24 = vadd.f32 %v9463_v44, %v9462_v36  ;;  %v9426_v60 = vpop.f32.mrf.mxu0  ;;  %9937 = vmatprep.subr.bf16.mxu0 %v11563_v9  ;;  %7094 = vmatprep.mubr.bf16.mxu0 %v10961_v15  ;;  %v10967_v46 = vld [vmem:[%s15965_s3 + $0x104] ss:$100 sps:$4 sm:$0xff]   ;;  %v10970_v44 = vld [vmem:[%s15965_s3 + $0x10c] ss:$100 sps:$4 sm:$0xff]   ;;  %v11570_v15 = vld [vmem:[%s15961_s4 + $0x538] sm:$0xff]  }
 0x322   :  { %v9465_v49 = vpop.f32.mrf.mxu1  ;;  %7054 = vmatmul.mubr.bf16.gmra.mxu1 %v10956_v37  ;;  %v9427_v61 = vadd.f32 %v9426_v60, %v9425_v50  ;;  %v11567_v37 = vld [vmem:[%s15961_s4 + $0x4f8] sm:$0xff]   ;;  %v10965_v9 = vld [vmem:[%s15965_s3 + $0x100] ss:$100 sps:$4 sm:$0xff]  }
 0x323   :  { %9976 = vmatpush3.bf16.msra.mxu1 %v11562_v23  ;;  %v15380_v38 = vadd.f32 %v9464_v24, %v5590_v20  ;;  %7159 = vmatprep.mubr.bf16.mxu1 %v10964_v8  ;;  %v9428_v26 = vpop.f32.mrf.mxu0  ;;  %v11569_v24 = vld [vmem:[%s15961_s4 + $0x4b8] sm:$0xff]  }
 0x324   :  { %v9466_v11 = vpop.f32.mrf.mxu1  ;;  %9977 = vmatprep.subr.bf16.mxu1 %v11564_v28  ;;  %v5595_v47 = vadd.f32 %v9427_v61, %v15233_v51  ;;  %9938 = vmatpush3.bf16.msra.mxu0 %v11565_v40  ;;  %v11568_v51 = vld [vmem:[%s15961_s4 + $0x578] sm:$0xff]   ;;  %v10968_v28 = vld [vmem:[%s15965_s3 + $0x108] ss:$100 sps:$4 sm:$0xff]  }
 0x325   :  { %v9467_v45 = vadd.f32 %v9466_v11, %v9465_v49  ;;  %v9429_v36 = vpop.f32.mrf.mxu0  ;;  %10003 = vmatprep.subr.bf16.mxu0 %v11567_v37  ;;  %v11571_v49 = vld [vmem:[%s15961_s4 + $0x4f0] sm:$0xff]  }
 0x326   :  { %v9468_v39 = vpop.f32.mrf.mxu1  ;;  %v9430_v3 = vadd.f32 %v9429_v36, %v9428_v26  ;;  %v11574_v26 = vld [vmem:[%s15961_s4 + $0x530] sm:$0xff]  }
 0x327   :  { %9978 = vmatpush3.bf16.msra.mxu1 %v11566_v58  ;;  %v15401_v5 = vadd.f32 %v9467_v45, %v5595_v47  ;;  %v9487_v52 = vpop.f32.mrf.mxu0  ;;  %7095 = vmatmul.mubr.bf16.vlgmr.msra.gmra.mxu0 %v10959_v34  ;;  %v11573_v45 = vld [vmem:[%s15961_s4 + $0x4b0] sm:$0xff]  }
 0x328   :  { %v9469_v53 = vpop.f32.mrf.mxu1  ;;  %10043 = vmatprep.subr.bf16.mxu1 %v11568_v51  ;;  %v5598_v29 = vadd.f32 %v9430_v3, %v15254_v0  ;;  %10004 = vmatpush3.bf16.msra.mxu0 %v11569_v24  ;;  %v11572_v0 = vld [vmem:[%s15961_s4 + $0x570] sm:$0xff]  }
 0x329   :  { %v9470_v17 = vadd.f32 %v9469_v53, %v9468_v39  ;;  %v9488_v8 = vpop.f32.mrf.mxu0  ;;  %10005 = vmatprep.subr.bf16.mxu0 %v11571_v49  ;;  %7102 = vmatprep.mubr.bf16.mxu0 %v10967_v46  ;;  %v10973_v36 = vld [vmem:[%s15965_s3 + $0x1cc] ss:$100 sps:$4 sm:$0xff]   ;;  %v10976_v53 = vld [vmem:[%s15965_s3 + $0x1d4] ss:$100 sps:$4 sm:$0xff]  }
 0x32a   :  { %v9527_v16 = vpop.f32.mrf.mxu1  ;;  %7160 = vmatmul.mubr.bf16.vlgmr.msra.gmra.mxu1 %v10962_v55  ;;  %v9489_v35 = vadd.f32 %v9488_v8, %v9487_v52  ;;  %v11575_v55 = vld [vmem:[%s15961_s4 + $0x4e8] sm:$0xff]  }
 0x32b   :  { %10044 = vmatpush3.bf16.msra.mxu1 %v11570_v15  ;;  %v15422_v20 = vadd.f32 %v9470_v17, %v5598_v29  ;;  %7167 = vmatprep.mubr.bf16.mxu1 %v10970_v44  ;;  %v9490_v60 = vpop.f32.mrf.mxu0  ;;  %v11577_v17 = vld [vmem:[%s15961_s4 + $0x4a8] sm:$0xff]  }
 0x32c   :  { %v9528_v50 = vpop.f32.mrf.mxu1  ;;  %10045 = vmatprep.subr.bf16.mxu1 %v11572_v0  ;;  %v5701_v61 = vadd.f32 %v9489_v35, %v15275_v42  ;;  %10006 = vmatpush3.bf16.msra.mxu0 %v11573_v45  ;;  %v11576_v42 = vld [vmem:[%s15961_s4 + $0x568] sm:$0xff]   ;;  %v10974_v0 = vld [vmem:[%s15965_s3 + $0x1d0] ss:$100 sps:$4 sm:$0xff]  }
 0x32d   :  { %v9529_v23 = vadd.f32 %v9528_v50, %v9527_v16  ;;  %v9491_v39 = vpop.f32.mrf.mxu0  ;;  %10007 = vmatprep.subr.bf16.mxu0 %v11575_v55  ;;  %v11578_v46 = vld [vmem:[%s15961_s4 + $0x528] sm:$0xff]   ;;  %v11579_v16 = vld [vmem:[%s15961_s4 + $0x4e0] sm:$0xff]  }
 0x32e   :  { %v9530_v11 = vpop.f32.mrf.mxu1  ;;  %v9492_v40 = vadd.f32 %v9491_v39, %v9490_v60  ;;  %v10971_v49 = vld [vmem:[%s15965_s3 + $0x1c8] ss:$100 sps:$4 sm:$0xff]   ;;  %v11582_v60 = vld [vmem:[%s15961_s4 + $0x520] sm:$0xff]   ;;  %v10979_v39 = vld [vmem:[%s15965_s3 + $0x294] ss:$100 sps:$4 sm:$0xff]  }
 0x32f   :  { %10046 = vmatpush3.bf16.msra.mxu1 %v11574_v26  ;;  %v15443_v47 = vadd.f32 %v9529_v23, %v5701_v61  ;;  %v9493_v37 = vpop.f32.mrf.mxu0  ;;  %7103 = vmatmul.mubr.bf16.gmra.mxu0 %v10965_v9  ;;  %v11581_v23 = vld [vmem:[%s15961_s4 + $0x4a0] sm:$0xff]  }
 0x330   :  { %v9531_v34 = vpop.f32.mrf.mxu1  ;;  %10047 = vmatprep.subr.bf16.mxu1 %v11576_v42  ;;  %v5704_v3 = vadd.f32 %v9492_v40, %v15296_v59  ;;  %10008 = vmatpush3.bf16.msra.mxu0 %v11577_v17  ;;  %v11580_v59 = vld [vmem:[%s15961_s4 + $0x560] sm:$0xff]  }
 0x331   :  { %v9532_v58 = vadd.f32 %v9531_v34, %v9530_v11  ;;  %v9494_v44 = vpop.f32.mrf.mxu0  ;;  %10009 = vmatprep.subr.bf16.mxu0 %v11579_v16  ;;  %7110 = vmatprep.mubr.bf16.mxu0 %v10973_v36  ;;  %v10982_v34 = vld [vmem:[%s15965_s3 + $0x29c] ss:$100 sps:$4 sm:$0xff]   ;;  %v10977_v16 = vld [vmem:[%s15965_s3 + $0x290] ss:$100 sps:$4 sm:$0xff]  }
 0x332   :  { %v9533_v51 = vpop.f32.mrf.mxu1  ;;  %7168 = vmatmul.mubr.bf16.gmra.mxu1 %v10968_v28  ;;  %v9495_v24 = vadd.f32 %v9494_v44, %v9493_v37  ;;  %v11583_v28 = vld [vmem:[%s15961_s4 + $0x4d8] sm:$0xff]  }
 0x333   :  { %10048 = vmatpush3.bf16.msra.mxu1 %v11578_v46  ;;  %v15464_v29 = vadd.f32 %v9532_v58, %v5704_v3  ;;  %7175 = vmatprep.mubr.bf16.mxu1 %v10976_v53  ;;  %v9496_v8 = vpop.f32.mrf.mxu0  ;;  %v11585_v58 = vld [vmem:[%s15961_s4 + $0x498] sm:$0xff]  }
 0x334   :  { %v9534_v52 = vpop.f32.mrf.mxu1  ;;  %10049 = vmatprep.subr.bf16.mxu1 %v11580_v59  ;;  %v5709_v35 = vadd.f32 %v9495_v24, %v15317_v21  ;;  %10010 = vmatpush3.bf16.msra.mxu0 %v11581_v23  ;;  %v11584_v21 = vld [vmem:[%s15961_s4 + $0x558] sm:$0xff]  }
 0x335   :  { %v9535_v15 = vadd.f32 %v9534_v52, %v9533_v51  ;;  %v9497_v11 = vpop.f32.mrf.mxu0  ;;  %10011 = vmatprep.subr.bf16.mxu0 %v11583_v28  ;;  %v11586_v36 = vld [vmem:[%s15961_s4 + $0x518] sm:$0xff]   ;;  %v11587_v51 = vld [vmem:[%s15961_s4 + $0x4d0] sm:$0xff]  }
 0x336   :  { %v9536_v50 = vpop.f32.mrf.mxu1  ;;  %v9498_v45 = vadd.f32 %v9497_v11, %v9496_v8  ;;  %v10980_v59 = vld [vmem:[%s15965_s3 + $0x298] ss:$100 sps:$4 sm:$0xff]   ;;  %v11590_v8 = vld [vmem:[%s15961_s4 + $0x510] sm:$0xff]  }
 0x337   :  { %10050 = vmatpush3.bf16.msra.mxu1 %v11582_v60  ;;  %v15485_v61 = vadd.f32 %v9535_v15, %v5709_v35  ;;  %v9499_v55 = vpop.f32.mrf.mxu0  ;;  %7111 = vmatmul.mubr.bf16.gmra.mxu0 %v10971_v49  ;;  %v11589_v15 = vld [vmem:[%s15961_s4 + $0x490] sm:$0xff]  }
 0x338   :  { %v9537_v9 = vpop.f32.mrf.mxu1  ;;  %10051 = vmatprep.subr.bf16.mxu1 %v11584_v21  ;;  %v5712_v40 = vadd.f32 %v9498_v45, %v15338_v48  ;;  %10012 = vmatpush3.bf16.msra.mxu0 %v11585_v58  ;;  %v11588_v48 = vld [vmem:[%s15961_s4 + $0x550] sm:$0xff]  }
 0x339   :  { %v9538_v26 = vadd.f32 %v9537_v9, %v9536_v50  ;;  %v9500_v53 = vpop.f32.mrf.mxu0  ;;  %10013 = vmatprep.subr.bf16.mxu0 %v11587_v51  ;;  %7118 = vmatprep.mubr.bf16.mxu0 %v10979_v39  ;;  %v10985_v11 = vld [vmem:[%s15965_s3 + $0x4c] ss:$100 sps:$4 sm:$0xff]   ;;  %v10988_v9 = vld [vmem:[%s15965_s3 + $0x54] ss:$100 sps:$4 sm:$0xff]  }
 0x33a   :  { %v9539_v42 = vpop.f32.mrf.mxu1  ;;  %7176 = vmatmul.mubr.bf16.gmra.mxu1 %v10974_v0  ;;  %v9501_v17 = vadd.f32 %v9500_v53, %v9499_v55  ;;  %v11591_v0 = vld [vmem:[%s15961_s4 + $0x4c8] sm:$0xff]  }
 0x33b   :  { %10052 = vmatpush3.bf16.msra.mxu1 %v11586_v36  ;;  %v15506_v3 = vadd.f32 %v9538_v26, %v5712_v40  ;;  %7183 = vmatprep.mubr.bf16.mxu1 %v10982_v34  ;;  %v9502_v44 = vpop.f32.mrf.mxu0  ;;  %v11593_v26 = vld [vmem:[%s15961_s4 + $0x488] sm:$0xff]  }
 0x33c   :  { %v9540_v37 = vpop.f32.mrf.mxu1  ;;  %10053 = vmatprep.subr.bf16.mxu1 %v11588_v48  ;;  %v5717_v24 = vadd.f32 %v9501_v17, %v15359_v2  ;;  %10014 = vmatpush3.bf16.msra.mxu0 %v11589_v15  ;;  %v11592_v2 = vld [vmem:[%s15961_s4 + $0x548] sm:$0xff]   ;;  %v10986_v48 = vld [vmem:[%s15965_s3 + $0x50] ss:$100 sps:$4 sm:$0xff]  }
 0x33d   :  { %v9541_v46 = vadd.f32 %v9540_v37, %v9539_v42  ;;  %v9503_v50 = vpop.f32.mrf.mxu0  ;;  %10015 = vmatprep.subr.bf16.mxu0 %v11591_v0  ;;  %v11594_v39 = vld [vmem:[%s15961_s4 + $0x508] sm:$0xff]   ;;  %v11595_v42 = vld [vmem:[%s15961_s4 + $0x4c0] sm:$0xff]  }
 0x33e   :  { %v9542_v52 = vpop.f32.mrf.mxu1  ;;  %v9504_v23 = vadd.f32 %v9503_v50, %v9502_v44  ;;  %v10983_v51 = vld [vmem:[%s15965_s3 + $0x48] ss:$100 sps:$4 sm:$0xff]   ;;  %v11598_v44 = vld [vmem:[%s15961_s4 + $0x500] sm:$0xff]  }
 0x33f   :  { %10054 = vmatpush3.bf16.msra.mxu1 %v11590_v8  ;;  %v15527_v35 = vadd.f32 %v9541_v46, %v5717_v24  ;;  %v9505_v28 = vpop.f32.mrf.mxu0  ;;  %7119 = vmatmul.mubr.bf16.gmra.mxu0 %v10977_v16  ;;  %v11597_v46 = vld [vmem:[%s15961_s4 + $0x480] sm:$0xff]   ;;  %v10991_v24 = vld [vmem:[%s15965_s3 + $0x114] ss:$100 sps:$4 sm:$0xff]  }
 0x340   :  { %v9543_v49 = vpop.f32.mrf.mxu1  ;;  %10055 = vmatprep.subr.bf16.mxu1 %v11592_v2  ;;  %v5720_v45 = vadd.f32 %v9504_v23, %v15380_v38  ;;  %10016 = vmatpush3.bf16.msra.mxu0 %v11593_v26  ;;  %v11596_v38 = vld [vmem:[%s15961_s4 + $0x540] sm:$0xff]  }
 0x341   :  { %v9544_v60 = vadd.f32 %v9543_v49, %v9542_v52  ;;  %v9506_v34 = vpop.f32.mrf.mxu0  ;;  %10017 = vmatprep.subr.bf16.mxu0 %v11595_v42  ;;  %7224 = vmatprep.mubr.bf16.mxu0 %v10985_v11  ;;  %v10994_v49 = vld [vmem:[%s15965_s3 + $0x11c] ss:$100 sps:$4 sm:$0xff]  }
 0x342   :  { %v9545_v21 = vpop.f32.mrf.mxu1  ;;  %7184 = vmatmul.mubr.bf16.gmra.mxu1 %v10980_v59  ;;  %v9507_v58 = vadd.f32 %v9506_v34, %v9505_v28  ;;  %v11599_v59 = vld [vmem:[%s15961_s4 + $0x5f8] sm:$0xff]   ;;  %v11602_v28 = vld [vmem:[%s15961_s4 + $0x5f0] sm:$0xff]  }
 0x343   :  { %10056 = vmatpush3.bf16.msra.mxu1 %v11594_v39  ;;  %v15548_v40 = vadd.f32 %v9544_v60, %v5720_v45  ;;  %7289 = vmatprep.mubr.bf16.mxu1 %v10988_v9  ;;  %v9508_v53 = vpop.f32.mrf.mxu0  ;;  %v11601_v60 = vld [vmem:[%s15961_s4 + $0x5b8] sm:$0xff]  }
 0x344   :  { %v9546_v55 = vpop.f32.mrf.mxu1  ;;  %10057 = vmatprep.subr.bf16.mxu1 %v11596_v38  ;;  %v5725_v17 = vadd.f32 %v9507_v58, %v15401_v5  ;;  %10018 = vmatpush3.bf16.msra.mxu0 %v11597_v46  ;;  %v11600_v5 = vld [vmem:[%s15961_s4 + $0x638] sm:$0xff]   ;;  %v11604_v58 = vld [vmem:[%s15961_s4 + $0x5b0] sm:$0xff]   ;;  %v11000_v46 = vld [vmem:[%s15965_s3 + $0x1e4] ss:$100 sps:$4 sm:$0xff]  }
 0x345   :  { %v9547_v36 = vadd.f32 %v9546_v55, %v9545_v21  ;;  %v9509_v52 = vpop.f32.mrf.mxu0  ;;  %10083 = vmatprep.subr.bf16.mxu0 %v11599_v59  ;;  %v10989_v55 = vld [vmem:[%s15965_s3 + $0x110] ss:$100 sps:$4 sm:$0xff]   ;;  %v10992_v42 = vld [vmem:[%s15965_s3 + $0x118] ss:$100 sps:$4 sm:$0xff]  }
 0x346   :  { %v9548_v37 = vpop.f32.mrf.mxu1  ;;  %v9510_v8 = vadd.f32 %v9509_v52, %v9508_v53 }
 0x347   :  { %10058 = vmatpush3.bf16.msra.mxu1 %v11598_v44  ;;  %v15572_v15 = vadd.f32 %v9547_v36, %v5725_v17  ;;  %v9567_v0 = vpop.f32.mrf.mxu0  ;;  %7225 = vmatmul.mubr.bf16.vlgmr.msra.gmra.mxu0 %v10983_v51  ;;  %v11606_v51 = vld [vmem:[%s15961_s4 + $0x628] sm:$0xff]  }
 0x348   :  { %v9549_v16 = vpop.f32.mrf.mxu1  ;;  %10207 = vmatprep.subr.bf16.mxu1 %v11600_v5  ;;  %v5728_v23 = vadd.f32 %v9510_v8, %v15422_v20  ;;  %10084 = vmatpush3.bf16.msra.mxu0 %v11601_v60  ;;  %v11603_v20 = vld [vmem:[%s15961_s4 + $0x630] sm:$0xff]  }
 0x349   :  { %v9550_v50 = vadd.f32 %v9549_v16, %v9548_v37  ;;  %v9568_v11 = vpop.f32.mrf.mxu0  ;;  %10085 = vmatprep.subr.bf16.mxu0 %v11602_v28  ;;  %7232 = vmatprep.mubr.bf16.mxu0 %v10991_v24  ;;  %v11605_v37 = vld [vmem:[%s15961_s4 + $0x5e8] sm:$0xff]  }
 0x34a   :  { %v9607_v2 = vpop.f32.mrf.mxu1  ;;  %7290 = vmatmul.mubr.bf16.vlgmr.msra.gmra.mxu1 %v10986_v48  ;;  %v9569_v45 = vadd.f32 %v9568_v11, %v9567_v0  ;;  %v10995_v11 = vld [vmem:[%s15965_s3 + $0x1d8] ss:$100 sps:$4 sm:$0xff]  }
 0x34b   :  { %10208 = vmatpush3.bf16.msra.mxu1 %v11600_v5  ;;  %v15584_v21 = vadd.f32 %v9550_v50, %v5728_v23  ;;  %7297 = vmatprep.mubr.bf16.mxu1 %v10994_v49  ;;  %v9570_v39 = vpop.f32.mrf.mxu0  ;;  %v11607_v5 = vld [vmem:[%s15961_s4 + $0x5a8] sm:$0xff]   ;;  %v11608_v50 = vld [vmem:[%s15961_s4 + $0x5e0] sm:$0xff]  }
 0x34c   :  { %v9608_v9 = vpop.f32.mrf.mxu1  ;;  %10209 = vmatprep.subr.bf16.mxu1 %v11603_v20  ;;  %v5831_v38 = vadd.f32 %v9569_v45, %v15443_v47  ;;  %10086 = vmatpush3.bf16.msra.mxu0 %v11604_v58  ;;  %v10997_v47 = vld [vmem:[%s15965_s3 + $0x1dc] ss:$100 sps:$4 sm:$0xff]  }
 0x34d   :  { %v9609_v26 = vadd.f32 %v9608_v9, %v9607_v2  ;;  %v9571_v36 = vpop.f32.mrf.mxu0  ;;  %10087 = vmatprep.subr.bf16.mxu0 %v11605_v37  ;;  %v10998_v9 = vld [vmem:[%s15965_s3 + $0x1e0] ss:$100 sps:$4 sm:$0xff]  }
 0x34e   :  { %v9610_v34 = vpop.f32.mrf.mxu1  ;;  %v9572_v48 = vadd.f32 %v9571_v36, %v9570_v39  ;;  %v11610_v45 = vld [vmem:[%s15961_s4 + $0x5a0] sm:$0xff]   ;;  %v11611_v39 = vld [vmem:[%s15961_s4 + $0x5d8] sm:$0xff]  }
 0x34f   :  { %10210 = vmatpush3.bf16.msra.mxu1 %v11603_v20  ;;  %v15611_v44 = vadd.f32 %v9609_v26, %v5831_v38  ;;  %v9573_v52 = vpop.f32.mrf.mxu0  ;;  %7233 = vmatmul.mubr.bf16.gmra.mxu0 %v10989_v55  ;;  %v11006_v38 = vld [vmem:[%s15965_s3 + $0x2ac] ss:$100 sps:$4 sm:$0xff]  }
 0x350   :  { %v9611_v53 = vpop.f32.mrf.mxu1  ;;  %10211 = vmatprep.subr.bf16.mxu1 %v11606_v51  ;;  %v5834_v59 = vadd.f32 %v9572_v48, %v15464_v29  ;;  %10088 = vmatpush3.bf16.msra.mxu0 %v11607_v5  ;;  %v11609_v29 = vld [vmem:[%s15961_s4 + $0x620] sm:$0xff]  }
 0x351   :  { %v9612_v17 = vadd.f32 %v9611_v53, %v9610_v34  ;;  %v9574_v24 = vpop.f32.mrf.mxu0  ;;  %10089 = vmatprep.subr.bf16.mxu0 %v11608_v50  ;;  %7240 = vmatprep.mubr.bf16.mxu0 %v10997_v47  ;;  %v11612_v34 = vld [vmem:[%s15961_s4 + $0x618] sm:$0xff]  }
 0x352   :  { %v9613_v16 = vpop.f32.mrf.mxu1  ;;  %7298 = vmatmul.mubr.bf16.gmra.mxu1 %v10992_v42  ;;  %v9575_v49 = vadd.f32 %v9574_v24, %v9573_v52  ;;  %v11001_v24 = vld [vmem:[%s15965_s3 + $0x2a0] ss:$100 sps:$4 sm:$0xff]  }
 0x353   :  { %10212 = vmatpush3.bf16.msra.mxu1 %v11606_v51  ;;  %7305 = vmatprep.mubr.bf16.mxu1 %v11000_v46  ;;  %v15623_v2 = vadd.f32 %v9612_v17, %v5834_v59  ;;  %v9576_v23 = vpop.f32.mrf.mxu0  ;;  %v11613_v51 = vld [vmem:[%s15961_s4 + $0x598] sm:$0xff]   ;;  %v11614_v17 = vld [vmem:[%s15961_s4 + $0x5d0] sm:$0xff]  }
 0x354   :  { %v9614_v8 = vpop.f32.mrf.mxu1  ;;  %10213 = vmatprep.subr.bf16.mxu1 %v11609_v29  ;;  %v5839_v28 = vadd.f32 %v9575_v49, %v15485_v61  ;;  %10090 = vmatpush3.bf16.msra.mxu0 %v11610_v45  ;;  %v11003_v61 = vld [vmem:[%s15965_s3 + $0x2a4] ss:$100 sps:$4 sm:$0xff]   ;;  %v11616_v49 = vld [vmem:[%s15961_s4 + $0x590] sm:$0xff]  }
 0x355   :  { %v9615_v0 = vadd.f32 %v9614_v8, %v9613_v16  ;;  %v9577_v26 = vpop.f32.mrf.mxu0  ;;  %10091 = vmatprep.subr.bf16.mxu0 %v11611_v39  ;;  %v11004_v8 = vld [vmem:[%s15965_s3 + $0x2a8] ss:$100 sps:$4 sm:$0xff]  }
 0x356   :  { %v9616_v60 = vpop.f32.mrf.mxu1  ;;  %v9578_v55 = vadd.f32 %v9577_v26, %v9576_v23  ;;  %v11617_v23 = vld [vmem:[%s15961_s4 + $0x5c8] sm:$0xff]  }
 0x357   :  { %10214 = vmatpush3.bf16.msra.mxu1 %v11609_v29  ;;  %v15647_v58 = vadd.f32 %v9615_v0, %v5839_v28  ;;  %v9579_v36 = vpop.f32.mrf.mxu0  ;;  %7241 = vmatmul.mubr.bf16.gmra.mxu0 %v10995_v11  ;;  %v11010_v28 = vld [vmem:[%s15965_s3 + $0x60] ss:$100 sps:$4 sm:$0xff]  }
 0x358   :  { %v9617_v20 = vpop.f32.mrf.mxu1  ;;  %10215 = vmatprep.subr.bf16.mxu1 %v11612_v34  ;;  %v5842_v37 = vadd.f32 %v9578_v55, %v15506_v3  ;;  %10092 = vmatpush3.bf16.msra.mxu0 %v11613_v51  ;;  %v11615_v3 = vld [vmem:[%s15961_s4 + $0x610] sm:$0xff]  }
 0x359   :  { %v9618_v42 = vadd.f32 %v9617_v20, %v9616_v60  ;;  %v9580_v47 = vpop.f32.mrf.mxu0  ;;  %10093 = vmatprep.subr.bf16.mxu0 %v11614_v17  ;;  %7248 = vmatprep.mubr.bf16.mxu0 %v11003_v61  ;;  %v11618_v60 = vld [vmem:[%s15961_s4 + $0x608] sm:$0xff]  }
 0x35a   :  { %v9619_v53 = vpop.f32.mrf.mxu1  ;;  %7306 = vmatmul.mubr.bf16.gmra.mxu1 %v10998_v9  ;;  %v9581_v46 = vadd.f32 %v9580_v47, %v9579_v36  ;;  %v11007_v47 = vld [vmem:[%s15965_s3 + $0x58] ss:$100 sps:$4 sm:$0xff]  }
 0x35b   :  { %10216 = vmatpush3.bf16.msra.mxu1 %v11612_v34  ;;  %7313 = vmatprep.mubr.bf16.mxu1 %v11006_v38  ;;  %v15659_v16 = vadd.f32 %v9618_v42, %v5842_v37  ;;  %v9582_v59 = vpop.f32.mrf.mxu0  ;;  %v11619_v34 = vld [vmem:[%s15961_s4 + $0x588] sm:$0xff]   ;;  %v11620_v42 = vld [vmem:[%s15961_s4 + $0x5c0] sm:$0xff]  }
 0x35c   :  { %v9620_v48 = vpop.f32.mrf.mxu1  ;;  %10217 = vmatprep.subr.bf16.mxu1 %v11615_v3  ;;  %v5847_v50 = vadd.f32 %v9581_v46, %v15527_v35  ;;  %10094 = vmatpush3.bf16.msra.mxu0 %v11616_v49  ;;  %v11009_v35 = vld [vmem:[%s15965_s3 + $0x5c] ss:$100 sps:$4 sm:$0xff]  }
 0x35d   :  { %v9621_v52 = vadd.f32 %v9620_v48, %v9619_v53  ;;  %v9583_v0 = vpop.f32.mrf.mxu0  ;;  %10095 = vmatprep.subr.bf16.mxu0 %v11617_v23  ;;  %v11011_v48 = vld [vmem:[%s15965_s3 + $0x128] ss:$100 sps:$4 sm:$0xff]   ;;  %v11622_v46 = vld [vmem:[%s15961_s4 + $0x580] sm:$0xff]  }
 0x35e   :  { %v9622_v5 = vpop.f32.mrf.mxu1  ;;  %v9584_v11 = vadd.f32 %v9583_v0, %v9582_v59 }
 0x35f   :  { %10218 = vmatpush3.bf16.msra.mxu1 %v11615_v3  ;;  %v15683_v45 = vadd.f32 %v9621_v52, %v5847_v50  ;;  %v9585_v26 = vpop.f32.mrf.mxu0  ;;  %7249 = vmatmul.mubr.bf16.gmra.mxu0 %v11001_v24  ;;  %v11014_v52 = vld [vmem:[%s15965_s3 + $0x124] ss:$100 sps:$4 sm:$0xff]   ;;  %v11018_v3 = vld [vmem:[%s15965_s3 + $0x1f0] ss:$100 sps:$4 sm:$0xff]  }
 0x360   :  { %v9623_v29 = vpop.f32.mrf.mxu1  ;;  %10219 = vmatprep.subr.bf16.mxu1 %v11618_v60  ;;  %v5850_v39 = vadd.f32 %v9584_v11, %v15548_v40  ;;  %10096 = vmatpush3.bf16.msra.mxu0 %v11619_v34  ;;  %v11621_v40 = vld [vmem:[%s15961_s4 + $0x600] sm:$0xff]  }
 0x361   :  { %v9624_v9 = vadd.f32 %v9623_v29, %v9622_v5  ;;  %v9586_v61 = vpop.f32.mrf.mxu0  ;;  %10097 = vmatprep.subr.bf16.mxu0 %v11620_v42  ;;  %7354 = vmatprep.mubr.bf16.mxu0 %v11009_v35 }
 0x362   :  { %v9625_v20 = vpop.f32.mrf.mxu1  ;;  %7314 = vmatmul.mubr.bf16.gmra.mxu1 %v11004_v8  ;;  %v9587_v38 = vadd.f32 %v9586_v61, %v9585_v26 }
 0x363   :  { %10220 = vmatpush3.bf16.msra.mxu1 %v11618_v60  ;;  %10223 = vmatprep.mubr.bf16.mxu1 %v11010_v28  ;;  %v15695_v53 = vadd.f32 %v9624_v9, %v5850_v39  ;;  %v9588_v37 = vpop.f32.mrf.mxu0 }
 0x364   :  { %v9626_v55 = vpop.f32.mrf.mxu1  ;;  %10221 = vmatprep.subr.bf16.mxu1 %v11621_v40  ;;  %v5855_v17 = vadd.f32 %v9587_v38, %v15572_v15  ;;  %10098 = vmatpush3.bf16.msra.mxu0 %v11622_v46 }
 0x365   :  { %v9627_v36 = vadd.f32 %v9626_v55, %v9625_v20  ;;  %v9589_v59 = vpop.f32.mrf.mxu0 }
 0x366   :  { %v9628_v51 = vpop.f32.mrf.mxu1  ;;  %v9590_v24 = vadd.f32 %v9589_v59, %v9588_v37 }
 0x367   :  { %10222 = vmatpush3.bf16.msra.mxu1 %v11621_v40  ;;  %v5920_v50 = vadd.f32 %v9627_v36, %v5855_v17  ;;  %v10201_v15 = vpop.f32.mrf.mxu0  ;;  %7355 = vmatmul.mubr.bf16.vlgmr.msra.gmra.mxu0 %v11007_v47 }
 0x368   :  { %v9629_v5 = vpop.f32.mrf.mxu1  ;;  %v5858_v0 = vadd.f32 %v9590_v24, %v15584_v21  ;;  %v5969_v29 = vadd.f32 %v10201_v15, %v15647_v58  ;;  %7362 = vmatprep.mubr.bf16.mxu0 %v11014_v52  ;;  %v11012_v21 = vld [vmem:[%s15965_s3 + $0x120] ss:$100 sps:$4 sm:$0xff]   ;;  %v11019_v58 = vld [vmem:[%s15965_s3 + $0x2b8] ss:$100 sps:$4 sm:$0xff]  }
 0x369   :  { %v9630_v8 = vadd.f32 %v9629_v5, %v9628_v51  ;;  %v5960_v23 = vpop.f32.mrf.mxu0 }
 0x36a   :  { %v9659_v49 = vpop.f32.mrf.mxu1  ;;  %10224 = vmatmul.mubr.bf16.vlgmr.msra.gmra.mxu1 %v11011_v48  ;;  %v15718_v35 = vmax.f32 %v4532_v63, %v5969_v29  ;;  %v5961_v11 = vadd.f32 %v5960_v23, %v15611_v44  ;;  %v11017_v63 = vld [vmem:[%s15965_s3 + $0x1ec] ss:$100 sps:$4 sm:$0xff]  }
 0x36b   :  { %10227 = vmatprep.mubr.bf16.mxu1 %v11018_v3  ;;  %v5923_v28 = vadd.f32 %v9630_v8, %v5858_v0  ;;  %v10202_v26 = vpop.f32.mrf.mxu0 }
 0x36c   :  { %v9660_v60 = vpop.f32.mrf.mxu1  ;;  %15968 = vst [vmem:[#allocation2_spill] sm:$0xff] %v15718_v35  ;;  %v15730_v57 = vmax.f32 %v4530_v25, %v5961_v11  ;;  %v5972_v56 = vadd.f32 %v10202_v26, %v15659_v16 }
 0x36d   :  { %v9661_v9 = vadd.f32 %v9660_v60, %v9659_v49  ;;  %v5963_v44 = vpop.f32.mrf.mxu0 }
 0x36e   :  { %v9662_v20 = vpop.f32.mrf.mxu1  ;;  %v15739_v34 = vmax.f32 %v4533_v30, %v5972_v56  ;;  %v5964_v61 = vadd.f32 %v5963_v44, %v15623_v2 }
 0x36f   :  { %v10205_v42 = vpop.f32.mrf.mxu0  ;;  %7363 = vmatmul.mubr.bf16.gmra.mxu0 %v11012_v21 }
 0x370   :  { %v9663_v39 = vpop.f32.mrf.mxu1  ;;  %15969 = vst [vmem:[#allocation3_spill] sm:$0xff] %v15739_v34  ;;  %v15745_v43 = vmax.f32 %v4531_v33, %v5964_v61  ;;  %v5985_v25 = vadd.f32 %v10205_v42, %v5920_v50  ;;  %7370 = vmatprep.mubr.bf16.mxu0 %v11017_v63 }
 0x371   :  { %v9664_v55 = vadd.f32 %v9663_v39, %v9662_v20  ;;  %v5976_v16 = vpop.f32.mrf.mxu0 }
 0x372   :  { %v9665_v1 = vpop.f32.mrf.mxu1  ;;  %10228 = vmatmul.mubr.bf16.gmra.mxu1 %v11019_v58  ;;  %v15750_v7 = vmax.f32 %v4536_v54, %v5985_v25  ;;  %v5977_v12 = vadd.f32 %v5976_v16, %v15683_v45 }
 0x373   :  { %v10206_v2 = vpop.f32.mrf.mxu0 }
 0x374   :  { %v9666_v38 = vpop.f32.mrf.mxu1  ;;  %15970 = vst [vmem:[#allocation4_spill] sm:$0xff] %v15750_v7  ;;  %v15759_v19 = vmax.f32 %v4534_v14, %v5977_v12  ;;  %v5988_v33 = vadd.f32 %v10206_v2, %v5923_v28 }
 0x375   :  { %v9667_v30 = vadd.f32 %v9666_v38, %v9665_v1  ;;  %v5979_v62 = vpop.f32.mrf.mxu0 }
 0x376   :  { %v9668_v36 = vpop.f32.mrf.mxu1  ;;  %15971 = vst [vmem:[#allocation5_spill] sm:$0xff] %v15759_v19  ;;  %v15767_v45 = vmax.f32 %v4537_v10, %v5988_v33  ;;  %v5980_v40 = vadd.f32 %v5979_v62, %v15695_v53 }
 0x377   :  { %7371 = vmatmul.mubr.bf16.gmra.mxu0 %v11015_v13 }
 0x378   :  { %v9669_v54 = vpop.f32.mrf.mxu1  ;;  %15972 = vst [vmem:[#allocation6_spill] sm:$0xff] %v15767_v45  ;;  %v15773_v27 = vmax.f32 %v4535_v4, %v5980_v40  ;;  %7378 = vmatprep.mubr.bf16.mxu0 %v11022_v18 }
 0x379   :  { %v9670_v37 = vadd.f32 %v9669_v54, %v9668_v36 }
 0x37a   :  { %v9671_v51 = vpop.f32.mrf.mxu1  ;;  %15973 = vst [vmem:[#allocation7_spill] sm:$0xff] %v15773_v27 }
 0x37c   :  { %v9672_v22 = vpop.f32.mrf.mxu1 }
 0x37d   :  { %v9673_v14 = vadd.f32 %v9672_v22, %v9671_v51 }
 0x37e   :  { %v9674_v47 = vpop.f32.mrf.mxu1 }
 0x37f   :  { %7379 = vmatmul.mubr.bf16.gmra.mxu0 %v11020_v31 }
 0x380   :  { %v9675_v6 = vpop.f32.mrf.mxu1 }
 0x381   :  { %v9676_v10 = vadd.f32 %v9675_v6, %v9674_v47 }
 0x382   :  { %v9677_v53 = vpop.f32.mrf.mxu1 }
 0x384   :  { %v9678_v48 = vpop.f32.mrf.mxu1 }
 0x385   :  { %v9679_v17 = vadd.f32 %v9678_v48, %v9677_v53 }
 0x386   :  { %v9680_v46 = vpop.f32.mrf.mxu1 }
 0x387   :  { %v9699_v32 = vpop.f32.mrf.mxu0 }
 0x388   :  { %v9681_v52 = vpop.f32.mrf.mxu1 }
 0x389   :  { %v15778_v3 = vadd.f32 %v9681_v52, %v9680_v46  ;;  %v9700_v4 = vpop.f32.mrf.mxu0 }
 0x38a   :  { %v9739_v41 = vpop.f32.mrf.mxu1  ;;  %v9701_v5 = vadd.f32 %v9700_v4, %v9699_v32 }
 0x38b   :  { %v9702_v8 = vpop.f32.mrf.mxu0 }
 0x38c   :  { %v9740_v59 = vpop.f32.mrf.mxu1  ;;  %v6707_v15 = vadd.f32 %v9701_v5, %v9661_v9 }
 0x38d   :  { %v9741_v24 = vadd.f32 %v9740_v59, %v9739_v41  ;;  %v9703_v49 = vpop.f32.mrf.mxu0 }
 0x38e   :  { %v9742_v50 = vpop.f32.mrf.mxu1  ;;  %v9704_v23 = vadd.f32 %v9703_v49, %v9702_v8 }
 0x38f   :  { %v6772_v29 = vadd.f32 %v9741_v24, %v6707_v15  ;;  %v9705_v11 = vpop.f32.mrf.mxu0 }
 0x390   :  { %v9743_v0 = vpop.f32.mrf.mxu1  ;;  %v6710_v26 = vadd.f32 %v9704_v23, %v9664_v55 }
 0x391   :  { %v9744_v60 = vadd.f32 %v9743_v0, %v9742_v50  ;;  %v9706_v20 = vpop.f32.mrf.mxu0 }
 0x392   :  { %v9745_v28 = vpop.f32.mrf.mxu1  ;;  %v9707_v56 = vadd.f32 %v9706_v20, %v9705_v11 }
 0x393   :  { %v6775_v58 = vadd.f32 %v9744_v60, %v6710_v26  ;;  %v9708_v44 = vpop.f32.mrf.mxu0 }
 0x394   :  { %v9746_v21 = vpop.f32.mrf.mxu1  ;;  %v6715_v61 = vadd.f32 %v9707_v56, %v9667_v30 }
 0x395   :  { %v9747_v63 = vadd.f32 %v9746_v21, %v9745_v28  ;;  %v9709_v42 = vpop.f32.mrf.mxu0 }
 0x396   :  { %v9748_v39 = vpop.f32.mrf.mxu1  ;;  %v9710_v9 = vadd.f32 %v9709_v42, %v9708_v44 }
 0x397   :  { %v6780_v25 = vadd.f32 %v9747_v63, %v6715_v61  ;;  %v9711_v38 = vpop.f32.mrf.mxu0 }
 0x398   :  { %v9749_v1 = vpop.f32.mrf.mxu1  ;;  %v6718_v2 = vadd.f32 %v9710_v9, %v9670_v37 }
 0x399   :  { %v9750_v16 = vadd.f32 %v9749_v1, %v9748_v39  ;;  %v9712_v36 = vpop.f32.mrf.mxu0 }
 0x39a   :  { %v9751_v12 = vpop.f32.mrf.mxu1  ;;  %v9713_v55 = vadd.f32 %v9712_v36, %v9711_v38 }
 0x39b   :  { %v6783_v33 = vadd.f32 %v9750_v16, %v6718_v2  ;;  %v9714_v62 = vpop.f32.mrf.mxu0 }
 0x39c   :  { %v9752_v13 = vpop.f32.mrf.mxu1  ;;  %v6723_v40 = vadd.f32 %v9713_v55, %v9673_v14 }
 0x39d   :  { %v9753_v18 = vadd.f32 %v9752_v13, %v9751_v12  ;;  %v9715_v51 = vpop.f32.mrf.mxu0 }
 0x39e   :  { %v9754_v54 = vpop.f32.mrf.mxu1  ;;  %v9716_v30 = vadd.f32 %v9715_v51, %v9714_v62 }
 0x39f   :  { %v6788_v47 = vadd.f32 %v9753_v18, %v6723_v40  ;;  %v9717_v6 = vpop.f32.mrf.mxu0 }
 0x3a0   :  { %v9755_v22 = vpop.f32.mrf.mxu1  ;;  %v6726_v48 = vadd.f32 %v9716_v30, %v9676_v10 }
 0x3a1   :  { %v9756_v31 = vadd.f32 %v9755_v22, %v9754_v54  ;;  %v9718_v46 = vpop.f32.mrf.mxu0 }
 0x3a2   :  { %v9757_v53 = vpop.f32.mrf.mxu1  ;;  %v9719_v37 = vadd.f32 %v9718_v46, %v9717_v6 }
 0x3a3   :  { %v6791_v32 = vadd.f32 %v9756_v31, %v6726_v48  ;;  %v9720_v4 = vpop.f32.mrf.mxu0 }
 0x3a4   :  { %v9758_v52 = vpop.f32.mrf.mxu1  ;;  %v6731_v5 = vadd.f32 %v9719_v37, %v9679_v17 }
 0x3a5   :  { %v9759_v41 = vadd.f32 %v9758_v52, %v9757_v53  ;;  %v9721_v24 = vpop.f32.mrf.mxu0 }
 0x3a6   :  { %v9760_v59 = vpop.f32.mrf.mxu1  ;;  %v9722_v14 = vadd.f32 %v9721_v24, %v9720_v4 }
 0x3a7   :  { %v6796_v50 = vadd.f32 %v9759_v41, %v6731_v5  ;;  %v9779_v49 = vpop.f32.mrf.mxu0 }
 0x3a8   :  { %v9761_v8 = vpop.f32.mrf.mxu1  ;;  %v6734_v23 = vadd.f32 %v9722_v14, %v15778_v3 }
 0x3a9   :  { %v9762_v15 = vadd.f32 %v9761_v8, %v9760_v59  ;;  %v9780_v60 = vpop.f32.mrf.mxu0 }
 0x3aa   :  { %v9819_v0 = vpop.f32.mrf.mxu1  ;;  %v9781_v28 = vadd.f32 %v9780_v60, %v9779_v49 }
 0x3ab   :  { %v6799_v10 = vadd.f32 %v9762_v15, %v6734_v23  ;;  %v9782_v20 = vpop.f32.mrf.mxu0 }
 0x3ac   :  { %v9820_v11 = vpop.f32.mrf.mxu1  ;;  %v6837_v56 = vadd.f32 %v9781_v28, %v6772_v29 }
 0x3ad   :  { %v9821_v26 = vadd.f32 %v9820_v11, %v9819_v0  ;;  %v9783_v63 = vpop.f32.mrf.mxu0 }
 0x3ae   :  { %v9822_v21 = vpop.f32.mrf.mxu1  ;;  %v9784_v39 = vadd.f32 %v9783_v63, %v9782_v20 }
 0x3af   :  { %v6902_v17 = vadd.f32 %v9821_v26, %v6837_v56  ;;  %v9785_v42 = vpop.f32.mrf.mxu0 }
 0x3b0   :  { %v9823_v44 = vpop.f32.mrf.mxu1  ;;  %v6840_v9 = vadd.f32 %v9784_v39, %v6775_v58 }
 0x3b1   :  { %v9824_v61 = vadd.f32 %v9823_v44, %v9822_v21  ;;  %v9786_v16 = vpop.f32.mrf.mxu0 }
 0x3b2   :  { %v9825_v1 = vpop.f32.mrf.mxu1  ;;  %v9787_v3 = vadd.f32 %v9786_v16, %v9785_v42 }
 0x3b3   :  { %v6905_v12 = vadd.f32 %v9824_v61, %v6840_v9  ;;  %v9788_v36 = vpop.f32.mrf.mxu0 }
 0x3b4   :  { %v9826_v38 = vpop.f32.mrf.mxu1  ;;  %v6845_v55 = vadd.f32 %v9787_v3, %v6780_v25 }
 0x3b5   :  { %v9827_v2 = vadd.f32 %v9826_v38, %v9825_v1  ;;  %v9789_v18 = vpop.f32.mrf.mxu0 }
 0x3b6   :  { %v9828_v13 = vpop.f32.mrf.mxu1  ;;  %v9790_v29 = vadd.f32 %v9789_v18, %v9788_v36 }
 0x3b7   :  { %v6910_v54 = vadd.f32 %v9827_v2, %v6845_v55  ;;  %v9791_v51 = vpop.f32.mrf.mxu0 }
 0x3b8   :  { %v9829_v62 = vpop.f32.mrf.mxu1  ;;  %v6848_v30 = vadd.f32 %v9790_v29, %v6783_v33 }
 0x3b9   :  { %v9830_v40 = vadd.f32 %v9829_v62, %v9828_v13  ;;  %v9792_v31 = vpop.f32.mrf.mxu0 }
 0x3ba   :  { %v9831_v22 = vpop.f32.mrf.mxu1  ;;  %v9793_v58 = vadd.f32 %v9792_v31, %v9791_v51 }
 0x3bb   :  { %v6913_v53 = vadd.f32 %v9830_v40, %v6848_v30  ;;  %v9794_v46 = vpop.f32.mrf.mxu0 }
 0x3bc   :  { %v9832_v6 = vpop.f32.mrf.mxu1  ;;  %v6853_v37 = vadd.f32 %v9793_v58, %v6788_v47 }
 0x3bd   :  { %v9833_v48 = vadd.f32 %v9832_v6, %v9831_v22  ;;  %v9795_v41 = vpop.f32.mrf.mxu0 }
 0x3be   :  { %v9834_v52 = vpop.f32.mrf.mxu1  ;;  %v9796_v25 = vadd.f32 %v9795_v41, %v9794_v46 }
 0x3bf   :  { %v6918_v59 = vadd.f32 %v9833_v48, %v6853_v37  ;;  %v9797_v24 = vpop.f32.mrf.mxu0 }
 0x3c0   :  { %v9835_v4 = vpop.f32.mrf.mxu1  ;;  %v6856_v14 = vadd.f32 %v9796_v25, %v6791_v32 }
 0x3c1   :  { %v9836_v5 = vadd.f32 %v9835_v4, %v9834_v52  ;;  %v9798_v15 = vpop.f32.mrf.mxu0 }
 0x3c2   :  { %v9837_v8 = vpop.f32.mrf.mxu1  ;;  %v9799_v33 = vadd.f32 %v9798_v15, %v9797_v24 }
 0x3c3   :  { %v6921_v0 = vadd.f32 %v9836_v5, %v6856_v14  ;;  %v9800_v60 = vpop.f32.mrf.mxu0 }
 0x3c4   :  { %v9838_v49 = vpop.f32.mrf.mxu1  ;;  %v6861_v28 = vadd.f32 %v9799_v33, %v6796_v50 }
 0x3c5   :  { %v9839_v23 = vadd.f32 %v9838_v49, %v9837_v8  ;;  %v9801_v26 = vpop.f32.mrf.mxu0 }
 0x3c6   :  { %v9840_v11 = vpop.f32.mrf.mxu1  ;;  %v9802_v47 = vadd.f32 %v9801_v26, %v9800_v60 }
 0x3c7   :  { %v6926_v21 = vadd.f32 %v9839_v23, %v6861_v28  ;;  %v9859_v63 = vpop.f32.mrf.mxu0 }
 0x3c8   :  { %v9841_v20 = vpop.f32.mrf.mxu1  ;;  %v6864_v39 = vadd.f32 %v9802_v47, %v6799_v10 }
 0x3c9   :  { %v9842_v56 = vadd.f32 %v9841_v20, %v9840_v11  ;;  %v9860_v61 = vpop.f32.mrf.mxu0 }
 0x3ca   :  { %v9899_v44 = vpop.f32.mrf.mxu1  ;;  %v9861_v32 = vadd.f32 %v9860_v61, %v9859_v63 }
 0x3cb   :  { %v6929_v1 = vadd.f32 %v9842_v56, %v6864_v39  ;;  %v9862_v16 = vpop.f32.mrf.mxu0 }
 0x3cc   :  { %v9900_v42 = vpop.f32.mrf.mxu1  ;;  %v6967_v3 = vadd.f32 %v9861_v32, %v6902_v17 }
 0x3cd   :  { %v9901_v9 = vadd.f32 %v9900_v42, %v9899_v44  ;;  %v9863_v2 = vpop.f32.mrf.mxu0 }
 0x3ce   :  { %v9902_v38 = vpop.f32.mrf.mxu1  ;;  %v9864_v50 = vadd.f32 %v9863_v2, %v9862_v16 }
 0x3cf   :  { %v15781_v13 = vadd.f32 %v9901_v9, %v6967_v3  ;;  %v9865_v18 = vpop.f32.mrf.mxu0 }
 0x3d0   :  { %v9903_v36 = vpop.f32.mrf.mxu1  ;;  %v6970_v29 = vadd.f32 %v9864_v50, %v6905_v12 }
 0x3d1   :  { %v9904_v55 = vadd.f32 %v9903_v36, %v9902_v38  ;;  %v9866_v40 = vpop.f32.mrf.mxu0 }
 0x3d2   :  { %v9905_v62 = vpop.f32.mrf.mxu1  ;;  %v9867_v22 = vadd.f32 %v9866_v40, %v9865_v18 }
 0x3d3   :  { %v15783_v10 = vadd.f32 %v9904_v55, %v6970_v29  ;;  %v9868_v31 = vpop.f32.mrf.mxu0 }
 0x3d4   :  { %v9906_v51 = vpop.f32.mrf.mxu1  ;;  %v6975_v58 = vadd.f32 %v9867_v22, %v6910_v54 }
 0x3d5   :  { %v9907_v30 = vadd.f32 %v9906_v51, %v9905_v62  ;;  %v9869_v48 = vpop.f32.mrf.mxu0 }
 0x3d6   :  { %v9908_v6 = vpop.f32.mrf.mxu1  ;;  %v9870_v52 = vadd.f32 %v9869_v48, %v9868_v31 }
 0x3d7   :  { %v15785_v46 = vadd.f32 %v9907_v30, %v6975_v58  ;;  %v9871_v41 = vpop.f32.mrf.mxu0 }
 0x3d8   :  { %v9909_v17 = vpop.f32.mrf.mxu1  ;;  %v6978_v25 = vadd.f32 %v9870_v52, %v6913_v53 }
 0x3d9   :  { %v9910_v37 = vadd.f32 %v9909_v17, %v9908_v6  ;;  %v9872_v5 = vpop.f32.mrf.mxu0 }
 0x3da   :  { %v9911_v4 = vpop.f32.mrf.mxu1  ;;  %v9873_v8 = vadd.f32 %v9872_v5, %v9871_v41 }
 0x3db   :  { %v15787_v24 = vadd.f32 %v9910_v37, %v6978_v25  ;;  %v9874_v15 = vpop.f32.mrf.mxu0 }
 0x3dc   :  { %v9912_v12 = vpop.f32.mrf.mxu1  ;;  %v6983_v33 = vadd.f32 %v9873_v8, %v6918_v59 }
 0x3dd   :  { %v9913_v14 = vadd.f32 %v9912_v12, %v9911_v4  ;;  %v9875_v23 = vpop.f32.mrf.mxu0 }
 0x3de   :  { %v9914_v49 = vpop.f32.mrf.mxu1  ;;  %v9876_v11 = vadd.f32 %v9875_v23, %v9874_v15 }
 0x3df   :  { %v15789_v60 = vadd.f32 %v9913_v14, %v6983_v33  ;;  %v9877_v26 = vpop.f32.mrf.mxu0 }
 0x3e0   :  { %v9915_v54 = vpop.f32.mrf.mxu1  ;;  %v6986_v47 = vadd.f32 %v9876_v11, %v6921_v0 }
 0x3e1   :  { %v9916_v28 = vadd.f32 %v9915_v54, %v9914_v49  ;;  %v9878_v56 = vpop.f32.mrf.mxu0 }
 0x3e2   :  { %v9917_v20 = vpop.f32.mrf.mxu1  ;;  %v9879_v44 = vadd.f32 %v9878_v56, %v9877_v26 }
 0x3e3   :  { %v15791_v63 = vadd.f32 %v9916_v28, %v6986_v47  ;;  %v9880_v61 = vpop.f32.mrf.mxu0 }
 0x3e4   :  { %v9918_v53 = vpop.f32.mrf.mxu1  ;;  %v6991_v32 = vadd.f32 %v9879_v44, %v6926_v21 }
 0x3e5   :  { %v9919_v39 = vadd.f32 %v9918_v53, %v9917_v20  ;;  %v9881_v9 = vpop.f32.mrf.mxu0 }
 0x3e6   :  { %v9920_v42 = vpop.f32.mrf.mxu1  ;;  %v9882_v38 = vadd.f32 %v9881_v9, %v9880_v61 }
 0x3e7   :  { %v15793_v16 = vadd.f32 %v9919_v39, %v6991_v32  ;;  %v9939_v2 = vpop.f32.mrf.mxu0 }
 0x3e8   :  { %v9921_v59 = vpop.f32.mrf.mxu1  ;;  %v6994_v50 = vadd.f32 %v9882_v38, %v6929_v1 }
 0x3e9   :  { %15974 = vst [vmem:[#allocation8_spill] sm:$0xff] %v15793_v16  ;;  %v9922_v3 = vadd.f32 %v9921_v59, %v9920_v42  ;;  %v9940_v55 = vpop.f32.mrf.mxu0 }
 0x3ea   :  { %v9979_v36 = vpop.f32.mrf.mxu1 }
 0x3eb   :  { %v15795_v18 = vadd.f32 %v9922_v3, %v6994_v50  ;;  %v9942_v62 = vpop.f32.mrf.mxu0 }
 0x3ec   :  { %v9980_v0 = vpop.f32.mrf.mxu1 }
 0x3ed   :  { %15975 = vst [vmem:[#allocation9_spill] sm:$0xff] %v15795_v18  ;;  %v9943_v40 = vpop.f32.mrf.mxu0  ;;  %v9981_v16 = vadd.f32 %v9980_v0, %v9979_v36 }
 0x3ee   :  { %v9982_v29 = vpop.f32.mrf.mxu1 }
 0x3ef   :  { %v9945_v22 = vpop.f32.mrf.mxu0 }
 0x3f0   :  { %v9983_v51 = vpop.f32.mrf.mxu1 }
 0x3f1   :  { %v9946_v21 = vpop.f32.mrf.mxu0 }
 0x3f2   :  { %v15797_v30 = vpop.f32.mrf.mxu1 }
 0x3f3   :  { %v15801_v6 = vpop.f32.mrf.mxu0 }
 0x3f4   :  { %v15799_v31 = vpop.f32.mrf.mxu1 }
 0x3f5   :  { %v15805_v48 = vpop.f32.mrf.mxu0 }
 0x3f6   :  { %v15803_v58 = vpop.f32.mrf.mxu1 }
 0x3f7   :  { %v15809_v17 = vpop.f32.mrf.mxu0 }
 0x3f8   :  { %v15807_v1 = vpop.f32.mrf.mxu1 }
 0x3f9   :  { %v15813_v37 = vpop.f32.mrf.mxu0 }
 0x3fa   :  { %v15811_v52 = vpop.f32.mrf.mxu1 }
 0x3fb   :  { %v15817_v4 = vpop.f32.mrf.mxu0 }
 0x3fc   :  { %v15815_v41 = vpop.f32.mrf.mxu1 }
 0x3fd   :  { %v15821_v5 = vpop.f32.mrf.mxu0 }
 0x3fe   :  { %v15819_v25 = vpop.f32.mrf.mxu1 }
 0x3ff   :  { %v15825_v8 = vpop.f32.mrf.mxu0 }
 0x400   :  { %v15823_v12 = vpop.f32.mrf.mxu1 }
 0x401   :  { %v15829_v15 = vpop.f32.mrf.mxu0 }
 0x402   :  { %v15827_v14 = vpop.f32.mrf.mxu1 }
 0x403   :  { %15976 = vst [vmem:[#allocation10_spill] sm:$0xff] %v15827_v14  ;;  %v15833_v33 = vpop.f32.mrf.mxu0 }
 0x404   :  { %v15831_v49 = vpop.f32.mrf.mxu1  ;;  %15978 = vst [vmem:[#allocation12_spill] sm:$0xff] %v15833_v33 }
 0x405   :  { %15977 = vst [vmem:[#allocation11_spill] sm:$0xff] %v15831_v49  ;;  %v15837_v54 = vpop.f32.mrf.mxu0 }
 0x406   :  { %v15835_v23 = vpop.f32.mrf.mxu1  ;;  %15980 = vst [vmem:[#allocation14_spill] sm:$0xff] %v15837_v54  ;;  %v9944_v54 = vadd.f32 %v9943_v40, %v9942_v62  ;;  %v9947_v40 = vadd.f32 %v9946_v21, %v9945_v22 }
 0x407   :  { %15979 = vst [vmem:[#allocation13_spill] sm:$0xff] %v15835_v23  ;;  %v10019_v28 = vpop.f32.mrf.mxu0  ;;  %v9941_v23 = vadd.f32 %v9940_v55, %v9939_v2  ;;  %v9984_v2 = vadd.f32 %v9983_v51, %v9982_v29  ;;  %v9987_v51 = vadd.f32 %v15799_v31, %v15797_v30 }
 0x408   :  { %v15839_v11 = vpop.f32.mrf.mxu1  ;;  %v7105_v29 = vadd.f32 %v9947_v40, %v15785_v46  ;;  %v9953_v46 = vadd.f32 %v15813_v37, %v15809_v17 }
 0x409   :  { %15981 = vst [vmem:[#allocation15_spill] sm:$0xff] %v15839_v11  ;;  %v10020_v20 = vpop.f32.mrf.mxu0  ;;  %v7097_v14 = vadd.f32 %v9941_v23, %v15781_v13  ;;  %v9950_v23 = vadd.f32 %v15805_v48, %v15801_v6 }
 0x40a   :  { %v10059_v26 = vpop.f32.mrf.mxu1 }
 0x40b   :  { %v10022_v56 = vpop.f32.mrf.mxu0  ;;  %v7162_v62 = vadd.f32 %v9981_v16, %v7097_v14 }
 0x40c   :  { %v10060_v47 = vpop.f32.mrf.mxu1 }
 0x40d   :  { %v10023_v44 = vpop.f32.mrf.mxu0  ;;  %v10061_v36 = vadd.f32 %v10060_v47, %v10059_v26  ;;  %v7170_v26 = vadd.f32 %v9987_v51, %v7105_v29 }
 0x40e   :  { %v10062_v53 = vpop.f32.mrf.mxu1 }
 0x40f   :  { %v10025_v61 = vpop.f32.mrf.mxu0 }
 0x410   :  { %v10063_v39 = vpop.f32.mrf.mxu1 }
 0x411   :  { %v10026_v32 = vpop.f32.mrf.mxu0  ;;  %v10064_v22 = vadd.f32 %v10063_v39, %v10062_v53 }
 0x412   :  { %v10065_v42 = vpop.f32.mrf.mxu1 }
 0x413   :  { %v10028_v59 = vpop.f32.mrf.mxu0 }
 0x414   :  { %v10066_v9 = vpop.f32.mrf.mxu1 }
 0x415   :  { %v10029_v3 = vpop.f32.mrf.mxu0 }
 0x416   :  { %v15841_v38 = vpop.f32.mrf.mxu1  ;;  %v10030_v31 = vadd.f32 %v10029_v3, %v10028_v59 }
 0x417   :  { %v15845_v45 = vpop.f32.mrf.mxu0 }
 0x418   :  { %v15843_v50 = vpop.f32.mrf.mxu1 }
 0x419   :  { %v15849_v27 = vpop.f32.mrf.mxu0 }
 0x41a   :  { %v15847_v7 = vpop.f32.mrf.mxu1 }
 0x41b   :  { %15982 = vst [vmem:[#allocation16_spill] sm:$0xff] %v15847_v7  ;;  %v15853_v34 = vpop.f32.mrf.mxu0 }
 0x41c   :  { %v15851_v19 = vpop.f32.mrf.mxu1  ;;  %15984 = vst [vmem:[#allocation18_spill] sm:$0xff] %v15853_v34  ;;  %v10021_v34 = vadd.f32 %v10020_v20, %v10019_v28  ;;  %v10027_v20 = vadd.f32 %v10026_v32, %v10025_v61 }
 0x41d   :  { %15983 = vst [vmem:[#allocation17_spill] sm:$0xff] %v15851_v19  ;;  %v15857_v18 = vpop.f32.mrf.mxu0 }
 0x41e   :  { %v15855_v11 = vpop.f32.mrf.mxu1  ;;  %15986 = vst [vmem:[#allocation20_spill] sm:$0xff] %v15857_v18  ;;  %v7227_v13 = vadd.f32 %v10021_v34, %v7162_v62  ;;  %v7108_v34 = vadd.f32 %v9950_v23, %v15787_v24  ;;  %v7235_v53 = vadd.f32 %v10027_v20, %v7170_v26  ;;  %v9956_v24 = vadd.f32 %v15821_v5, %v15817_v4  ;;  %v15995_v20 = vld [vmem:[#allocation10_spill] sm:$0xff] }
 0x41f   :  { %15985 = vst [vmem:[#allocation19_spill] sm:$0xff] %v15855_v11  ;;  %v15861_v33 = vpop.f32.mrf.mxu0  ;;  %v7100_v11 = vadd.f32 %v9944_v54, %v15783_v10  ;;  %v9993_v62 = vadd.f32 %v15815_v41, %v15811_v52  ;;  %v9959_v41 = vadd.f32 %v15829_v15, %v15825_v8 }
 0x420   :  { %v15859_v35 = vpop.f32.mrf.mxu1  ;;  %15988 = vst [vmem:[#allocation22_spill] sm:$0xff] %v15861_v33  ;;  %v10024_v33 = vadd.f32 %v10023_v44, %v10022_v56  ;;  %v7292_v54 = vadd.f32 %v10061_v36, %v7227_v13  ;;  %v10067_v44 = vadd.f32 %v10066_v9, %v10065_v42  ;;  %v10070_v42 = vadd.f32 %v15843_v50, %v15841_v38  ;;  %v15900_v9 = vld [vmem:[%s15966_s5] ss:$0 sm:$0xff] }
 0x421   :  { %15987 = vst [vmem:[#allocation21_spill] sm:$0xff] %v15859_v35  ;;  %v15866_v7 = vpop.f32.mrf.mxu0  ;;  %v7165_v0 = vadd.f32 %v9984_v2, %v7100_v11  ;;  %v9990_v11 = vadd.f32 %v15807_v1, %v15803_v58  ;;  %v7113_v1 = vadd.f32 %v9953_v46, %v15789_v60  ;;  %v10033_v60 = vadd.f32 %v15849_v27, %v15845_v45 }
 0x422   :  { %v15863_v49 = vpop.f32.mrf.mxu1  ;;  %v7300_v5 = vadd.f32 %v10067_v44, %v7235_v53  ;;  %v7116_v52 = vadd.f32 %v9956_v24, %v15791_v63  ;;  %v15990_v27 = vld [vmem:[#allocation16_spill] sm:$0xff] }
 0x423   :  { %15989 = vst [vmem:[#allocation23_spill] sm:$0xff] %v15863_v49  ;;  %v15871_v55 = vpop.f32.mrf.mxu0  ;;  %v7230_v16 = vadd.f32 %v10024_v33, %v7165_v0  ;;  %v7173_v32 = vadd.f32 %v9990_v11, %v7108_v34  ;;  %v7178_v13 = vadd.f32 %v9993_v62, %v7113_v1  ;;  %v15992_v63 = vld [vmem:[#allocation18_spill] sm:$0xff] }
 0x424   :  { %v15868_v19 = vpop.f32.mrf.mxu1  ;;  %v15998_v11 = vld [vmem:[#allocation14_spill] sm:$0xff] }
 0x425   :  { %v15875_v35 = vpop.f32.mrf.mxu0  ;;  %v7295_v30 = vadd.f32 %v10064_v22, %v7230_v16  ;;  %v7238_v59 = vadd.f32 %v10030_v31, %v7173_v32  ;;  %v15993_v51 = vld [vmem:[#allocation20_spill] sm:$0xff] }
 0x426   :  { %v15873_v18 = vpop.f32.mrf.mxu1  ;;  %v10036_v16 = vadd.f32 %v15993_v51, %v15992_v63  ;;  %v16000_v44 = vld [vmem:[#allocation19_spill] sm:$0xff] }
 0x427   :  { %v10099_v28 = vpop.f32.mrf.mxu0  ;;  %v7303_v45 = vadd.f32 %v10070_v42, %v7238_v59  ;;  %v16002_v32 = vld [vmem:[#allocation22_spill] sm:$0xff]  ;;  %v16003_v59 = vld [vmem:[#allocation9_spill] sm:$0xff] }
 0x428   :  { %v15877_v49 = vpop.f32.mrf.mxu1  ;;  %v10039_v24 = vadd.f32 %v15866_v7, %v16002_v32  ;;  %v16006_v7 = vld [vmem:[#allocation3_spill] sm:$0xff] }
 0x429   :  { %v10100_v21 = vpop.f32.mrf.mxu0 }
 0x42a   :  { %v10225_v10 = vpop.f32.mrf.mxu1  ;;  %v10101_v56 = vadd.f32 %v10100_v21, %v10099_v28  ;;  %v15991_v28 = vld [vmem:[#allocation17_spill] sm:$0xff] }
 0x42b   :  { %v10102_v6 = vpop.f32.mrf.mxu0  ;;  %v10073_v29 = vadd.f32 %v15991_v28, %v15990_v27 }
 0x42c   :  { %v7421_v14 = vpop.f32.mrf.mxu1  ;;  %v7357_v47 = vadd.f32 %v10101_v56, %v7292_v54  ;;  %v15996_v56 = vld [vmem:[#allocation11_spill] sm:$0xff] }
 0x42d   :  { %v10103_v33 = vpop.f32.mrf.mxu0  ;;  %v9999_v34 = vadd.f32 %v15996_v56, %v15995_v20 }
 0x42e   :  { %v10226_v48 = vpop.f32.mrf.mxu1  ;;  %v10104_v39 = vadd.f32 %v10103_v33, %v10102_v6  ;;  %v7422_v61 = vadd.f32 %v7421_v14, %v7357_v47  ;;  %v15994_v14 = vld [vmem:[#allocation8_spill] sm:$0xff] }
 0x42f   :  { %v10105_v2 = vpop.f32.mrf.mxu0  ;;  %v7121_v54 = vadd.f32 %v9959_v41, %v15994_v14 }
 0x430   :  { %v7424_v58 = vpop.f32.mrf.mxu1  ;;  %v7452_v17 = vmax.f32 %v15730_v57, %v7422_v61  ;;  %v7360_v37 = vadd.f32 %v10104_v39, %v7295_v30  ;;  %v9996_v57 = vadd.f32 %v15823_v12, %v15819_v25  ;;  %v7243_v12 = vadd.f32 %v10033_v60, %v7178_v13  ;;  %v15999_v30 = vld [vmem:[#allocation2_spill] sm:$0xff]  ;;  %v16001_v39 = vld [vmem:[#allocation21_spill] sm:$0xff]  ;;  %v16007_v13 = vld [vmem:[#allocation23_spill] sm:$0xff] }
 0x431   :  { %v10106_v4 = vpop.f32.mrf.mxu0  ;;  %v10076_v61 = vadd.f32 %v16001_v39, %v16000_v44 }
 0x432   :  { %v10107_v3 = vadd.f32 %v10106_v4, %v10105_v2  ;;  %v7425_v40 = vadd.f32 %v7424_v58, %v7360_v37  ;;  %v15909_v50 = vpop.f32.mrf.mxu1  ;;  %v7467_v36 = vadd.f32 %v15900_v9, %v7452_v17  ;;  %v7181_v21 = vadd.f32 %v9996_v57, %v7116_v52  ;;  %v16004_v4 = vld [vmem:[#allocation13_spill] sm:$0xff] }
 0x433   :  { %v10108_v38 = vpop.f32.mrf.mxu0  ;;  %v7308_v58 = vadd.f32 %v10073_v29, %v7243_v12  ;;  %v7186_v37 = vadd.f32 %v9999_v34, %v7121_v54  ;;  %v16008_v12 = vld [vmem:[#allocation5_spill] sm:$0xff] }
 0x434   :  { %v7365_v0 = vadd.f32 %v10107_v3, %v7300_v5  ;;  %v7453_v23 = vmax.f32 %v15745_v43, %v7425_v40  ;;  %v15997_v43 = vld [vmem:[#allocation12_spill] sm:$0xff]  ;;  %v7437_v46 = vpop.f32.mrf.mxu1  ;;  %v7475_v47 = vmax.f32 %v7467_v36, 0.0  ;;  %v16005_v5 = vld [vmem:[#allocation15_spill] sm:$0xff]  ;;  %v10079_v36 = vadd.f32 %v15868_v19, %v16007_v13 }
 0x435   :  { %v10109_v25 = vpop.f32.mrf.mxu0  ;;  %v9962_v6 = vadd.f32 %v15998_v11, %v15997_v43  ;;  %v10002_v60 = vadd.f32 %v16005_v5, %v16004_v4  ;;  %v10082_v19 = vadd.f32 %v15877_v49, %v15873_v18  ;;  %v16009_v43 = vld [vmem:[#allocation7_spill] sm:$0xff] }
 0x436   :  { %v7430_v22 = vadd.f32 %v10225_v10, %v7365_v0  ;;  %v7468_v8 = vadd.f32 %v15900_v9, %v7453_v23  ;;  %v10110_v15 = vadd.f32 %v10109_v25, %v10108_v38  ;;  %v7246_v10 = vadd.f32 %v10036_v16, %v7181_v21  ;;  %v10230_v40 = vpop.f32.mrf.mxu1 }
 0x437   :  { %v10111_v26 = vpop.f32.mrf.mxu0  ;;  %v7124_v42 = vadd.f32 %v9962_v6, %v16003_v59  ;;  %v10042_v23 = vadd.f32 %v15875_v35, %v15871_v55 }
 0x438   :  { %v7454_v31 = vmax.f32 %v15999_v30, %v7430_v22  ;;  %v7476_v33 = vmax.f32 %v7468_v8, 0.0  ;;  %v7368_v53 = vadd.f32 %v10110_v15, %v7303_v45  ;;  %v7311_v38 = vadd.f32 %v10076_v61, %v7246_v10  ;;  %v7440_v51 = vpop.f32.mrf.mxu1  ;;  %v16010_v30 = vld [vmem:[#allocation4_spill] sm:$0xff]  ;;  %v16011_v61 = vld [vmem:[#allocation6_spill] sm:$0xff] }
 0x439   :  { %v10112_v2 = vpop.f32.mrf.mxu0  ;;  %v7189_v29 = vadd.f32 %v10002_v60, %v7124_v42 }
 0x43a   :  { %v8147_v1 = vpack.c.bf16 %v7476_v33, %v7475_v47  ;;  %v7433_v62 = vadd.f32 %v10226_v48, %v7368_v53  ;;  %v10113_v17 = vadd.f32 %v10112_v2, %v10111_v26  ;;  %v7469_v52 = vadd.f32 %v15900_v9, %v7454_v31 }
 0x43b   :  { %v10114_v3 = vpop.f32.mrf.mxu0  ;;  %v7251_v48 = vadd.f32 %v10039_v24, %v7186_v37  ;;  %v7254_v14 = vadd.f32 %v10042_v23, %v7189_v29 }
 0x43c   :  { %8148 = vst [vmem:[%s15967_s6] sm:$0xff] %v8147_v1   ;;  %v7455_v57 = vmax.f32 %v16006_v7, %v7433_v62  ;;  %v7373_v41 = vadd.f32 %v10113_v17, %v7308_v58  ;;  %v7477_v16 = vmax.f32 %v7469_v52, 0.0 }
 0x43d   :  { %v10115_v0 = vpop.f32.mrf.mxu0  ;;  %v7316_v15 = vadd.f32 %v10079_v36, %v7251_v48  ;;  %v7319_v26 = vadd.f32 %v10082_v19, %v7254_v14 }
 0x43e   :  { %v7470_v45 = vadd.f32 %v15900_v9, %v7455_v57  ;;  %v10116_v27 = vadd.f32 %v10115_v0, %v10114_v3  ;;  %v7438_v28 = vadd.f32 %v7437_v46, %v7373_v41 }
 0x43f   :  { %v10117_v63 = vpop.f32.mrf.mxu0 }
 0x440   :  { %v7478_v25 = vmax.f32 %v7470_v45, 0.0  ;;  %v7456_v22 = vmax.f32 %v16008_v12, %v7438_v28  ;;  %v7376_v8 = vadd.f32 %v10116_v27, %v7311_v38 }
 0x441   :  { %v10118_v21 = vpop.f32.mrf.mxu0 }
 0x442   :  { %v8152_v54 = vpack.c.bf16 %v7478_v25, %v7477_v16  ;;  %v10119_v35 = vadd.f32 %v10118_v21, %v10117_v63  ;;  %v7441_v55 = vadd.f32 %v7440_v51, %v7376_v8  ;;  %v7471_v56 = vadd.f32 %v15900_v9, %v7456_v22 }
 0x443   :  { %v10120_v20 = vpop.f32.mrf.mxu0 }
 0x444   :  { %8164 = vst [vmem:[%s15967_s6 + $0x8] sm:$0xff] %v8152_v54   ;;  %v7381_v34 = vadd.f32 %v10119_v35, %v7316_v15  ;;  %v7457_v11 = vmax.f32 %v16009_v43, %v7441_v55  ;;  %v7479_v47 = vmax.f32 %v7471_v56, 0.0 }
 0x445   :  { %v10121_v6 = vpop.f32.mrf.mxu0 }
 0x446   :  { %v7446_v46 = vadd.f32 %v15909_v50, %v7381_v34  ;;  %v7472_v18 = vadd.f32 %v15900_v9, %v7457_v11  ;;  %v10122_v49 = vadd.f32 %v10121_v6, %v10120_v20 }
 0x448   :  { %v7458_v31 = vmax.f32 %v16010_v30, %v7446_v46  ;;  %v7480_v33 = vmax.f32 %v7472_v18, 0.0  ;;  %v7384_v53 = vadd.f32 %v10122_v49, %v7319_v26 }
 0x44a   :  { %v8157_v10 = vpack.c.bf16 %v7480_v33, %v7479_v47  ;;  %v7449_v44 = vadd.f32 %v10230_v40, %v7384_v53  ;;  %v7473_v39 = vadd.f32 %v15900_v9, %v7458_v31 }
 0x44c   :  { %8165 = vst [vmem:[%s15967_s6 + $0x10] sm:$0xff] %v8157_v10   ;;  %v7459_v32 = vmax.f32 %v16011_v61, %v7449_v44  ;;  %v7481_v24 = vmax.f32 %v7473_v39, 0.0 }
 0x44e   :  { %v7474_v50 = vadd.f32 %v15900_v9, %v7459_v32 }
 0x450   :  { %v7482_v2 = vmax.f32 %v7474_v50, 0.0 }
 0x452   :  { %v8162_v58 = vpack.c.bf16 %v7482_v2, %v7481_v24 }
 0x454   :  { %8166 = vst [vmem:[%s15967_s6 + $0x18] sm:$0xff] %v8162_v58  }

</bundles_post_ra>
